<compile_context>
chip_gen: v7x
topology: tpu7x:2x2x1
jax: 0.10.0
libtpu: 0.0.40
codegen_flags: <defaults>
</compile_context>

<pallas_src>
import functools
import math

import jax
import jax.numpy as jnp
from jax.experimental import pallas as pl
from jax.experimental.pallas import tpu as pltpu

EPS = 1e-5


# ----------------------------------------------------------------------------
# small in-kernel helpers
# ----------------------------------------------------------------------------
def _ln(x, gamma=None, beta=None, eps=EPS):
    """PyTorch-style LayerNorm over the last axis (biased variance)."""
    mu = jnp.mean(x, axis=-1, keepdims=True)
    var = jnp.mean((x - mu) ** 2, axis=-1, keepdims=True)
    y = (x - mu) * jax.lax.rsqrt(var + eps)
    if gamma is not None:
        y = y * gamma
    if beta is not None:
        y = y + beta
    return y


def _silu(x):
    return x * jax.nn.sigmoid(x)


def _softplus(x):
    # numerically stable: max(x, 0) + log1p(exp(-|x|))
    return jnp.maximum(x, 0.0) + jnp.log1p(jnp.exp(-jnp.abs(x)))


# ----------------------------------------------------------------------------
# the single fused kernel: patch-embed -> depth x SimbaBlock -> head
# (one grid step processes BPG images packed along the sublane axis)
# ----------------------------------------------------------------------------
def _simba_fused_kernel(
        patches_ref,
        emb_ln1_ref, wpatch_ref, emb_post_ref, pos_ref,
        in_wx_ref, in_wres_ref, convw_ref, mvec_ref, wdelta_ref, wbc_ref,
        aneg_ref, outw_ref, fftw_ref,
        convshift_ref, fcat_ref, icat_ref,
        pool_ref, hln_ref, hw_ref, hb_ref,
        o_ref,
        hs_ref,
        *, depth, N, BPG, Di, n_state, d_conv):
    BN = BPG * N
    f32 = jnp.float32

    # ---- patch embedding: LN -> Linear -> LN -> +pos --------------------------
    x = patches_ref[0]                                              # [BN, P]
    x = _ln(x, emb_ln1_ref[0:1, :], emb_ln1_ref[1:2, :])
    x = jnp.dot(x, wpatch_ref[...],
                preferred_element_type=f32) + emb_post_ref[0:1, :]
    x = _ln(x, emb_post_ref[1:2, :], emb_post_ref[2:3, :])
    x = x + pos_ref[...]                                            # [BN, D]

    conv_shift = convshift_ref[...]                                 # [d_conv*BN, BN]
    fcat = fcat_ref[...]                                            # [2BN, BN]
    icat = icat_ref[...]                                            # [BN, 2BN]

    # ---- depth SimbaBlocks, activations stay resident in VMEM -----------------
    for l in range(depth):
        residual = x
        normed = _ln(x)                                             # fresh nn.LayerNorm(d)

        # --------------------------- MambaBlock -------------------------------
        xm = jnp.dot(normed, in_wx_ref[l], preferred_element_type=f32)   # [BN, Di]
        res = jnp.dot(normed, in_wres_ref[l], preferred_element_type=f32)  # [BN, Di]

        # causal depthwise conv1d: block-diag Toeplitz shifts on the MXU,
        # per-tap per-channel weights on the VPU; all slices 8-sublane aligned.
        shifted = jnp.dot(conv_shift, xm, preferred_element_type=f32)    # [d_conv*BN, Di]
        wk = convw_ref[l]                                                # [d_conv, Di]
        mvec = mvec_ref[l]                                               # [3, Di] = conv_b, dt_b, D
        acc = shifted[0:BN] * wk[0:1, :]
        for k in range(1, d_conv):
            acc = acc + shifted[k * BN:(k + 1) * BN] * wk[k:k + 1, :]
        xc = _silu(acc + mvec[0:1, :])                                   # [BN, Di]

        # SSM projections (dt_rank projection pre-folded into W_delta)
        delta = _softplus(
            jnp.dot(xc, wdelta_ref[l], preferred_element_type=f32) + mvec[1:2, :])
        wbc = wbc_ref[l]                                                 # [2, Di, n]
        Bp = jnp.dot(xc, wbc[0], preferred_element_type=f32)             # [BN, n]
        Cp = jnp.dot(xc, wbc[1], preferred_element_type=f32)             # [BN, n]

        # bulk (hoisted) state-transition exp and B (x) u outer product
        u = delta * xc                                                   # [BN, Di]
        dA = jnp.exp(delta[:, None, :] * aneg_ref[l][None, :, :])        # [BN, n, Di]
        dBu = Bp[:, :, None] * u[:, None, :]                             # [BN, n, Di]

        # selective scan: per step only the 2-op recurrence + 1 aligned store;
        # the two packed images' chains are independent and can interleave.
        for b in range(BPG):
            h = jnp.zeros((n_state, Di), f32)
            for i in range(N):
                t = b * N + i
                h = dA[t] * h + dBu[t]
                hs_ref[t] = h
        hs = hs_ref[...]                                                 # [BN, n, Di]
        y = jnp.sum(hs * Cp[:, :, None], axis=1)                         # [BN, Di] bulk C-contraction
        y = y + xc * mvec[2:3, :]                                        # + u * D
        y = y * _silu(res)                                               # gate
        mamba_out = jnp.dot(y, outw_ref[l], preferred_element_type=f32)  # [BN, D]
        out1 = residual + mamba_out                                      # dropout = identity

        # --------------------------- EinFFTText -------------------------------
        normed2 = _ln(out1)
        Xcat = jnp.dot(fcat, normed2, preferred_element_type=f32)        # [2BN, D]
        Xre = Xcat[0:BN]
        Xim = Xcat[BN:2 * BN]
        fw = fftw_ref[l]                                                 # [2, BN, D]
        Yre = Xre * fw[0] - Xim * fw[1]
        Yim = Xre * fw[1] + Xim * fw[0]
        Ycat = jnp.concatenate([Yre, Yim], axis=0)                       # [2BN, D]
        einfft_real = jnp.dot(icat, Ycat, preferred_element_type=f32)    # [BN, D]

        # (complex einfft + real out1).real  ==  out1 + Re(einfft)
        x = out1 + einfft_real

    # ---- output head: per-image mean (pooling matmul) -> LN -> Linear ---------
    m = jnp.dot(pool_ref[...], x, preferred_element_type=f32)            # [BPG, D]
    m = _ln(m, hln_ref[0:1, :], hln_ref[1:2, :])
    o_ref[0] = jnp.dot(m, hw_ref[...], preferred_element_type=f32) + hb_ref[...]


def simba_forward_fused(patches, fused, *, depth, N, D, Di, n_state, d_conv,
                        num_classes, bpg):
    B, _, P = patches.shape
    assert B % bpg == 0, "batch must be divisible by images-per-grid-step"
    G = B // bpg
    BN = bpg * N
    patches_g = patches.reshape(G, BN, P)

    kernel = functools.partial(_simba_fused_kernel, depth=depth, N=N, BPG=bpg,
                               Di=Di, n_state=n_state, d_conv=d_conv)

    weights = (
        fused["emb_ln1"], fused["w_patch"], fused["emb_post"], fused["pos"],
        fused["in_wx"], fused["in_wres"], fused["conv_w"], fused["mamba_vec"],
        fused["w_delta"], fused["w_bc"], fused["a_neg"], fused["out_w"],
        fused["fft_w"],
        fused["conv_shift"], fused["fcat"], fused["icat"],
        fused["pool"], fused["head_ln"], fused["head_w"], fused["head_b"],
    )

    def const_spec(arr):
        nd = arr.ndim
        # constant block index -> each weight is DMA'd to VMEM only once.
        return pl.BlockSpec(arr.shape, lambda g, _nd=nd: (0,) * _nd)

    out = pl.pallas_call(
        kernel,
        out_shape=jax.ShapeDtypeStruct((G, bpg, num_classes), jnp.float32),
        grid=(G,),
        in_specs=[pl.BlockSpec((1, BN, P), lambda g: (g, 0, 0))]
        + [const_spec(w) for w in weights],
        out_specs=pl.BlockSpec((1, bpg, num_classes), lambda g: (g, 0, 0)),
        scratch_shapes=[pltpu.VMEM((BN, n_state, Di), jnp.float32)],
        compiler_params=pltpu.CompilerParams(
            # batch-group axis is independent -> shard across v7x's 2 TCs
            dimension_semantics=("parallel",),
            vmem_limit_bytes=32 * 1024 * 1024),
    )(patches_g, *weights)
    return out.reshape(B, num_classes)


# ----------------------------------------------------------------------------
# glue: patches, pos-emb, DFT/Toeplitz matrices, parameter init + packing
# ----------------------------------------------------------------------------
def to_patches(x, p):
    # 'b c (h p1) (w p2) -> b (h w) (p1 p2 c)'
    B, C, H, W = x.shape
    x = x.reshape(B, C, H // p, p, W // p, p)
    x = jnp.transpose(x, (0, 2, 4, 3, 5, 1))                      # B, h, w, p1, p2, C
    return x.reshape(B, (H // p) * (W // p), p * p * C)


def posemb_sincos_2d(h, w, dim, temperature=10000, dtype=jnp.float32):
    y, x = jnp.meshgrid(jnp.arange(h), jnp.arange(w), indexing="ij")
    assert dim % 4 == 0
    omega = jnp.arange(dim // 4) / (dim // 4 - 1)
    omega = 1.0 / (temperature ** omega)
    y = y.flatten()[:, None] * omega[None, :]
    x = x.flatten()[:, None] * omega[None, :]
    pe = jnp.concatenate((jnp.sin(x), jnp.cos(x), jnp.sin(y), jnp.cos(y)), axis=1)
    return pe.astype(dtype)


def dft_matrices(n):
    idx = jnp.arange(n)
    ang = 2.0 * jnp.pi * (idx[:, None] * idx[None, :]) / n
    fre = jnp.cos(ang).astype(jnp.float32)
    fim = (-jnp.sin(ang)).astype(jnp.float32)
    ire = (jnp.cos(ang) / n).astype(jnp.float32)
    iim = (jnp.sin(ang) / n).astype(jnp.float32)
    return fre, fim, ire, iim


def init_params(key, *, dim, patch_dim, n_patches, depth, d_state, d_conv,
                dt_rank, d_inner):
    keys = iter(jax.random.split(key, 16 + 16 * depth))

    def uni(shape, fan_in):
        bound = 1.0 / math.sqrt(fan_in)
        return jax.random.uniform(next(keys), shape, jnp.float32, -bound, bound)

    params = {
        "ln1_g": jnp.ones((1, patch_dim), jnp.float32),
        "ln1_b": jnp.zeros((1, patch_dim), jnp.float32),
        "w_patch": uni((patch_dim, dim), patch_dim),
        "b_patch": uni((1, dim), patch_dim),
        "ln2_g": jnp.ones((1, dim), jnp.float32),
        "ln2_b": jnp.zeros((1, dim), jnp.float32),
        "head_ln_g": jnp.ones((1, dim), jnp.float32),
        "head_ln_b": jnp.zeros((1, dim), jnp.float32),
        "head_w": uni((dim, n_patches), dim),       # num_classes == n_patches
        "head_b": uni((1, n_patches), dim),
    }
    # A_log stored pre-transposed as [n_state, d_inner]; A_log_t[n, d] = log(n+1)
    a_log_t = jnp.log(jnp.tile(
        jnp.arange(1, d_state + 1, dtype=jnp.float32)[:, None], (1, d_inner)))
    blocks = []
    for _ in range(depth):
        blocks.append({
            "in_w": uni((dim, 2 * d_inner), dim),
            "conv_w": uni((d_inner, d_conv), d_conv),
            "conv_b": uni((1, d_inner), d_conv),
            "xproj_w": uni((d_inner, dt_rank + 2 * d_state), d_inner),
            "dt_w": uni((dt_rank, d_inner), dt_rank),
            "dt_b": uni((1, d_inner), dt_rank),
            "A_log_t": a_log_t,
            "D": jnp.ones((1, d_inner), jnp.float32),
            "out_w": uni((d_inner, dim), d_inner),
            "fft_wre": 0.02 * jax.random.normal(next(keys), (n_patches, dim), jnp.float32),
            "fft_wim": 0.02 * jax.random.normal(next(keys), (n_patches, dim), jnp.float32),
        })
    params["blocks"] = blocks
    return params


def prepare_fused_params(params, pos, *, n_patches, dt_rank, d_state, d_inner,
                         d_conv, bpg):
    """One-time plain-JAX repack: split/fold/stack weights, build the
    block-diagonal (over the packed batch) DFT/IDFT, Toeplitz-shift and pooling
    matrices, and coalesce tiny per-layer vectors."""
    blocks = params["blocks"]
    N = n_patches
    I = jnp.eye(bpg, dtype=jnp.float32)
    bd = lambda m: jnp.kron(I, m)                  # block-diag over packed batch

    fre, fim, ire, iim = dft_matrices(N)

    def stack(fn):
        return jnp.stack([fn(bp) for bp in blocks], axis=0)

    return {
        # patch-embed params (LN gammas/betas packed)
        "emb_ln1": jnp.concatenate([params["ln1_g"], params["ln1_b"]], axis=0),
        "w_patch": params["w_patch"],
        "emb_post": jnp.concatenate(
            [params["b_patch"], params["ln2_g"], params["ln2_b"]], axis=0),
        "pos": jnp.tile(pos, (bpg, 1)),
        # in_proj split into xm / res halves (lane-aligned matmul outputs)
        "in_wx": stack(lambda bp: bp["in_w"][:, :d_inner]),
        "in_wres": stack(lambda bp: bp["in_w"][:, d_inner:]),
        # depthwise conv weight pre-transposed to [d_conv, d_inner]
        "conv_w": stack(lambda bp: bp["conv_w"].T),
        # tiny per-layer vectors packed: rows = (conv_b, dt_b, D)
        "mamba_vec": stack(lambda bp: jnp.concatenate(
            [bp["conv_b"], bp["dt_b"], bp["D"]], axis=0)),
        # dt_rank projection folded: W_delta = x_proj[:, :dt_rank] @ dt_proj
        "w_delta": stack(lambda bp: bp["xproj_w"][:, :dt_rank] @ bp["dt_w"]),
        # W_B / W_C packed along a leading axis (no lane-unaligned slicing)
        "w_bc": stack(lambda bp: jnp.stack(
            [bp["xproj_w"][:, dt_rank:dt_rank + d_state],
             bp["xproj_w"][:, dt_rank + d_state:dt_rank + 2 * d_state]], axis=0)),
        # A = -exp(A_log), pre-transposed [n_state, d_inner]
        "a_neg": stack(lambda bp: -jnp.exp(bp["A_log_t"])),
        "out_w": stack(lambda bp: bp["out_w"]),
        # fft weights packed (re, im) and tiled over the packed batch
        "fft_w": stack(lambda bp: jnp.stack(
            [jnp.tile(bp["fft_wre"], (bpg, 1)),
             jnp.tile(bp["fft_wim"], (bpg, 1))], axis=0)),
        # causal-conv block-diag Toeplitz shifts, stacked over taps
        "conv_shift": jnp.concatenate(
            [bd(jnp.eye(N, k=k - (d_conv - 1), dtype=jnp.float32))
             for k in range(d_conv)], axis=0),
        # stacked block-diag DFT / IDFT: [Fre; Fim] and [Ire, -Iim]
        "fcat": jnp.concatenate([bd(fre), bd(fim)], axis=0),
        "icat": jnp.concatenate([bd(ire), -bd(iim)], axis=1),
        # per-image mean pooling as a matmul
        "pool": bd(jnp.ones((1, N), jnp.float32) / N),
        "head_ln": jnp.concatenate(
            [params["head_ln_g"], params["head_ln_b"]], axis=0),
        "head_w": params["head_w"],
        "head_b": params["head_b"],
    }


# ----------------------------------------------------------------------------
if __name__ == "__main__":
    B, C, H, W = 4, 3, 32, 32
    patch_size = 8
    dim = 32
    d_state = 8
    d_conv = 4
    depth = 2
    BPG = 2                                                 # images per grid step
    n_patches = (H // patch_size) * (W // patch_size)       # 16
    # EinFFTText(sequence_length=num_classes) must match the token count
    num_classes = n_patches
    patch_dim = C * patch_size * patch_size                 # 192
    d_inner = 2 * dim
    dt_rank = math.ceil(dim / 16)

    key = jax.random.PRNGKey(0)
    kx, kp = jax.random.split(key)
    x_img = jax.random.normal(kx, (B, C, H, W), jnp.float32)

    params = init_params(kp, dim=dim, patch_dim=patch_dim, n_patches=n_patches,
                         depth=depth, d_state=d_state, d_conv=d_conv,
                         dt_rank=dt_rank, d_inner=d_inner)
    pos = posemb_sincos_2d(H // patch_size, W // patch_size, dim)
    fused = prepare_fused_params(params, pos, n_patches=n_patches,
                                 dt_rank=dt_rank, d_state=d_state,
                                 d_inner=d_inner, d_conv=d_conv, bpg=BPG)

    patches = to_patches(x_img, patch_size)
    out = simba_forward_fused(patches, fused, depth=depth, N=n_patches, D=dim,
                              Di=d_inner, n_state=d_state, d_conv=d_conv,
                              num_classes=num_classes, bpg=BPG)
    out = jax.block_until_ready(out)
    assert out.shape == (B, num_classes)
    assert bool(jnp.all(jnp.isfinite(out)))
    print("KERNEL_OK")
</pallas_src>

<mosaic_0001>
module attributes {stable_mosaic.version = 11 : i64} {
  func.func @_simba_fused_kernel(%arg0: i32, %arg1: memref<1x32x192xf32, #tpu.memory_space<vmem>>, %arg2: memref<2x192xf32, #tpu.memory_space<vmem>>, %arg3: memref<192x32xf32, #tpu.memory_space<vmem>>, %arg4: memref<3x32xf32, #tpu.memory_space<vmem>>, %arg5: memref<32x32xf32, #tpu.memory_space<vmem>>, %arg6: memref<2x32x64xf32, #tpu.memory_space<vmem>>, %arg7: memref<2x32x64xf32, #tpu.memory_space<vmem>>, %arg8: memref<2x4x64xf32, #tpu.memory_space<vmem>>, %arg9: memref<2x3x64xf32, #tpu.memory_space<vmem>>, %arg10: memref<2x64x64xf32, #tpu.memory_space<vmem>>, %arg11: memref<2x2x64x8xf32, #tpu.memory_space<vmem>>, %arg12: memref<2x8x64xf32, #tpu.memory_space<vmem>>, %arg13: memref<2x64x32xf32, #tpu.memory_space<vmem>>, %arg14: memref<2x2x32x32xf32, #tpu.memory_space<vmem>>, %arg15: memref<128x32xf32, #tpu.memory_space<vmem>>, %arg16: memref<64x32xf32, #tpu.memory_space<vmem>>, %arg17: memref<32x64xf32, #tpu.memory_space<vmem>>, %arg18: memref<2x32xf32, #tpu.memory_space<vmem>>, %arg19: memref<2x32xf32, #tpu.memory_space<vmem>>, %arg20: memref<32x16xf32, #tpu.memory_space<vmem>>, %arg21: memref<1x16xf32, #tpu.memory_space<vmem>>, %arg22: memref<1x2x16xf32, #tpu.memory_space<vmem>>, %arg23: memref<32x8x64xf32, #tpu.memory_space<vmem>>) attributes {dimension_semantics = [#tpu.dimension_semantics<parallel>], iteration_bounds = array<i64: 2>, scalar_prefetch = 0 : i64, scratch_operands = 1 : i64, tpu.core_type = #tpu.core_type<tc>, window_params = [{transform_indices = @transform_0, window_bounds = array<i64: 1, 32, 192>}, {pipeline_mode = #tpu.pipeline_mode<synchronous>, transform_indices = @transform_1, window_bounds = array<i64: 2, 192>}, {pipeline_mode = #tpu.pipeline_mode<synchronous>, transform_indices = @transform_2, window_bounds = array<i64: 192, 32>}, {pipeline_mode = #tpu.pipeline_mode<synchronous>, transform_indices = @transform_3, window_bounds = array<i64: 3, 32>}, {pipeline_mode = #tpu.pipeline_mode<synchronous>, transform_indices = @transform_4, window_bounds = array<i64: 32, 32>}, {pipeline_mode = #tpu.pipeline_mode<synchronous>, transform_indices = @transform_5, window_bounds = array<i64: 2, 32, 64>}, {pipeline_mode = #tpu.pipeline_mode<synchronous>, transform_indices = @transform_6, window_bounds = array<i64: 2, 32, 64>}, {pipeline_mode = #tpu.pipeline_mode<synchronous>, transform_indices = @transform_7, window_bounds = array<i64: 2, 4, 64>}, {pipeline_mode = #tpu.pipeline_mode<synchronous>, transform_indices = @transform_8, window_bounds = array<i64: 2, 3, 64>}, {pipeline_mode = #tpu.pipeline_mode<synchronous>, transform_indices = @transform_9, window_bounds = array<i64: 2, 64, 64>}, {pipeline_mode = #tpu.pipeline_mode<synchronous>, transform_indices = @transform_10, window_bounds = array<i64: 2, 2, 64, 8>}, {pipeline_mode = #tpu.pipeline_mode<synchronous>, transform_indices = @transform_11, window_bounds = array<i64: 2, 8, 64>}, {pipeline_mode = #tpu.pipeline_mode<synchronous>, transform_indices = @transform_12, window_bounds = array<i64: 2, 64, 32>}, {pipeline_mode = #tpu.pipeline_mode<synchronous>, transform_indices = @transform_13, window_bounds = array<i64: 2, 2, 32, 32>}, {pipeline_mode = #tpu.pipeline_mode<synchronous>, transform_indices = @transform_14, window_bounds = array<i64: 128, 32>}, {pipeline_mode = #tpu.pipeline_mode<synchronous>, transform_indices = @transform_15, window_bounds = array<i64: 64, 32>}, {pipeline_mode = #tpu.pipeline_mode<synchronous>, transform_indices = @transform_16, window_bounds = array<i64: 32, 64>}, {pipeline_mode = #tpu.pipeline_mode<synchronous>, transform_indices = @transform_17, window_bounds = array<i64: 2, 32>}, {pipeline_mode = #tpu.pipeline_mode<synchronous>, transform_indices = @transform_18, window_bounds = array<i64: 2, 32>}, {pipeline_mode = #tpu.pipeline_mode<synchronous>, transform_indices = @transform_19, window_bounds = array<i64: 32, 16>}, {pipeline_mode = #tpu.pipeline_mode<synchronous>, transform_indices = @transform_20, window_bounds = array<i64: 1, 16>}, {transform_indices = @transform_21, window_bounds = array<i64: 1, 2, 16>}]} {
    %c0 = arith.constant 0 : index
    %c0_0 = arith.constant 0 : index
    %c0_1 = arith.constant 0 : index
    %0 = vector.load %arg1[%c0, %c0_0, %c0_1] : memref<1x32x192xf32, #tpu.memory_space<vmem>>, vector<1x32x192xf32>
    %1 = vector.shape_cast %0 : vector<1x32x192xf32> to vector<32x192xf32>
    %c0_2 = arith.constant 0 : index
    %c0_3 = arith.constant 0 : index
    %2 = vector.load %arg2[%c0_2, %c0_3] : memref<2x192xf32, #tpu.memory_space<vmem>>, vector<1x192xf32>
    %c1 = arith.constant 1 : index
    %c0_4 = arith.constant 0 : index
    %3 = vector.load %arg2[%c1, %c0_4] : memref<2x192xf32, #tpu.memory_space<vmem>>, vector<1x192xf32>
    %cst = arith.constant dense<0.000000e+00> : vector<32xf32>
    %4 = vector.multi_reduction <add>, %1, %cst [1] : vector<32x192xf32> to vector<32xf32>
    %5 = vector.shape_cast %4 : vector<32xf32> to vector<32x1xf32>
    %cst_5 = arith.constant 1.920000e+02 : f32
    %6 = vector.broadcast %cst_5 : f32 to vector<32x1xf32>
    %7 = arith.divf %5, %6 : vector<32x1xf32>
    %8 = vector.broadcast %7 : vector<32x1xf32> to vector<32x192xf32>
    %9 = arith.subf %1, %8 : vector<32x192xf32>
    %10 = arith.mulf %9, %9 : vector<32x192xf32>
    %cst_6 = arith.constant dense<0.000000e+00> : vector<32xf32>
    %11 = vector.multi_reduction <add>, %10, %cst_6 [1] : vector<32x192xf32> to vector<32xf32>
    %12 = vector.shape_cast %11 : vector<32xf32> to vector<32x1xf32>
    %cst_7 = arith.constant 1.920000e+02 : f32
    %13 = vector.broadcast %cst_7 : f32 to vector<32x1xf32>
    %14 = arith.divf %12, %13 : vector<32x1xf32>
    %15 = vector.broadcast %7 : vector<32x1xf32> to vector<32x192xf32>
    %16 = arith.subf %1, %15 : vector<32x192xf32>
    %cst_8 = arith.constant 9.99999974E-6 : f32
    %17 = vector.broadcast %cst_8 : f32 to vector<32x1xf32>
    %18 = arith.addf %14, %17 : vector<32x1xf32>
    %19 = math.rsqrt %18 : vector<32x1xf32>
    %20 = vector.broadcast %19 : vector<32x1xf32> to vector<32x192xf32>
    %21 = arith.mulf %16, %20 : vector<32x192xf32>
    %22 = vector.broadcast %2 : vector<1x192xf32> to vector<32x192xf32>
    %23 = arith.mulf %21, %22 : vector<32x192xf32>
    %24 = vector.broadcast %3 : vector<1x192xf32> to vector<32x192xf32>
    %25 = arith.addf %23, %24 : vector<32x192xf32>
    %c0_9 = arith.constant 0 : index
    %c0_10 = arith.constant 0 : index
    %26 = vector.load %arg3[%c0_9, %c0_10] : memref<192x32xf32, #tpu.memory_space<vmem>>, vector<192x32xf32>
    %cst_11 = arith.constant dense<0.000000e+00> : vector<32x32xf32>
    %27 = tpu.matmul %25, %26, %cst_11 {dimension_numbers = #tpu.dot_dimension_numbers<[1], [0], [0], [1], [0, 0, 1, 1], [], []>} : vector<32x192xf32>, vector<192x32xf32>, vector<32x32xf32> -> vector<32x32xf32>
    %c0_12 = arith.constant 0 : index
    %c0_13 = arith.constant 0 : index
    %28 = vector.load %arg4[%c0_12, %c0_13] : memref<3x32xf32, #tpu.memory_space<vmem>>, vector<1x32xf32>
    %29 = vector.broadcast %28 : vector<1x32xf32> to vector<32x32xf32>
    %30 = arith.addf %27, %29 : vector<32x32xf32>
    %c1_14 = arith.constant 1 : index
    %c0_15 = arith.constant 0 : index
    %31 = vector.load %arg4[%c1_14, %c0_15] : memref<3x32xf32, #tpu.memory_space<vmem>>, vector<1x32xf32>
    %c2 = arith.constant 2 : index
    %c0_16 = arith.constant 0 : index
    %32 = vector.load %arg4[%c2, %c0_16] : memref<3x32xf32, #tpu.memory_space<vmem>>, vector<1x32xf32>
    %cst_17 = arith.constant dense<0.000000e+00> : vector<32xf32>
    %33 = vector.multi_reduction <add>, %30, %cst_17 [1] : vector<32x32xf32> to vector<32xf32>
    %34 = vector.shape_cast %33 : vector<32xf32> to vector<32x1xf32>
    %cst_18 = arith.constant 3.200000e+01 : f32
    %35 = vector.broadcast %cst_18 : f32 to vector<32x1xf32>
    %36 = arith.divf %34, %35 : vector<32x1xf32>
    %37 = vector.broadcast %36 : vector<32x1xf32> to vector<32x32xf32>
    %38 = arith.subf %30, %37 : vector<32x32xf32>
    %39 = arith.mulf %38, %38 : vector<32x32xf32>
    %cst_19 = arith.constant dense<0.000000e+00> : vector<32xf32>
    %40 = vector.multi_reduction <add>, %39, %cst_19 [1] : vector<32x32xf32> to vector<32xf32>
    %41 = vector.shape_cast %40 : vector<32xf32> to vector<32x1xf32>
    %cst_20 = arith.constant 3.200000e+01 : f32
    %42 = vector.broadcast %cst_20 : f32 to vector<32x1xf32>
    %43 = arith.divf %41, %42 : vector<32x1xf32>
    %44 = vector.broadcast %36 : vector<32x1xf32> to vector<32x32xf32>
    %45 = arith.subf %30, %44 : vector<32x32xf32>
    %cst_21 = arith.constant 9.99999974E-6 : f32
    %46 = vector.broadcast %cst_21 : f32 to vector<32x1xf32>
    %47 = arith.addf %43, %46 : vector<32x1xf32>
    %48 = math.rsqrt %47 : vector<32x1xf32>
    %49 = vector.broadcast %48 : vector<32x1xf32> to vector<32x32xf32>
    %50 = arith.mulf %45, %49 : vector<32x32xf32>
    %51 = vector.broadcast %31 : vector<1x32xf32> to vector<32x32xf32>
    %52 = arith.mulf %50, %51 : vector<32x32xf32>
    %53 = vector.broadcast %32 : vector<1x32xf32> to vector<32x32xf32>
    %54 = arith.addf %52, %53 : vector<32x32xf32>
    %c0_22 = arith.constant 0 : index
    %c0_23 = arith.constant 0 : index
    %55 = vector.load %arg5[%c0_22, %c0_23] : memref<32x32xf32, #tpu.memory_space<vmem>>, vector<32x32xf32>
    %56 = arith.addf %54, %55 : vector<32x32xf32>
    %c0_24 = arith.constant 0 : index
    %c0_25 = arith.constant 0 : index
    %57 = vector.load %arg15[%c0_24, %c0_25] : memref<128x32xf32, #tpu.memory_space<vmem>>, vector<128x32xf32>
    %c0_26 = arith.constant 0 : index
    %c0_27 = arith.constant 0 : index
    %58 = vector.load %arg16[%c0_26, %c0_27] : memref<64x32xf32, #tpu.memory_space<vmem>>, vector<64x32xf32>
    %c0_28 = arith.constant 0 : index
    %c0_29 = arith.constant 0 : index
    %59 = vector.load %arg17[%c0_28, %c0_29] : memref<32x64xf32, #tpu.memory_space<vmem>>, vector<32x64xf32>
    %cst_30 = arith.constant dense<0.000000e+00> : vector<32xf32>
    %60 = vector.multi_reduction <add>, %56, %cst_30 [1] : vector<32x32xf32> to vector<32xf32>
    %61 = vector.shape_cast %60 : vector<32xf32> to vector<32x1xf32>
    %cst_31 = arith.constant 3.200000e+01 : f32
    %62 = vector.broadcast %cst_31 : f32 to vector<32x1xf32>
    %63 = arith.divf %61, %62 : vector<32x1xf32>
    %64 = vector.broadcast %63 : vector<32x1xf32> to vector<32x32xf32>
    %65 = arith.subf %56, %64 : vector<32x32xf32>
    %66 = arith.mulf %65, %65 : vector<32x32xf32>
    %cst_32 = arith.constant dense<0.000000e+00> : vector<32xf32>
    %67 = vector.multi_reduction <add>, %66, %cst_32 [1] : vector<32x32xf32> to vector<32xf32>
    %68 = vector.shape_cast %67 : vector<32xf32> to vector<32x1xf32>
    %cst_33 = arith.constant 3.200000e+01 : f32
    %69 = vector.broadcast %cst_33 : f32 to vector<32x1xf32>
    %70 = arith.divf %68, %69 : vector<32x1xf32>
    %71 = vector.broadcast %63 : vector<32x1xf32> to vector<32x32xf32>
    %72 = arith.subf %56, %71 : vector<32x32xf32>
    %cst_34 = arith.constant 9.99999974E-6 : f32
    %73 = vector.broadcast %cst_34 : f32 to vector<32x1xf32>
    %74 = arith.addf %70, %73 : vector<32x1xf32>
    %75 = math.rsqrt %74 : vector<32x1xf32>
    %76 = vector.broadcast %75 : vector<32x1xf32> to vector<32x32xf32>
    %77 = arith.mulf %72, %76 : vector<32x32xf32>
    %c0_35 = arith.constant 0 : index
    %c0_36 = arith.constant 0 : index
    %c0_37 = arith.constant 0 : index
    %78 = vector.load %arg6[%c0_35, %c0_36, %c0_37] : memref<2x32x64xf32, #tpu.memory_space<vmem>>, vector<1x32x64xf32>
    %79 = vector.shape_cast %78 : vector<1x32x64xf32> to vector<32x64xf32>
    %cst_38 = arith.constant dense<0.000000e+00> : vector<32x64xf32>
    %80 = tpu.matmul %77, %79, %cst_38 {dimension_numbers = #tpu.dot_dimension_numbers<[1], [0], [0], [1], [0, 0, 1, 1], [], []>} : vector<32x32xf32>, vector<32x64xf32>, vector<32x64xf32> -> vector<32x64xf32>
    %c0_39 = arith.constant 0 : index
    %c0_40 = arith.constant 0 : index
    %c0_41 = arith.constant 0 : index
    %81 = vector.load %arg7[%c0_39, %c0_40, %c0_41] : memref<2x32x64xf32, #tpu.memory_space<vmem>>, vector<1x32x64xf32>
    %82 = vector.shape_cast %81 : vector<1x32x64xf32> to vector<32x64xf32>
    %cst_42 = arith.constant dense<0.000000e+00> : vector<32x64xf32>
    %83 = tpu.matmul %77, %82, %cst_42 {dimension_numbers = #tpu.dot_dimension_numbers<[1], [0], [0], [1], [0, 0, 1, 1], [], []>} : vector<32x32xf32>, vector<32x64xf32>, vector<32x64xf32> -> vector<32x64xf32>
    %cst_43 = arith.constant dense<0.000000e+00> : vector<128x64xf32>
    %84 = tpu.matmul %57, %80, %cst_43 {dimension_numbers = #tpu.dot_dimension_numbers<[1], [0], [0], [1], [0, 0, 1, 1], [], []>} : vector<128x32xf32>, vector<32x64xf32>, vector<128x64xf32> -> vector<128x64xf32>
    %c0_44 = arith.constant 0 : index
    %c0_45 = arith.constant 0 : index
    %c0_46 = arith.constant 0 : index
    %85 = vector.load %arg8[%c0_44, %c0_45, %c0_46] : memref<2x4x64xf32, #tpu.memory_space<vmem>>, vector<1x4x64xf32>
    %86 = vector.shape_cast %85 : vector<1x4x64xf32> to vector<4x64xf32>
    %c0_47 = arith.constant 0 : index
    %c0_48 = arith.constant 0 : index
    %c0_49 = arith.constant 0 : index
    %87 = vector.load %arg9[%c0_47, %c0_48, %c0_49] : memref<2x3x64xf32, #tpu.memory_space<vmem>>, vector<1x3x64xf32>
    %88 = vector.shape_cast %87 : vector<1x3x64xf32> to vector<3x64xf32>
    %89 = vector.extract_strided_slice %84 {offsets = [0, 0], sizes = [32, 64], strides = [1, 1]} : vector<128x64xf32> to vector<32x64xf32>
    %90 = vector.extract_strided_slice %86 {offsets = [0, 0], sizes = [1, 64], strides = [1, 1]} : vector<4x64xf32> to vector<1x64xf32>
    %91 = vector.broadcast %90 : vector<1x64xf32> to vector<32x64xf32>
    %92 = arith.mulf %89, %91 : vector<32x64xf32>
    %93 = vector.extract_strided_slice %84 {offsets = [32, 0], sizes = [32, 64], strides = [1, 1]} : vector<128x64xf32> to vector<32x64xf32>
    %94 = vector.extract_strided_slice %86 {offsets = [1, 0], sizes = [1, 64], strides = [1, 1]} : vector<4x64xf32> to vector<1x64xf32>
    %95 = vector.broadcast %94 : vector<1x64xf32> to vector<32x64xf32>
    %96 = arith.mulf %93, %95 : vector<32x64xf32>
    %97 = arith.addf %92, %96 : vector<32x64xf32>
    %98 = vector.extract_strided_slice %84 {offsets = [64, 0], sizes = [32, 64], strides = [1, 1]} : vector<128x64xf32> to vector<32x64xf32>
    %99 = vector.extract_strided_slice %86 {offsets = [2, 0], sizes = [1, 64], strides = [1, 1]} : vector<4x64xf32> to vector<1x64xf32>
    %100 = vector.broadcast %99 : vector<1x64xf32> to vector<32x64xf32>
    %101 = arith.mulf %98, %100 : vector<32x64xf32>
    %102 = arith.addf %97, %101 : vector<32x64xf32>
    %103 = vector.extract_strided_slice %84 {offsets = [96, 0], sizes = [32, 64], strides = [1, 1]} : vector<128x64xf32> to vector<32x64xf32>
    %104 = vector.extract_strided_slice %86 {offsets = [3, 0], sizes = [1, 64], strides = [1, 1]} : vector<4x64xf32> to vector<1x64xf32>
    %105 = vector.broadcast %104 : vector<1x64xf32> to vector<32x64xf32>
    %106 = arith.mulf %103, %105 : vector<32x64xf32>
    %107 = arith.addf %102, %106 : vector<32x64xf32>
    %108 = vector.extract_strided_slice %88 {offsets = [0, 0], sizes = [1, 64], strides = [1, 1]} : vector<3x64xf32> to vector<1x64xf32>
    %109 = vector.broadcast %108 : vector<1x64xf32> to vector<32x64xf32>
    %110 = arith.addf %107, %109 : vector<32x64xf32>
    %111 = arith.negf %110 : vector<32x64xf32>
    %112 = math.exp %111 : vector<32x64xf32>
    %cst_50 = arith.constant 1.000000e+00 : f32
    %113 = vector.broadcast %cst_50 : f32 to vector<32x64xf32>
    %114 = arith.addf %113, %112 : vector<32x64xf32>
    %115 = arith.divf %113, %114 : vector<32x64xf32>
    %116 = arith.mulf %110, %115 : vector<32x64xf32>
    %c0_51 = arith.constant 0 : index
    %c0_52 = arith.constant 0 : index
    %c0_53 = arith.constant 0 : index
    %117 = vector.load %arg10[%c0_51, %c0_52, %c0_53] : memref<2x64x64xf32, #tpu.memory_space<vmem>>, vector<1x64x64xf32>
    %118 = vector.shape_cast %117 : vector<1x64x64xf32> to vector<64x64xf32>
    %cst_54 = arith.constant dense<0.000000e+00> : vector<32x64xf32>
    %119 = tpu.matmul %116, %118, %cst_54 {dimension_numbers = #tpu.dot_dimension_numbers<[1], [0], [0], [1], [0, 0, 1, 1], [], []>} : vector<32x64xf32>, vector<64x64xf32>, vector<32x64xf32> -> vector<32x64xf32>
    %120 = vector.extract_strided_slice %88 {offsets = [1, 0], sizes = [1, 64], strides = [1, 1]} : vector<3x64xf32> to vector<1x64xf32>
    %121 = vector.broadcast %120 : vector<1x64xf32> to vector<32x64xf32>
    %122 = arith.addf %119, %121 : vector<32x64xf32>
    %cst_55 = arith.constant 0.000000e+00 : f32
    %123 = vector.broadcast %cst_55 : f32 to vector<32x64xf32>
    %124 = arith.maximumf %122, %123 : vector<32x64xf32>
    %125 = math.absf %122 : vector<32x64xf32>
    %cst_56 = arith.constant 0.000000e+00 : f32
    %126 = vector.broadcast %cst_56 : f32 to vector<32x64xf32>
    %127 = arith.subf %126, %125 : vector<32x64xf32>
    %128 = math.exp %127 : vector<32x64xf32>
    %129 = math.log1p %128 : vector<32x64xf32>
    %130 = arith.addf %124, %129 : vector<32x64xf32>
    %c0_57 = arith.constant 0 : index
    %c0_58 = arith.constant 0 : index
    %c0_59 = arith.constant 0 : index
    %c0_60 = arith.constant 0 : index
    %131 = vector.load %arg11[%c0_57, %c0_58, %c0_59, %c0_60] : memref<2x2x64x8xf32, #tpu.memory_space<vmem>>, vector<1x2x64x8xf32>
    %132 = vector.shape_cast %131 : vector<1x2x64x8xf32> to vector<2x64x8xf32>
    %133 = vector.extract_strided_slice %132 {offsets = [0, 0, 0], sizes = [1, 64, 8], strides = [1, 1, 1]} : vector<2x64x8xf32> to vector<1x64x8xf32>
    %134 = vector.shape_cast %133 : vector<1x64x8xf32> to vector<64x8xf32>
    %cst_61 = arith.constant dense<0.000000e+00> : vector<32x8xf32>
    %135 = tpu.matmul %116, %134, %cst_61 {dimension_numbers = #tpu.dot_dimension_numbers<[1], [0], [0], [1], [0, 0, 1, 1], [], []>} : vector<32x64xf32>, vector<64x8xf32>, vector<32x8xf32> -> vector<32x8xf32>
    %136 = vector.extract_strided_slice %132 {offsets = [1, 0, 0], sizes = [1, 64, 8], strides = [1, 1, 1]} : vector<2x64x8xf32> to vector<1x64x8xf32>
    %137 = vector.shape_cast %136 : vector<1x64x8xf32> to vector<64x8xf32>
    %cst_62 = arith.constant dense<0.000000e+00> : vector<32x8xf32>
    %138 = tpu.matmul %116, %137, %cst_62 {dimension_numbers = #tpu.dot_dimension_numbers<[1], [0], [0], [1], [0, 0, 1, 1], [], []>} : vector<32x64xf32>, vector<64x8xf32>, vector<32x8xf32> -> vector<32x8xf32>
    %139 = arith.mulf %130, %116 : vector<32x64xf32>
    %140 = vector.shape_cast %130 : vector<32x64xf32> to vector<32x1x64xf32>
    %c0_63 = arith.constant 0 : index
    %c0_64 = arith.constant 0 : index
    %c0_65 = arith.constant 0 : index
    %141 = vector.load %arg12[%c0_63, %c0_64, %c0_65] : memref<2x8x64xf32, #tpu.memory_space<vmem>>, vector<1x8x64xf32>
    %142 = vector.shape_cast %141 : vector<1x8x64xf32> to vector<8x64xf32>
    %143 = vector.shape_cast %142 : vector<8x64xf32> to vector<1x8x64xf32>
    %144 = vector.broadcast %140 : vector<32x1x64xf32> to vector<32x8x64xf32>
    %145 = vector.broadcast %143 : vector<1x8x64xf32> to vector<32x8x64xf32>
    %146 = arith.mulf %144, %145 : vector<32x8x64xf32>
    %147 = math.exp %146 : vector<32x8x64xf32>
    %148 = vector.shape_cast %135 : vector<32x8xf32> to vector<32x8x1xf32>
    %149 = vector.shape_cast %139 : vector<32x64xf32> to vector<32x1x64xf32>
    %150 = vector.broadcast %148 : vector<32x8x1xf32> to vector<32x8x64xf32>
    %151 = vector.broadcast %149 : vector<32x1x64xf32> to vector<32x8x64xf32>
    %152 = arith.mulf %150, %151 : vector<32x8x64xf32>
    %cst_66 = arith.constant 0.000000e+00 : f32
    %153 = vector.broadcast %cst_66 : f32 to vector<8x64xf32>
    %154 = vector.extract_strided_slice %147 {offsets = [0, 0, 0], sizes = [1, 8, 64], strides = [1, 1, 1]} : vector<32x8x64xf32> to vector<1x8x64xf32>
    %155 = vector.shape_cast %154 : vector<1x8x64xf32> to vector<8x64xf32>
    %156 = arith.mulf %155, %153 : vector<8x64xf32>
    %157 = vector.extract_strided_slice %152 {offsets = [0, 0, 0], sizes = [1, 8, 64], strides = [1, 1, 1]} : vector<32x8x64xf32> to vector<1x8x64xf32>
    %158 = vector.shape_cast %157 : vector<1x8x64xf32> to vector<8x64xf32>
    %159 = arith.addf %156, %158 : vector<8x64xf32>
    %c0_67 = arith.constant 0 : index
    %c0_68 = arith.constant 0 : index
    %c0_69 = arith.constant 0 : index
    %160 = vector.load %arg23[%c0_67, %c0_68, %c0_69] : memref<32x8x64xf32, #tpu.memory_space<vmem>>, vector<1x8x64xf32>
    %161 = vector.shape_cast %160 : vector<1x8x64xf32> to vector<8x64xf32>
    %162 = vector.shape_cast %159 : vector<8x64xf32> to vector<1x8x64xf32>
    tpu.vector_store %arg23[%c0_67, %c0_68, %c0_69], %162 {strides = array<i32>} : memref<32x8x64xf32, #tpu.memory_space<vmem>>, vector<1x8x64xf32>,
    %163 = vector.extract_strided_slice %147 {offsets = [1, 0, 0], sizes = [1, 8, 64], strides = [1, 1, 1]} : vector<32x8x64xf32> to vector<1x8x64xf32>
    %164 = vector.shape_cast %163 : vector<1x8x64xf32> to vector<8x64xf32>
    %165 = arith.mulf %164, %159 : vector<8x64xf32>
    %166 = vector.extract_strided_slice %152 {offsets = [1, 0, 0], sizes = [1, 8, 64], strides = [1, 1, 1]} : vector<32x8x64xf32> to vector<1x8x64xf32>
    %167 = vector.shape_cast %166 : vector<1x8x64xf32> to vector<8x64xf32>
    %168 = arith.addf %165, %167 : vector<8x64xf32>
    %c1_70 = arith.constant 1 : index
    %c0_71 = arith.constant 0 : index
    %c0_72 = arith.constant 0 : index
    %169 = vector.load %arg23[%c1_70, %c0_71, %c0_72] : memref<32x8x64xf32, #tpu.memory_space<vmem>>, vector<1x8x64xf32>
    %170 = vector.shape_cast %169 : vector<1x8x64xf32> to vector<8x64xf32>
    %171 = vector.shape_cast %168 : vector<8x64xf32> to vector<1x8x64xf32>
    tpu.vector_store %arg23[%c1_70, %c0_71, %c0_72], %171 {strides = array<i32>} : memref<32x8x64xf32, #tpu.memory_space<vmem>>, vector<1x8x64xf32>,
    %172 = vector.extract_strided_slice %147 {offsets = [2, 0, 0], sizes = [1, 8, 64], strides = [1, 1, 1]} : vector<32x8x64xf32> to vector<1x8x64xf32>
    %173 = vector.shape_cast %172 : vector<1x8x64xf32> to vector<8x64xf32>
    %174 = arith.mulf %173, %168 : vector<8x64xf32>
    %175 = vector.extract_strided_slice %152 {offsets = [2, 0, 0], sizes = [1, 8, 64], strides = [1, 1, 1]} : vector<32x8x64xf32> to vector<1x8x64xf32>
    %176 = vector.shape_cast %175 : vector<1x8x64xf32> to vector<8x64xf32>
    %177 = arith.addf %174, %176 : vector<8x64xf32>
    %c2_73 = arith.constant 2 : index
    %c0_74 = arith.constant 0 : index
    %c0_75 = arith.constant 0 : index
    %178 = vector.load %arg23[%c2_73, %c0_74, %c0_75] : memref<32x8x64xf32, #tpu.memory_space<vmem>>, vector<1x8x64xf32>
    %179 = vector.shape_cast %178 : vector<1x8x64xf32> to vector<8x64xf32>
    %180 = vector.shape_cast %177 : vector<8x64xf32> to vector<1x8x64xf32>
    tpu.vector_store %arg23[%c2_73, %c0_74, %c0_75], %180 {strides = array<i32>} : memref<32x8x64xf32, #tpu.memory_space<vmem>>, vector<1x8x64xf32>,
    %181 = vector.extract_strided_slice %147 {offsets = [3, 0, 0], sizes = [1, 8, 64], strides = [1, 1, 1]} : vector<32x8x64xf32> to vector<1x8x64xf32>
    %182 = vector.shape_cast %181 : vector<1x8x64xf32> to vector<8x64xf32>
    %183 = arith.mulf %182, %177 : vector<8x64xf32>
    %184 = vector.extract_strided_slice %152 {offsets = [3, 0, 0], sizes = [1, 8, 64], strides = [1, 1, 1]} : vector<32x8x64xf32> to vector<1x8x64xf32>
    %185 = vector.shape_cast %184 : vector<1x8x64xf32> to vector<8x64xf32>
    %186 = arith.addf %183, %185 : vector<8x64xf32>
    %c3 = arith.constant 3 : index
    %c0_76 = arith.constant 0 : index
    %c0_77 = arith.constant 0 : index
    %187 = vector.load %arg23[%c3, %c0_76, %c0_77] : memref<32x8x64xf32, #tpu.memory_space<vmem>>, vector<1x8x64xf32>
    %188 = vector.shape_cast %187 : vector<1x8x64xf32> to vector<8x64xf32>
    %189 = vector.shape_cast %186 : vector<8x64xf32> to vector<1x8x64xf32>
    tpu.vector_store %arg23[%c3, %c0_76, %c0_77], %189 {strides = array<i32>} : memref<32x8x64xf32, #tpu.memory_space<vmem>>, vector<1x8x64xf32>,
    %190 = vector.extract_strided_slice %147 {offsets = [4, 0, 0], sizes = [1, 8, 64], strides = [1, 1, 1]} : vector<32x8x64xf32> to vector<1x8x64xf32>
    %191 = vector.shape_cast %190 : vector<1x8x64xf32> to vector<8x64xf32>
    %192 = arith.mulf %191, %186 : vector<8x64xf32>
    %193 = vector.extract_strided_slice %152 {offsets = [4, 0, 0], sizes = [1, 8, 64], strides = [1, 1, 1]} : vector<32x8x64xf32> to vector<1x8x64xf32>
    %194 = vector.shape_cast %193 : vector<1x8x64xf32> to vector<8x64xf32>
    %195 = arith.addf %192, %194 : vector<8x64xf32>
    %c4 = arith.constant 4 : index
    %c0_78 = arith.constant 0 : index
    %c0_79 = arith.constant 0 : index
    %196 = vector.load %arg23[%c4, %c0_78, %c0_79] : memref<32x8x64xf32, #tpu.memory_space<vmem>>, vector<1x8x64xf32>
    %197 = vector.shape_cast %196 : vector<1x8x64xf32> to vector<8x64xf32>
    %198 = vector.shape_cast %195 : vector<8x64xf32> to vector<1x8x64xf32>
    tpu.vector_store %arg23[%c4, %c0_78, %c0_79], %198 {strides = array<i32>} : memref<32x8x64xf32, #tpu.memory_space<vmem>>, vector<1x8x64xf32>,
    %199 = vector.extract_strided_slice %147 {offsets = [5, 0, 0], sizes = [1, 8, 64], strides = [1, 1, 1]} : vector<32x8x64xf32> to vector<1x8x64xf32>
    %200 = vector.shape_cast %199 : vector<1x8x64xf32> to vector<8x64xf32>
    %201 = arith.mulf %200, %195 : vector<8x64xf32>
    %202 = vector.extract_strided_slice %152 {offsets = [5, 0, 0], sizes = [1, 8, 64], strides = [1, 1, 1]} : vector<32x8x64xf32> to vector<1x8x64xf32>
    %203 = vector.shape_cast %202 : vector<1x8x64xf32> to vector<8x64xf32>
    %204 = arith.addf %201, %203 : vector<8x64xf32>
    %c5 = arith.constant 5 : index
    %c0_80 = arith.constant 0 : index
    %c0_81 = arith.constant 0 : index
    %205 = vector.load %arg23[%c5, %c0_80, %c0_81] : memref<32x8x64xf32, #tpu.memory_space<vmem>>, vector<1x8x64xf32>
    %206 = vector.shape_cast %205 : vector<1x8x64xf32> to vector<8x64xf32>
    %207 = vector.shape_cast %204 : vector<8x64xf32> to vector<1x8x64xf32>
    tpu.vector_store %arg23[%c5, %c0_80, %c0_81], %207 {strides = array<i32>} : memref<32x8x64xf32, #tpu.memory_space<vmem>>, vector<1x8x64xf32>,
    %208 = vector.extract_strided_slice %147 {offsets = [6, 0, 0], sizes = [1, 8, 64], strides = [1, 1, 1]} : vector<32x8x64xf32> to vector<1x8x64xf32>
    %209 = vector.shape_cast %208 : vector<1x8x64xf32> to vector<8x64xf32>
    %210 = arith.mulf %209, %204 : vector<8x64xf32>
    %211 = vector.extract_strided_slice %152 {offsets = [6, 0, 0], sizes = [1, 8, 64], strides = [1, 1, 1]} : vector<32x8x64xf32> to vector<1x8x64xf32>
    %212 = vector.shape_cast %211 : vector<1x8x64xf32> to vector<8x64xf32>
    %213 = arith.addf %210, %212 : vector<8x64xf32>
    %c6 = arith.constant 6 : index
    %c0_82 = arith.constant 0 : index
    %c0_83 = arith.constant 0 : index
    %214 = vector.load %arg23[%c6, %c0_82, %c0_83] : memref<32x8x64xf32, #tpu.memory_space<vmem>>, vector<1x8x64xf32>
    %215 = vector.shape_cast %214 : vector<1x8x64xf32> to vector<8x64xf32>
    %216 = vector.shape_cast %213 : vector<8x64xf32> to vector<1x8x64xf32>
    tpu.vector_store %arg23[%c6, %c0_82, %c0_83], %216 {strides = array<i32>} : memref<32x8x64xf32, #tpu.memory_space<vmem>>, vector<1x8x64xf32>,
    %217 = vector.extract_strided_slice %147 {offsets = [7, 0, 0], sizes = [1, 8, 64], strides = [1, 1, 1]} : vector<32x8x64xf32> to vector<1x8x64xf32>
    %218 = vector.shape_cast %217 : vector<1x8x64xf32> to vector<8x64xf32>
    %219 = arith.mulf %218, %213 : vector<8x64xf32>
    %220 = vector.extract_strided_slice %152 {offsets = [7, 0, 0], sizes = [1, 8, 64], strides = [1, 1, 1]} : vector<32x8x64xf32> to vector<1x8x64xf32>
    %221 = vector.shape_cast %220 : vector<1x8x64xf32> to vector<8x64xf32>
    %222 = arith.addf %219, %221 : vector<8x64xf32>
    %c7 = arith.constant 7 : index
    %c0_84 = arith.constant 0 : index
    %c0_85 = arith.constant 0 : index
    %223 = vector.load %arg23[%c7, %c0_84, %c0_85] : memref<32x8x64xf32, #tpu.memory_space<vmem>>, vector<1x8x64xf32>
    %224 = vector.shape_cast %223 : vector<1x8x64xf32> to vector<8x64xf32>
    %225 = vector.shape_cast %222 : vector<8x64xf32> to vector<1x8x64xf32>
    tpu.vector_store %arg23[%c7, %c0_84, %c0_85], %225 {strides = array<i32>} : memref<32x8x64xf32, #tpu.memory_space<vmem>>, vector<1x8x64xf32>,
    %226 = vector.extract_strided_slice %147 {offsets = [8, 0, 0], sizes = [1, 8, 64], strides = [1, 1, 1]} : vector<32x8x64xf32> to vector<1x8x64xf32>
    %227 = vector.shape_cast %226 : vector<1x8x64xf32> to vector<8x64xf32>
    %228 = arith.mulf %227, %222 : vector<8x64xf32>
    %229 = vector.extract_strided_slice %152 {offsets = [8, 0, 0], sizes = [1, 8, 64], strides = [1, 1, 1]} : vector<32x8x64xf32> to vector<1x8x64xf32>
    %230 = vector.shape_cast %229 : vector<1x8x64xf32> to vector<8x64xf32>
    %231 = arith.addf %228, %230 : vector<8x64xf32>
    %c8 = arith.constant 8 : index
    %c0_86 = arith.constant 0 : index
    %c0_87 = arith.constant 0 : index
    %232 = vector.load %arg23[%c8, %c0_86, %c0_87] : memref<32x8x64xf32, #tpu.memory_space<vmem>>, vector<1x8x64xf32>
    %233 = vector.shape_cast %232 : vector<1x8x64xf32> to vector<8x64xf32>
    %234 = vector.shape_cast %231 : vector<8x64xf32> to vector<1x8x64xf32>
    tpu.vector_store %arg23[%c8, %c0_86, %c0_87], %234 {strides = array<i32>} : memref<32x8x64xf32, #tpu.memory_space<vmem>>, vector<1x8x64xf32>,
    %235 = vector.extract_strided_slice %147 {offsets = [9, 0, 0], sizes = [1, 8, 64], strides = [1, 1, 1]} : vector<32x8x64xf32> to vector<1x8x64xf32>
    %236 = vector.shape_cast %235 : vector<1x8x64xf32> to vector<8x64xf32>
    %237 = arith.mulf %236, %231 : vector<8x64xf32>
    %238 = vector.extract_strided_slice %152 {offsets = [9, 0, 0], sizes = [1, 8, 64], strides = [1, 1, 1]} : vector<32x8x64xf32> to vector<1x8x64xf32>
    %239 = vector.shape_cast %238 : vector<1x8x64xf32> to vector<8x64xf32>
    %240 = arith.addf %237, %239 : vector<8x64xf32>
    %c9 = arith.constant 9 : index
    %c0_88 = arith.constant 0 : index
    %c0_89 = arith.constant 0 : index
    %241 = vector.load %arg23[%c9, %c0_88, %c0_89] : memref<32x8x64xf32, #tpu.memory_space<vmem>>, vector<1x8x64xf32>
    %242 = vector.shape_cast %241 : vector<1x8x64xf32> to vector<8x64xf32>
    %243 = vector.shape_cast %240 : vector<8x64xf32> to vector<1x8x64xf32>
    tpu.vector_store %arg23[%c9, %c0_88, %c0_89], %243 {strides = array<i32>} : memref<32x8x64xf32, #tpu.memory_space<vmem>>, vector<1x8x64xf32>,
    %244 = vector.extract_strided_slice %147 {offsets = [10, 0, 0], sizes = [1, 8, 64], strides = [1, 1, 1]} : vector<32x8x64xf32> to vector<1x8x64xf32>
    %245 = vector.shape_cast %244 : vector<1x8x64xf32> to vector<8x64xf32>
    %246 = arith.mulf %245, %240 : vector<8x64xf32>
    %247 = vector.extract_strided_slice %152 {offsets = [10, 0, 0], sizes = [1, 8, 64], strides = [1, 1, 1]} : vector<32x8x64xf32> to vector<1x8x64xf32>
    %248 = vector.shape_cast %247 : vector<1x8x64xf32> to vector<8x64xf32>
    %249 = arith.addf %246, %248 : vector<8x64xf32>
    %c10 = arith.constant 10 : index
    %c0_90 = arith.constant 0 : index
    %c0_91 = arith.constant 0 : index
    %250 = vector.load %arg23[%c10, %c0_90, %c0_91] : memref<32x8x64xf32, #tpu.memory_space<vmem>>, vector<1x8x64xf32>
    %251 = vector.shape_cast %250 : vector<1x8x64xf32> to vector<8x64xf32>
    %252 = vector.shape_cast %249 : vector<8x64xf32> to vector<1x8x64xf32>
    tpu.vector_store %arg23[%c10, %c0_90, %c0_91], %252 {strides = array<i32>} : memref<32x8x64xf32, #tpu.memory_space<vmem>>, vector<1x8x64xf32>,
    %253 = vector.extract_strided_slice %147 {offsets = [11, 0, 0], sizes = [1, 8, 64], strides = [1, 1, 1]} : vector<32x8x64xf32> to vector<1x8x64xf32>
    %254 = vector.shape_cast %253 : vector<1x8x64xf32> to vector<8x64xf32>
    %255 = arith.mulf %254, %249 : vector<8x64xf32>
    %256 = vector.extract_strided_slice %152 {offsets = [11, 0, 0], sizes = [1, 8, 64], strides = [1, 1, 1]} : vector<32x8x64xf32> to vector<1x8x64xf32>
    %257 = vector.shape_cast %256 : vector<1x8x64xf32> to vector<8x64xf32>
    %258 = arith.addf %255, %257 : vector<8x64xf32>
    %c11 = arith.constant 11 : index
    %c0_92 = arith.constant 0 : index
    %c0_93 = arith.constant 0 : index
    %259 = vector.load %arg23[%c11, %c0_92, %c0_93] : memref<32x8x64xf32, #tpu.memory_space<vmem>>, vector<1x8x64xf32>
    %260 = vector.shape_cast %259 : vector<1x8x64xf32> to vector<8x64xf32>
    %261 = vector.shape_cast %258 : vector<8x64xf32> to vector<1x8x64xf32>
    tpu.vector_store %arg23[%c11, %c0_92, %c0_93], %261 {strides = array<i32>} : memref<32x8x64xf32, #tpu.memory_space<vmem>>, vector<1x8x64xf32>,
    %262 = vector.extract_strided_slice %147 {offsets = [12, 0, 0], sizes = [1, 8, 64], strides = [1, 1, 1]} : vector<32x8x64xf32> to vector<1x8x64xf32>
    %263 = vector.shape_cast %262 : vector<1x8x64xf32> to vector<8x64xf32>
    %264 = arith.mulf %263, %258 : vector<8x64xf32>
    %265 = vector.extract_strided_slice %152 {offsets = [12, 0, 0], sizes = [1, 8, 64], strides = [1, 1, 1]} : vector<32x8x64xf32> to vector<1x8x64xf32>
    %266 = vector.shape_cast %265 : vector<1x8x64xf32> to vector<8x64xf32>
    %267 = arith.addf %264, %266 : vector<8x64xf32>
    %c12 = arith.constant 12 : index
    %c0_94 = arith.constant 0 : index
    %c0_95 = arith.constant 0 : index
    %268 = vector.load %arg23[%c12, %c0_94, %c0_95] : memref<32x8x64xf32, #tpu.memory_space<vmem>>, vector<1x8x64xf32>
    %269 = vector.shape_cast %268 : vector<1x8x64xf32> to vector<8x64xf32>
    %270 = vector.shape_cast %267 : vector<8x64xf32> to vector<1x8x64xf32>
    tpu.vector_store %arg23[%c12, %c0_94, %c0_95], %270 {strides = array<i32>} : memref<32x8x64xf32, #tpu.memory_space<vmem>>, vector<1x8x64xf32>,
    %271 = vector.extract_strided_slice %147 {offsets = [13, 0, 0], sizes = [1, 8, 64], strides = [1, 1, 1]} : vector<32x8x64xf32> to vector<1x8x64xf32>
    %272 = vector.shape_cast %271 : vector<1x8x64xf32> to vector<8x64xf32>
    %273 = arith.mulf %272, %267 : vector<8x64xf32>
    %274 = vector.extract_strided_slice %152 {offsets = [13, 0, 0], sizes = [1, 8, 64], strides = [1, 1, 1]} : vector<32x8x64xf32> to vector<1x8x64xf32>
    %275 = vector.shape_cast %274 : vector<1x8x64xf32> to vector<8x64xf32>
    %276 = arith.addf %273, %275 : vector<8x64xf32>
    %c13 = arith.constant 13 : index
    %c0_96 = arith.constant 0 : index
    %c0_97 = arith.constant 0 : index
    %277 = vector.load %arg23[%c13, %c0_96, %c0_97] : memref<32x8x64xf32, #tpu.memory_space<vmem>>, vector<1x8x64xf32>
    %278 = vector.shape_cast %277 : vector<1x8x64xf32> to vector<8x64xf32>
    %279 = vector.shape_cast %276 : vector<8x64xf32> to vector<1x8x64xf32>
    tpu.vector_store %arg23[%c13, %c0_96, %c0_97], %279 {strides = array<i32>} : memref<32x8x64xf32, #tpu.memory_space<vmem>>, vector<1x8x64xf32>,
    %280 = vector.extract_strided_slice %147 {offsets = [14, 0, 0], sizes = [1, 8, 64], strides = [1, 1, 1]} : vector<32x8x64xf32> to vector<1x8x64xf32>
    %281 = vector.shape_cast %280 : vector<1x8x64xf32> to vector<8x64xf32>
    %282 = arith.mulf %281, %276 : vector<8x64xf32>
    %283 = vector.extract_strided_slice %152 {offsets = [14, 0, 0], sizes = [1, 8, 64], strides = [1, 1, 1]} : vector<32x8x64xf32> to vector<1x8x64xf32>
    %284 = vector.shape_cast %283 : vector<1x8x64xf32> to vector<8x64xf32>
    %285 = arith.addf %282, %284 : vector<8x64xf32>
    %c14 = arith.constant 14 : index
    %c0_98 = arith.constant 0 : index
    %c0_99 = arith.constant 0 : index
    %286 = vector.load %arg23[%c14, %c0_98, %c0_99] : memref<32x8x64xf32, #tpu.memory_space<vmem>>, vector<1x8x64xf32>
    %287 = vector.shape_cast %286 : vector<1x8x64xf32> to vector<8x64xf32>
    %288 = vector.shape_cast %285 : vector<8x64xf32> to vector<1x8x64xf32>
    tpu.vector_store %arg23[%c14, %c0_98, %c0_99], %288 {strides = array<i32>} : memref<32x8x64xf32, #tpu.memory_space<vmem>>, vector<1x8x64xf32>,
    %289 = vector.extract_strided_slice %147 {offsets = [15, 0, 0], sizes = [1, 8, 64], strides = [1, 1, 1]} : vector<32x8x64xf32> to vector<1x8x64xf32>
    %290 = vector.shape_cast %289 : vector<1x8x64xf32> to vector<8x64xf32>
    %291 = arith.mulf %290, %285 : vector<8x64xf32>
    %292 = vector.extract_strided_slice %152 {offsets = [15, 0, 0], sizes = [1, 8, 64], strides = [1, 1, 1]} : vector<32x8x64xf32> to vector<1x8x64xf32>
    %293 = vector.shape_cast %292 : vector<1x8x64xf32> to vector<8x64xf32>
    %294 = arith.addf %291, %293 : vector<8x64xf32>
    %c15 = arith.constant 15 : index
    %c0_100 = arith.constant 0 : index
    %c0_101 = arith.constant 0 : index
    %295 = vector.load %arg23[%c15, %c0_100, %c0_101] : memref<32x8x64xf32, #tpu.memory_space<vmem>>, vector<1x8x64xf32>
    %296 = vector.shape_cast %295 : vector<1x8x64xf32> to vector<8x64xf32>
    %297 = vector.shape_cast %294 : vector<8x64xf32> to vector<1x8x64xf32>
    tpu.vector_store %arg23[%c15, %c0_100, %c0_101], %297 {strides = array<i32>} : memref<32x8x64xf32, #tpu.memory_space<vmem>>, vector<1x8x64xf32>,
    %cst_102 = arith.constant 0.000000e+00 : f32
    %298 = vector.broadcast %cst_102 : f32 to vector<8x64xf32>
    %299 = vector.extract_strided_slice %147 {offsets = [16, 0, 0], sizes = [1, 8, 64], strides = [1, 1, 1]} : vector<32x8x64xf32> to vector<1x8x64xf32>
    %300 = vector.shape_cast %299 : vector<1x8x64xf32> to vector<8x64xf32>
    %301 = arith.mulf %300, %298 : vector<8x64xf32>
    %302 = vector.extract_strided_slice %152 {offsets = [16, 0, 0], sizes = [1, 8, 64], strides = [1, 1, 1]} : vector<32x8x64xf32> to vector<1x8x64xf32>
    %303 = vector.shape_cast %302 : vector<1x8x64xf32> to vector<8x64xf32>
    %304 = arith.addf %301, %303 : vector<8x64xf32>
    %c16 = arith.constant 16 : index
    %c0_103 = arith.constant 0 : index
    %c0_104 = arith.constant 0 : index
    %305 = vector.load %arg23[%c16, %c0_103, %c0_104] : memref<32x8x64xf32, #tpu.memory_space<vmem>>, vector<1x8x64xf32>
    %306 = vector.shape_cast %305 : vector<1x8x64xf32> to vector<8x64xf32>
    %307 = vector.shape_cast %304 : vector<8x64xf32> to vector<1x8x64xf32>
    tpu.vector_store %arg23[%c16, %c0_103, %c0_104], %307 {strides = array<i32>} : memref<32x8x64xf32, #tpu.memory_space<vmem>>, vector<1x8x64xf32>,
    %308 = vector.extract_strided_slice %147 {offsets = [17, 0, 0], sizes = [1, 8, 64], strides = [1, 1, 1]} : vector<32x8x64xf32> to vector<1x8x64xf32>
    %309 = vector.shape_cast %308 : vector<1x8x64xf32> to vector<8x64xf32>
    %310 = arith.mulf %309, %304 : vector<8x64xf32>
    %311 = vector.extract_strided_slice %152 {offsets = [17, 0, 0], sizes = [1, 8, 64], strides = [1, 1, 1]} : vector<32x8x64xf32> to vector<1x8x64xf32>
    %312 = vector.shape_cast %311 : vector<1x8x64xf32> to vector<8x64xf32>
    %313 = arith.addf %310, %312 : vector<8x64xf32>
    %c17 = arith.constant 17 : index
    %c0_105 = arith.constant 0 : index
    %c0_106 = arith.constant 0 : index
    %314 = vector.load %arg23[%c17, %c0_105, %c0_106] : memref<32x8x64xf32, #tpu.memory_space<vmem>>, vector<1x8x64xf32>
    %315 = vector.shape_cast %314 : vector<1x8x64xf32> to vector<8x64xf32>
    %316 = vector.shape_cast %313 : vector<8x64xf32> to vector<1x8x64xf32>
    tpu.vector_store %arg23[%c17, %c0_105, %c0_106], %316 {strides = array<i32>} : memref<32x8x64xf32, #tpu.memory_space<vmem>>, vector<1x8x64xf32>,
    %317 = vector.extract_strided_slice %147 {offsets = [18, 0, 0], sizes = [1, 8, 64], strides = [1, 1, 1]} : vector<32x8x64xf32> to vector<1x8x64xf32>
    %318 = vector.shape_cast %317 : vector<1x8x64xf32> to vector<8x64xf32>
    %319 = arith.mulf %318, %313 : vector<8x64xf32>
    %320 = vector.extract_strided_slice %152 {offsets = [18, 0, 0], sizes = [1, 8, 64], strides = [1, 1, 1]} : vector<32x8x64xf32> to vector<1x8x64xf32>
    %321 = vector.shape_cast %320 : vector<1x8x64xf32> to vector<8x64xf32>
    %322 = arith.addf %319, %321 : vector<8x64xf32>
    %c18 = arith.constant 18 : index
    %c0_107 = arith.constant 0 : index
    %c0_108 = arith.constant 0 : index
    %323 = vector.load %arg23[%c18, %c0_107, %c0_108] : memref<32x8x64xf32, #tpu.memory_space<vmem>>, vector<1x8x64xf32>
    %324 = vector.shape_cast %323 : vector<1x8x64xf32> to vector<8x64xf32>
    %325 = vector.shape_cast %322 : vector<8x64xf32> to vector<1x8x64xf32>
    tpu.vector_store %arg23[%c18, %c0_107, %c0_108], %325 {strides = array<i32>} : memref<32x8x64xf32, #tpu.memory_space<vmem>>, vector<1x8x64xf32>,
    %326 = vector.extract_strided_slice %147 {offsets = [19, 0, 0], sizes = [1, 8, 64], strides = [1, 1, 1]} : vector<32x8x64xf32> to vector<1x8x64xf32>
    %327 = vector.shape_cast %326 : vector<1x8x64xf32> to vector<8x64xf32>
    %328 = arith.mulf %327, %322 : vector<8x64xf32>
    %329 = vector.extract_strided_slice %152 {offsets = [19, 0, 0], sizes = [1, 8, 64], strides = [1, 1, 1]} : vector<32x8x64xf32> to vector<1x8x64xf32>
    %330 = vector.shape_cast %329 : vector<1x8x64xf32> to vector<8x64xf32>
    %331 = arith.addf %328, %330 : vector<8x64xf32>
    %c19 = arith.constant 19 : index
    %c0_109 = arith.constant 0 : index
    %c0_110 = arith.constant 0 : index
    %332 = vector.load %arg23[%c19, %c0_109, %c0_110] : memref<32x8x64xf32, #tpu.memory_space<vmem>>, vector<1x8x64xf32>
    %333 = vector.shape_cast %332 : vector<1x8x64xf32> to vector<8x64xf32>
    %334 = vector.shape_cast %331 : vector<8x64xf32> to vector<1x8x64xf32>
    tpu.vector_store %arg23[%c19, %c0_109, %c0_110], %334 {strides = array<i32>} : memref<32x8x64xf32, #tpu.memory_space<vmem>>, vector<1x8x64xf32>,
    %335 = vector.extract_strided_slice %147 {offsets = [20, 0, 0], sizes = [1, 8, 64], strides = [1, 1, 1]} : vector<32x8x64xf32> to vector<1x8x64xf32>
    %336 = vector.shape_cast %335 : vector<1x8x64xf32> to vector<8x64xf32>
    %337 = arith.mulf %336, %331 : vector<8x64xf32>
    %338 = vector.extract_strided_slice %152 {offsets = [20, 0, 0], sizes = [1, 8, 64], strides = [1, 1, 1]} : vector<32x8x64xf32> to vector<1x8x64xf32>
    %339 = vector.shape_cast %338 : vector<1x8x64xf32> to vector<8x64xf32>
    %340 = arith.addf %337, %339 : vector<8x64xf32>
    %c20 = arith.constant 20 : index
    %c0_111 = arith.constant 0 : index
    %c0_112 = arith.constant 0 : index
    %341 = vector.load %arg23[%c20, %c0_111, %c0_112] : memref<32x8x64xf32, #tpu.memory_space<vmem>>, vector<1x8x64xf32>
    %342 = vector.shape_cast %341 : vector<1x8x64xf32> to vector<8x64xf32>
    %343 = vector.shape_cast %340 : vector<8x64xf32> to vector<1x8x64xf32>
    tpu.vector_store %arg23[%c20, %c0_111, %c0_112], %343 {strides = array<i32>} : memref<32x8x64xf32, #tpu.memory_space<vmem>>, vector<1x8x64xf32>,
    %344 = vector.extract_strided_slice %147 {offsets = [21, 0, 0], sizes = [1, 8, 64], strides = [1, 1, 1]} : vector<32x8x64xf32> to vector<1x8x64xf32>
    %345 = vector.shape_cast %344 : vector<1x8x64xf32> to vector<8x64xf32>
    %346 = arith.mulf %345, %340 : vector<8x64xf32>
    %347 = vector.extract_strided_slice %152 {offsets = [21, 0, 0], sizes = [1, 8, 64], strides = [1, 1, 1]} : vector<32x8x64xf32> to vector<1x8x64xf32>
    %348 = vector.shape_cast %347 : vector<1x8x64xf32> to vector<8x64xf32>
    %349 = arith.addf %346, %348 : vector<8x64xf32>
    %c21 = arith.constant 21 : index
    %c0_113 = arith.constant 0 : index
    %c0_114 = arith.constant 0 : index
    %350 = vector.load %arg23[%c21, %c0_113, %c0_114] : memref<32x8x64xf32, #tpu.memory_space<vmem>>, vector<1x8x64xf32>
    %351 = vector.shape_cast %350 : vector<1x8x64xf32> to vector<8x64xf32>
    %352 = vector.shape_cast %349 : vector<8x64xf32> to vector<1x8x64xf32>
    tpu.vector_store %arg23[%c21, %c0_113, %c0_114], %352 {strides = array<i32>} : memref<32x8x64xf32, #tpu.memory_space<vmem>>, vector<1x8x64xf32>,
    %353 = vector.extract_strided_slice %147 {offsets = [22, 0, 0], sizes = [1, 8, 64], strides = [1, 1, 1]} : vector<32x8x64xf32> to vector<1x8x64xf32>
    %354 = vector.shape_cast %353 : vector<1x8x64xf32> to vector<8x64xf32>
    %355 = arith.mulf %354, %349 : vector<8x64xf32>
    %356 = vector.extract_strided_slice %152 {offsets = [22, 0, 0], sizes = [1, 8, 64], strides = [1, 1, 1]} : vector<32x8x64xf32> to vector<1x8x64xf32>
    %357 = vector.shape_cast %356 : vector<1x8x64xf32> to vector<8x64xf32>
    %358 = arith.addf %355, %357 : vector<8x64xf32>
    %c22 = arith.constant 22 : index
    %c0_115 = arith.constant 0 : index
    %c0_116 = arith.constant 0 : index
    %359 = vector.load %arg23[%c22, %c0_115, %c0_116] : memref<32x8x64xf32, #tpu.memory_space<vmem>>, vector<1x8x64xf32>
    %360 = vector.shape_cast %359 : vector<1x8x64xf32> to vector<8x64xf32>
    %361 = vector.shape_cast %358 : vector<8x64xf32> to vector<1x8x64xf32>
    tpu.vector_store %arg23[%c22, %c0_115, %c0_116], %361 {strides = array<i32>} : memref<32x8x64xf32, #tpu.memory_space<vmem>>, vector<1x8x64xf32>,
    %362 = vector.extract_strided_slice %147 {offsets = [23, 0, 0], sizes = [1, 8, 64], strides = [1, 1, 1]} : vector<32x8x64xf32> to vector<1x8x64xf32>
    %363 = vector.shape_cast %362 : vector<1x8x64xf32> to vector<8x64xf32>
    %364 = arith.mulf %363, %358 : vector<8x64xf32>
    %365 = vector.extract_strided_slice %152 {offsets = [23, 0, 0], sizes = [1, 8, 64], strides = [1, 1, 1]} : vector<32x8x64xf32> to vector<1x8x64xf32>
    %366 = vector.shape_cast %365 : vector<1x8x64xf32> to vector<8x64xf32>
    %367 = arith.addf %364, %366 : vector<8x64xf32>
    %c23 = arith.constant 23 : index
    %c0_117 = arith.constant 0 : index
    %c0_118 = arith.constant 0 : index
    %368 = vector.load %arg23[%c23, %c0_117, %c0_118] : memref<32x8x64xf32, #tpu.memory_space<vmem>>, vector<1x8x64xf32>
    %369 = vector.shape_cast %368 : vector<1x8x64xf32> to vector<8x64xf32>
    %370 = vector.shape_cast %367 : vector<8x64xf32> to vector<1x8x64xf32>
    tpu.vector_store %arg23[%c23, %c0_117, %c0_118], %370 {strides = array<i32>} : memref<32x8x64xf32, #tpu.memory_space<vmem>>, vector<1x8x64xf32>,
    %371 = vector.extract_strided_slice %147 {offsets = [24, 0, 0], sizes = [1, 8, 64], strides = [1, 1, 1]} : vector<32x8x64xf32> to vector<1x8x64xf32>
    %372 = vector.shape_cast %371 : vector<1x8x64xf32> to vector<8x64xf32>
    %373 = arith.mulf %372, %367 : vector<8x64xf32>
    %374 = vector.extract_strided_slice %152 {offsets = [24, 0, 0], sizes = [1, 8, 64], strides = [1, 1, 1]} : vector<32x8x64xf32> to vector<1x8x64xf32>
    %375 = vector.shape_cast %374 : vector<1x8x64xf32> to vector<8x64xf32>
    %376 = arith.addf %373, %375 : vector<8x64xf32>
    %c24 = arith.constant 24 : index
    %c0_119 = arith.constant 0 : index
    %c0_120 = arith.constant 0 : index
    %377 = vector.load %arg23[%c24, %c0_119, %c0_120] : memref<32x8x64xf32, #tpu.memory_space<vmem>>, vector<1x8x64xf32>
    %378 = vector.shape_cast %377 : vector<1x8x64xf32> to vector<8x64xf32>
    %379 = vector.shape_cast %376 : vector<8x64xf32> to vector<1x8x64xf32>
    tpu.vector_store %arg23[%c24, %c0_119, %c0_120], %379 {strides = array<i32>} : memref<32x8x64xf32, #tpu.memory_space<vmem>>, vector<1x8x64xf32>,
    %380 = vector.extract_strided_slice %147 {offsets = [25, 0, 0], sizes = [1, 8, 64], strides = [1, 1, 1]} : vector<32x8x64xf32> to vector<1x8x64xf32>
    %381 = vector.shape_cast %380 : vector<1x8x64xf32> to vector<8x64xf32>
    %382 = arith.mulf %381, %376 : vector<8x64xf32>
    %383 = vector.extract_strided_slice %152 {offsets = [25, 0, 0], sizes = [1, 8, 64], strides = [1, 1, 1]} : vector<32x8x64xf32> to vector<1x8x64xf32>
    %384 = vector.shape_cast %383 : vector<1x8x64xf32> to vector<8x64xf32>
    %385 = arith.addf %382, %384 : vector<8x64xf32>
    %c25 = arith.constant 25 : index
    %c0_121 = arith.constant 0 : index
    %c0_122 = arith.constant 0 : index
    %386 = vector.load %arg23[%c25, %c0_121, %c0_122] : memref<32x8x64xf32, #tpu.memory_space<vmem>>, vector<1x8x64xf32>
    %387 = vector.shape_cast %386 : vector<1x8x64xf32> to vector<8x64xf32>
    %388 = vector.shape_cast %385 : vector<8x64xf32> to vector<1x8x64xf32>
    tpu.vector_store %arg23[%c25, %c0_121, %c0_122], %388 {strides = array<i32>} : memref<32x8x64xf32, #tpu.memory_space<vmem>>, vector<1x8x64xf32>,
    %389 = vector.extract_strided_slice %147 {offsets = [26, 0, 0], sizes = [1, 8, 64], strides = [1, 1, 1]} : vector<32x8x64xf32> to vector<1x8x64xf32>
    %390 = vector.shape_cast %389 : vector<1x8x64xf32> to vector<8x64xf32>
    %391 = arith.mulf %390, %385 : vector<8x64xf32>
    %392 = vector.extract_strided_slice %152 {offsets = [26, 0, 0], sizes = [1, 8, 64], strides = [1, 1, 1]} : vector<32x8x64xf32> to vector<1x8x64xf32>
    %393 = vector.shape_cast %392 : vector<1x8x64xf32> to vector<8x64xf32>
    %394 = arith.addf %391, %393 : vector<8x64xf32>
    %c26 = arith.constant 26 : index
    %c0_123 = arith.constant 0 : index
    %c0_124 = arith.constant 0 : index
    %395 = vector.load %arg23[%c26, %c0_123, %c0_124] : memref<32x8x64xf32, #tpu.memory_space<vmem>>, vector<1x8x64xf32>
    %396 = vector.shape_cast %395 : vector<1x8x64xf32> to vector<8x64xf32>
    %397 = vector.shape_cast %394 : vector<8x64xf32> to vector<1x8x64xf32>
    tpu.vector_store %arg23[%c26, %c0_123, %c0_124], %397 {strides = array<i32>} : memref<32x8x64xf32, #tpu.memory_space<vmem>>, vector<1x8x64xf32>,
    %398 = vector.extract_strided_slice %147 {offsets = [27, 0, 0], sizes = [1, 8, 64], strides = [1, 1, 1]} : vector<32x8x64xf32> to vector<1x8x64xf32>
    %399 = vector.shape_cast %398 : vector<1x8x64xf32> to vector<8x64xf32>
    %400 = arith.mulf %399, %394 : vector<8x64xf32>
    %401 = vector.extract_strided_slice %152 {offsets = [27, 0, 0], sizes = [1, 8, 64], strides = [1, 1, 1]} : vector<32x8x64xf32> to vector<1x8x64xf32>
    %402 = vector.shape_cast %401 : vector<1x8x64xf32> to vector<8x64xf32>
    %403 = arith.addf %400, %402 : vector<8x64xf32>
    %c27 = arith.constant 27 : index
    %c0_125 = arith.constant 0 : index
    %c0_126 = arith.constant 0 : index
    %404 = vector.load %arg23[%c27, %c0_125, %c0_126] : memref<32x8x64xf32, #tpu.memory_space<vmem>>, vector<1x8x64xf32>
    %405 = vector.shape_cast %404 : vector<1x8x64xf32> to vector<8x64xf32>
    %406 = vector.shape_cast %403 : vector<8x64xf32> to vector<1x8x64xf32>
    tpu.vector_store %arg23[%c27, %c0_125, %c0_126], %406 {strides = array<i32>} : memref<32x8x64xf32, #tpu.memory_space<vmem>>, vector<1x8x64xf32>,
    %407 = vector.extract_strided_slice %147 {offsets = [28, 0, 0], sizes = [1, 8, 64], strides = [1, 1, 1]} : vector<32x8x64xf32> to vector<1x8x64xf32>
    %408 = vector.shape_cast %407 : vector<1x8x64xf32> to vector<8x64xf32>
    %409 = arith.mulf %408, %403 : vector<8x64xf32>
    %410 = vector.extract_strided_slice %152 {offsets = [28, 0, 0], sizes = [1, 8, 64], strides = [1, 1, 1]} : vector<32x8x64xf32> to vector<1x8x64xf32>
    %411 = vector.shape_cast %410 : vector<1x8x64xf32> to vector<8x64xf32>
    %412 = arith.addf %409, %411 : vector<8x64xf32>
    %c28 = arith.constant 28 : index
    %c0_127 = arith.constant 0 : index
    %c0_128 = arith.constant 0 : index
    %413 = vector.load %arg23[%c28, %c0_127, %c0_128] : memref<32x8x64xf32, #tpu.memory_space<vmem>>, vector<1x8x64xf32>
    %414 = vector.shape_cast %413 : vector<1x8x64xf32> to vector<8x64xf32>
    %415 = vector.shape_cast %412 : vector<8x64xf32> to vector<1x8x64xf32>
    tpu.vector_store %arg23[%c28, %c0_127, %c0_128], %415 {strides = array<i32>} : memref<32x8x64xf32, #tpu.memory_space<vmem>>, vector<1x8x64xf32>,
    %416 = vector.extract_strided_slice %147 {offsets = [29, 0, 0], sizes = [1, 8, 64], strides = [1, 1, 1]} : vector<32x8x64xf32> to vector<1x8x64xf32>
    %417 = vector.shape_cast %416 : vector<1x8x64xf32> to vector<8x64xf32>
    %418 = arith.mulf %417, %412 : vector<8x64xf32>
    %419 = vector.extract_strided_slice %152 {offsets = [29, 0, 0], sizes = [1, 8, 64], strides = [1, 1, 1]} : vector<32x8x64xf32> to vector<1x8x64xf32>
    %420 = vector.shape_cast %419 : vector<1x8x64xf32> to vector<8x64xf32>
    %421 = arith.addf %418, %420 : vector<8x64xf32>
    %c29 = arith.constant 29 : index
    %c0_129 = arith.constant 0 : index
    %c0_130 = arith.constant 0 : index
    %422 = vector.load %arg23[%c29, %c0_129, %c0_130] : memref<32x8x64xf32, #tpu.memory_space<vmem>>, vector<1x8x64xf32>
    %423 = vector.shape_cast %422 : vector<1x8x64xf32> to vector<8x64xf32>
    %424 = vector.shape_cast %421 : vector<8x64xf32> to vector<1x8x64xf32>
    tpu.vector_store %arg23[%c29, %c0_129, %c0_130], %424 {strides = array<i32>} : memref<32x8x64xf32, #tpu.memory_space<vmem>>, vector<1x8x64xf32>,
    %425 = vector.extract_strided_slice %147 {offsets = [30, 0, 0], sizes = [1, 8, 64], strides = [1, 1, 1]} : vector<32x8x64xf32> to vector<1x8x64xf32>
    %426 = vector.shape_cast %425 : vector<1x8x64xf32> to vector<8x64xf32>
    %427 = arith.mulf %426, %421 : vector<8x64xf32>
    %428 = vector.extract_strided_slice %152 {offsets = [30, 0, 0], sizes = [1, 8, 64], strides = [1, 1, 1]} : vector<32x8x64xf32> to vector<1x8x64xf32>
    %429 = vector.shape_cast %428 : vector<1x8x64xf32> to vector<8x64xf32>
    %430 = arith.addf %427, %429 : vector<8x64xf32>
    %c30 = arith.constant 30 : index
    %c0_131 = arith.constant 0 : index
    %c0_132 = arith.constant 0 : index
    %431 = vector.load %arg23[%c30, %c0_131, %c0_132] : memref<32x8x64xf32, #tpu.memory_space<vmem>>, vector<1x8x64xf32>
    %432 = vector.shape_cast %431 : vector<1x8x64xf32> to vector<8x64xf32>
    %433 = vector.shape_cast %430 : vector<8x64xf32> to vector<1x8x64xf32>
    tpu.vector_store %arg23[%c30, %c0_131, %c0_132], %433 {strides = array<i32>} : memref<32x8x64xf32, #tpu.memory_space<vmem>>, vector<1x8x64xf32>,
    %434 = vector.extract_strided_slice %147 {offsets = [31, 0, 0], sizes = [1, 8, 64], strides = [1, 1, 1]} : vector<32x8x64xf32> to vector<1x8x64xf32>
    %435 = vector.shape_cast %434 : vector<1x8x64xf32> to vector<8x64xf32>
    %436 = arith.mulf %435, %430 : vector<8x64xf32>
    %437 = vector.extract_strided_slice %152 {offsets = [31, 0, 0], sizes = [1, 8, 64], strides = [1, 1, 1]} : vector<32x8x64xf32> to vector<1x8x64xf32>
    %438 = vector.shape_cast %437 : vector<1x8x64xf32> to vector<8x64xf32>
    %439 = arith.addf %436, %438 : vector<8x64xf32>
    %c31 = arith.constant 31 : index
    %c0_133 = arith.constant 0 : index
    %c0_134 = arith.constant 0 : index
    %440 = vector.load %arg23[%c31, %c0_133, %c0_134] : memref<32x8x64xf32, #tpu.memory_space<vmem>>, vector<1x8x64xf32>
    %441 = vector.shape_cast %440 : vector<1x8x64xf32> to vector<8x64xf32>
    %442 = vector.shape_cast %439 : vector<8x64xf32> to vector<1x8x64xf32>
    tpu.vector_store %arg23[%c31, %c0_133, %c0_134], %442 {strides = array<i32>} : memref<32x8x64xf32, #tpu.memory_space<vmem>>, vector<1x8x64xf32>,
    %c0_135 = arith.constant 0 : index
    %c0_136 = arith.constant 0 : index
    %c0_137 = arith.constant 0 : index
    %443 = vector.load %arg23[%c0_135, %c0_136, %c0_137] : memref<32x8x64xf32, #tpu.memory_space<vmem>>, vector<32x8x64xf32>
    %444 = vector.shape_cast %138 : vector<32x8xf32> to vector<32x8x1xf32>
    %445 = vector.broadcast %444 : vector<32x8x1xf32> to vector<32x8x64xf32>
    %446 = arith.mulf %443, %445 : vector<32x8x64xf32>
    %cst_138 = arith.constant dense<0.000000e+00> : vector<32x64xf32>
    %447 = vector.multi_reduction <add>, %446, %cst_138 [1] : vector<32x8x64xf32> to vector<32x64xf32>
    %448 = vector.extract_strided_slice %88 {offsets = [2, 0], sizes = [1, 64], strides = [1, 1]} : vector<3x64xf32> to vector<1x64xf32>
    %449 = vector.broadcast %448 : vector<1x64xf32> to vector<32x64xf32>
    %450 = arith.mulf %116, %449 : vector<32x64xf32>
    %451 = arith.addf %447, %450 : vector<32x64xf32>
    %452 = arith.negf %83 : vector<32x64xf32>
    %453 = math.exp %452 : vector<32x64xf32>
    %cst_139 = arith.constant 1.000000e+00 : f32
    %454 = vector.broadcast %cst_139 : f32 to vector<32x64xf32>
    %455 = arith.addf %454, %453 : vector<32x64xf32>
    %456 = arith.divf %454, %455 : vector<32x64xf32>
    %457 = arith.mulf %83, %456 : vector<32x64xf32>
    %458 = arith.mulf %451, %457 : vector<32x64xf32>
    %c0_140 = arith.constant 0 : index
    %c0_141 = arith.constant 0 : index
    %c0_142 = arith.constant 0 : index
    %459 = vector.load %arg13[%c0_140, %c0_141, %c0_142] : memref<2x64x32xf32, #tpu.memory_space<vmem>>, vector<1x64x32xf32>
    %460 = vector.shape_cast %459 : vector<1x64x32xf32> to vector<64x32xf32>
    %cst_143 = arith.constant dense<0.000000e+00> : vector<32x32xf32>
    %461 = tpu.matmul %458, %460, %cst_143 {dimension_numbers = #tpu.dot_dimension_numbers<[1], [0], [0], [1], [0, 0, 1, 1], [], []>} : vector<32x64xf32>, vector<64x32xf32>, vector<32x32xf32> -> vector<32x32xf32>
    %462 = arith.addf %56, %461 : vector<32x32xf32>
    %cst_144 = arith.constant dense<0.000000e+00> : vector<32xf32>
    %463 = vector.multi_reduction <add>, %462, %cst_144 [1] : vector<32x32xf32> to vector<32xf32>
    %464 = vector.shape_cast %463 : vector<32xf32> to vector<32x1xf32>
    %cst_145 = arith.constant 3.200000e+01 : f32
    %465 = vector.broadcast %cst_145 : f32 to vector<32x1xf32>
    %466 = arith.divf %464, %465 : vector<32x1xf32>
    %467 = vector.broadcast %466 : vector<32x1xf32> to vector<32x32xf32>
    %468 = arith.subf %462, %467 : vector<32x32xf32>
    %469 = arith.mulf %468, %468 : vector<32x32xf32>
    %cst_146 = arith.constant dense<0.000000e+00> : vector<32xf32>
    %470 = vector.multi_reduction <add>, %469, %cst_146 [1] : vector<32x32xf32> to vector<32xf32>
    %471 = vector.shape_cast %470 : vector<32xf32> to vector<32x1xf32>
    %cst_147 = arith.constant 3.200000e+01 : f32
    %472 = vector.broadcast %cst_147 : f32 to vector<32x1xf32>
    %473 = arith.divf %471, %472 : vector<32x1xf32>
    %474 = vector.broadcast %466 : vector<32x1xf32> to vector<32x32xf32>
    %475 = arith.subf %462, %474 : vector<32x32xf32>
    %cst_148 = arith.constant 9.99999974E-6 : f32
    %476 = vector.broadcast %cst_148 : f32 to vector<32x1xf32>
    %477 = arith.addf %473, %476 : vector<32x1xf32>
    %478 = math.rsqrt %477 : vector<32x1xf32>
    %479 = vector.broadcast %478 : vector<32x1xf32> to vector<32x32xf32>
    %480 = arith.mulf %475, %479 : vector<32x32xf32>
    %cst_149 = arith.constant dense<0.000000e+00> : vector<64x32xf32>
    %481 = tpu.matmul %58, %480, %cst_149 {dimension_numbers = #tpu.dot_dimension_numbers<[1], [0], [0], [1], [0, 0, 1, 1], [], []>} : vector<64x32xf32>, vector<32x32xf32>, vector<64x32xf32> -> vector<64x32xf32>
    %482 = vector.extract_strided_slice %481 {offsets = [0, 0], sizes = [32, 32], strides = [1, 1]} : vector<64x32xf32> to vector<32x32xf32>
    %483 = vector.extract_strided_slice %481 {offsets = [32, 0], sizes = [32, 32], strides = [1, 1]} : vector<64x32xf32> to vector<32x32xf32>
    %c0_150 = arith.constant 0 : index
    %c0_151 = arith.constant 0 : index
    %c0_152 = arith.constant 0 : index
    %c0_153 = arith.constant 0 : index
    %484 = vector.load %arg14[%c0_150, %c0_151, %c0_152, %c0_153] : memref<2x2x32x32xf32, #tpu.memory_space<vmem>>, vector<1x2x32x32xf32>
    %485 = vector.shape_cast %484 : vector<1x2x32x32xf32> to vector<2x32x32xf32>
    %486 = vector.extract_strided_slice %485 {offsets = [0, 0, 0], sizes = [1, 32, 32], strides = [1, 1, 1]} : vector<2x32x32xf32> to vector<1x32x32xf32>
    %487 = vector.shape_cast %486 : vector<1x32x32xf32> to vector<32x32xf32>
    %488 = arith.mulf %482, %487 : vector<32x32xf32>
    %489 = vector.extract_strided_slice %485 {offsets = [1, 0, 0], sizes = [1, 32, 32], strides = [1, 1, 1]} : vector<2x32x32xf32> to vector<1x32x32xf32>
    %490 = vector.shape_cast %489 : vector<1x32x32xf32> to vector<32x32xf32>
    %491 = arith.mulf %483, %490 : vector<32x32xf32>
    %492 = arith.subf %488, %491 : vector<32x32xf32>
    %493 = vector.extract_strided_slice %485 {offsets = [1, 0, 0], sizes = [1, 32, 32], strides = [1, 1, 1]} : vector<2x32x32xf32> to vector<1x32x32xf32>
    %494 = vector.shape_cast %493 : vector<1x32x32xf32> to vector<32x32xf32>
    %495 = arith.mulf %482, %494 : vector<32x32xf32>
    %496 = vector.extract_strided_slice %485 {offsets = [0, 0, 0], sizes = [1, 32, 32], strides = [1, 1, 1]} : vector<2x32x32xf32> to vector<1x32x32xf32>
    %497 = vector.shape_cast %496 : vector<1x32x32xf32> to vector<32x32xf32>
    %498 = arith.mulf %483, %497 : vector<32x32xf32>
    %499 = arith.addf %495, %498 : vector<32x32xf32>
    %500 = tpu.concatenate %492, %499 in 0 : vector<32x32xf32>, vector<32x32xf32> -> vector<64x32xf32>
    %cst_154 = arith.constant dense<0.000000e+00> : vector<32x32xf32>
    %501 = tpu.matmul %59, %500, %cst_154 {dimension_numbers = #tpu.dot_dimension_numbers<[1], [0], [0], [1], [0, 0, 1, 1], [], []>} : vector<32x64xf32>, vector<64x32xf32>, vector<32x32xf32> -> vector<32x32xf32>
    %502 = arith.addf %462, %501 : vector<32x32xf32>
    %cst_155 = arith.constant dense<0.000000e+00> : vector<32xf32>
    %503 = vector.multi_reduction <add>, %502, %cst_155 [1] : vector<32x32xf32> to vector<32xf32>
    %504 = vector.shape_cast %503 : vector<32xf32> to vector<32x1xf32>
    %cst_156 = arith.constant 3.200000e+01 : f32
    %505 = vector.broadcast %cst_156 : f32 to vector<32x1xf32>
    %506 = arith.divf %504, %505 : vector<32x1xf32>
    %507 = vector.broadcast %506 : vector<32x1xf32> to vector<32x32xf32>
    %508 = arith.subf %502, %507 : vector<32x32xf32>
    %509 = arith.mulf %508, %508 : vector<32x32xf32>
    %cst_157 = arith.constant dense<0.000000e+00> : vector<32xf32>
    %510 = vector.multi_reduction <add>, %509, %cst_157 [1] : vector<32x32xf32> to vector<32xf32>
    %511 = vector.shape_cast %510 : vector<32xf32> to vector<32x1xf32>
    %cst_158 = arith.constant 3.200000e+01 : f32
    %512 = vector.broadcast %cst_158 : f32 to vector<32x1xf32>
    %513 = arith.divf %511, %512 : vector<32x1xf32>
    %514 = vector.broadcast %506 : vector<32x1xf32> to vector<32x32xf32>
    %515 = arith.subf %502, %514 : vector<32x32xf32>
    %cst_159 = arith.constant 9.99999974E-6 : f32
    %516 = vector.broadcast %cst_159 : f32 to vector<32x1xf32>
    %517 = arith.addf %513, %516 : vector<32x1xf32>
    %518 = math.rsqrt %517 : vector<32x1xf32>
    %519 = vector.broadcast %518 : vector<32x1xf32> to vector<32x32xf32>
    %520 = arith.mulf %515, %519 : vector<32x32xf32>
    %c1_160 = arith.constant 1 : index
    %c0_161 = arith.constant 0 : index
    %c0_162 = arith.constant 0 : index
    %521 = vector.load %arg6[%c1_160, %c0_161, %c0_162] : memref<2x32x64xf32, #tpu.memory_space<vmem>>, vector<1x32x64xf32>
    %522 = vector.shape_cast %521 : vector<1x32x64xf32> to vector<32x64xf32>
    %cst_163 = arith.constant dense<0.000000e+00> : vector<32x64xf32>
    %523 = tpu.matmul %520, %522, %cst_163 {dimension_numbers = #tpu.dot_dimension_numbers<[1], [0], [0], [1], [0, 0, 1, 1], [], []>} : vector<32x32xf32>, vector<32x64xf32>, vector<32x64xf32> -> vector<32x64xf32>
    %c1_164 = arith.constant 1 : index
    %c0_165 = arith.constant 0 : index
    %c0_166 = arith.constant 0 : index
    %524 = vector.load %arg7[%c1_164, %c0_165, %c0_166] : memref<2x32x64xf32, #tpu.memory_space<vmem>>, vector<1x32x64xf32>
    %525 = vector.shape_cast %524 : vector<1x32x64xf32> to vector<32x64xf32>
    %cst_167 = arith.constant dense<0.000000e+00> : vector<32x64xf32>
    %526 = tpu.matmul %520, %525, %cst_167 {dimension_numbers = #tpu.dot_dimension_numbers<[1], [0], [0], [1], [0, 0, 1, 1], [], []>} : vector<32x32xf32>, vector<32x64xf32>, vector<32x64xf32> -> vector<32x64xf32>
    %cst_168 = arith.constant dense<0.000000e+00> : vector<128x64xf32>
    %527 = tpu.matmul %57, %523, %cst_168 {dimension_numbers = #tpu.dot_dimension_numbers<[1], [0], [0], [1], [0, 0, 1, 1], [], []>} : vector<128x32xf32>, vector<32x64xf32>, vector<128x64xf32> -> vector<128x64xf32>
    %c1_169 = arith.constant 1 : index
    %c0_170 = arith.constant 0 : index
    %c0_171 = arith.constant 0 : index
    %528 = vector.load %arg8[%c1_169, %c0_170, %c0_171] : memref<2x4x64xf32, #tpu.memory_space<vmem>>, vector<1x4x64xf32>
    %529 = vector.shape_cast %528 : vector<1x4x64xf32> to vector<4x64xf32>
    %c1_172 = arith.constant 1 : index
    %c0_173 = arith.constant 0 : index
    %c0_174 = arith.constant 0 : index
    %530 = vector.load %arg9[%c1_172, %c0_173, %c0_174] : memref<2x3x64xf32, #tpu.memory_space<vmem>>, vector<1x3x64xf32>
    %531 = vector.shape_cast %530 : vector<1x3x64xf32> to vector<3x64xf32>
    %532 = vector.extract_strided_slice %527 {offsets = [0, 0], sizes = [32, 64], strides = [1, 1]} : vector<128x64xf32> to vector<32x64xf32>
    %533 = vector.extract_strided_slice %529 {offsets = [0, 0], sizes = [1, 64], strides = [1, 1]} : vector<4x64xf32> to vector<1x64xf32>
    %534 = vector.broadcast %533 : vector<1x64xf32> to vector<32x64xf32>
    %535 = arith.mulf %532, %534 : vector<32x64xf32>
    %536 = vector.extract_strided_slice %527 {offsets = [32, 0], sizes = [32, 64], strides = [1, 1]} : vector<128x64xf32> to vector<32x64xf32>
    %537 = vector.extract_strided_slice %529 {offsets = [1, 0], sizes = [1, 64], strides = [1, 1]} : vector<4x64xf32> to vector<1x64xf32>
    %538 = vector.broadcast %537 : vector<1x64xf32> to vector<32x64xf32>
    %539 = arith.mulf %536, %538 : vector<32x64xf32>
    %540 = arith.addf %535, %539 : vector<32x64xf32>
    %541 = vector.extract_strided_slice %527 {offsets = [64, 0], sizes = [32, 64], strides = [1, 1]} : vector<128x64xf32> to vector<32x64xf32>
    %542 = vector.extract_strided_slice %529 {offsets = [2, 0], sizes = [1, 64], strides = [1, 1]} : vector<4x64xf32> to vector<1x64xf32>
    %543 = vector.broadcast %542 : vector<1x64xf32> to vector<32x64xf32>
    %544 = arith.mulf %541, %543 : vector<32x64xf32>
    %545 = arith.addf %540, %544 : vector<32x64xf32>
    %546 = vector.extract_strided_slice %527 {offsets = [96, 0], sizes = [32, 64], strides = [1, 1]} : vector<128x64xf32> to vector<32x64xf32>
    %547 = vector.extract_strided_slice %529 {offsets = [3, 0], sizes = [1, 64], strides = [1, 1]} : vector<4x64xf32> to vector<1x64xf32>
    %548 = vector.broadcast %547 : vector<1x64xf32> to vector<32x64xf32>
    %549 = arith.mulf %546, %548 : vector<32x64xf32>
    %550 = arith.addf %545, %549 : vector<32x64xf32>
    %551 = vector.extract_strided_slice %531 {offsets = [0, 0], sizes = [1, 64], strides = [1, 1]} : vector<3x64xf32> to vector<1x64xf32>
    %552 = vector.broadcast %551 : vector<1x64xf32> to vector<32x64xf32>
    %553 = arith.addf %550, %552 : vector<32x64xf32>
    %554 = arith.negf %553 : vector<32x64xf32>
    %555 = math.exp %554 : vector<32x64xf32>
    %cst_175 = arith.constant 1.000000e+00 : f32
    %556 = vector.broadcast %cst_175 : f32 to vector<32x64xf32>
    %557 = arith.addf %556, %555 : vector<32x64xf32>
    %558 = arith.divf %556, %557 : vector<32x64xf32>
    %559 = arith.mulf %553, %558 : vector<32x64xf32>
    %c1_176 = arith.constant 1 : index
    %c0_177 = arith.constant 0 : index
    %c0_178 = arith.constant 0 : index
    %560 = vector.load %arg10[%c1_176, %c0_177, %c0_178] : memref<2x64x64xf32, #tpu.memory_space<vmem>>, vector<1x64x64xf32>
    %561 = vector.shape_cast %560 : vector<1x64x64xf32> to vector<64x64xf32>
    %cst_179 = arith.constant dense<0.000000e+00> : vector<32x64xf32>
    %562 = tpu.matmul %559, %561, %cst_179 {dimension_numbers = #tpu.dot_dimension_numbers<[1], [0], [0], [1], [0, 0, 1, 1], [], []>} : vector<32x64xf32>, vector<64x64xf32>, vector<32x64xf32> -> vector<32x64xf32>
    %563 = vector.extract_strided_slice %531 {offsets = [1, 0], sizes = [1, 64], strides = [1, 1]} : vector<3x64xf32> to vector<1x64xf32>
    %564 = vector.broadcast %563 : vector<1x64xf32> to vector<32x64xf32>
    %565 = arith.addf %562, %564 : vector<32x64xf32>
    %cst_180 = arith.constant 0.000000e+00 : f32
    %566 = vector.broadcast %cst_180 : f32 to vector<32x64xf32>
    %567 = arith.maximumf %565, %566 : vector<32x64xf32>
    %568 = math.absf %565 : vector<32x64xf32>
    %cst_181 = arith.constant 0.000000e+00 : f32
    %569 = vector.broadcast %cst_181 : f32 to vector<32x64xf32>
    %570 = arith.subf %569, %568 : vector<32x64xf32>
    %571 = math.exp %570 : vector<32x64xf32>
    %572 = math.log1p %571 : vector<32x64xf32>
    %573 = arith.addf %567, %572 : vector<32x64xf32>
    %c1_182 = arith.constant 1 : index
    %c0_183 = arith.constant 0 : index
    %c0_184 = arith.constant 0 : index
    %c0_185 = arith.constant 0 : index
    %574 = vector.load %arg11[%c1_182, %c0_183, %c0_184, %c0_185] : memref<2x2x64x8xf32, #tpu.memory_space<vmem>>, vector<1x2x64x8xf32>
    %575 = vector.shape_cast %574 : vector<1x2x64x8xf32> to vector<2x64x8xf32>
    %576 = vector.extract_strided_slice %575 {offsets = [0, 0, 0], sizes = [1, 64, 8], strides = [1, 1, 1]} : vector<2x64x8xf32> to vector<1x64x8xf32>
    %577 = vector.shape_cast %576 : vector<1x64x8xf32> to vector<64x8xf32>
    %cst_186 = arith.constant dense<0.000000e+00> : vector<32x8xf32>
    %578 = tpu.matmul %559, %577, %cst_186 {dimension_numbers = #tpu.dot_dimension_numbers<[1], [0], [0], [1], [0, 0, 1, 1], [], []>} : vector<32x64xf32>, vector<64x8xf32>, vector<32x8xf32> -> vector<32x8xf32>
    %579 = vector.extract_strided_slice %575 {offsets = [1, 0, 0], sizes = [1, 64, 8], strides = [1, 1, 1]} : vector<2x64x8xf32> to vector<1x64x8xf32>
    %580 = vector.shape_cast %579 : vector<1x64x8xf32> to vector<64x8xf32>
    %cst_187 = arith.constant dense<0.000000e+00> : vector<32x8xf32>
    %581 = tpu.matmul %559, %580, %cst_187 {dimension_numbers = #tpu.dot_dimension_numbers<[1], [0], [0], [1], [0, 0, 1, 1], [], []>} : vector<32x64xf32>, vector<64x8xf32>, vector<32x8xf32> -> vector<32x8xf32>
    %582 = arith.mulf %573, %559 : vector<32x64xf32>
    %583 = vector.shape_cast %573 : vector<32x64xf32> to vector<32x1x64xf32>
    %c1_188 = arith.constant 1 : index
    %c0_189 = arith.constant 0 : index
    %c0_190 = arith.constant 0 : index
    %584 = vector.load %arg12[%c1_188, %c0_189, %c0_190] : memref<2x8x64xf32, #tpu.memory_space<vmem>>, vector<1x8x64xf32>
    %585 = vector.shape_cast %584 : vector<1x8x64xf32> to vector<8x64xf32>
    %586 = vector.shape_cast %585 : vector<8x64xf32> to vector<1x8x64xf32>
    %587 = vector.broadcast %583 : vector<32x1x64xf32> to vector<32x8x64xf32>
    %588 = vector.broadcast %586 : vector<1x8x64xf32> to vector<32x8x64xf32>
    %589 = arith.mulf %587, %588 : vector<32x8x64xf32>
    %590 = math.exp %589 : vector<32x8x64xf32>
    %591 = vector.shape_cast %578 : vector<32x8xf32> to vector<32x8x1xf32>
    %592 = vector.shape_cast %582 : vector<32x64xf32> to vector<32x1x64xf32>
    %593 = vector.broadcast %591 : vector<32x8x1xf32> to vector<32x8x64xf32>
    %594 = vector.broadcast %592 : vector<32x1x64xf32> to vector<32x8x64xf32>
    %595 = arith.mulf %593, %594 : vector<32x8x64xf32>
    %cst_191 = arith.constant 0.000000e+00 : f32
    %596 = vector.broadcast %cst_191 : f32 to vector<8x64xf32>
    %597 = vector.extract_strided_slice %590 {offsets = [0, 0, 0], sizes = [1, 8, 64], strides = [1, 1, 1]} : vector<32x8x64xf32> to vector<1x8x64xf32>
    %598 = vector.shape_cast %597 : vector<1x8x64xf32> to vector<8x64xf32>
    %599 = arith.mulf %598, %596 : vector<8x64xf32>
    %600 = vector.extract_strided_slice %595 {offsets = [0, 0, 0], sizes = [1, 8, 64], strides = [1, 1, 1]} : vector<32x8x64xf32> to vector<1x8x64xf32>
    %601 = vector.shape_cast %600 : vector<1x8x64xf32> to vector<8x64xf32>
    %602 = arith.addf %599, %601 : vector<8x64xf32>
    %c0_192 = arith.constant 0 : index
    %c0_193 = arith.constant 0 : index
    %c0_194 = arith.constant 0 : index
    %603 = vector.load %arg23[%c0_192, %c0_193, %c0_194] : memref<32x8x64xf32, #tpu.memory_space<vmem>>, vector<1x8x64xf32>
    %604 = vector.shape_cast %603 : vector<1x8x64xf32> to vector<8x64xf32>
    %605 = vector.shape_cast %602 : vector<8x64xf32> to vector<1x8x64xf32>
    tpu.vector_store %arg23[%c0_192, %c0_193, %c0_194], %605 {strides = array<i32>} : memref<32x8x64xf32, #tpu.memory_space<vmem>>, vector<1x8x64xf32>,
    %606 = vector.extract_strided_slice %590 {offsets = [1, 0, 0], sizes = [1, 8, 64], strides = [1, 1, 1]} : vector<32x8x64xf32> to vector<1x8x64xf32>
    %607 = vector.shape_cast %606 : vector<1x8x64xf32> to vector<8x64xf32>
    %608 = arith.mulf %607, %602 : vector<8x64xf32>
    %609 = vector.extract_strided_slice %595 {offsets = [1, 0, 0], sizes = [1, 8, 64], strides = [1, 1, 1]} : vector<32x8x64xf32> to vector<1x8x64xf32>
    %610 = vector.shape_cast %609 : vector<1x8x64xf32> to vector<8x64xf32>
    %611 = arith.addf %608, %610 : vector<8x64xf32>
    %c1_195 = arith.constant 1 : index
    %c0_196 = arith.constant 0 : index
    %c0_197 = arith.constant 0 : index
    %612 = vector.load %arg23[%c1_195, %c0_196, %c0_197] : memref<32x8x64xf32, #tpu.memory_space<vmem>>, vector<1x8x64xf32>
    %613 = vector.shape_cast %612 : vector<1x8x64xf32> to vector<8x64xf32>
    %614 = vector.shape_cast %611 : vector<8x64xf32> to vector<1x8x64xf32>
    tpu.vector_store %arg23[%c1_195, %c0_196, %c0_197], %614 {strides = array<i32>} : memref<32x8x64xf32, #tpu.memory_space<vmem>>, vector<1x8x64xf32>,
    %615 = vector.extract_strided_slice %590 {offsets = [2, 0, 0], sizes = [1, 8, 64], strides = [1, 1, 1]} : vector<32x8x64xf32> to vector<1x8x64xf32>
    %616 = vector.shape_cast %615 : vector<1x8x64xf32> to vector<8x64xf32>
    %617 = arith.mulf %616, %611 : vector<8x64xf32>
    %618 = vector.extract_strided_slice %595 {offsets = [2, 0, 0], sizes = [1, 8, 64], strides = [1, 1, 1]} : vector<32x8x64xf32> to vector<1x8x64xf32>
    %619 = vector.shape_cast %618 : vector<1x8x64xf32> to vector<8x64xf32>
    %620 = arith.addf %617, %619 : vector<8x64xf32>
    %c2_198 = arith.constant 2 : index
    %c0_199 = arith.constant 0 : index
    %c0_200 = arith.constant 0 : index
    %621 = vector.load %arg23[%c2_198, %c0_199, %c0_200] : memref<32x8x64xf32, #tpu.memory_space<vmem>>, vector<1x8x64xf32>
    %622 = vector.shape_cast %621 : vector<1x8x64xf32> to vector<8x64xf32>
    %623 = vector.shape_cast %620 : vector<8x64xf32> to vector<1x8x64xf32>
    tpu.vector_store %arg23[%c2_198, %c0_199, %c0_200], %623 {strides = array<i32>} : memref<32x8x64xf32, #tpu.memory_space<vmem>>, vector<1x8x64xf32>,
    %624 = vector.extract_strided_slice %590 {offsets = [3, 0, 0], sizes = [1, 8, 64], strides = [1, 1, 1]} : vector<32x8x64xf32> to vector<1x8x64xf32>
    %625 = vector.shape_cast %624 : vector<1x8x64xf32> to vector<8x64xf32>
    %626 = arith.mulf %625, %620 : vector<8x64xf32>
    %627 = vector.extract_strided_slice %595 {offsets = [3, 0, 0], sizes = [1, 8, 64], strides = [1, 1, 1]} : vector<32x8x64xf32> to vector<1x8x64xf32>
    %628 = vector.shape_cast %627 : vector<1x8x64xf32> to vector<8x64xf32>
    %629 = arith.addf %626, %628 : vector<8x64xf32>
    %c3_201 = arith.constant 3 : index
    %c0_202 = arith.constant 0 : index
    %c0_203 = arith.constant 0 : index
    %630 = vector.load %arg23[%c3_201, %c0_202, %c0_203] : memref<32x8x64xf32, #tpu.memory_space<vmem>>, vector<1x8x64xf32>
    %631 = vector.shape_cast %630 : vector<1x8x64xf32> to vector<8x64xf32>
    %632 = vector.shape_cast %629 : vector<8x64xf32> to vector<1x8x64xf32>
    tpu.vector_store %arg23[%c3_201, %c0_202, %c0_203], %632 {strides = array<i32>} : memref<32x8x64xf32, #tpu.memory_space<vmem>>, vector<1x8x64xf32>,
    %633 = vector.extract_strided_slice %590 {offsets = [4, 0, 0], sizes = [1, 8, 64], strides = [1, 1, 1]} : vector<32x8x64xf32> to vector<1x8x64xf32>
    %634 = vector.shape_cast %633 : vector<1x8x64xf32> to vector<8x64xf32>
    %635 = arith.mulf %634, %629 : vector<8x64xf32>
    %636 = vector.extract_strided_slice %595 {offsets = [4, 0, 0], sizes = [1, 8, 64], strides = [1, 1, 1]} : vector<32x8x64xf32> to vector<1x8x64xf32>
    %637 = vector.shape_cast %636 : vector<1x8x64xf32> to vector<8x64xf32>
    %638 = arith.addf %635, %637 : vector<8x64xf32>
    %c4_204 = arith.constant 4 : index
    %c0_205 = arith.constant 0 : index
    %c0_206 = arith.constant 0 : index
    %639 = vector.load %arg23[%c4_204, %c0_205, %c0_206] : memref<32x8x64xf32, #tpu.memory_space<vmem>>, vector<1x8x64xf32>
    %640 = vector.shape_cast %639 : vector<1x8x64xf32> to vector<8x64xf32>
    %641 = vector.shape_cast %638 : vector<8x64xf32> to vector<1x8x64xf32>
    tpu.vector_store %arg23[%c4_204, %c0_205, %c0_206], %641 {strides = array<i32>} : memref<32x8x64xf32, #tpu.memory_space<vmem>>, vector<1x8x64xf32>,
    %642 = vector.extract_strided_slice %590 {offsets = [5, 0, 0], sizes = [1, 8, 64], strides = [1, 1, 1]} : vector<32x8x64xf32> to vector<1x8x64xf32>
    %643 = vector.shape_cast %642 : vector<1x8x64xf32> to vector<8x64xf32>
    %644 = arith.mulf %643, %638 : vector<8x64xf32>
    %645 = vector.extract_strided_slice %595 {offsets = [5, 0, 0], sizes = [1, 8, 64], strides = [1, 1, 1]} : vector<32x8x64xf32> to vector<1x8x64xf32>
    %646 = vector.shape_cast %645 : vector<1x8x64xf32> to vector<8x64xf32>
    %647 = arith.addf %644, %646 : vector<8x64xf32>
    %c5_207 = arith.constant 5 : index
    %c0_208 = arith.constant 0 : index
    %c0_209 = arith.constant 0 : index
    %648 = vector.load %arg23[%c5_207, %c0_208, %c0_209] : memref<32x8x64xf32, #tpu.memory_space<vmem>>, vector<1x8x64xf32>
    %649 = vector.shape_cast %648 : vector<1x8x64xf32> to vector<8x64xf32>
    %650 = vector.shape_cast %647 : vector<8x64xf32> to vector<1x8x64xf32>
    tpu.vector_store %arg23[%c5_207, %c0_208, %c0_209], %650 {strides = array<i32>} : memref<32x8x64xf32, #tpu.memory_space<vmem>>, vector<1x8x64xf32>,
    %651 = vector.extract_strided_slice %590 {offsets = [6, 0, 0], sizes = [1, 8, 64], strides = [1, 1, 1]} : vector<32x8x64xf32> to vector<1x8x64xf32>
    %652 = vector.shape_cast %651 : vector<1x8x64xf32> to vector<8x64xf32>
    %653 = arith.mulf %652, %647 : vector<8x64xf32>
    %654 = vector.extract_strided_slice %595 {offsets = [6, 0, 0], sizes = [1, 8, 64], strides = [1, 1, 1]} : vector<32x8x64xf32> to vector<1x8x64xf32>
    %655 = vector.shape_cast %654 : vector<1x8x64xf32> to vector<8x64xf32>
    %656 = arith.addf %653, %655 : vector<8x64xf32>
    %c6_210 = arith.constant 6 : index
    %c0_211 = arith.constant 0 : index
    %c0_212 = arith.constant 0 : index
    %657 = vector.load %arg23[%c6_210, %c0_211, %c0_212] : memref<32x8x64xf32, #tpu.memory_space<vmem>>, vector<1x8x64xf32>
    %658 = vector.shape_cast %657 : vector<1x8x64xf32> to vector<8x64xf32>
    %659 = vector.shape_cast %656 : vector<8x64xf32> to vector<1x8x64xf32>
    tpu.vector_store %arg23[%c6_210, %c0_211, %c0_212], %659 {strides = array<i32>} : memref<32x8x64xf32, #tpu.memory_space<vmem>>, vector<1x8x64xf32>,
    %660 = vector.extract_strided_slice %590 {offsets = [7, 0, 0], sizes = [1, 8, 64], strides = [1, 1, 1]} : vector<32x8x64xf32> to vector<1x8x64xf32>
    %661 = vector.shape_cast %660 : vector<1x8x64xf32> to vector<8x64xf32>
    %662 = arith.mulf %661, %656 : vector<8x64xf32>
    %663 = vector.extract_strided_slice %595 {offsets = [7, 0, 0], sizes = [1, 8, 64], strides = [1, 1, 1]} : vector<32x8x64xf32> to vector<1x8x64xf32>
    %664 = vector.shape_cast %663 : vector<1x8x64xf32> to vector<8x64xf32>
    %665 = arith.addf %662, %664 : vector<8x64xf32>
    %c7_213 = arith.constant 7 : index
    %c0_214 = arith.constant 0 : index
    %c0_215 = arith.constant 0 : index
    %666 = vector.load %arg23[%c7_213, %c0_214, %c0_215] : memref<32x8x64xf32, #tpu.memory_space<vmem>>, vector<1x8x64xf32>
    %667 = vector.shape_cast %666 : vector<1x8x64xf32> to vector<8x64xf32>
    %668 = vector.shape_cast %665 : vector<8x64xf32> to vector<1x8x64xf32>
    tpu.vector_store %arg23[%c7_213, %c0_214, %c0_215], %668 {strides = array<i32>} : memref<32x8x64xf32, #tpu.memory_space<vmem>>, vector<1x8x64xf32>,
    %669 = vector.extract_strided_slice %590 {offsets = [8, 0, 0], sizes = [1, 8, 64], strides = [1, 1, 1]} : vector<32x8x64xf32> to vector<1x8x64xf32>
    %670 = vector.shape_cast %669 : vector<1x8x64xf32> to vector<8x64xf32>
    %671 = arith.mulf %670, %665 : vector<8x64xf32>
    %672 = vector.extract_strided_slice %595 {offsets = [8, 0, 0], sizes = [1, 8, 64], strides = [1, 1, 1]} : vector<32x8x64xf32> to vector<1x8x64xf32>
    %673 = vector.shape_cast %672 : vector<1x8x64xf32> to vector<8x64xf32>
    %674 = arith.addf %671, %673 : vector<8x64xf32>
    %c8_216 = arith.constant 8 : index
    %c0_217 = arith.constant 0 : index
    %c0_218 = arith.constant 0 : index
    %675 = vector.load %arg23[%c8_216, %c0_217, %c0_218] : memref<32x8x64xf32, #tpu.memory_space<vmem>>, vector<1x8x64xf32>
    %676 = vector.shape_cast %675 : vector<1x8x64xf32> to vector<8x64xf32>
    %677 = vector.shape_cast %674 : vector<8x64xf32> to vector<1x8x64xf32>
    tpu.vector_store %arg23[%c8_216, %c0_217, %c0_218], %677 {strides = array<i32>} : memref<32x8x64xf32, #tpu.memory_space<vmem>>, vector<1x8x64xf32>,
    %678 = vector.extract_strided_slice %590 {offsets = [9, 0, 0], sizes = [1, 8, 64], strides = [1, 1, 1]} : vector<32x8x64xf32> to vector<1x8x64xf32>
    %679 = vector.shape_cast %678 : vector<1x8x64xf32> to vector<8x64xf32>
    %680 = arith.mulf %679, %674 : vector<8x64xf32>
    %681 = vector.extract_strided_slice %595 {offsets = [9, 0, 0], sizes = [1, 8, 64], strides = [1, 1, 1]} : vector<32x8x64xf32> to vector<1x8x64xf32>
    %682 = vector.shape_cast %681 : vector<1x8x64xf32> to vector<8x64xf32>
    %683 = arith.addf %680, %682 : vector<8x64xf32>
    %c9_219 = arith.constant 9 : index
    %c0_220 = arith.constant 0 : index
    %c0_221 = arith.constant 0 : index
    %684 = vector.load %arg23[%c9_219, %c0_220, %c0_221] : memref<32x8x64xf32, #tpu.memory_space<vmem>>, vector<1x8x64xf32>
    %685 = vector.shape_cast %684 : vector<1x8x64xf32> to vector<8x64xf32>
    %686 = vector.shape_cast %683 : vector<8x64xf32> to vector<1x8x64xf32>
    tpu.vector_store %arg23[%c9_219, %c0_220, %c0_221], %686 {strides = array<i32>} : memref<32x8x64xf32, #tpu.memory_space<vmem>>, vector<1x8x64xf32>,
    %687 = vector.extract_strided_slice %590 {offsets = [10, 0, 0], sizes = [1, 8, 64], strides = [1, 1, 1]} : vector<32x8x64xf32> to vector<1x8x64xf32>
    %688 = vector.shape_cast %687 : vector<1x8x64xf32> to vector<8x64xf32>
    %689 = arith.mulf %688, %683 : vector<8x64xf32>
    %690 = vector.extract_strided_slice %595 {offsets = [10, 0, 0], sizes = [1, 8, 64], strides = [1, 1, 1]} : vector<32x8x64xf32> to vector<1x8x64xf32>
    %691 = vector.shape_cast %690 : vector<1x8x64xf32> to vector<8x64xf32>
    %692 = arith.addf %689, %691 : vector<8x64xf32>
    %c10_222 = arith.constant 10 : index
    %c0_223 = arith.constant 0 : index
    %c0_224 = arith.constant 0 : index
    %693 = vector.load %arg23[%c10_222, %c0_223, %c0_224] : memref<32x8x64xf32, #tpu.memory_space<vmem>>, vector<1x8x64xf32>
    %694 = vector.shape_cast %693 : vector<1x8x64xf32> to vector<8x64xf32>
    %695 = vector.shape_cast %692 : vector<8x64xf32> to vector<1x8x64xf32>
    tpu.vector_store %arg23[%c10_222, %c0_223, %c0_224], %695 {strides = array<i32>} : memref<32x8x64xf32, #tpu.memory_space<vmem>>, vector<1x8x64xf32>,
    %696 = vector.extract_strided_slice %590 {offsets = [11, 0, 0], sizes = [1, 8, 64], strides = [1, 1, 1]} : vector<32x8x64xf32> to vector<1x8x64xf32>
    %697 = vector.shape_cast %696 : vector<1x8x64xf32> to vector<8x64xf32>
    %698 = arith.mulf %697, %692 : vector<8x64xf32>
    %699 = vector.extract_strided_slice %595 {offsets = [11, 0, 0], sizes = [1, 8, 64], strides = [1, 1, 1]} : vector<32x8x64xf32> to vector<1x8x64xf32>
    %700 = vector.shape_cast %699 : vector<1x8x64xf32> to vector<8x64xf32>
    %701 = arith.addf %698, %700 : vector<8x64xf32>
    %c11_225 = arith.constant 11 : index
    %c0_226 = arith.constant 0 : index
    %c0_227 = arith.constant 0 : index
    %702 = vector.load %arg23[%c11_225, %c0_226, %c0_227] : memref<32x8x64xf32, #tpu.memory_space<vmem>>, vector<1x8x64xf32>
    %703 = vector.shape_cast %702 : vector<1x8x64xf32> to vector<8x64xf32>
    %704 = vector.shape_cast %701 : vector<8x64xf32> to vector<1x8x64xf32>
    tpu.vector_store %arg23[%c11_225, %c0_226, %c0_227], %704 {strides = array<i32>} : memref<32x8x64xf32, #tpu.memory_space<vmem>>, vector<1x8x64xf32>,
    %705 = vector.extract_strided_slice %590 {offsets = [12, 0, 0], sizes = [1, 8, 64], strides = [1, 1, 1]} : vector<32x8x64xf32> to vector<1x8x64xf32>
    %706 = vector.shape_cast %705 : vector<1x8x64xf32> to vector<8x64xf32>
    %707 = arith.mulf %706, %701 : vector<8x64xf32>
    %708 = vector.extract_strided_slice %595 {offsets = [12, 0, 0], sizes = [1, 8, 64], strides = [1, 1, 1]} : vector<32x8x64xf32> to vector<1x8x64xf32>
    %709 = vector.shape_cast %708 : vector<1x8x64xf32> to vector<8x64xf32>
    %710 = arith.addf %707, %709 : vector<8x64xf32>
    %c12_228 = arith.constant 12 : index
    %c0_229 = arith.constant 0 : index
    %c0_230 = arith.constant 0 : index
    %711 = vector.load %arg23[%c12_228, %c0_229, %c0_230] : memref<32x8x64xf32, #tpu.memory_space<vmem>>, vector<1x8x64xf32>
    %712 = vector.shape_cast %711 : vector<1x8x64xf32> to vector<8x64xf32>
    %713 = vector.shape_cast %710 : vector<8x64xf32> to vector<1x8x64xf32>
    tpu.vector_store %arg23[%c12_228, %c0_229, %c0_230], %713 {strides = array<i32>} : memref<32x8x64xf32, #tpu.memory_space<vmem>>, vector<1x8x64xf32>,
    %714 = vector.extract_strided_slice %590 {offsets = [13, 0, 0], sizes = [1, 8, 64], strides = [1, 1, 1]} : vector<32x8x64xf32> to vector<1x8x64xf32>
    %715 = vector.shape_cast %714 : vector<1x8x64xf32> to vector<8x64xf32>
    %716 = arith.mulf %715, %710 : vector<8x64xf32>
    %717 = vector.extract_strided_slice %595 {offsets = [13, 0, 0], sizes = [1, 8, 64], strides = [1, 1, 1]} : vector<32x8x64xf32> to vector<1x8x64xf32>
    %718 = vector.shape_cast %717 : vector<1x8x64xf32> to vector<8x64xf32>
    %719 = arith.addf %716, %718 : vector<8x64xf32>
    %c13_231 = arith.constant 13 : index
    %c0_232 = arith.constant 0 : index
    %c0_233 = arith.constant 0 : index
    %720 = vector.load %arg23[%c13_231, %c0_232, %c0_233] : memref<32x8x64xf32, #tpu.memory_space<vmem>>, vector<1x8x64xf32>
    %721 = vector.shape_cast %720 : vector<1x8x64xf32> to vector<8x64xf32>
    %722 = vector.shape_cast %719 : vector<8x64xf32> to vector<1x8x64xf32>
    tpu.vector_store %arg23[%c13_231, %c0_232, %c0_233], %722 {strides = array<i32>} : memref<32x8x64xf32, #tpu.memory_space<vmem>>, vector<1x8x64xf32>,
    %723 = vector.extract_strided_slice %590 {offsets = [14, 0, 0], sizes = [1, 8, 64], strides = [1, 1, 1]} : vector<32x8x64xf32> to vector<1x8x64xf32>
    %724 = vector.shape_cast %723 : vector<1x8x64xf32> to vector<8x64xf32>
    %725 = arith.mulf %724, %719 : vector<8x64xf32>
    %726 = vector.extract_strided_slice %595 {offsets = [14, 0, 0], sizes = [1, 8, 64], strides = [1, 1, 1]} : vector<32x8x64xf32> to vector<1x8x64xf32>
    %727 = vector.shape_cast %726 : vector<1x8x64xf32> to vector<8x64xf32>
    %728 = arith.addf %725, %727 : vector<8x64xf32>
    %c14_234 = arith.constant 14 : index
    %c0_235 = arith.constant 0 : index
    %c0_236 = arith.constant 0 : index
    %729 = vector.load %arg23[%c14_234, %c0_235, %c0_236] : memref<32x8x64xf32, #tpu.memory_space<vmem>>, vector<1x8x64xf32>
    %730 = vector.shape_cast %729 : vector<1x8x64xf32> to vector<8x64xf32>
    %731 = vector.shape_cast %728 : vector<8x64xf32> to vector<1x8x64xf32>
    tpu.vector_store %arg23[%c14_234, %c0_235, %c0_236], %731 {strides = array<i32>} : memref<32x8x64xf32, #tpu.memory_space<vmem>>, vector<1x8x64xf32>,
    %732 = vector.extract_strided_slice %590 {offsets = [15, 0, 0], sizes = [1, 8, 64], strides = [1, 1, 1]} : vector<32x8x64xf32> to vector<1x8x64xf32>
    %733 = vector.shape_cast %732 : vector<1x8x64xf32> to vector<8x64xf32>
    %734 = arith.mulf %733, %728 : vector<8x64xf32>
    %735 = vector.extract_strided_slice %595 {offsets = [15, 0, 0], sizes = [1, 8, 64], strides = [1, 1, 1]} : vector<32x8x64xf32> to vector<1x8x64xf32>
    %736 = vector.shape_cast %735 : vector<1x8x64xf32> to vector<8x64xf32>
    %737 = arith.addf %734, %736 : vector<8x64xf32>
    %c15_237 = arith.constant 15 : index
    %c0_238 = arith.constant 0 : index
    %c0_239 = arith.constant 0 : index
    %738 = vector.load %arg23[%c15_237, %c0_238, %c0_239] : memref<32x8x64xf32, #tpu.memory_space<vmem>>, vector<1x8x64xf32>
    %739 = vector.shape_cast %738 : vector<1x8x64xf32> to vector<8x64xf32>
    %740 = vector.shape_cast %737 : vector<8x64xf32> to vector<1x8x64xf32>
    tpu.vector_store %arg23[%c15_237, %c0_238, %c0_239], %740 {strides = array<i32>} : memref<32x8x64xf32, #tpu.memory_space<vmem>>, vector<1x8x64xf32>,
    %cst_240 = arith.constant 0.000000e+00 : f32
    %741 = vector.broadcast %cst_240 : f32 to vector<8x64xf32>
    %742 = vector.extract_strided_slice %590 {offsets = [16, 0, 0], sizes = [1, 8, 64], strides = [1, 1, 1]} : vector<32x8x64xf32> to vector<1x8x64xf32>
    %743 = vector.shape_cast %742 : vector<1x8x64xf32> to vector<8x64xf32>
    %744 = arith.mulf %743, %741 : vector<8x64xf32>
    %745 = vector.extract_strided_slice %595 {offsets = [16, 0, 0], sizes = [1, 8, 64], strides = [1, 1, 1]} : vector<32x8x64xf32> to vector<1x8x64xf32>
    %746 = vector.shape_cast %745 : vector<1x8x64xf32> to vector<8x64xf32>
    %747 = arith.addf %744, %746 : vector<8x64xf32>
    %c16_241 = arith.constant 16 : index
    %c0_242 = arith.constant 0 : index
    %c0_243 = arith.constant 0 : index
    %748 = vector.load %arg23[%c16_241, %c0_242, %c0_243] : memref<32x8x64xf32, #tpu.memory_space<vmem>>, vector<1x8x64xf32>
    %749 = vector.shape_cast %748 : vector<1x8x64xf32> to vector<8x64xf32>
    %750 = vector.shape_cast %747 : vector<8x64xf32> to vector<1x8x64xf32>
    tpu.vector_store %arg23[%c16_241, %c0_242, %c0_243], %750 {strides = array<i32>} : memref<32x8x64xf32, #tpu.memory_space<vmem>>, vector<1x8x64xf32>,
    %751 = vector.extract_strided_slice %590 {offsets = [17, 0, 0], sizes = [1, 8, 64], strides = [1, 1, 1]} : vector<32x8x64xf32> to vector<1x8x64xf32>
    %752 = vector.shape_cast %751 : vector<1x8x64xf32> to vector<8x64xf32>
    %753 = arith.mulf %752, %747 : vector<8x64xf32>
    %754 = vector.extract_strided_slice %595 {offsets = [17, 0, 0], sizes = [1, 8, 64], strides = [1, 1, 1]} : vector<32x8x64xf32> to vector<1x8x64xf32>
    %755 = vector.shape_cast %754 : vector<1x8x64xf32> to vector<8x64xf32>
    %756 = arith.addf %753, %755 : vector<8x64xf32>
    %c17_244 = arith.constant 17 : index
    %c0_245 = arith.constant 0 : index
    %c0_246 = arith.constant 0 : index
    %757 = vector.load %arg23[%c17_244, %c0_245, %c0_246] : memref<32x8x64xf32, #tpu.memory_space<vmem>>, vector<1x8x64xf32>
    %758 = vector.shape_cast %757 : vector<1x8x64xf32> to vector<8x64xf32>
    %759 = vector.shape_cast %756 : vector<8x64xf32> to vector<1x8x64xf32>
    tpu.vector_store %arg23[%c17_244, %c0_245, %c0_246], %759 {strides = array<i32>} : memref<32x8x64xf32, #tpu.memory_space<vmem>>, vector<1x8x64xf32>,
    %760 = vector.extract_strided_slice %590 {offsets = [18, 0, 0], sizes = [1, 8, 64], strides = [1, 1, 1]} : vector<32x8x64xf32> to vector<1x8x64xf32>
    %761 = vector.shape_cast %760 : vector<1x8x64xf32> to vector<8x64xf32>
    %762 = arith.mulf %761, %756 : vector<8x64xf32>
    %763 = vector.extract_strided_slice %595 {offsets = [18, 0, 0], sizes = [1, 8, 64], strides = [1, 1, 1]} : vector<32x8x64xf32> to vector<1x8x64xf32>
    %764 = vector.shape_cast %763 : vector<1x8x64xf32> to vector<8x64xf32>
    %765 = arith.addf %762, %764 : vector<8x64xf32>
    %c18_247 = arith.constant 18 : index
    %c0_248 = arith.constant 0 : index
    %c0_249 = arith.constant 0 : index
    %766 = vector.load %arg23[%c18_247, %c0_248, %c0_249] : memref<32x8x64xf32, #tpu.memory_space<vmem>>, vector<1x8x64xf32>
    %767 = vector.shape_cast %766 : vector<1x8x64xf32> to vector<8x64xf32>
    %768 = vector.shape_cast %765 : vector<8x64xf32> to vector<1x8x64xf32>
    tpu.vector_store %arg23[%c18_247, %c0_248, %c0_249], %768 {strides = array<i32>} : memref<32x8x64xf32, #tpu.memory_space<vmem>>, vector<1x8x64xf32>,
    %769 = vector.extract_strided_slice %590 {offsets = [19, 0, 0], sizes = [1, 8, 64], strides = [1, 1, 1]} : vector<32x8x64xf32> to vector<1x8x64xf32>
    %770 = vector.shape_cast %769 : vector<1x8x64xf32> to vector<8x64xf32>
    %771 = arith.mulf %770, %765 : vector<8x64xf32>
    %772 = vector.extract_strided_slice %595 {offsets = [19, 0, 0], sizes = [1, 8, 64], strides = [1, 1, 1]} : vector<32x8x64xf32> to vector<1x8x64xf32>
    %773 = vector.shape_cast %772 : vector<1x8x64xf32> to vector<8x64xf32>
    %774 = arith.addf %771, %773 : vector<8x64xf32>
    %c19_250 = arith.constant 19 : index
    %c0_251 = arith.constant 0 : index
    %c0_252 = arith.constant 0 : index
    %775 = vector.load %arg23[%c19_250, %c0_251, %c0_252] : memref<32x8x64xf32, #tpu.memory_space<vmem>>, vector<1x8x64xf32>
    %776 = vector.shape_cast %775 : vector<1x8x64xf32> to vector<8x64xf32>
    %777 = vector.shape_cast %774 : vector<8x64xf32> to vector<1x8x64xf32>
    tpu.vector_store %arg23[%c19_250, %c0_251, %c0_252], %777 {strides = array<i32>} : memref<32x8x64xf32, #tpu.memory_space<vmem>>, vector<1x8x64xf32>,
    %778 = vector.extract_strided_slice %590 {offsets = [20, 0, 0], sizes = [1, 8, 64], strides = [1, 1, 1]} : vector<32x8x64xf32> to vector<1x8x64xf32>
    %779 = vector.shape_cast %778 : vector<1x8x64xf32> to vector<8x64xf32>
    %780 = arith.mulf %779, %774 : vector<8x64xf32>
    %781 = vector.extract_strided_slice %595 {offsets = [20, 0, 0], sizes = [1, 8, 64], strides = [1, 1, 1]} : vector<32x8x64xf32> to vector<1x8x64xf32>
    %782 = vector.shape_cast %781 : vector<1x8x64xf32> to vector<8x64xf32>
    %783 = arith.addf %780, %782 : vector<8x64xf32>
    %c20_253 = arith.constant 20 : index
    %c0_254 = arith.constant 0 : index
    %c0_255 = arith.constant 0 : index
    %784 = vector.load %arg23[%c20_253, %c0_254, %c0_255] : memref<32x8x64xf32, #tpu.memory_space<vmem>>, vector<1x8x64xf32>
    %785 = vector.shape_cast %784 : vector<1x8x64xf32> to vector<8x64xf32>
    %786 = vector.shape_cast %783 : vector<8x64xf32> to vector<1x8x64xf32>
    tpu.vector_store %arg23[%c20_253, %c0_254, %c0_255], %786 {strides = array<i32>} : memref<32x8x64xf32, #tpu.memory_space<vmem>>, vector<1x8x64xf32>,
    %787 = vector.extract_strided_slice %590 {offsets = [21, 0, 0], sizes = [1, 8, 64], strides = [1, 1, 1]} : vector<32x8x64xf32> to vector<1x8x64xf32>
    %788 = vector.shape_cast %787 : vector<1x8x64xf32> to vector<8x64xf32>
    %789 = arith.mulf %788, %783 : vector<8x64xf32>
    %790 = vector.extract_strided_slice %595 {offsets = [21, 0, 0], sizes = [1, 8, 64], strides = [1, 1, 1]} : vector<32x8x64xf32> to vector<1x8x64xf32>
    %791 = vector.shape_cast %790 : vector<1x8x64xf32> to vector<8x64xf32>
    %792 = arith.addf %789, %791 : vector<8x64xf32>
    %c21_256 = arith.constant 21 : index
    %c0_257 = arith.constant 0 : index
    %c0_258 = arith.constant 0 : index
    %793 = vector.load %arg23[%c21_256, %c0_257, %c0_258] : memref<32x8x64xf32, #tpu.memory_space<vmem>>, vector<1x8x64xf32>
    %794 = vector.shape_cast %793 : vector<1x8x64xf32> to vector<8x64xf32>
    %795 = vector.shape_cast %792 : vector<8x64xf32> to vector<1x8x64xf32>
    tpu.vector_store %arg23[%c21_256, %c0_257, %c0_258], %795 {strides = array<i32>} : memref<32x8x64xf32, #tpu.memory_space<vmem>>, vector<1x8x64xf32>,
    %796 = vector.extract_strided_slice %590 {offsets = [22, 0, 0], sizes = [1, 8, 64], strides = [1, 1, 1]} : vector<32x8x64xf32> to vector<1x8x64xf32>
    %797 = vector.shape_cast %796 : vector<1x8x64xf32> to vector<8x64xf32>
    %798 = arith.mulf %797, %792 : vector<8x64xf32>
    %799 = vector.extract_strided_slice %595 {offsets = [22, 0, 0], sizes = [1, 8, 64], strides = [1, 1, 1]} : vector<32x8x64xf32> to vector<1x8x64xf32>
    %800 = vector.shape_cast %799 : vector<1x8x64xf32> to vector<8x64xf32>
    %801 = arith.addf %798, %800 : vector<8x64xf32>
    %c22_259 = arith.constant 22 : index
    %c0_260 = arith.constant 0 : index
    %c0_261 = arith.constant 0 : index
    %802 = vector.load %arg23[%c22_259, %c0_260, %c0_261] : memref<32x8x64xf32, #tpu.memory_space<vmem>>, vector<1x8x64xf32>
    %803 = vector.shape_cast %802 : vector<1x8x64xf32> to vector<8x64xf32>
    %804 = vector.shape_cast %801 : vector<8x64xf32> to vector<1x8x64xf32>
    tpu.vector_store %arg23[%c22_259, %c0_260, %c0_261], %804 {strides = array<i32>} : memref<32x8x64xf32, #tpu.memory_space<vmem>>, vector<1x8x64xf32>,
    %805 = vector.extract_strided_slice %590 {offsets = [23, 0, 0], sizes = [1, 8, 64], strides = [1, 1, 1]} : vector<32x8x64xf32> to vector<1x8x64xf32>
    %806 = vector.shape_cast %805 : vector<1x8x64xf32> to vector<8x64xf32>
    %807 = arith.mulf %806, %801 : vector<8x64xf32>
    %808 = vector.extract_strided_slice %595 {offsets = [23, 0, 0], sizes = [1, 8, 64], strides = [1, 1, 1]} : vector<32x8x64xf32> to vector<1x8x64xf32>
    %809 = vector.shape_cast %808 : vector<1x8x64xf32> to vector<8x64xf32>
    %810 = arith.addf %807, %809 : vector<8x64xf32>
    %c23_262 = arith.constant 23 : index
    %c0_263 = arith.constant 0 : index
    %c0_264 = arith.constant 0 : index
    %811 = vector.load %arg23[%c23_262, %c0_263, %c0_264] : memref<32x8x64xf32, #tpu.memory_space<vmem>>, vector<1x8x64xf32>
    %812 = vector.shape_cast %811 : vector<1x8x64xf32> to vector<8x64xf32>
    %813 = vector.shape_cast %810 : vector<8x64xf32> to vector<1x8x64xf32>
    tpu.vector_store %arg23[%c23_262, %c0_263, %c0_264], %813 {strides = array<i32>} : memref<32x8x64xf32, #tpu.memory_space<vmem>>, vector<1x8x64xf32>,
    %814 = vector.extract_strided_slice %590 {offsets = [24, 0, 0], sizes = [1, 8, 64], strides = [1, 1, 1]} : vector<32x8x64xf32> to vector<1x8x64xf32>
    %815 = vector.shape_cast %814 : vector<1x8x64xf32> to vector<8x64xf32>
    %816 = arith.mulf %815, %810 : vector<8x64xf32>
    %817 = vector.extract_strided_slice %595 {offsets = [24, 0, 0], sizes = [1, 8, 64], strides = [1, 1, 1]} : vector<32x8x64xf32> to vector<1x8x64xf32>
    %818 = vector.shape_cast %817 : vector<1x8x64xf32> to vector<8x64xf32>
    %819 = arith.addf %816, %818 : vector<8x64xf32>
    %c24_265 = arith.constant 24 : index
    %c0_266 = arith.constant 0 : index
    %c0_267 = arith.constant 0 : index
    %820 = vector.load %arg23[%c24_265, %c0_266, %c0_267] : memref<32x8x64xf32, #tpu.memory_space<vmem>>, vector<1x8x64xf32>
    %821 = vector.shape_cast %820 : vector<1x8x64xf32> to vector<8x64xf32>
    %822 = vector.shape_cast %819 : vector<8x64xf32> to vector<1x8x64xf32>
    tpu.vector_store %arg23[%c24_265, %c0_266, %c0_267], %822 {strides = array<i32>} : memref<32x8x64xf32, #tpu.memory_space<vmem>>, vector<1x8x64xf32>,
    %823 = vector.extract_strided_slice %590 {offsets = [25, 0, 0], sizes = [1, 8, 64], strides = [1, 1, 1]} : vector<32x8x64xf32> to vector<1x8x64xf32>
    %824 = vector.shape_cast %823 : vector<1x8x64xf32> to vector<8x64xf32>
    %825 = arith.mulf %824, %819 : vector<8x64xf32>
    %826 = vector.extract_strided_slice %595 {offsets = [25, 0, 0], sizes = [1, 8, 64], strides = [1, 1, 1]} : vector<32x8x64xf32> to vector<1x8x64xf32>
    %827 = vector.shape_cast %826 : vector<1x8x64xf32> to vector<8x64xf32>
    %828 = arith.addf %825, %827 : vector<8x64xf32>
    %c25_268 = arith.constant 25 : index
    %c0_269 = arith.constant 0 : index
    %c0_270 = arith.constant 0 : index
    %829 = vector.load %arg23[%c25_268, %c0_269, %c0_270] : memref<32x8x64xf32, #tpu.memory_space<vmem>>, vector<1x8x64xf32>
    %830 = vector.shape_cast %829 : vector<1x8x64xf32> to vector<8x64xf32>
    %831 = vector.shape_cast %828 : vector<8x64xf32> to vector<1x8x64xf32>
    tpu.vector_store %arg23[%c25_268, %c0_269, %c0_270], %831 {strides = array<i32>} : memref<32x8x64xf32, #tpu.memory_space<vmem>>, vector<1x8x64xf32>,
    %832 = vector.extract_strided_slice %590 {offsets = [26, 0, 0], sizes = [1, 8, 64], strides = [1, 1, 1]} : vector<32x8x64xf32> to vector<1x8x64xf32>
    %833 = vector.shape_cast %832 : vector<1x8x64xf32> to vector<8x64xf32>
    %834 = arith.mulf %833, %828 : vector<8x64xf32>
    %835 = vector.extract_strided_slice %595 {offsets = [26, 0, 0], sizes = [1, 8, 64], strides = [1, 1, 1]} : vector<32x8x64xf32> to vector<1x8x64xf32>
    %836 = vector.shape_cast %835 : vector<1x8x64xf32> to vector<8x64xf32>
    %837 = arith.addf %834, %836 : vector<8x64xf32>
    %c26_271 = arith.constant 26 : index
    %c0_272 = arith.constant 0 : index
    %c0_273 = arith.constant 0 : index
    %838 = vector.load %arg23[%c26_271, %c0_272, %c0_273] : memref<32x8x64xf32, #tpu.memory_space<vmem>>, vector<1x8x64xf32>
    %839 = vector.shape_cast %838 : vector<1x8x64xf32> to vector<8x64xf32>
    %840 = vector.shape_cast %837 : vector<8x64xf32> to vector<1x8x64xf32>
    tpu.vector_store %arg23[%c26_271, %c0_272, %c0_273], %840 {strides = array<i32>} : memref<32x8x64xf32, #tpu.memory_space<vmem>>, vector<1x8x64xf32>,
    %841 = vector.extract_strided_slice %590 {offsets = [27, 0, 0], sizes = [1, 8, 64], strides = [1, 1, 1]} : vector<32x8x64xf32> to vector<1x8x64xf32>
    %842 = vector.shape_cast %841 : vector<1x8x64xf32> to vector<8x64xf32>
    %843 = arith.mulf %842, %837 : vector<8x64xf32>
    %844 = vector.extract_strided_slice %595 {offsets = [27, 0, 0], sizes = [1, 8, 64], strides = [1, 1, 1]} : vector<32x8x64xf32> to vector<1x8x64xf32>
    %845 = vector.shape_cast %844 : vector<1x8x64xf32> to vector<8x64xf32>
    %846 = arith.addf %843, %845 : vector<8x64xf32>
    %c27_274 = arith.constant 27 : index
    %c0_275 = arith.constant 0 : index
    %c0_276 = arith.constant 0 : index
    %847 = vector.load %arg23[%c27_274, %c0_275, %c0_276] : memref<32x8x64xf32, #tpu.memory_space<vmem>>, vector<1x8x64xf32>
    %848 = vector.shape_cast %847 : vector<1x8x64xf32> to vector<8x64xf32>
    %849 = vector.shape_cast %846 : vector<8x64xf32> to vector<1x8x64xf32>
    tpu.vector_store %arg23[%c27_274, %c0_275, %c0_276], %849 {strides = array<i32>} : memref<32x8x64xf32, #tpu.memory_space<vmem>>, vector<1x8x64xf32>,
    %850 = vector.extract_strided_slice %590 {offsets = [28, 0, 0], sizes = [1, 8, 64], strides = [1, 1, 1]} : vector<32x8x64xf32> to vector<1x8x64xf32>
    %851 = vector.shape_cast %850 : vector<1x8x64xf32> to vector<8x64xf32>
    %852 = arith.mulf %851, %846 : vector<8x64xf32>
    %853 = vector.extract_strided_slice %595 {offsets = [28, 0, 0], sizes = [1, 8, 64], strides = [1, 1, 1]} : vector<32x8x64xf32> to vector<1x8x64xf32>
    %854 = vector.shape_cast %853 : vector<1x8x64xf32> to vector<8x64xf32>
    %855 = arith.addf %852, %854 : vector<8x64xf32>
    %c28_277 = arith.constant 28 : index
    %c0_278 = arith.constant 0 : index
    %c0_279 = arith.constant 0 : index
    %856 = vector.load %arg23[%c28_277, %c0_278, %c0_279] : memref<32x8x64xf32, #tpu.memory_space<vmem>>, vector<1x8x64xf32>
    %857 = vector.shape_cast %856 : vector<1x8x64xf32> to vector<8x64xf32>
    %858 = vector.shape_cast %855 : vector<8x64xf32> to vector<1x8x64xf32>
    tpu.vector_store %arg23[%c28_277, %c0_278, %c0_279], %858 {strides = array<i32>} : memref<32x8x64xf32, #tpu.memory_space<vmem>>, vector<1x8x64xf32>,
    %859 = vector.extract_strided_slice %590 {offsets = [29, 0, 0], sizes = [1, 8, 64], strides = [1, 1, 1]} : vector<32x8x64xf32> to vector<1x8x64xf32>
    %860 = vector.shape_cast %859 : vector<1x8x64xf32> to vector<8x64xf32>
    %861 = arith.mulf %860, %855 : vector<8x64xf32>
    %862 = vector.extract_strided_slice %595 {offsets = [29, 0, 0], sizes = [1, 8, 64], strides = [1, 1, 1]} : vector<32x8x64xf32> to vector<1x8x64xf32>
    %863 = vector.shape_cast %862 : vector<1x8x64xf32> to vector<8x64xf32>
    %864 = arith.addf %861, %863 : vector<8x64xf32>
    %c29_280 = arith.constant 29 : index
    %c0_281 = arith.constant 0 : index
    %c0_282 = arith.constant 0 : index
    %865 = vector.load %arg23[%c29_280, %c0_281, %c0_282] : memref<32x8x64xf32, #tpu.memory_space<vmem>>, vector<1x8x64xf32>
    %866 = vector.shape_cast %865 : vector<1x8x64xf32> to vector<8x64xf32>
    %867 = vector.shape_cast %864 : vector<8x64xf32> to vector<1x8x64xf32>
    tpu.vector_store %arg23[%c29_280, %c0_281, %c0_282], %867 {strides = array<i32>} : memref<32x8x64xf32, #tpu.memory_space<vmem>>, vector<1x8x64xf32>,
    %868 = vector.extract_strided_slice %590 {offsets = [30, 0, 0], sizes = [1, 8, 64], strides = [1, 1, 1]} : vector<32x8x64xf32> to vector<1x8x64xf32>
    %869 = vector.shape_cast %868 : vector<1x8x64xf32> to vector<8x64xf32>
    %870 = arith.mulf %869, %864 : vector<8x64xf32>
    %871 = vector.extract_strided_slice %595 {offsets = [30, 0, 0], sizes = [1, 8, 64], strides = [1, 1, 1]} : vector<32x8x64xf32> to vector<1x8x64xf32>
    %872 = vector.shape_cast %871 : vector<1x8x64xf32> to vector<8x64xf32>
    %873 = arith.addf %870, %872 : vector<8x64xf32>
    %c30_283 = arith.constant 30 : index
    %c0_284 = arith.constant 0 : index
    %c0_285 = arith.constant 0 : index
    %874 = vector.load %arg23[%c30_283, %c0_284, %c0_285] : memref<32x8x64xf32, #tpu.memory_space<vmem>>, vector<1x8x64xf32>
    %875 = vector.shape_cast %874 : vector<1x8x64xf32> to vector<8x64xf32>
    %876 = vector.shape_cast %873 : vector<8x64xf32> to vector<1x8x64xf32>
    tpu.vector_store %arg23[%c30_283, %c0_284, %c0_285], %876 {strides = array<i32>} : memref<32x8x64xf32, #tpu.memory_space<vmem>>, vector<1x8x64xf32>,
    %877 = vector.extract_strided_slice %590 {offsets = [31, 0, 0], sizes = [1, 8, 64], strides = [1, 1, 1]} : vector<32x8x64xf32> to vector<1x8x64xf32>
    %878 = vector.shape_cast %877 : vector<1x8x64xf32> to vector<8x64xf32>
    %879 = arith.mulf %878, %873 : vector<8x64xf32>
    %880 = vector.extract_strided_slice %595 {offsets = [31, 0, 0], sizes = [1, 8, 64], strides = [1, 1, 1]} : vector<32x8x64xf32> to vector<1x8x64xf32>
    %881 = vector.shape_cast %880 : vector<1x8x64xf32> to vector<8x64xf32>
    %882 = arith.addf %879, %881 : vector<8x64xf32>
    %c31_286 = arith.constant 31 : index
    %c0_287 = arith.constant 0 : index
    %c0_288 = arith.constant 0 : index
    %883 = vector.load %arg23[%c31_286, %c0_287, %c0_288] : memref<32x8x64xf32, #tpu.memory_space<vmem>>, vector<1x8x64xf32>
    %884 = vector.shape_cast %883 : vector<1x8x64xf32> to vector<8x64xf32>
    %885 = vector.shape_cast %882 : vector<8x64xf32> to vector<1x8x64xf32>
    tpu.vector_store %arg23[%c31_286, %c0_287, %c0_288], %885 {strides = array<i32>} : memref<32x8x64xf32, #tpu.memory_space<vmem>>, vector<1x8x64xf32>,
    %c0_289 = arith.constant 0 : index
    %c0_290 = arith.constant 0 : index
    %c0_291 = arith.constant 0 : index
    %886 = vector.load %arg23[%c0_289, %c0_290, %c0_291] : memref<32x8x64xf32, #tpu.memory_space<vmem>>, vector<32x8x64xf32>
    %887 = vector.shape_cast %581 : vector<32x8xf32> to vector<32x8x1xf32>
    %888 = vector.broadcast %887 : vector<32x8x1xf32> to vector<32x8x64xf32>
    %889 = arith.mulf %886, %888 : vector<32x8x64xf32>
    %cst_292 = arith.constant dense<0.000000e+00> : vector<32x64xf32>
    %890 = vector.multi_reduction <add>, %889, %cst_292 [1] : vector<32x8x64xf32> to vector<32x64xf32>
    %891 = vector.extract_strided_slice %531 {offsets = [2, 0], sizes = [1, 64], strides = [1, 1]} : vector<3x64xf32> to vector<1x64xf32>
    %892 = vector.broadcast %891 : vector<1x64xf32> to vector<32x64xf32>
    %893 = arith.mulf %559, %892 : vector<32x64xf32>
    %894 = arith.addf %890, %893 : vector<32x64xf32>
    %895 = arith.negf %526 : vector<32x64xf32>
    %896 = math.exp %895 : vector<32x64xf32>
    %cst_293 = arith.constant 1.000000e+00 : f32
    %897 = vector.broadcast %cst_293 : f32 to vector<32x64xf32>
    %898 = arith.addf %897, %896 : vector<32x64xf32>
    %899 = arith.divf %897, %898 : vector<32x64xf32>
    %900 = arith.mulf %526, %899 : vector<32x64xf32>
    %901 = arith.mulf %894, %900 : vector<32x64xf32>
    %c1_294 = arith.constant 1 : index
    %c0_295 = arith.constant 0 : index
    %c0_296 = arith.constant 0 : index
    %902 = vector.load %arg13[%c1_294, %c0_295, %c0_296] : memref<2x64x32xf32, #tpu.memory_space<vmem>>, vector<1x64x32xf32>
    %903 = vector.shape_cast %902 : vector<1x64x32xf32> to vector<64x32xf32>
    %cst_297 = arith.constant dense<0.000000e+00> : vector<32x32xf32>
    %904 = tpu.matmul %901, %903, %cst_297 {dimension_numbers = #tpu.dot_dimension_numbers<[1], [0], [0], [1], [0, 0, 1, 1], [], []>} : vector<32x64xf32>, vector<64x32xf32>, vector<32x32xf32> -> vector<32x32xf32>
    %905 = arith.addf %502, %904 : vector<32x32xf32>
    %cst_298 = arith.constant dense<0.000000e+00> : vector<32xf32>
    %906 = vector.multi_reduction <add>, %905, %cst_298 [1] : vector<32x32xf32> to vector<32xf32>
    %907 = vector.shape_cast %906 : vector<32xf32> to vector<32x1xf32>
    %cst_299 = arith.constant 3.200000e+01 : f32
    %908 = vector.broadcast %cst_299 : f32 to vector<32x1xf32>
    %909 = arith.divf %907, %908 : vector<32x1xf32>
    %910 = vector.broadcast %909 : vector<32x1xf32> to vector<32x32xf32>
    %911 = arith.subf %905, %910 : vector<32x32xf32>
    %912 = arith.mulf %911, %911 : vector<32x32xf32>
    %cst_300 = arith.constant dense<0.000000e+00> : vector<32xf32>
    %913 = vector.multi_reduction <add>, %912, %cst_300 [1] : vector<32x32xf32> to vector<32xf32>
    %914 = vector.shape_cast %913 : vector<32xf32> to vector<32x1xf32>
    %cst_301 = arith.constant 3.200000e+01 : f32
    %915 = vector.broadcast %cst_301 : f32 to vector<32x1xf32>
    %916 = arith.divf %914, %915 : vector<32x1xf32>
    %917 = vector.broadcast %909 : vector<32x1xf32> to vector<32x32xf32>
    %918 = arith.subf %905, %917 : vector<32x32xf32>
    %cst_302 = arith.constant 9.99999974E-6 : f32
    %919 = vector.broadcast %cst_302 : f32 to vector<32x1xf32>
    %920 = arith.addf %916, %919 : vector<32x1xf32>
    %921 = math.rsqrt %920 : vector<32x1xf32>
    %922 = vector.broadcast %921 : vector<32x1xf32> to vector<32x32xf32>
    %923 = arith.mulf %918, %922 : vector<32x32xf32>
    %cst_303 = arith.constant dense<0.000000e+00> : vector<64x32xf32>
    %924 = tpu.matmul %58, %923, %cst_303 {dimension_numbers = #tpu.dot_dimension_numbers<[1], [0], [0], [1], [0, 0, 1, 1], [], []>} : vector<64x32xf32>, vector<32x32xf32>, vector<64x32xf32> -> vector<64x32xf32>
    %925 = vector.extract_strided_slice %924 {offsets = [0, 0], sizes = [32, 32], strides = [1, 1]} : vector<64x32xf32> to vector<32x32xf32>
    %926 = vector.extract_strided_slice %924 {offsets = [32, 0], sizes = [32, 32], strides = [1, 1]} : vector<64x32xf32> to vector<32x32xf32>
    %c1_304 = arith.constant 1 : index
    %c0_305 = arith.constant 0 : index
    %c0_306 = arith.constant 0 : index
    %c0_307 = arith.constant 0 : index
    %927 = vector.load %arg14[%c1_304, %c0_305, %c0_306, %c0_307] : memref<2x2x32x32xf32, #tpu.memory_space<vmem>>, vector<1x2x32x32xf32>
    %928 = vector.shape_cast %927 : vector<1x2x32x32xf32> to vector<2x32x32xf32>
    %929 = vector.extract_strided_slice %928 {offsets = [0, 0, 0], sizes = [1, 32, 32], strides = [1, 1, 1]} : vector<2x32x32xf32> to vector<1x32x32xf32>
    %930 = vector.shape_cast %929 : vector<1x32x32xf32> to vector<32x32xf32>
    %931 = arith.mulf %925, %930 : vector<32x32xf32>
    %932 = vector.extract_strided_slice %928 {offsets = [1, 0, 0], sizes = [1, 32, 32], strides = [1, 1, 1]} : vector<2x32x32xf32> to vector<1x32x32xf32>
    %933 = vector.shape_cast %932 : vector<1x32x32xf32> to vector<32x32xf32>
    %934 = arith.mulf %926, %933 : vector<32x32xf32>
    %935 = arith.subf %931, %934 : vector<32x32xf32>
    %936 = vector.extract_strided_slice %928 {offsets = [1, 0, 0], sizes = [1, 32, 32], strides = [1, 1, 1]} : vector<2x32x32xf32> to vector<1x32x32xf32>
    %937 = vector.shape_cast %936 : vector<1x32x32xf32> to vector<32x32xf32>
    %938 = arith.mulf %925, %937 : vector<32x32xf32>
    %939 = vector.extract_strided_slice %928 {offsets = [0, 0, 0], sizes = [1, 32, 32], strides = [1, 1, 1]} : vector<2x32x32xf32> to vector<1x32x32xf32>
    %940 = vector.shape_cast %939 : vector<1x32x32xf32> to vector<32x32xf32>
    %941 = arith.mulf %926, %940 : vector<32x32xf32>
    %942 = arith.addf %938, %941 : vector<32x32xf32>
    %943 = tpu.concatenate %935, %942 in 0 : vector<32x32xf32>, vector<32x32xf32> -> vector<64x32xf32>
    %cst_308 = arith.constant dense<0.000000e+00> : vector<32x32xf32>
    %944 = tpu.matmul %59, %943, %cst_308 {dimension_numbers = #tpu.dot_dimension_numbers<[1], [0], [0], [1], [0, 0, 1, 1], [], []>} : vector<32x64xf32>, vector<64x32xf32>, vector<32x32xf32> -> vector<32x32xf32>
    %945 = arith.addf %905, %944 : vector<32x32xf32>
    %c0_309 = arith.constant 0 : index
    %c0_310 = arith.constant 0 : index
    %946 = vector.load %arg18[%c0_309, %c0_310] : memref<2x32xf32, #tpu.memory_space<vmem>>, vector<2x32xf32>
    %cst_311 = arith.constant dense<0.000000e+00> : vector<2x32xf32>
    %947 = tpu.matmul %946, %945, %cst_311 {dimension_numbers = #tpu.dot_dimension_numbers<[1], [0], [0], [1], [0, 0, 1, 1], [], []>} : vector<2x32xf32>, vector<32x32xf32>, vector<2x32xf32> -> vector<2x32xf32>
    %c0_312 = arith.constant 0 : index
    %c0_313 = arith.constant 0 : index
    %948 = vector.load %arg19[%c0_312, %c0_313] : memref<2x32xf32, #tpu.memory_space<vmem>>, vector<1x32xf32>
    %c1_314 = arith.constant 1 : index
    %c0_315 = arith.constant 0 : index
    %949 = vector.load %arg19[%c1_314, %c0_315] : memref<2x32xf32, #tpu.memory_space<vmem>>, vector<1x32xf32>
    %cst_316 = arith.constant dense<0.000000e+00> : vector<2xf32>
    %950 = vector.multi_reduction <add>, %947, %cst_316 [1] : vector<2x32xf32> to vector<2xf32>
    %951 = vector.shape_cast %950 : vector<2xf32> to vector<2x1xf32>
    %cst_317 = arith.constant 3.200000e+01 : f32
    %952 = vector.broadcast %cst_317 : f32 to vector<2x1xf32>
    %953 = arith.divf %951, %952 : vector<2x1xf32>
    %954 = vector.broadcast %953 : vector<2x1xf32> to vector<2x32xf32>
    %955 = arith.subf %947, %954 : vector<2x32xf32>
    %956 = arith.mulf %955, %955 : vector<2x32xf32>
    %cst_318 = arith.constant dense<0.000000e+00> : vector<2xf32>
    %957 = vector.multi_reduction <add>, %956, %cst_318 [1] : vector<2x32xf32> to vector<2xf32>
    %958 = vector.shape_cast %957 : vector<2xf32> to vector<2x1xf32>
    %cst_319 = arith.constant 3.200000e+01 : f32
    %959 = vector.broadcast %cst_319 : f32 to vector<2x1xf32>
    %960 = arith.divf %958, %959 : vector<2x1xf32>
    %961 = vector.broadcast %953 : vector<2x1xf32> to vector<2x32xf32>
    %962 = arith.subf %947, %961 : vector<2x32xf32>
    %cst_320 = arith.constant 9.99999974E-6 : f32
    %963 = vector.broadcast %cst_320 : f32 to vector<2x1xf32>
    %964 = arith.addf %960, %963 : vector<2x1xf32>
    %965 = math.rsqrt %964 : vector<2x1xf32>
    %966 = vector.broadcast %965 : vector<2x1xf32> to vector<2x32xf32>
    %967 = arith.mulf %962, %966 : vector<2x32xf32>
    %968 = vector.broadcast %948 : vector<1x32xf32> to vector<2x32xf32>
    %969 = arith.mulf %967, %968 : vector<2x32xf32>
    %970 = vector.broadcast %949 : vector<1x32xf32> to vector<2x32xf32>
    %971 = arith.addf %969, %970 : vector<2x32xf32>
    %c0_321 = arith.constant 0 : index
    %c0_322 = arith.constant 0 : index
    %972 = vector.load %arg20[%c0_321, %c0_322] : memref<32x16xf32, #tpu.memory_space<vmem>>, vector<32x16xf32>
    %cst_323 = arith.constant dense<0.000000e+00> : vector<2x16xf32>
    %973 = tpu.matmul %971, %972, %cst_323 {dimension_numbers = #tpu.dot_dimension_numbers<[1], [0], [0], [1], [0, 0, 1, 1], [], []>} : vector<2x32xf32>, vector<32x16xf32>, vector<2x16xf32> -> vector<2x16xf32>
    %c0_324 = arith.constant 0 : index
    %c0_325 = arith.constant 0 : index
    %974 = vector.load %arg21[%c0_324, %c0_325] : memref<1x16xf32, #tpu.memory_space<vmem>>, vector<1x16xf32>
    %975 = vector.broadcast %974 : vector<1x16xf32> to vector<2x16xf32>
    %976 = arith.addf %973, %975 : vector<2x16xf32>
    %c0_326 = arith.constant 0 : index
    %c0_327 = arith.constant 0 : index
    %c0_328 = arith.constant 0 : index
    %977 = vector.load %arg22[%c0_326, %c0_327, %c0_328] : memref<1x2x16xf32, #tpu.memory_space<vmem>>, vector<1x2x16xf32>
    %978 = vector.shape_cast %977 : vector<1x2x16xf32> to vector<2x16xf32>
    %979 = vector.shape_cast %976 : vector<2x16xf32> to vector<1x2x16xf32>
    tpu.vector_store %arg22[%c0_326, %c0_327, %c0_328], %979 {strides = array<i32>} : memref<1x2x16xf32, #tpu.memory_space<vmem>>, vector<1x2x16xf32>,
    return
  }
  func.func @transform_0(%arg0: i32) -> (i32, i32, i32) {
    %c0_i32 = arith.constant 0 : i32
    %c0_i32_0 = arith.constant 0 : i32
    %c0_i32_1 = arith.constant 0 : i32
    return %arg0, %c0_i32, %c0_i32_0 : i32, i32, i32
  }
  func.func @transform_1(%arg0: i32) -> (i32, i32) {
    %c0_i32 = arith.constant 0 : i32
    %c0_i32_0 = arith.constant 0 : i32
    %c0_i32_1 = arith.constant 0 : i32
    return %c0_i32, %c0_i32_0 : i32, i32
  }
  func.func @transform_2(%arg0: i32) -> (i32, i32) {
    %c0_i32 = arith.constant 0 : i32
    %c0_i32_0 = arith.constant 0 : i32
    %c0_i32_1 = arith.constant 0 : i32
    return %c0_i32, %c0_i32_0 : i32, i32
  }
  func.func @transform_3(%arg0: i32) -> (i32, i32) {
    %c0_i32 = arith.constant 0 : i32
    %c0_i32_0 = arith.constant 0 : i32
    %c0_i32_1 = arith.constant 0 : i32
    return %c0_i32, %c0_i32_0 : i32, i32
  }
  func.func @transform_4(%arg0: i32) -> (i32, i32) {
    %c0_i32 = arith.constant 0 : i32
    %c0_i32_0 = arith.constant 0 : i32
    %c0_i32_1 = arith.constant 0 : i32
    return %c0_i32, %c0_i32_0 : i32, i32
  }
  func.func @transform_5(%arg0: i32) -> (i32, i32, i32) {
    %c0_i32 = arith.constant 0 : i32
    %c0_i32_0 = arith.constant 0 : i32
    %c0_i32_1 = arith.constant 0 : i32
    %c0_i32_2 = arith.constant 0 : i32
    return %c0_i32, %c0_i32_0, %c0_i32_1 : i32, i32, i32
  }
  func.func @transform_6(%arg0: i32) -> (i32, i32, i32) {
    %c0_i32 = arith.constant 0 : i32
    %c0_i32_0 = arith.constant 0 : i32
    %c0_i32_1 = arith.constant 0 : i32
    %c0_i32_2 = arith.constant 0 : i32
    return %c0_i32, %c0_i32_0, %c0_i32_1 : i32, i32, i32
  }
  func.func @transform_7(%arg0: i32) -> (i32, i32, i32) {
    %c0_i32 = arith.constant 0 : i32
    %c0_i32_0 = arith.constant 0 : i32
    %c0_i32_1 = arith.constant 0 : i32
    %c0_i32_2 = arith.constant 0 : i32
    return %c0_i32, %c0_i32_0, %c0_i32_1 : i32, i32, i32
  }
  func.func @transform_8(%arg0: i32) -> (i32, i32, i32) {
    %c0_i32 = arith.constant 0 : i32
    %c0_i32_0 = arith.constant 0 : i32
    %c0_i32_1 = arith.constant 0 : i32
    %c0_i32_2 = arith.constant 0 : i32
    return %c0_i32, %c0_i32_0, %c0_i32_1 : i32, i32, i32
  }
  func.func @transform_9(%arg0: i32) -> (i32, i32, i32) {
    %c0_i32 = arith.constant 0 : i32
    %c0_i32_0 = arith.constant 0 : i32
    %c0_i32_1 = arith.constant 0 : i32
    %c0_i32_2 = arith.constant 0 : i32
    return %c0_i32, %c0_i32_0, %c0_i32_1 : i32, i32, i32
  }
  func.func @transform_10(%arg0: i32) -> (i32, i32, i32, i32) {
    %c0_i32 = arith.constant 0 : i32
    %c0_i32_0 = arith.constant 0 : i32
    %c0_i32_1 = arith.constant 0 : i32
    %c0_i32_2 = arith.constant 0 : i32
    %c0_i32_3 = arith.constant 0 : i32
    return %c0_i32, %c0_i32_0, %c0_i32_1, %c0_i32_2 : i32, i32, i32, i32
  }
  func.func @transform_11(%arg0: i32) -> (i32, i32, i32) {
    %c0_i32 = arith.constant 0 : i32
    %c0_i32_0 = arith.constant 0 : i32
    %c0_i32_1 = arith.constant 0 : i32
    %c0_i32_2 = arith.constant 0 : i32
    return %c0_i32, %c0_i32_0, %c0_i32_1 : i32, i32, i32
  }
  func.func @transform_12(%arg0: i32) -> (i32, i32, i32) {
    %c0_i32 = arith.constant 0 : i32
    %c0_i32_0 = arith.constant 0 : i32
    %c0_i32_1 = arith.constant 0 : i32
    %c0_i32_2 = arith.constant 0 : i32
    return %c0_i32, %c0_i32_0, %c0_i32_1 : i32, i32, i32
  }
  func.func @transform_13(%arg0: i32) -> (i32, i32, i32, i32) {
    %c0_i32 = arith.constant 0 : i32
    %c0_i32_0 = arith.constant 0 : i32
    %c0_i32_1 = arith.constant 0 : i32
    %c0_i32_2 = arith.constant 0 : i32
    %c0_i32_3 = arith.constant 0 : i32
    return %c0_i32, %c0_i32_0, %c0_i32_1, %c0_i32_2 : i32, i32, i32, i32
  }
  func.func @transform_14(%arg0: i32) -> (i32, i32) {
    %c0_i32 = arith.constant 0 : i32
    %c0_i32_0 = arith.constant 0 : i32
    %c0_i32_1 = arith.constant 0 : i32
    return %c0_i32, %c0_i32_0 : i32, i32
  }
  func.func @transform_15(%arg0: i32) -> (i32, i32) {
    %c0_i32 = arith.constant 0 : i32
    %c0_i32_0 = arith.constant 0 : i32
    %c0_i32_1 = arith.constant 0 : i32
    return %c0_i32, %c0_i32_0 : i32, i32
  }
  func.func @transform_16(%arg0: i32) -> (i32, i32) {
    %c0_i32 = arith.constant 0 : i32
    %c0_i32_0 = arith.constant 0 : i32
    %c0_i32_1 = arith.constant 0 : i32
    return %c0_i32, %c0_i32_0 : i32, i32
  }
  func.func @transform_17(%arg0: i32) -> (i32, i32) {
    %c0_i32 = arith.constant 0 : i32
    %c0_i32_0 = arith.constant 0 : i32
    %c0_i32_1 = arith.constant 0 : i32
    return %c0_i32, %c0_i32_0 : i32, i32
  }
  func.func @transform_18(%arg0: i32) -> (i32, i32) {
    %c0_i32 = arith.constant 0 : i32
    %c0_i32_0 = arith.constant 0 : i32
    %c0_i32_1 = arith.constant 0 : i32
    return %c0_i32, %c0_i32_0 : i32, i32
  }
  func.func @transform_19(%arg0: i32) -> (i32, i32) {
    %c0_i32 = arith.constant 0 : i32
    %c0_i32_0 = arith.constant 0 : i32
    %c0_i32_1 = arith.constant 0 : i32
    return %c0_i32, %c0_i32_0 : i32, i32
  }
  func.func @transform_20(%arg0: i32) -> (i32, i32) {
    %c0_i32 = arith.constant 0 : i32
    %c0_i32_0 = arith.constant 0 : i32
    %c0_i32_1 = arith.constant 0 : i32
    return %c0_i32, %c0_i32_0 : i32, i32
  }
  func.func @transform_21(%arg0: i32) -> (i32, i32, i32) {
    %c0_i32 = arith.constant 0 : i32
    %c0_i32_0 = arith.constant 0 : i32
    %c0_i32_1 = arith.constant 0 : i32
    return %arg0, %c0_i32, %c0_i32_0 : i32, i32, i32
  }
}

</mosaic_0001>

<bundles_post_ra>
// kernel: tpu_custom_call.1
= control target key start
LH: loop header
LB: loop body
LE: loop exit
PB: predicated region body
PF: predicated region fallthrough
CT: control target
= control target key end

     0   :  { %s12793_s0 = inlined_call_operand.vmem [shape: f32[2,32,192], index: 0, kind: input, shape index: {}]   ;;  %s12794_s1 = inlined_call_operand.vmem [shape: f32[2,192], index: 1, kind: input, shape index: {}]   ;;  %s12795_s2 = inlined_call_operand.vmem [shape: f32[192,32], index: 2, kind: input, shape index: {}]   ;;  %s12796_s3 = inlined_call_operand.vmem [shape: f32[3,32], index: 3, kind: input, shape index: {}]   ;;  %s12797_s4 = inlined_call_operand.vmem [shape: f32[32,32], index: 4, kind: input, shape index: {}]   ;;  %s12798_s5 = inlined_call_operand.vmem [shape: f32[2,32,64], index: 5, kind: input, shape index: {}]   ;;  %s12799_s6 = inlined_call_operand.vmem [shape: f32[2,32,64], index: 6, kind: input, shape index: {}]   ;;  %s12800_s7 = inlined_call_operand.vmem [shape: f32[2,4,64], index: 7, kind: input, shape index: {}]   ;;  %s12801_s8 = inlined_call_operand.vmem [shape: f32[2,3,64], index: 8, kind: input, shape index: {}]   ;;  %s12802_s9 = inlined_call_operand.vmem [shape: f32[2,64,64], index: 9, kind: input, shape index: {}]   ;;  %s12803_s10 = inlined_call_operand.vmem [shape: f32[2,2,64,8], index: 10, kind: input, shape index: {}]   ;;  %s12804_s11 = inlined_call_operand.vmem [shape: f32[2,8,64], index: 11, kind: input, shape index: {}]   ;;  %s12805_s12 = inlined_call_operand.vmem [shape: f32[2,64,32], index: 12, kind: input, shape index: {}]   ;;  %s12806_s13 = inlined_call_operand.vmem [shape: f32[2,2,32,32], index: 13, kind: input, shape index: {}]   ;;  %s12807_s14 = inlined_call_operand.vmem [shape: f32[128,32], index: 14, kind: input, shape index: {}]   ;;  %s12808_s15 = inlined_call_operand.vmem [shape: f32[64,32], index: 15, kind: input, shape index: {}]   ;;  %s12809_s16 = inlined_call_operand.vmem [shape: f32[32,64], index: 16, kind: input, shape index: {}]   ;;  %s12810_s17 = inlined_call_operand.vmem [shape: f32[2,32], index: 17, kind: input, shape index: {}]   ;;  %s12811_s18 = inlined_call_operand.vmem [shape: f32[2,32], index: 18, kind: input, shape index: {}]   ;;  %s12812_s19 = inlined_call_operand.vmem [shape: f32[32,16], index: 19, kind: input, shape index: {}]   ;;  %s12813_s20 = inlined_call_operand.vmem [shape: f32[1,16], index: 20, kind: input, shape index: {}]   ;;  %s12814_s21 = inlined_call_operand.hbm [shape: f32[2,2,16], index: 21, kind: output, shape index: {}]  }
   0x1   :  { %12884 = sst [smem:[#allocation42_spill]] %s12793_s0 }
   0x2   :  { %12885 = sst [smem:[#allocation43_spill]] %s12794_s1 }
   0x3   :  { %12886 = sst [smem:[#allocation44_spill]] %s12795_s2 }
   0x4   :  { %12887 = sst [smem:[#allocation45_spill]] %s12796_s3 }
   0x5   :  { %12888 = sst [smem:[#allocation46_spill]] %s12797_s4 }
   0x6   :  { %12889 = sst [smem:[#allocation47_spill]] %s12798_s5 }
   0x7   :  { %26 = vsyncpa [#allocation4], 0 }
   0x8   :  { %28 = vsyncpa [#allocation4 + $0x1], 0  ;;  %s9438_s2 = smov 0   ;;  %s9440_s25 = smov 0  }
   0x9   :  { %s9442_s26 = smov 0   ;;  %s9444_s27 = smov 0  }
   0xa LB: > { %12890 = sst [smem:[#allocation6_spill]] %s9309_s2  ;;  %s9459_s3 = sadd.s32 4294967295, %s9321_s27   ;;  %s9321_s27 = sphi %s9444_s27, %s13136_s27   ;;  %s9317_s26 = sphi %s9442_s26, %s13138_s26   ;;  %s9313_s25 = sphi %s9440_s25, %s13140_s25   ;;  %s9309_s2 = sphi %s9438_s2, %s13139_s2  }
   0xb   : > { %12891 = sst [smem:[#allocation7_spill]] %s9317_s26  ;;  %s7818_s28 = sadd.s32 4294967294, %s9321_s27  }
   0xc   : > { %12892 = sst [smem:[#allocation8_spill]] %s9321_s27  ;;  %s9463_s29 = sadd.s32 1, %s9321_s27  }
   0xd   : > { %12893 = sst [smem:[#allocation9_spill]] %s9463_s29  ;;  %s487_s0 = sadd.s32 1, %s9317_s26 }
   0xe   : > { %s484_s4 = ssub.s32 %s9321_s27, %s9463_s29  ;;  %p497_p0 = scmp.ne.s32.totalorder %s9317_s26, %s9313_s25 }
   0xf   : > { %p485_p1 = scmp.eq.s32.totalorder %s484_s4, 0  ;;  %p498_p2 = scmp.eq.s32.totalorder %s9459_s3, 1 }
  0x10   : > { %p503_p3 = scmp.ne.s32.totalorder %s9313_s25, %s9309_s2  ;;  %p504_p4 = scmp.eq.s32.totalorder %s7818_s28, 1 }
  0x11   : > { %s9474_s30 = scalar_select %p485_p1, %s9317_s26, %s487_s0  }
  0x12   : > { %p9476_p5 = por %p498_p2, %p497_p0  ;;  %p9480_p6 = por %p504_p4, %p503_p3 }
  0x13   : > { %12894 = sst [smem:[#allocation10_spill]] %s9474_s30  ;;  %p7821_p7 = scmp.ge.s32.totalorder %s9321_s27, 1 }
  0x14   : > { %s12896_s22 = scalar_select %p9480_p6, 1, 0 }
  0x15   : > { %p590_p8 = scmp.lt.s32.totalorder %s9321_s27, 3 }
  0x16   : > { %12897 = sst [smem:[#allocation11_spill]] %s12896_s22 }
  0x17   : > { %p591_p9 = pnand %p7821_p7, %p590_p8 }
  0x19   : > { %594 = sbr.rel (%p591_p9) target bundleno = 6314 (0x18aa), region = 104 }
  0x20   : > { %p650_p10 = scmp.lt.s32.totalorder %s9459_s3, 1  ;;  %vm666_vm0 = vcmask 523264   ;;  %s12898_s0 = sld [smem:[#allocation42_spill]]  ;;  %v12829_v19 = vmov 0.0|0.0   ;;  %vm906_vm1 = vcmask 261120   ;;  %vm3869_vm6 = vcmask 1041409  }
  0x21   : > { %s12899_s24 = sld [smem:[#allocation44_spill]]  ;;  %8642 = vmatprep.subr.bf16.mxu0 %v12829_v19  ;;  %s12903_s30 = sld [smem:[#allocation46_spill]]  ;;  %vm3872_vm7 = vcmask 1042434   ;;  %vm3875_vm8 = vcmask 1043459   ;;  %vm3878_vm9 = vcmask 1044484   ;;  %vm3881_vm10 = vcmask 1045509  }
  0x22   : > { %s651_s23 = scalar_select %p650_p10, %s9459_s3, 1  ;;  %vm3884_vm11 = vcmask 1046534   ;;  %vm3887_vm12 = vcmask 1047559  }
  0x23   : > { %s12908_s29 = sld [smem:[#allocation47_spill]]  ;;  %s8010_s26 = sshll.u32 %s9459_s3, 5 }
  0x24   : > { %s8013_s1 = sshll.u32 %s651_s23, 6  ;;  %s12901_s23 = sld [smem:[#allocation43_spill]] }
  0x25   : > { %s12751_s27 = scalar_lea.hbm %s12814_s21, %s8010_s26  ;;  %s9327_s3 = smov [#allocation3]  }
  0x26   : > { %s654_s4 = scalar_lea.vmem %s12898_s0, %s8013_s1 }
  0x27   : > { %v655_v0 = vld [vmem:[%s654_s4] sm:$0xff]  ;;  %v656_v1 = vld [vmem:[%s654_s4 + $0x8] sm:$0xff]  ;;  %v9492_v5 = vld [vmem:[%s654_s4 + $0x10] sm:$0xff] }
  0x28   : > { %v659_v2 = vld [vmem:[%s654_s4 + $0x20] sm:$0xff]  ;;  %v667_v3 = vsel %vm666_vm0, %v656_v1, 0.0  ;;  %v660_v4 = vld [vmem:[%s654_s4 + $0x28] sm:$0xff]  ;;  %v9494_v6 = vld [vmem:[%s654_s4 + $0x18] sm:$0xff] }
  0x29   : > { %v668_v7 = vadd.f32 %v667_v3, %v655_v0  ;;  %v675_v8 = vsel %vm666_vm0, %v660_v4, 0.0  ;;  %v671_v9 = vsel %vm666_vm0, %v9494_v6, 0.0  ;;  %v9499_v10 = vld [vmem:[%s654_s4 + $0x30] sm:$0xff]  ;;  %v9501_v11 = vld [vmem:[%s654_s4 + $0x38] sm:$0xff]  ;;  %v778_v16 = vld [vmem:[%s12899_s24] sm:$0xff]  ;;  %s12902_s4 = sld [smem:[#allocation45_spill]] }
  0x2a   : > { %v676_v12 = vadd.f32 %v675_v8, %v659_v2  ;;  %v679_v13 = vsel %vm666_vm0, %v9501_v11, 0.0  ;;  %v672_v14 = vadd.f32 %v671_v9, %v9492_v5  ;;  %v779_v17 = vld [vmem:[%s12899_s24 + $0x8] sm:$0xff]  ;;  %v780_v18 = vld [vmem:[%s12899_s24 + $0x10] sm:$0xff]  ;;  %v781_v21 = vld [vmem:[%s12899_s24 + $0x18] sm:$0xff] }
  0x2b   : > { %669 = vadd.xlane.f32.xlu0 %v668_v7  ;;  %v680_v15 = vadd.f32 %v679_v13, %v9499_v10  ;;  %v8643_v20 = vpack.c.bf16 %v779_v17, %v778_v16  ;;  %v8646_v22 = vpack.c.bf16 %v781_v21, %v780_v18  ;;  %v782_v23 = vld [vmem:[%s12899_s24 + $0x20] sm:$0xff]  ;;  %v783_v24 = vld [vmem:[%s12899_s24 + $0x28] sm:$0xff]  ;;  %v784_v26 = vld [vmem:[%s12899_s24 + $0x30] sm:$0xff] }
  0x2c   : > { %677 = vadd.xlane.f32.xlu1 %v676_v12  ;;  %v8649_v25 = vpack.c.bf16 %v783_v24, %v782_v23  ;;  %v785_v27 = vld [vmem:[%s12899_s24 + $0x38] sm:$0xff]  ;;  %v786_v29 = vld [vmem:[%s12899_s24 + $0x40] sm:$0xff]  ;;  %v787_v30 = vld [vmem:[%s12899_s24 + $0x48] sm:$0xff]  ;;  %v741_v24 = vlaneseq }
  0x2d   : > { %8644 = vmatpush1.bf16.msra.mxu0 %v8643_v20  ;;  %v8652_v28 = vpack.c.bf16 %v785_v27, %v784_v26  ;;  %v8655_v31 = vpack.c.bf16 %v787_v30, %v786_v29  ;;  %v788_v32 = vld [vmem:[%s12899_s24 + $0x50] sm:$0xff]  ;;  %v789_v33 = vld [vmem:[%s12899_s24 + $0x58] sm:$0xff]  ;;  %v790_v35 = vld [vmem:[%s12899_s24 + $0x60] sm:$0xff] }
  0x2e   : > { %8645 = vmatprep.subr.bf16.mxu0 %v12829_v19  ;;  %v8658_v34 = vpack.c.bf16 %v789_v33, %v788_v32  ;;  %v791_v36 = vld [vmem:[%s12899_s24 + $0x68] sm:$0xff]  ;;  %v793_v7 = vld [vmem:[%s12899_s24 + $0x78] sm:$0xff]  ;;  %v794_v9 = vld [vmem:[%s12899_s24 + $0x80] sm:$0xff]  ;;  %v9631_v30 = vshrl.u32 %v741_v24, 7 }
  0x2f   : > { %673 = vadd.xlane.f32.xlu0 %v672_v14  ;;  %v8661_v37 = vpack.c.bf16 %v791_v36, %v790_v35  ;;  %v796_v12 = vld [vmem:[%s12899_s24 + $0x90] sm:$0xff]  ;;  %v797_v13 = vld [vmem:[%s12899_s24 + $0x98] sm:$0xff]  ;;  %v799_v16 = vld [vmem:[%s12899_s24 + $0xa8] sm:$0xff] }
  0x30   : > { %681 = vadd.xlane.f32.xlu1 %v680_v15  ;;  %v8670_v14 = vpack.c.bf16 %v797_v13, %v796_v12  ;;  %v798_v15 = vld [vmem:[%s12899_s24 + $0xa0] sm:$0xff]  ;;  %v800_v18 = vld [vmem:[%s12899_s24 + $0xb0] sm:$0xff]  ;;  %v801_v20 = vld [vmem:[%s12899_s24 + $0xb8] sm:$0xff]  ;;  %v9634_v35 = vsub.s32 0, %v9631_v30  ;;  %v9637_v36 = vsub.s32 1, %v9631_v30 }
  0x31   : > { %8647 = vmatpush1.bf16.msra.mxu0 %v8646_v22  ;;  %v8673_v17 = vpack.c.bf16 %v799_v16, %v798_v15  ;;  %v8676_v21 = vpack.c.bf16 %v801_v20, %v800_v18 }
  0x32   : > { %8648 = vmatprep.subr.bf16.mxu0 %v12829_v19  ;;  %12900 = vst [vmem:[#allocation12_spill] sm:$0xff] %v9637_v36 }
  0x35   : > { %8650 = vmatpush1.bf16.msra.mxu0 %v8649_v25 }
  0x36   : > { %8651 = vmatprep.subr.bf16.mxu0 %v12829_v19 }
  0x39   : > { %8653 = vmatpush1.bf16.msra.mxu0 %v8652_v28 }
  0x3a   : > { %8654 = vmatprep.subr.bf16.mxu0 %v12829_v19 }
  0x3d   : > { %8656 = vmatpush1.bf16.msra.mxu0 %v8655_v31 }
  0x3e   : > { %8657 = vmatprep.subr.bf16.mxu0 %v12829_v19 }
  0x41   : > { %8659 = vmatpush1.bf16.msra.mxu0 %v8658_v34 }
  0x42   : > { %8660 = vmatprep.subr.bf16.mxu0 %v12829_v19 }
  0x45   : > { %8662 = vmatpush1.bf16.msra.mxu0 %v8661_v37 }
  0x46   : > { %8663 = vmatprep.subr.bf16.mxu0 %v12829_v19 }
  0xb8   : > { %v670_v38 = vpop.xlane.xlu0 %669 }
  0xb9   : > { %v684_v39 = vmul.f32 0.0052083335, %v670_v38  ;;  %v678_v40 = vpop.xlane.xlu1 %677  ;;  %v663_v38 = vld [vmem:[%s12901_s23] ss:$2 sm:$0x3] }
  0xba   : > { %v686_v41 = vmul.f32 0.0052083335, %v678_v40  ;;  %v744_v40 = vrot.slane %v663_v38, %v9634_v35 }
  0xbb   : > { %v9557_v42 = vsub.f32 %v655_v0, %v684_v39  ;;  %v9559_v43 = vsub.f32 %v656_v1, %v684_v39  ;;  %v7825_v39 = vld [vmem:[%s12901_s23 + $0x1] ss:$2 sm:$0x3] }
  0xbc   : > { %v9561_v44 = vsub.f32 %v659_v2, %v686_v41  ;;  %v9563_v45 = vsub.f32 %v660_v4, %v686_v41  ;;  %v674_v46 = vpop.xlane.xlu0 %673  ;;  %v748_v41 = vrot.slane %v663_v38, %v9637_v36 }
  0xbd   : > { %v685_v47 = vmul.f32 0.0052083335, %v674_v46  ;;  %v682_v48 = vpop.xlane.xlu1 %681  ;;  %v696_v49 = vmul.f32 %v9557_v42, %v9557_v42  ;;  %v697_v50 = vmul.f32 %v9559_v43, %v9559_v43 }
  0xbe   : > { %v687_v51 = vmul.f32 0.0052083335, %v682_v48  ;;  %v700_v52 = vmul.f32 %v9561_v44, %v9561_v44  ;;  %v701_v53 = vmul.f32 %v9563_v45, %v9563_v45  ;;  %v763_v48 = vrot.slane %v7825_v39, %v9634_v35 }
  0xbf   : > { %v9574_v54 = vsub.f32 %v9492_v5, %v685_v47  ;;  %v9577_v55 = vsub.f32 %v9494_v6, %v685_v47  ;;  %v704_v56 = vsel %vm666_vm0, %v697_v50, 0.0  ;;  %v792_v6 = vld [vmem:[%s12899_s24 + $0x70] sm:$0xff] }
  0xc0   : > { %v9581_v57 = vsub.f32 %v9499_v10, %v687_v51  ;;  %v9584_v58 = vsub.f32 %v9501_v11, %v687_v51  ;;  %v705_v59 = vadd.f32 %v704_v56, %v696_v49  ;;  %v712_v60 = vsel %vm666_vm0, %v701_v53, 0.0  ;;  %v795_v10 = vld [vmem:[%s12899_s24 + $0x88] sm:$0xff]  ;;  %s647_s24 = sand.u32 1, %s9313_s25  }
  0xc1   : > { %v698_v61 = vmul.f32 %v9574_v54, %v9574_v54  ;;  %v699_v62 = vmul.f32 %v9577_v55, %v9577_v55  ;;  %v713_v63 = vadd.f32 %v712_v60, %v700_v52  ;;  %v8664_v8 = vpack.c.bf16 %v793_v7, %v792_v6  ;;  %s7822_s23 = sshll.u32 %s647_s24, 1 }
  0xc2   : > { %706 = vadd.xlane.f32.xlu0 %v705_v59  ;;  %v702_v0 = vmul.f32 %v9581_v57, %v9581_v57  ;;  %v703_v1 = vmul.f32 %v9584_v58, %v9584_v58  ;;  %v8667_v11 = vpack.c.bf16 %v795_v10, %v794_v9  ;;  %v767_v49 = vrot.slane %v7825_v39, %v9637_v36  ;;  %s649_s22 = scalar_lea.vmem [#allocation3], %s7822_s23  ;;  %s9263_s23 = sshll.u32 %s9327_s3, 4  ;;  %s9264_s23 = int_to_ptr.vmem [resolvable:$false] %s9263_s23 }
  0xc3   : > { %v708_v2 = vsel %vm666_vm0, %v699_v62, 0.0  ;;  %8665 = vmatpush1.bf16.msra.mxu0 %v8664_v8  ;;  %s7759_s1 = sshll.u32 %s649_s22, 4  ;;  %s9265_s0 = scalar_lea.vmem %s9264_s23, 64  ;;  %s12753_s1 = int_to_ptr.vmem [resolvable:$true] %s7759_s1 }
  0xc4   : > { %v709_v3 = vadd.f32 %v708_v2, %v698_v61  ;;  %v716_v4 = vsel %vm666_vm0, %v703_v1, 0.0  ;;  %8666 = vmatprep.subr.bf16.mxu0 %v12829_v19  ;;  %p9266_p0 = scmp.lt.s32.totalorder %s12753_s1, %s9264_s23 }
  0xc5   : > { %v717_v5 = vadd.f32 %v716_v4, %v702_v0 }
  0xc6   : > { %714 = vadd.xlane.f32.xlu0 %v713_v63  ;;  %710 = vadd.xlane.f32.xlu1 %v709_v3 }
  0xc7   : > { %8668 = vmatpush1.bf16.msra.mxu0 %v8667_v11 }
  0xc8   : > { %8669 = vmatprep.subr.bf16.mxu0 %v12829_v19 }
  0xca   : > { %718 = vadd.xlane.f32.xlu1 %v717_v5 }
  0xcb   : > { %8671 = vmatpush1.bf16.msra.mxu0 %v8670_v14 }
  0xcc   : > { %8672 = vmatprep.subr.bf16.mxu0 %v12829_v19 }
  0xcf   : > { %8674 = vmatpush1.bf16.msra.mxu0 %v8673_v17 }
  0xd0   : > { %8675 = vmatprep.subr.bf16.mxu0 %v12829_v19 }
  0xd3   : > { %8677 = vmatpush1.bf16.msra.mxu0 %v8676_v21 }
 0x14f   : > { %v707_v22 = vpop.xlane.xlu0 %706 }
 0x150   : > { %v720_v23 = vmul.f32 0.0052083335, %v707_v22 }
 0x152   : > { %v724_v25 = vadd.f32 1e-05, %v720_v23 }
 0x153   : > { %v711_v26 = vpop.xlane.xlu1 %710  ;;  %v715_v27 = vpop.xlane.xlu0 %714 }
 0x154   : > { %8957 = vrsqrt.f32 %v724_v25  ;;  %v721_v28 = vmul.f32 0.0052083335, %v711_v26  ;;  %v722_v29 = vmul.f32 0.0052083335, %v715_v27 }
 0x156   : > { %v725_v31 = vadd.f32 1e-05, %v721_v28  ;;  %v726_v32 = vadd.f32 1e-05, %v722_v29 }
 0x157   : > { %v719_v33 = vpop.xlane.xlu1 %718 }
 0x158   : > { %8959 = vrsqrt.f32 %v725_v31  ;;  %v723_v34 = vmul.f32 0.0052083335, %v719_v33 }
 0x159   : > { %8961 = vrsqrt.f32 %v726_v32 }
 0x15a   : > { %v727_v37 = vadd.f32 1e-05, %v723_v34 }
 0x15c   : > { %8963 = vrsqrt.f32 %v727_v37 }
 0x15e   : > { %v8958_v46 = vpop.eup %8957 }
 0x15f   : > { %v733_v47 = vmul.f32 %v8958_v46, %v9559_v43  ;;  %v732_v50 = vmul.f32 %v8958_v46, %v9557_v42 }
 0x161   : > { %v752_v51 = vmul.f32 %v748_v41, %v733_v47  ;;  %v751_v52 = vmul.f32 %v744_v40, %v732_v50 }
 0x162   : > { %v8960_v53 = vpop.eup %8959 }
 0x163   : > { %v8962_v56 = vpop.eup %8961  ;;  %v771_v59 = vadd.f32 %v767_v49, %v752_v51  ;;  %v770_v60 = vadd.f32 %v763_v48, %v751_v52  ;;  %v735_v61 = vmul.f32 %v8960_v53, %v9577_v55  ;;  %v734_v62 = vmul.f32 %v8960_v53, %v9574_v54 }
 0x164   : > { %v737_v63 = vmul.f32 %v8962_v56, %v9563_v45  ;;  %v736_v43 = vmul.f32 %v8962_v56, %v9561_v44 }
 0x165   : > { %7827 = vmatprep.mubr.msk.f32.mxu0 %vm666_vm0, %v771_v59  ;;  %v754_v0 = vmul.f32 %v748_v41, %v735_v61  ;;  %v753_v1 = vmul.f32 %v744_v40, %v734_v62 }
 0x166   : > { %v8964_v2 = vpop.eup %8963  ;;  %884 = vmatmul.mubr.f32.vlgmr.msra.gmra.mrb[0].mxu0 %v770_v60  ;;  %v756_v42 = vmul.f32 %v748_v41, %v737_v63  ;;  %v755_v6 = vmul.f32 %v744_v40, %v736_v43 }
 0x167   : > { %v773_v3 = vadd.f32 %v767_v49, %v754_v0  ;;  %v772_v4 = vadd.f32 %v763_v48, %v753_v1  ;;  %v739_v5 = vmul.f32 %v8964_v2, %v9584_v58  ;;  %v738_v55 = vmul.f32 %v8964_v2, %v9581_v57  ;;  %v7826_v58 = vld [vmem:[%s12902_s4] ss:$0 sm:$0xff] }
 0x168   : > { %v775_v54 = vadd.f32 %v767_v49, %v756_v42  ;;  %v774_v44 = vadd.f32 %v763_v48, %v755_v6  ;;  %v7832_v6 = vld [vmem:[%s12902_s4 + $0x2] ss:$0 sm:$0xff] }
 0x169   : > { %7828 = vmatprep.mubr.msk.f32.mxu0 %vm666_vm0, %v773_v3  ;;  %v758_v45 = vmul.f32 %v748_v41, %v739_v5  ;;  %v757_v7 = vmul.f32 %v744_v40, %v738_v55 }
 0x16a   : > { %889 = vmatmul.mubr.f32.gmra.mrb[2].mxu0 %v772_v4  ;;  %v7831_v4 = vld [vmem:[%s12902_s4 + $0x1] ss:$0 sm:$0xff]  ;;  %s9259_s4 = scalar_lea.vmem %s12753_s1, 32 }
 0x16b   : > { %7829 = vmatprep.mubr.msk.f32.mxu0 %vm666_vm0, %v775_v54  ;;  %v777_v8 = vadd.f32 %v767_v49, %v758_v45  ;;  %v776_v9 = vadd.f32 %v763_v48, %v757_v7  ;;  %v976_v45 = vld [vmem:[%s12903_s30] sm:$0xff]  ;;  %p9260_p11 = scmp.ne.s32.totalorder %s12753_s1, %s9259_s4  ;;  %p9267_p1 = scmp.lt.s32.totalorder %s9265_s0, %s9259_s4 }
 0x16d   : > { %p9261_p12 = pnand %p9260_p11, %p9476_p5  ;;  %p9268_p2 = por %p9267_p1, %p9266_p0 }
 0x16e   : > { %894 = vmatmul.mubr.f32.gmra.mrb[4].mxu0 %v774_v44 }
 0x16f   : > { %7830 = vmatprep.mubr.msk.f32.mxu0 %vm666_vm0, %v777_v8  ;;  %p9262_p13 = pneg %p9261_p12 }
 0x171   : > { %p9269_p3 = pnand %p9268_p2, %p9262_p13 }
 0x172   : > { %899 = vmatmul.mubr.f32.gmra.mrb[6].mxu0 %v776_v9 }
 0x239   : > { %v885_v57 = vpop.f32.mrb[0].mxu0 }
 0x23a   : > { %v886_v10 = vadd.f32 %v7826_v58, %v885_v57  ;;  %v887_v11 = vpop.f32.mrb[1].mxu0  ;;  %v977_v57 = vld [vmem:[%s12903_s30 + $0x8] sm:$0xff] }
 0x23c   : > { %v907_v12 = vsel %vm906_vm1, %v886_v10, 0.0 }
 0x23d   : > { %v890_v13 = vpop.f32.mrb[2].mxu0  ;;  %908 = vadd.xlane.f32.xlu0 %v907_v12 }
 0x23e   : > { %v891_v14 = vadd.f32 %v7826_v58, %v890_v13  ;;  %v892_v15 = vpop.f32.mrb[3].mxu0 }
 0x240   : > { %v910_v16 = vsel %vm906_vm1, %v891_v14, 0.0 }
 0x241   : > { %911 = vadd.xlane.f32.xlu1 %v910_v16  ;;  %v895_v17 = vpop.f32.mrb[4].mxu0  ;;  %v978_v16 = vld [vmem:[%s12903_s30 + $0x10] sm:$0xff] }
 0x242   : > { %v896_v18 = vadd.f32 %v7826_v58, %v895_v17  ;;  %v897_v20 = vpop.f32.mrb[5].mxu0 }
 0x244   : > { %v913_v21 = vsel %vm906_vm1, %v896_v18, 0.0 }
 0x245   : > { %v900_v22 = vpop.f32.mrb[6].mxu0  ;;  %914 = vadd.xlane.f32.xlu0 %v913_v21 }
 0x246   : > { %v901_v23 = vadd.f32 %v7826_v58, %v900_v22  ;;  %v902_v24 = vpop.f32.mrb[7].mxu0 }
 0x248   : > { %v916_v25 = vsel %vm906_vm1, %v901_v23, 0.0 }
 0x249   : > { %917 = vadd.xlane.f32.xlu1 %v916_v25 }
 0x2ca   : > { %v909_v26 = vpop.xlane.xlu0 %908 }
 0x2cb   : > { %v920_v27 = vmul.f32 0.03125, %v909_v26 }
 0x2cd   : > { %v924_v28 = vsub.f32 %v886_v10, %v920_v27 }
 0x2ce   : > { %v912_v29 = vpop.xlane.xlu1 %911 }
 0x2cf   : > { %v921_v31 = vmul.f32 0.03125, %v912_v29  ;;  %v928_v32 = vmul.f32 %v924_v28, %v924_v28 }
 0x2d1   : > { %v925_v33 = vsub.f32 %v891_v14, %v921_v31  ;;  %v932_v34 = vsel %vm906_vm1, %v928_v32, 0.0 }
 0x2d2   : > { %933 = vadd.xlane.f32.xlu0 %v932_v34  ;;  %v915_v37 = vpop.xlane.xlu0 %914 }
 0x2d3   : > { %v922_v38 = vmul.f32 0.03125, %v915_v37  ;;  %v929_v39 = vmul.f32 %v925_v33, %v925_v33 }
 0x2d5   : > { %v926_v40 = vsub.f32 %v896_v18, %v922_v38  ;;  %v935_v41 = vsel %vm906_vm1, %v929_v39, 0.0 }
 0x2d6   : > { %936 = vadd.xlane.f32.xlu1 %v935_v41  ;;  %v918_v46 = vpop.xlane.xlu1 %917 }
 0x2d7   : > { %v923_v47 = vmul.f32 0.03125, %v918_v46  ;;  %v930_v48 = vmul.f32 %v926_v40, %v926_v40 }
 0x2d9   : > { %v927_v49 = vsub.f32 %v901_v23, %v923_v47  ;;  %v938_v50 = vsel %vm906_vm1, %v930_v48, 0.0  ;;  %v979_v23 = vld [vmem:[%s12903_s30 + $0x18] sm:$0xff]  ;;  %s7746_s30 = scalar_lea.sflag [#allocation4], %s647_s24 }
 0x2da   : > { %939 = vadd.xlane.f32.xlu0 %v938_v50 }
 0x2db   : > { %v931_v51 = vmul.f32 %v927_v49, %v927_v49 }
 0x2dd   : > { %v941_v52 = vsel %vm906_vm1, %v931_v51, 0.0 }
 0x2de   : > { %942 = vadd.xlane.f32.xlu1 %v941_v52 }
 0x35f   : > { %v934_v53 = vpop.xlane.xlu0 %933 }
 0x360   : > { %v944_v56 = vmul.f32 0.03125, %v934_v53 }
 0x362   : > { %v948_v59 = vadd.f32 1e-05, %v944_v56 }
 0x363   : > { %v937_v60 = vpop.xlane.xlu1 %936 }
 0x364   : > { %8965 = vrsqrt.f32 %v948_v59  ;;  %v945_v61 = vmul.f32 0.03125, %v937_v60  ;;  %v1064_v59 = vld [vmem:[%s12908_s29] sm:$0xff]  ;;  %v1065_v60 = vld [vmem:[%s12908_s29 + $0x8] sm:$0xff] }
 0x366   : > { %v949_v62 = vadd.f32 1e-05, %v945_v61  ;;  %v8678_v61 = vpack.c.bf16 %v1065_v60, %v1064_v59  ;;  %v998_v59 = vld [vmem:[%s12807_s14 + $0x70] sm:$0xff]  ;;  %v999_v60 = vld [vmem:[%s12807_s14 + $0x78] sm:$0xff] }
 0x367   : > { %v940_v63 = vpop.xlane.xlu0 %939 }
 0x368   : > { %8967 = vrsqrt.f32 %v949_v62  ;;  %v946_v43 = vmul.f32 0.03125, %v940_v63  ;;  %8679 = vmatprep.subr.bf16.mxu1 %v8678_v61  ;;  %v1066_v62 = vld [vmem:[%s12908_s29 + $0x10] sm:$0xff]  ;;  %v1067_v63 = vld [vmem:[%s12908_s29 + $0x18] sm:$0xff] }
 0x369   : > { %8681 = vmatpush3.bf16.msra.mxu1 %v8678_v61  ;;  %v1529_v61 = vld [vmem:[%s12802_s9] sm:$0xff] }
 0x36a   : > { %v950_v0 = vadd.f32 1e-05, %v946_v43  ;;  %v8682_v43 = vpack.c.bf16 %v1067_v63, %v1066_v62  ;;  %v1530_v62 = vld [vmem:[%s12802_s9 + $0x8] sm:$0xff] }
 0x36b   : > { %v943_v1 = vpop.xlane.xlu1 %942  ;;  %v8702_v63 = vpack.c.bf16 %v1530_v62, %v1529_v61 }
 0x36c   : > { %8969 = vrsqrt.f32 %v950_v0  ;;  %v947_v2 = vmul.f32 0.03125, %v943_v1  ;;  %8683 = vmatprep.subr.bf16.mxu1 %v8682_v43  ;;  %v1165_v0 = vld [vmem:[%s12799_s6] sm:$0xff]  ;;  %v1166_v1 = vld [vmem:[%s12799_s6 + $0x8] sm:$0xff] }
 0x36d   : > { %8685 = vmatpush3.bf16.msra.mxu1 %v8682_v43  ;;  %v1698_v43 = vld [vmem:[%s12803_s10] sm:$0xff] }
 0x36e   : > { %v8966_v42 = vpop.eup %8965  ;;  %v951_v3 = vadd.f32 1e-05, %v947_v2  ;;  %v8686_v2 = vpack.c.bf16 %v1166_v1, %v1165_v0  ;;  %v1699_v0 = vld [vmem:[%s12803_s10 + $0x8] sm:$0xff] }
 0x36f   : > { %v956_v5 = vmul.f32 %v8966_v42, %v924_v28  ;;  %v8718_v1 = vpack.c.bf16 %v1699_v0, %v1698_v43  ;;  %v9885_v43 = vsub.s32 3, %v9631_v30 }
 0x370   : > { %8971 = vrsqrt.f32 %v951_v3  ;;  %8687 = vmatprep.subr.bf16.mxu1 %v8686_v2 }
 0x371   : > { %v964_v55 = vmul.f32 %v7831_v4, %v956_v5  ;;  %8719 = vmatprep.subr.bf16.mxu0 %v8718_v1  ;;  %12910 = vst [vmem:[#allocation18_spill] sm:$0xff] %v9885_v43 }
 0x372   : > { %v8968_v54 = vpop.eup %8967  ;;  %8721 = vmatpush3.bf16.msra.mxu0 %v8718_v1 }
 0x373   : > { %v972_v44 = vadd.f32 %v7832_v6, %v964_v55  ;;  %v957_v7 = vmul.f32 %v8968_v54, %v925_v33 }
 0x375   : > { %v9681_v8 = vadd.f32 %v976_v45, %v972_v44  ;;  %v965_v9 = vmul.f32 %v7831_v4, %v957_v7 }
 0x376   : > { %v8970_v58 = vpop.eup %8969 }
 0x377   : > { %12904 = vst [vmem:[#allocation13_spill] sm:$0xff] %v9681_v8  ;;  %v1012_v10 = vsel %vm906_vm1, %v9681_v8, 0.0  ;;  %v973_v11 = vadd.f32 %v7832_v6, %v965_v9  ;;  %v958_v12 = vmul.f32 %v8970_v58, %v926_v40 }
 0x378   : > { %1013 = vadd.xlane.f32.xlu0 %v1012_v10 }
 0x379   : > { %v9688_v13 = vadd.f32 %v977_v57, %v973_v11  ;;  %v966_v14 = vmul.f32 %v7831_v4, %v958_v12  ;;  %v1167_v11 = vld [vmem:[%s12799_s6 + $0x10] sm:$0xff]  ;;  %v1168_v12 = vld [vmem:[%s12799_s6 + $0x18] sm:$0xff] }
 0x37a   : > { %v8972_v15 = vpop.eup %8971 }
 0x37b   : > { %12905 = vst [vmem:[#allocation14_spill] sm:$0xff] %v9688_v13  ;;  %v1015_v17 = vsel %vm906_vm1, %v9688_v13, 0.0  ;;  %v974_v18 = vadd.f32 %v7832_v6, %v966_v14  ;;  %v959_v20 = vmul.f32 %v8972_v15, %v927_v49 }
 0x37c   : > { %1016 = vadd.xlane.f32.xlu1 %v1015_v17 }
 0x37d   : > { %v9695_v21 = vadd.f32 %v978_v16, %v974_v18  ;;  %v967_v22 = vmul.f32 %v7831_v4, %v959_v20  ;;  %v8690_v16 = vpack.c.bf16 %v1168_v12, %v1167_v11  ;;  %v1704_v11 = vld [vmem:[%s12803_s10 + $0x30] sm:$0xff]  ;;  %v1705_v12 = vld [vmem:[%s12803_s10 + $0x38] sm:$0xff] }
 0x37f   : > { %12906 = vst [vmem:[#allocation15_spill] sm:$0xff] %v9695_v21  ;;  %v1018_v24 = vsel %vm906_vm1, %v9695_v21, 0.0  ;;  %v975_v25 = vadd.f32 %v7832_v6, %v967_v22 }
 0x380   : > { %1019 = vadd.xlane.f32.xlu0 %v1018_v24 }
 0x381   : > { %v9702_v26 = vadd.f32 %v979_v23, %v975_v25  ;;  %v984_v23 = vld [vmem:[%s12807_s14] sm:$0xff] }
 0x383   : > { %12907 = vst [vmem:[#allocation16_spill] sm:$0xff] %v9702_v26  ;;  %v1021_v27 = vsel %vm906_vm1, %v9702_v26, 0.0 }
 0x384   : > { %1022 = vadd.xlane.f32.xlu1 %v1021_v27 }
 0x405   : > { %v1014_v28 = vpop.xlane.xlu0 %1013 }
 0x406   : > { %v1024_v29 = vmul.f32 0.03125, %v1014_v28 }
 0x408   : > { %v1028_v31 = vsub.f32 %v9681_v8, %v1024_v29 }
 0x409   : > { %v1017_v32 = vpop.xlane.xlu1 %1016 }
 0x40a   : > { %v1025_v33 = vmul.f32 0.03125, %v1017_v32  ;;  %v1032_v34 = vmul.f32 %v1028_v31, %v1028_v31 }
 0x40c   : > { %v1029_v37 = vsub.f32 %v9688_v13, %v1025_v33  ;;  %v1036_v38 = vsel %vm906_vm1, %v1032_v34, 0.0  ;;  %v985_v34 = vld [vmem:[%s12807_s14 + $0x8] sm:$0xff] }
 0x40d   : > { %1037 = vadd.xlane.f32.xlu0 %v1036_v38  ;;  %v1020_v39 = vpop.xlane.xlu0 %1019 }
 0x40e   : > { %v1026_v40 = vmul.f32 0.03125, %v1020_v39  ;;  %v1033_v41 = vmul.f32 %v1029_v37, %v1029_v37 }
 0x410   : > { %v1030_v46 = vsub.f32 %v9695_v21, %v1026_v40  ;;  %v1039_v47 = vsel %vm906_vm1, %v1033_v41, 0.0  ;;  %v987_v40 = vld [vmem:[%s12807_s14 + $0x18] sm:$0xff]  ;;  %v988_v41 = vld [vmem:[%s12807_s14 + $0x20] sm:$0xff] }
 0x411   : > { %1040 = vadd.xlane.f32.xlu1 %v1039_v47  ;;  %v1023_v48 = vpop.xlane.xlu1 %1022  ;;  %v990_v47 = vld [vmem:[%s12807_s14 + $0x30] sm:$0xff] }
 0x412   : > { %v1027_v49 = vmul.f32 0.03125, %v1023_v48  ;;  %v1034_v50 = vmul.f32 %v1030_v46, %v1030_v46  ;;  %v991_v48 = vld [vmem:[%s12807_s14 + $0x38] sm:$0xff] }
 0x414   : > { %v1031_v51 = vsub.f32 %v9702_v26, %v1027_v49  ;;  %v1042_v52 = vsel %vm906_vm1, %v1034_v50, 0.0  ;;  %v992_v49 = vld [vmem:[%s12807_s14 + $0x40] sm:$0xff]  ;;  %v993_v50 = vld [vmem:[%s12807_s14 + $0x48] sm:$0xff] }
 0x415   : > { %1043 = vadd.xlane.f32.xlu0 %v1042_v52  ;;  %v995_v52 = vld [vmem:[%s12807_s14 + $0x58] sm:$0xff] }
 0x416   : > { %v1035_v53 = vmul.f32 %v1031_v51, %v1031_v51 }
 0x418   : > { %v1045_v56 = vsel %vm906_vm1, %v1035_v53, 0.0  ;;  %v996_v53 = vld [vmem:[%s12807_s14 + $0x60] sm:$0xff] }
 0x419   : > { %1046 = vadd.xlane.f32.xlu1 %v1045_v56  ;;  %v997_v56 = vld [vmem:[%s12807_s14 + $0x68] sm:$0xff] }
 0x49a   : > { %v1038_v42 = vpop.xlane.xlu0 %1037 }
 0x49b   : > { %v1048_v3 = vmul.f32 0.03125, %v1038_v42  ;;  %v1532_v42 = vld [vmem:[%s12802_s9 + $0x18] sm:$0xff] }
 0x49d   : > { %v1052_v4 = vadd.f32 1e-05, %v1048_v3 }
 0x49e   : > { %v1041_v5 = vpop.xlane.xlu1 %1040 }
 0x49f   : > { %8973 = vrsqrt.f32 %v1052_v4  ;;  %v1049_v6 = vmul.f32 0.03125, %v1041_v5  ;;  %v1700_v4 = vld [vmem:[%s12803_s10 + $0x10] sm:$0xff]  ;;  %v1701_v5 = vld [vmem:[%s12803_s10 + $0x18] sm:$0xff] }
 0x4a1   : > { %v1053_v55 = vadd.f32 1e-05, %v1049_v6  ;;  %v8722_v6 = vpack.c.bf16 %v1701_v5, %v1700_v4 }
 0x4a2   : > { %v1044_v54 = vpop.xlane.xlu0 %1043 }
 0x4a3   : > { %8975 = vrsqrt.f32 %v1053_v55  ;;  %v1050_v45 = vmul.f32 0.03125, %v1044_v54  ;;  %8723 = vmatprep.subr.bf16.mxu0 %v8722_v6  ;;  %v1533_v55 = vld [vmem:[%s12802_s9 + $0x20] sm:$0xff]  ;;  %v1534_v54 = vld [vmem:[%s12802_s9 + $0x28] sm:$0xff] }
 0x4a4   : > { %8725 = vmatpush3.bf16.msra.mxu0 %v8722_v6 }
 0x4a5   : > { %v1054_v44 = vadd.f32 1e-05, %v1050_v45  ;;  %v8710_v45 = vpack.c.bf16 %v1534_v54, %v1533_v55  ;;  %v9891_v55 = vld [vmem:[%s12801_s8] sm:$0x7] }
 0x4a6   : > { %v1047_v7 = vpop.xlane.xlu1 %1046 }
 0x4a7   : > { %8977 = vrsqrt.f32 %v1054_v44  ;;  %v1051_v9 = vmul.f32 0.03125, %v1047_v7  ;;  %v1702_v44 = vld [vmem:[%s12803_s10 + $0x20] sm:$0xff]  ;;  %v1703_v7 = vld [vmem:[%s12803_s10 + $0x28] sm:$0xff] }
 0x4a9   : > { %v8974_v58 = vpop.eup %8973  ;;  %v1055_v57 = vadd.f32 1e-05, %v1051_v9  ;;  %v8726_v9 = vpack.c.bf16 %v1703_v7, %v1702_v44 }
 0x4aa   : > { %v1060_v10 = vmul.f32 %v8974_v58, %v1028_v31  ;;  %v1535_v58 = vld [vmem:[%s12802_s9 + $0x30] sm:$0xff] }
 0x4ab   : > { %8979 = vrsqrt.f32 %v1055_v57  ;;  %8727 = vmatprep.subr.bf16.mxu0 %v8726_v9  ;;  %v1536_v57 = vld [vmem:[%s12802_s9 + $0x38] sm:$0xff] }
 0x4ac   : > { %8248 = vmatprep.mubr.msk.f32.mxu1 %vm906_vm1, %v1060_v10  ;;  %8729 = vmatpush3.bf16.msra.mxu0 %v8726_v9  ;;  %v1496_v9 = vrot.slane %v9891_v55, %v9634_v35 }
 0x4ad   : > { %v8976_v14 = vpop.eup %8975 }
 0x4ae   : > { %v1061_v15 = vmul.f32 %v8976_v14, %v1029_v37  ;;  %v986_v37 = vld [vmem:[%s12807_s14 + $0x10] sm:$0xff]  ;;  %v8730_v14 = vpack.c.bf16 %v1705_v12, %v1704_v11 }
 0x4b0   : > { %8249 = vmatmul.mubr.msk.f32.vlgmr.msra.gmra.mrb[0].mxu1 %vm906_vm1, %v1061_v15  ;;  %8731 = vmatprep.subr.bf16.mxu0 %v8730_v14 }
 0x4b1   : > { %v8978_v17 = vpop.eup %8977  ;;  %8689 = vmatpush3.bf16.msra.mxu1 %v8686_v2  ;;  %v1531_v2 = vld [vmem:[%s12802_s9 + $0x10] sm:$0xff]  ;;  %8733 = vmatpush3.bf16.msra.mxu0 %v8730_v14 }
 0x4b2   : > { %v1062_v18 = vmul.f32 %v8978_v17, %v1030_v46  ;;  %8691 = vmatprep.subr.bf16.mxu1 %v8690_v16  ;;  %v989_v46 = vld [vmem:[%s12807_s14 + $0x28] sm:$0xff]  ;;  %v8706_v3 = vpack.c.bf16 %v1532_v42, %v1531_v2 }
 0x4b4   : > { %8251 = vmatprep.mubr.msk.f32.mxu1 %vm906_vm1, %v1062_v18 }
 0x4b5   : > { %v8980_v20 = vpop.eup %8979  ;;  %8693 = vmatpush3.bf16.msra.mxu1 %v8690_v16  ;;  %v1707_v16 = vld [vmem:[%s12803_s10 + $0x48] sm:$0xff] }
 0x4b6   : > { %v1063_v22 = vmul.f32 %v8980_v20, %v1031_v51  ;;  %v994_v51 = vld [vmem:[%s12807_s14 + $0x50] sm:$0xff] }
 0x4b8   : > { %8252 = vmatmul.mubr.msk.f32.gmra.mrb[2].mxu1 %vm906_vm1, %v1063_v22 }
 0x4b9   : > { %8262 = vmatprep.mubr.msk.f32.mxu1 %vm906_vm1, %v1060_v10  ;;  %v8714_v10 = vpack.c.bf16 %v1536_v57, %v1535_v58 }
 0x4bc   : > { %8263 = vmatmul.mubr.msk.f32.vlgmr.msra.gmra.mrb[4].mxu1 %vm906_vm1, %v1061_v15  ;;  %v1706_v15 = vld [vmem:[%s12803_s10 + $0x40] sm:$0xff] }
 0x4bd   : > { %8265 = vmatprep.mubr.msk.f32.mxu1 %vm906_vm1, %v1062_v18  ;;  %v9872_v17 = vpack.c.bf16 %v1707_v16, %v1706_v15 }
 0x4c0   : > { %8266 = vmatmul.mubr.msk.f32.gmra.mrb[6].mxu1 %vm906_vm1, %v1063_v22  ;;  %v1447_v22 = vld [vmem:[%s12800_s7] sm:$0xf] }
 0x4c1   : > { %8276 = vmatprep.mubr.msk.f32.mxu1 %vm906_vm1, %v984_v23  ;;  %v1484_v5 = vrot.slane %v1447_v22, %v9885_v43 }
 0x583   : > { %v8250_v24 = vpop.f32.mrb[0].mxu1 }
 0x584   : > { %v1146_v25 = vpop.f32.mrb[1].mxu1 }
 0x585   : > { %v8694_v27 = vpack.c.bf16 %v8250_v24, %v1146_v25  ;;  %v1452_v24 = vrot.slane %v1447_v22, %v9634_v35 }
 0x587   : > { %8695 = vmatprep.subr.bf16.mxu1 %v8694_v27 }
 0x588   : > { %8697 = vmatpush3.bf16.msra.mxu1 %v8694_v27  ;;  %v1460_v27 = vrot.slane %v1447_v22, %v9637_v36 }
 0x58b   : > { %v8253_v28 = vpop.f32.mrb[2].mxu1 }
 0x58c   : > { %v1156_v29 = vpop.f32.mrb[3].mxu1 }
 0x58d   : > { %v8698_v31 = vpack.c.bf16 %v8253_v28, %v1156_v29 }
 0x58f   : > { %v9750_v32 = vpop.f32.mrb[4].mxu1  ;;  %8699 = vmatprep.subr.bf16.mxu1 %v8698_v31 }
 0x590   : > { %v9752_v33 = vpop.f32.mrb[5].mxu1  ;;  %8701 = vmatpush3.bf16.msra.mxu1 %v8698_v31 }
 0x591   : > { %8703 = vmatprep.subr.bf16.mxu1 %v8702_v63  ;;  %v7873_v26 = vmul.f32 -1.442695, %v9752_v33 }
 0x593   : > { %v9760_v38 = vpop.f32.mrb[6].mxu1  ;;  %8277 = vmatmul.mubr.msk.f32.vlgmr.msra.gmra.mrb[8].mxu1 %vm906_vm1, %v985_v34 }
 0x594   : > { %v9763_v39 = vpop.f32.mrb[7].mxu1  ;;  %8279 = vmatprep.mubr.msk.f32.mxu1 %vm906_vm1, %v986_v37  ;;  %8705 = vmatpush3.bf16.msra.mxu1 %v8702_v63  ;;  %v9881_v37 = vsub.s32 2, %v9631_v30 }
 0x595   : > { %8707 = vmatprep.subr.bf16.mxu1 %v8706_v3 }
 0x596   : > { %12909 = vst [vmem:[#allocation17_spill] sm:$0xff] %v9881_v37 }
 0x597   : > { %8280 = vmatmul.mubr.msk.f32.gmra.mrb[10].mxu1 %vm906_vm1, %v987_v40 }
 0x598   : > { %8282 = vmatprep.mubr.msk.f32.mxu1 %vm906_vm1, %v988_v41  ;;  %8709 = vmatpush3.bf16.msra.mxu1 %v8706_v3 }
 0x599   : > { %8711 = vmatprep.subr.bf16.mxu1 %v8710_v45 }
 0x59b   : > { %8283 = vmatmul.mubr.msk.f32.gmra.mrb[12].mxu1 %vm906_vm1, %v989_v46 }
 0x59c   : > { %8285 = vmatprep.mubr.msk.f32.mxu1 %vm906_vm1, %v990_v47  ;;  %8713 = vmatpush3.bf16.msra.mxu1 %v8710_v45 }
 0x59d   : > { %8715 = vmatprep.subr.bf16.mxu1 %v8714_v10 }
 0x59f   : > { %8286 = vmatmul.mubr.msk.f32.gmra.mrb[14].mxu1 %vm906_vm1, %v991_v48 }
 0x5a0   : > { %8288 = vmatprep.mubr.msk.f32.mxu1 %vm906_vm1, %v992_v49  ;;  %8717 = vmatpush3.bf16.msra.mxu1 %v8714_v10 }
 0x5a1   : > { %8735 = vmatprep.subr.bf16.mxu1 %v9872_v17 }
 0x5a3   : > { %8289 = vmatmul.mubr.msk.f32.gmra.mrb[16].mxu1 %vm906_vm1, %v993_v50 }
 0x5a4   : > { %8291 = vmatprep.mubr.msk.f32.mxu1 %vm906_vm1, %v994_v51 }
 0x5a7   : > { %8292 = vmatmul.mubr.msk.f32.gmra.mrb[18].mxu1 %vm906_vm1, %v995_v52  ;;  %v1472_v52 = vrot.slane %v1447_v22, %v9881_v37 }
 0x5a8   : > { %8294 = vmatprep.mubr.msk.f32.mxu1 %vm906_vm1, %v996_v53 }
 0x5ab   : > { %8295 = vmatmul.mubr.msk.f32.gmra.mrb[20].mxu1 %vm906_vm1, %v997_v56 }
 0x5ac   : > { %8297 = vmatprep.mubr.msk.f32.mxu1 %vm906_vm1, %v998_v59 }
 0x5af   : > { %8298 = vmatmul.mubr.msk.f32.gmra.mrb[22].mxu1 %vm906_vm1, %v999_v60 }
 0x666   : > { %v8278_v18 = vpop.f32.mrb[8].mxu1 }
 0x667   : > { %v1368_v20 = vpop.f32.mrb[9].mxu1  ;;  %v1454_v29 = vmul.f32 %v8278_v18, %v1452_v24 }
 0x668   : > { %v1453_v40 = vmul.f32 %v1452_v24, %v1368_v20 }
 0x66a   : > { %v8281_v23 = vpop.f32.mrb[10].mxu1 }
 0x66b   : > { %v1378_v25 = vpop.f32.mrb[11].mxu1  ;;  %v1456_v49 = vmul.f32 %v8281_v23, %v1452_v24 }
 0x66c   : > { %v1455_v53 = vmul.f32 %v1452_v24, %v1378_v25 }
 0x66e   : > { %v8284_v28 = vpop.f32.mrb[12].mxu1 }
 0x66f   : > { %v1462_v31 = vmul.f32 %v8284_v28, %v1460_v27  ;;  %v1388_v34 = vpop.f32.mrb[13].mxu1 }
 0x670   : > { %v1461_v41 = vmul.f32 %v1460_v27, %v1388_v34 }
 0x671   : > { %v1466_v46 = vadd.f32 %v1462_v31, %v1454_v29 }
 0x672   : > { %v1465_v47 = vadd.f32 %v1461_v41, %v1453_v40  ;;  %v8287_v48 = vpop.f32.mrb[14].mxu1 }
 0x673   : > { %v1464_v50 = vmul.f32 %v8287_v48, %v1460_v27  ;;  %v1398_v51 = vpop.f32.mrb[15].mxu1 }
 0x674   : > { %v1463_v56 = vmul.f32 %v1460_v27, %v1398_v51 }
 0x675   : > { %v1468_v59 = vadd.f32 %v1464_v50, %v1456_v49 }
 0x676   : > { %v1467_v60 = vadd.f32 %v1463_v56, %v1455_v53  ;;  %v8290_v61 = vpop.f32.mrb[16].mxu1  ;;  %v1709_v53 = vld [vmem:[%s12803_s10 + $0x58] sm:$0xff] }
 0x677   : > { %v1474_v62 = vmul.f32 %v8290_v61, %v1472_v52  ;;  %v1408_v63 = vpop.f32.mrb[17].mxu1 }
 0x678   : > { %v1473_v0 = vmul.f32 %v1472_v52, %v1408_v63  ;;  %v1710_v63 = vld [vmem:[%s12803_s10 + $0x60] sm:$0xff] }
 0x679   : > { %v1478_v1 = vadd.f32 %v1474_v62, %v1466_v46 }
 0x67a   : > { %v1477_v2 = vadd.f32 %v1473_v0, %v1465_v47  ;;  %v8293_v42 = vpop.f32.mrb[18].mxu1  ;;  %v1711_v0 = vld [vmem:[%s12803_s10 + $0x68] sm:$0xff] }
 0x67b   : > { %v1476_v3 = vmul.f32 %v8293_v42, %v1472_v52  ;;  %v1418_v4 = vpop.f32.mrb[19].mxu1 }
 0x67c   : > { %v1475_v6 = vmul.f32 %v1472_v52, %v1418_v4  ;;  %v1708_v52 = vld [vmem:[%s12803_s10 + $0x50] sm:$0xff] }
 0x67d   : > { %v1480_v54 = vadd.f32 %v1476_v3, %v1468_v59  ;;  %v8738_v61 = vpack.c.bf16 %v1709_v53, %v1708_v52  ;;  %v8742_v3 = vpack.c.bf16 %v1711_v0, %v1710_v63  ;;  %v1712_v4 = vld [vmem:[%s12803_s10 + $0x70] sm:$0xff]  ;;  %v9993_v53 = vsub.s32 5, %v9631_v30 }
 0x67e   : > { %v1479_v45 = vadd.f32 %v1475_v6, %v1467_v60  ;;  %v8296_v44 = vpop.f32.mrb[20].mxu1  ;;  %v1540_v6 = vrot.slane %v9891_v55, %v9637_v36 }
 0x67f   : > { %v1486_v7 = vmul.f32 %v8296_v44, %v1484_v5  ;;  %v1428_v58 = vpop.f32.mrb[21].mxu1  ;;  %12912 = vst [vmem:[#allocation20_spill] sm:$0xff] %v9993_v53 }
 0x680   : > { %v1485_v57 = vmul.f32 %v1484_v5, %v1428_v58 }
 0x681   : > { %v1490_v10 = vadd.f32 %v1486_v7, %v1478_v1 }
 0x682   : > { %v1489_v11 = vadd.f32 %v1485_v57, %v1477_v2  ;;  %v8299_v12 = vpop.f32.mrb[22].mxu1 }
 0x683   : > { %v1498_v14 = vadd.f32 %v1496_v9, %v1490_v10  ;;  %v1488_v15 = vmul.f32 %v8299_v12, %v1484_v5  ;;  %v1438_v16 = vpop.f32.mrb[23].mxu1 }
 0x684   : > { %v1497_v18 = vadd.f32 %v1496_v9, %v1489_v11  ;;  %v1487_v20 = vmul.f32 %v1484_v5, %v1438_v16  ;;  %v1713_v5 = vld [vmem:[%s12803_s10 + $0x78] sm:$0xff] }
 0x685   : > { %v7858_v22 = vmul.f32 -1.442695, %v1498_v14  ;;  %v1492_v23 = vadd.f32 %v1488_v15, %v1480_v54 }
 0x686   : > { %v7857_v24 = vmul.f32 -1.442695, %v1497_v18  ;;  %v1491_v25 = vadd.f32 %v1487_v20, %v1479_v45 }
 0x687   : > { %8981 = vpow2.f32 %v7858_v22  ;;  %v1500_v27 = vadd.f32 %v1496_v9, %v1492_v23 }
 0x688   : > { %8983 = vpow2.f32 %v7857_v24  ;;  %v1499_v28 = vadd.f32 %v1496_v9, %v1491_v25 }
 0x689   : > { %v7860_v29 = vmul.f32 -1.442695, %v1500_v27 }
 0x68a   : > { %v7859_v31 = vmul.f32 -1.442695, %v1499_v28 }
 0x68b   : > { %8985 = vpow2.f32 %v7860_v29 }
 0x68c   : > { %8987 = vpow2.f32 %v7859_v31 }
 0x691   : > { %v8982_v34 = vpop.eup %8981 }
 0x692   : > { %v8984_v40 = vpop.eup %8983  ;;  %v1514_v41 = vadd.f32 1.0, %v8982_v34 }
 0x693   : > { %v1513_v46 = vadd.f32 1.0, %v8984_v40 }
 0x694   : > { %8989 = vrcp.f32 %v1514_v41 }
 0x695   : > { %v8986_v47 = vpop.eup %8985  ;;  %8991 = vrcp.f32 %v1513_v46 }
 0x696   : > { %v8988_v48 = vpop.eup %8987  ;;  %v1516_v49 = vadd.f32 1.0, %v8986_v47  ;;  %v9982_v47 = vsub.s32 4, %v9631_v30 }
 0x697   : > { %v1515_v50 = vadd.f32 1.0, %v8988_v48 }
 0x698   : > { %8993 = vrcp.f32 %v1516_v49  ;;  %12911 = vst [vmem:[#allocation19_spill] sm:$0xff] %v9982_v47 }
 0x699   : > { %8995 = vrcp.f32 %v1515_v50 }
 0x69e   : > { %v8990_v51 = vpop.eup %8989 }
 0x69f   : > { %v8992_v56 = vpop.eup %8991  ;;  %v9903_v60 = vmul.f32 %v8990_v51, %v1498_v14 }
 0x6a0   : > { %v9901_v59 = vmul.f32 %v8992_v56, %v1497_v18 }
 0x6a2   : > { %v8994_v62 = vpop.eup %8993  ;;  %8316 = vmatprep.mubr.msk.f32.mxu1 %vm666_vm0, %v9901_v59  ;;  %8338 = vmatprep.mubr.msk.f32.mxu0 %vm666_vm0, %v9901_v59 }
 0x6a3   : > { %v8996_v1 = vpop.eup %8995  ;;  %8317 = vmatmul.mubr.msk.f32.vlgmr.msra.gmra.mrb[24].mxu1 %vm666_vm0, %v9903_v60  ;;  %8339 = vmatmul.mubr.msk.f32.vlgmr.msra.gmra.mrb[8].mxu0 %vm666_vm0, %v9903_v60  ;;  %v9922_v42 = vmul.f32 %v8994_v62, %v1500_v27 }
 0x6a4   : > { %v9919_v2 = vmul.f32 %v8996_v1, %v1499_v28  ;;  %8737 = vmatpush3.bf16.msra.mxu1 %v9872_v17  ;;  %v8746_v17 = vpack.c.bf16 %v1713_v5, %v1712_v4 }
 0x6a5   : > { %8739 = vmatprep.subr.bf16.mxu1 %v8738_v61 }
 0x6a6   : > { %8319 = vmatprep.mubr.msk.f32.mxu1 %vm666_vm0, %v9919_v2  ;;  %8341 = vmatprep.mubr.msk.f32.mxu0 %vm666_vm0, %v9919_v2 }
 0x6a7   : > { %8320 = vmatmul.mubr.msk.f32.gmra.mrb[26].mxu1 %vm666_vm0, %v9922_v42  ;;  %8342 = vmatmul.mubr.msk.f32.gmra.mrb[10].mxu0 %vm666_vm0, %v9922_v42 }
 0x6a8   : > { %8741 = vmatpush3.bf16.msra.mxu1 %v8738_v61  ;;  %8360 = vmatprep.mubr.msk.f32.mxu1 %vm666_vm0, %v9901_v59 }
 0x6a9   : > { %8743 = vmatprep.subr.bf16.mxu1 %v8742_v3 }
 0x6ac   : > { %8745 = vmatpush3.bf16.msra.mxu1 %v8742_v3  ;;  %v10004_v3 = vsub.s32 6, %v9631_v30 }
 0x6ad   : > { %8747 = vmatprep.subr.bf16.mxu1 %v8746_v17 }
 0x6ae   : > { %12913 = vst [vmem:[#allocation21_spill] sm:$0xff] %v10004_v3 }
 0x6b0   : > { %8749 = vmatpush3.bf16.msra.mxu1 %v8746_v17 }
 0x6b3   : > { %8361 = vmatmul.mubr.msk.f32.vlgmr.msra.gmra.mrb[28].mxu1 %vm666_vm0, %v9903_v60 }
 0x6b4   : > { %8363 = vmatprep.mubr.msk.f32.mxu1 %vm666_vm0, %v9919_v2 }
 0x6b7   : > { %8364 = vmatmul.mubr.msk.f32.gmra.mrb[30].mxu1 %vm666_vm0, %v9922_v42 }
 0x776   : > { %v8318_v54 = vpop.f32.mrb[24].mxu1  ;;  %v9948_v45 = vpop.f32.mrb[8].mxu0 }
 0x777   : > { %v9950_v44 = vadd.f32 %v8318_v54, %v1540_v6  ;;  %v1619_v7 = vpop.f32.mrb[25].mxu1  ;;  %v9952_v9 = vpop.f32.mrb[9].mxu0  ;;  %v2404_v58 = vrot.slane %v9948_v45, %v9634_v35  ;;  %v2411_v22 = vrot.slane %v9948_v45, %v9637_v36  ;;  %v2418_v31 = vrot.slane %v9948_v45, %v9881_v37 }
 0x778   : > { %v9956_v57 = vadd.f32 %v1619_v7, %v1540_v6  ;;  %v2348_v10 = vrot.slane %v9952_v9, %v9634_v35  ;;  %v2425_v46 = vrot.slane %v9948_v45, %v9885_v43  ;;  %v2432_v52 = vrot.slane %v9948_v45, %v9982_v47 }
 0x779   : > { %v1643_v11 = vand.u32 2147483647, %v9950_v44  ;;  %2406 = vbcast.lane.b32.xlu1 %v2404_v58, 256  ;;  %v2439_v1 = vrot.slane %v9948_v45, %v9993_v53  ;;  %v9324_v54 = vmov 1966171168  }
 0x77a   : > { %2350 = vbcast.lane.b32.xlu0 %v2348_v10, 256  ;;  %v8321_v12 = vpop.f32.mrb[26].mxu1  ;;  %v9961_v14 = vpop.f32.mrb[10].mxu0  ;;  %v1894_v7 = vunpack.c.l.s4 %v9324_v54 }
 0x77b   : > { %v1647_v15 = vsub.f32 0.0, %v1643_v11  ;;  %v9963_v16 = vadd.f32 %v8321_v12, %v1540_v6  ;;  %v1629_v18 = vpop.f32.mrb[27].mxu1  ;;  %v9965_v20 = vpop.f32.mrb[11].mxu0  ;;  %v2516_v23 = vrot.slane %v9961_v14, %v9634_v35  ;;  %v2523_v34 = vrot.slane %v9961_v14, %v9637_v36 }
 0x77c   : > { %v9971_v24 = vadd.f32 %v1629_v18, %v1540_v6  ;;  %v2530_v48 = vrot.slane %v9961_v14, %v9881_v37  ;;  %v2537_v56 = vrot.slane %v9961_v14, %v9885_v43  ;;  %v2544_v4 = vrot.slane %v9961_v14, %v9982_v47 }
 0x77d   : > { %v1652_v25 = vmul.f32 1.442695, %v1647_v15  ;;  %v1645_v27 = vand.u32 2147483647, %v9963_v16  ;;  %2413 = vbcast.lane.b32.xlu1 %v2411_v22, 256  ;;  %v2446_v6 = vrot.slane %v9948_v45, %v10004_v3  ;;  %v2551_v58 = vrot.slane %v9961_v14, %v9993_v53 }
 0x77e   : > { %v1644_v28 = vand.u32 2147483647, %v9971_v24  ;;  %2518 = vbcast.lane.b32.xlu0 %v2516_v23, 256  ;;  %v2355_v15 = vrot.slane %v9952_v9, %v9637_v36  ;;  %v1895_v18 = vunpack.c.0.s8 %v1894_v7  ;;  %v2558_v23 = vrot.slane %v9961_v14, %v10004_v3 }
 0x77f   : > { %8997 = vpow2.f32 %v1652_v25  ;;  %v1649_v29 = vsub.f32 0.0, %v1645_v27  ;;  %v1642_v25 = vand.u32 2147483647, %v9956_v57  ;;  %v2376_v7 = vrot.slane %v9952_v9, %v9982_v47 }
 0x780   : > { %v1648_v41 = vsub.f32 0.0, %v1644_v28 }
 0x781   : > { %v1656_v40 = vmul.f32 1.442695, %v1649_v29  ;;  %2420 = vbcast.lane.b32.xlu1 %v2418_v31, 256 }
 0x782   : > { %2525 = vbcast.lane.b32.xlu0 %v2523_v34, 256  ;;  %v1654_v49 = vmul.f32 1.442695, %v1648_v41  ;;  %v2362_v34 = vrot.slane %v9952_v9, %v9881_v37  ;;  %v1639_v41 = vmax.f32 %v9950_v44, 0.0 }
 0x783   : > { %8999 = vpow2.f32 %v1656_v40  ;;  %v10026_v40 = vsub.s32 %v1895_v18, %v9631_v30 }
 0x784   : > { %9001 = vpow2.f32 %v1654_v49  ;;  %v1646_v49 = vsub.f32 0.0, %v1642_v25 }
 0x785   : > { %2427 = vbcast.lane.b32.xlu1 %v2425_v46, 256  ;;  %12914 = vst [vmem:[#allocation22_spill] sm:$0xff] %v10026_v40  ;;  %v2467_v46 = vrot.slane %v9965_v20, %v9637_v36 }
 0x786   : > { %v9986_v50 = vpop.f32.mrb[28].mxu1  ;;  %2532 = vbcast.lane.b32.xlu0 %v2530_v48, 256 }
 0x787   : > { %v9988_v51 = vpop.f32.mrb[29].mxu1  ;;  %v3179_v19 = vrot.slane %v9986_v50, %v9634_v35 }
 0x789   : > { %v8998_v61 = vpop.eup %8997  ;;  %2434 = vbcast.lane.b32.xlu1 %v2432_v52, 256 }
 0x78a   : > { %v1667_v62 = vadd.f32 1.0, %v8998_v61  ;;  %v9997_v63 = vpop.f32.mrb[30].mxu1  ;;  %2539 = vbcast.lane.b32.xlu0 %v2537_v56, 256  ;;  %v1670_v17 = vmul.f32 -0.5, %v8998_v61  ;;  %v1673_v22 = vand.u32 2147483647, %v8998_v61  ;;  %v2369_v56 = vrot.slane %v9952_v9, %v9885_v43 }
 0x78b   : > { %v9999_v0 = vpop.f32.mrb[31].mxu1 }
 0x78c   : > { %9003 = vlog2.f32 %v1667_v62  ;;  %v1671_v12 = vadd.f32 1.0, %v1670_v17  ;;  %vm1674_vm2 = vcmp.lt.f32.partialorder %v1673_v22, 0.0004427343 }
 0x78d   : > { %2441 = vbcast.lane.b32.xlu1 %v2439_v1, 256  ;;  %v10008_v5 = vpop.eup %8999  ;;  %v2474_v1 = vrot.slane %v9965_v20, %v9881_v37 }
 0x78e   : > { %2546 = vbcast.lane.b32.xlu0 %v2544_v4, 256  ;;  %v1685_v10 = vadd.f32 1.0, %v10008_v5  ;;  %v10015_v11 = vpop.eup %9001  ;;  %v1672_v31 = vmul.f32 %v8998_v61, %v1671_v12  ;;  %v1688_v62 = vmul.f32 -0.5, %v10008_v5  ;;  %v1650_v4 = vmul.f32 1.442695, %v1646_v49 }
 0x78f   : > { %v1676_v28 = vadd.f32 1.0, %v10015_v11  ;;  %v1691_v22 = vand.u32 2147483647, %v10008_v5 }
 0x790   : > { %9005 = vlog2.f32 %v1685_v10  ;;  %v1689_v18 = vadd.f32 1.0, %v1688_v62 }
 0x791   : > { %2448 = vbcast.lane.b32.xlu1 %v2446_v6, 256  ;;  %9007 = vlog2.f32 %v1676_v28  ;;  %vm1692_vm3 = vcmp.lt.f32.partialorder %v1691_v22, 0.0004427343  ;;  %v2495_v22 = vrot.slane %v9965_v20, %v9993_v53 }
 0x792   : > { %2553 = vbcast.lane.b32.xlu0 %v2551_v58, 256  ;;  %v2481_v58 = vrot.slane %v9965_v20, %v9885_v43  ;;  %9009 = vpow2.f32 %v1650_v4  ;;  %v1690_v62 = vmul.f32 %v10008_v5, %v1689_v18  ;;  %v1641_v5 = vmax.f32 %v9963_v16, 0.0 }
 0x793   : > { %v10094_v18 = vsub.s32 7, %v9631_v30  ;;  %v2502_v30 = vrot.slane %v9965_v20, %v10004_v3 }
 0x795   : > { %2357 = vbcast.lane.b32.xlu1 %v2355_v15, 256  ;;  %12915 = vst [vmem:[#allocation23_spill] sm:$0xff] %v10094_v18 }
 0x796   : > { %v9004_v27 = vpop.eup %9003  ;;  %2560 = vbcast.lane.b32.xlu0 %v2558_v23, 256  ;;  %v1679_v23 = vmul.f32 -0.5, %v10015_v11 }
 0x797   : > { %v1669_v29 = vmul.f32 0.6931472, %v9004_v27 }
 0x798   : > { %v1680_v4 = vadd.f32 1.0, %v1679_v23 }
 0x799   : > { %v1675_v48 = vsel %vm1674_vm2, %v1672_v31, %v1669_v29  ;;  %2364 = vbcast.lane.b32.xlu1 %v2362_v34, 256  ;;  %v2383_v34 = vrot.slane %v9952_v9, %v9993_v53 }
 0x79a   : > { %v10031_v52 = vadd.f32 %v1675_v48, %v1639_v41  ;;  %2469 = vbcast.lane.b32.xlu0 %v2467_v46, 256  ;;  %v9006_v54 = vpop.eup %9005  ;;  %v2488_v41 = vrot.slane %v9965_v20, %v9982_v47  ;;  %v10070_v48 = vld [vmem:[%s12804_s11] sm:$0xff] }
 0x79b   : > { %v1687_v29 = vmul.f32 0.6931472, %v9006_v54  ;;  %v9008_v46 = vpop.eup %9007 }
 0x79c   : > { %v1941_v61 = vcombine.high %v10031_v52, %v10031_v52  ;;  %v10039_v44 = vrot.slane %v10031_v52, %v10026_v40 }
 0x79d   : > { %2371 = vbcast.lane.b32.xlu1 %v2369_v56, 256 }
 0x79e   : > { %v1955_v17 = vrot.slane %v1941_v61, %v10026_v40  ;;  %v1956_v6 = vcombine.high %v10039_v44, %v10039_v44  ;;  %2476 = vbcast.lane.b32.xlu0 %v2474_v1, 256 }
 0x7a0   : > { %v1957_v10 = vcombine.high %v1955_v17, %v1955_v17  ;;  %v1971_v12 = vrot.slane %v1955_v17, %v10026_v40  ;;  %v10053_v15 = vrot.slane %v1956_v6, %v10026_v40  ;;  %v1682_v17 = vand.u32 2147483647, %v10015_v11 }
 0x7a1   : > { %2378 = vbcast.lane.b32.xlu1 %v2376_v7, 256 }
 0x7a2   : > { %v10058_v25 = vrot.slane %v1957_v10, %v10026_v40  ;;  %v1987_v27 = vcombine.high %v1971_v12, %v1971_v12  ;;  %v1988_v28 = vcombine.high %v10053_v15, %v10053_v15  ;;  %2483 = vbcast.lane.b32.xlu0 %v2481_v58, 256  ;;  %v2140_v31 = vrot.slane %v1971_v12, %v9634_v35 }
 0x7a3   : > { %v1693_v58 = vsel %vm1692_vm3, %v1690_v62, %v1687_v29  ;;  %v1678_v10 = vmul.f32 0.6931472, %v9008_v46  ;;  %v2390_v12 = vrot.slane %v9952_v9, %v10004_v3  ;;  %vm1683_vm4 = vcmp.lt.f32.partialorder %v1682_v17, 0.0004427343 }
 0x7a4   : > { %v2136_v49 = vrot.slane %v1988_v28, %v9634_v35  ;;  %v2144_v56 = vrot.slane %v10058_v25, %v9634_v35  ;;  %v2148_v61 = vrot.slane %v1987_v27, %v9634_v35  ;;  %v10078_v1 = vmul.f32 %v2140_v31, %v10070_v48  ;;  %v10101_v28 = vpop.eup %9009 }
 0x7a5   : > { %2385 = vbcast.lane.b32.xlu1 %v2383_v34, 256  ;;  %v10098_v23 = vadd.f32 %v1693_v58, %v1641_v5  ;;  %v1681_v27 = vmul.f32 %v10015_v11, %v1680_v4  ;;  %v2397_v29 = vrot.slane %v9952_v9, %v10094_v18  ;;  %v1640_v31 = vmax.f32 %v9971_v24, 0.0 }
 0x7a6   : > { %v10082_v6 = vmul.f32 %v2136_v49, %v10070_v48  ;;  %v10085_v54 = vmul.f32 %v2144_v56, %v10070_v48  ;;  %v10088_v7 = vmul.f32 %v2148_v61, %v10070_v48  ;;  %2490 = vbcast.lane.b32.xlu0 %v2488_v41, 256  ;;  %v1658_v11 = vadd.f32 1.0, %v10101_v28 }
 0x7a7   : > { %v1684_v16 = vsel %vm1683_vm4, %v1681_v27, %v1678_v10  ;;  %v2039_v34 = vcombine.high %v10098_v23, %v10098_v23  ;;  %v2046_v41 = vrot.slane %v10098_v23, %v10026_v40  ;;  %v2460_v9 = vrot.slane %v9965_v20, %v9634_v35 }
 0x7a8   : > { %v10113_v46 = vadd.f32 %v1684_v16, %v1640_v31  ;;  %v2509_v61 = vrot.slane %v9965_v20, %v10094_v18  ;;  %v2453_v62 = vrot.slane %v9948_v45, %v10094_v18  ;;  %v3186_v5 = vrot.slane %v9986_v50, %v9637_v36 }
 0x7a9   : > { %2392 = vbcast.lane.b32.xlu1 %v2390_v12, 256  ;;  %v2053_v49 = vrot.slane %v2039_v34, %v10026_v40  ;;  %v2054_v24 = vcombine.high %v2046_v41, %v2046_v41  ;;  %v2062_v56 = vrot.slane %v2046_v41, %v10026_v40  ;;  %9011 = vlog2.f32 %v1658_v11 }
 0x7aa   : > { %2497 = vbcast.lane.b32.xlu0 %v2495_v22, 256  ;;  %v1990_v58 = vcombine.high %v10113_v46, %v10113_v46  ;;  %v10136_v16 = vrot.slane %v10113_v46, %v10026_v40  ;;  %vm9325_vm3 = vmmov 0   ;;  %vm7743_vm4 = vcmask 123904  }
 0x7ab   : > { %v2055_v4 = vcombine.high %v2053_v49, %v2053_v49  ;;  %v2069_v17 = vrot.slane %v2053_v49, %v10026_v40  ;;  %v2076_v10 = vrot.slane %v2054_v24, %v10026_v40  ;;  %v2084_v12 = vcombine.high %v2062_v56, %v2062_v56 }
 0x7ac   : > { %v2188_v22 = vrot.slane %v2062_v56, %v9634_v35 }
 0x7ad   : > { %2399 = vbcast.lane.b32.xlu1 %v2397_v29, 256  ;;  %v10131_v20 = vrot.slane %v2055_v4, %v10026_v40  ;;  %v2085_v45 = vcombine.high %v2069_v17, %v2069_v17  ;;  %v2204_v27 = vrot.slane %v2069_v17, %v9634_v35  ;;  %v2086_v29 = vcombine.high %v2076_v10, %v2076_v10 }
 0x7ae   : > { %2504 = vbcast.lane.b32.xlu0 %v2502_v30, 256  ;;  %v2192_v31 = vrot.slane %v2076_v10, %v9634_v35  ;;  %v2196_v30 = vrot.slane %v2084_v12, %v9634_v35  ;;  %v10141_v34 = vmul.f32 %v2188_v22, %v10070_v48  ;;  %v2005_v10 = vcombine.high %v10136_v16, %v10136_v16 }
 0x7af   : > { %v2208_v11 = vrot.slane %v10131_v20, %v9634_v35  ;;  %v2212_v41 = vrot.slane %v2085_v45, %v9634_v35  ;;  %v10147_v49 = vmul.f32 %v2204_v27, %v10070_v48  ;;  %v2200_v24 = vrot.slane %v2086_v29, %v9634_v35 }
 0x7b0   : > { %v10152_v56 = vmul.f32 %v2192_v31, %v10070_v48  ;;  %v3200_v12 = vrot.slane %v9986_v50, %v9885_v43  ;;  %v1661_v45 = vmul.f32 -0.5, %v10101_v28  ;;  %v10175_v27 = vrot.slane %v2005_v10, %v10026_v40 }
 0x7b1   : > { %2462 = vbcast.lane.b32.xlu1 %v2460_v9, 256  ;;  %v2004_v9 = vrot.slane %v1990_v58, %v10026_v40  ;;  %v10158_v4 = vmul.f32 %v2208_v11, %v10070_v48  ;;  %v10161_v17 = vmul.f32 %v2212_v41, %v10070_v48  ;;  %v10168_v58 = vmul.f32 %v2200_v24, %v10070_v48 }
 0x7b2   : > { %2511 = vbcast.lane.b32.xlu0 %v2509_v61, 256  ;;  %v10155_v61 = vmul.f32 %v2196_v30, %v10070_v48  ;;  %v3207_v41 = vrot.slane %v9986_v50, %v9982_v47  ;;  %v7874_v24 = vmul.f32 -1.442695, %v9750_v32 }
 0x7b3   : > { %v2006_v22 = vcombine.high %v2004_v9, %v2004_v9  ;;  %v9012_v31 = vpop.eup %9011 }
 0x7b4   : > { %9013 = vpow2.f32 %v7874_v24 }
 0x7b5   : > { %2455 = vbcast.lane.b32.xlu1 %v2453_v62, 256  ;;  %v2565_v62 = vrot.slane %v9961_v14, %v10094_v18  ;;  %v10178_v29 = vrot.slane %v2006_v22, %v10026_v40  ;;  %v3193_v14 = vrot.slane %v9986_v50, %v9881_v37  ;;  %9015 = vpow2.f32 %v7873_v26 }
 0x7b6   : > { %3188 = vbcast.lane.b32.xlu0 %v3186_v5, 256  ;;  %v2020_v5 = vrot.slane %v2004_v9, %v10026_v40  ;;  %v2037_v9 = vcombine.high %v10175_v27, %v10175_v27  ;;  %v3151_v26 = vrot.slane %v9988_v51, %v9982_v47 }
 0x7b7   : > { %v2176_v10 = vrot.slane %v10178_v29, %v9634_v35 }
 0x7b8   : > { %v2036_v30 = vcombine.high %v2020_v5, %v2020_v5  ;;  %v2172_v11 = vrot.slane %v2020_v5, %v9634_v35  ;;  %v2168_v22 = vrot.slane %v2037_v9, %v9634_v35  ;;  %v3214_v9 = vrot.slane %v9986_v50, %v9993_v53 }
 0x7b9   : > { %2567 = vbcast.lane.b32.xlu1 %v2565_v62, 256  ;;  %v10200_v21 = vmul.f32 %v2176_v10, %v10070_v48  ;;  %v7876_v10 = vmul.f32 -1.442695, %v9760_v38 }
 0x7ba   : > { %3202 = vbcast.lane.b32.xlu0 %v3200_v12, 256  ;;  %v2180_v62 = vrot.slane %v2036_v30, %v9634_v35  ;;  %v1662_v12 = vadd.f32 1.0, %v1661_v45  ;;  %v10193_v5 = vmul.f32 %v2172_v11, %v10070_v48  ;;  %v1660_v30 = vmul.f32 0.6931472, %v9012_v31 }
 0x7bb   : > { %v10206_v45 = vmul.f32 %v2168_v22, %v10070_v48  ;;  %v3130_v11 = vrot.slane %v9988_v51, %v9637_v36  ;;  %v3144_v31 = vrot.slane %v9988_v51, %v9885_v43  ;;  %v1638_v22 = vmax.f32 %v9956_v57, 0.0 }
 0x7bc   : > { %v10203_v8 = vmul.f32 %v2180_v62, %v10070_v48  ;;  %9017 = vpow2.f32 %v7876_v10 }
 0x7bd   : > { %3195 = vbcast.lane.b32.xlu1 %v3193_v14, 256  ;;  %v1664_v14 = vand.u32 2147483647, %v10101_v28 }
 0x7be   : > { %3209 = vbcast.lane.b32.xlu0 %v3207_v41, 256  ;;  %v1663_v41 = vmul.f32 %v10101_v28, %v1662_v12  ;;  %v3221_v28 = vrot.slane %v9986_v50, %v10004_v3  ;;  %v3228_v12 = vrot.slane %v9986_v50, %v10094_v18  ;;  %v9014_v57 = vpop.eup %9013 }
 0x7bf   : > { %vm1665_vm5 = vcmp.lt.f32.partialorder %v1664_v14, 0.0004427343 }
 0x7c0   : > { %v1666_v62 = vsel %vm1665_vm5, %v1663_v41, %v1660_v30  ;;  %v3165_v30 = vrot.slane %v9988_v51, %v10004_v3  ;;  %v3137_v41 = vrot.slane %v9988_v51, %v9881_v37 }
 0x7c1   : > { %3181 = vbcast.lane.b32.xlu1 %v3179_v19, 256  ;;  %v7875_v19 = vmul.f32 -1.442695, %v9763_v39  ;;  %v10220_v24 = vadd.f32 %v1666_v62, %v1638_v22  ;;  %v3172_v62 = vrot.slane %v9988_v51, %v10094_v18  ;;  %v3123_v22 = vrot.slane %v9988_v51, %v9634_v35 }
 0x7c2   : > { %3132 = vbcast.lane.b32.xlu0 %v3130_v11, 256  ;;  %v9016_v11 = vpop.eup %9015 }
 0x7c3   : > { %9019 = vpow2.f32 %v7875_v19  ;;  %v10228_v14 = vrot.slane %v10220_v24, %v10026_v40  ;;  %v3716_v50 = vadd.f32 1.0, %v9016_v11  ;;  %v2038_v19 = vcombine.high %v10178_v29, %v10178_v29 }
 0x7c4   : > { %v3305_v29 = vrot.slane %v9997_v63, %v9881_v37 }
 0x7c5   : > { %3216 = vbcast.lane.b32.xlu1 %v3214_v9, 256  ;;  %v3717_v9 = vadd.f32 1.0, %v9014_v57  ;;  %v10236_v10 = vrot.slane %v10228_v14, %v10026_v40 }
 0x7c6   : > { %3146 = vbcast.lane.b32.xlu0 %v3144_v31, 256  ;;  %v9018_v31 = vpop.eup %9017 }
 0x7c7   : > { %9021 = vrcp.f32 %v3717_v9  ;;  %v3719_v57 = vadd.f32 1.0, %v9018_v31  ;;  %v3158_v9 = vrot.slane %v9988_v51, %v9993_v53  ;;  %v3298_v31 = vrot.slane %v9997_v63, %v9637_v36 }
 0x7c8   : > { %9023 = vrcp.f32 %v3716_v50 }
 0x7c9   : > { %3223 = vbcast.lane.b32.xlu1 %v3221_v28, 256  ;;  %9025 = vrcp.f32 %v3719_v57 }
 0x7ca   : > { %3153 = vbcast.lane.b32.xlu0 %v3151_v26, 256  ;;  %v1989_v26 = vcombine.high %v10058_v25, %v10058_v25 }
 0x7cc   : > { %v2152_v25 = vrot.slane %v1989_v26, %v9634_v35 }
 0x7cd   : > { %3230 = vbcast.lane.b32.xlu1 %v3228_v12, 256  ;;  %v9020_v28 = vpop.eup %9019  ;;  %v2092_v12 = vrot.slane %v10236_v10, %v9634_v35 }
 0x7ce   : > { %3167 = vbcast.lane.b32.xlu0 %v3165_v30, 256  ;;  %v2087_v30 = vcombine.high %v10131_v20, %v10131_v20  ;;  %v3718_v11 = vadd.f32 1.0, %v9020_v28  ;;  %v3312_v20 = vrot.slane %v9997_v63, %v9885_v43  ;;  %v3319_v28 = vrot.slane %v9997_v63, %v9982_v47 }
 0x7d0   : > { %v2216_v50 = vrot.slane %v2087_v30, %v9634_v35  ;;  %9027 = vrcp.f32 %v3718_v11  ;;  %v10275_v30 = vmul.f32 %v10220_v24, %v9901_v59 }
 0x7d1   : > { %3139 = vbcast.lane.b32.xlu1 %v3137_v41, 256  ;;  %v2184_v41 = vrot.slane %v2038_v19, %v9634_v35 }
 0x7d2   : > { %3174 = vbcast.lane.b32.xlu0 %v3172_v62, 256  ;;  %v2249_v62 = vmul.f32 %v2092_v12, %v10070_v48  ;;  %v10271_v26 = vmul.f32 %v2216_v50, %v10070_v48  ;;  %v9022_v12 = vpop.eup %9021  ;;  %v10291_v50 = vrot.slane %v10275_v30, %v10026_v40 }
 0x7d3   : > { %v10263_v19 = vmul.f32 %v2184_v41, %v10070_v48  ;;  %v9024_v57 = vpop.eup %9023  ;;  %v10280_v11 = vmul.f32 %v9022_v12, %v9750_v32  ;;  %v3326_v41 = vrot.slane %v9997_v63, %v9993_v53  ;;  %v3249_v32 = vrot.slane %v9999_v0, %v9881_v37 }
 0x7d4   : > { %v2281_v51 = vmul.f32 1.442695, %v2249_v62  ;;  %v3242_v62 = vrot.slane %v9999_v0, %v9637_v36  ;;  %v1907_v12 = vcombine.high %v10228_v14, %v10228_v14 }
 0x7d5   : > { %3125 = vbcast.lane.b32.xlu1 %v3123_v22, 256  ;;  %v10266_v22 = vmul.f32 %v2152_v25, %v10070_v48  ;;  %12916 = vst [vmem:[#allocation24_spill] sm:$0xff] %v10280_v11  ;;  %v9026_v25 = vpop.eup %9025 }
 0x7d6   : > { %3307 = vbcast.lane.b32.xlu0 %v3305_v29, 256  ;;  %v3291_v29 = vrot.slane %v9997_v63, %v9634_v35  ;;  %9029 = vpow2.f32 %v2281_v51  ;;  %v3235_v51 = vrot.slane %v9999_v0, %v9634_v35 }
 0x7d9   : > { %3160 = vbcast.lane.b32.xlu1 %v3158_v9, 256  ;;  %v10285_v9 = vmul.f32 %v9024_v57, %v9752_v33  ;;  %v3270_v33 = vrot.slane %v9999_v0, %v9993_v53 }
 0x7da   : > { %3314 = vbcast.lane.b32.xlu0 %v3312_v20, 256  ;;  %v9028_v20 = vpop.eup %9027 }
 0x7db   : > { %12917 = vst [vmem:[#allocation25_spill] sm:$0xff] %v10285_v9 }
 0x7dd   : > { %3300 = vbcast.lane.b32.xlu1 %v3298_v31, 256 }
 0x7de   : > { %3321 = vbcast.lane.b32.xlu0 %v3319_v28, 256  ;;  %v10299_v28 = vmul.f32 %v9026_v25, %v9760_v38  ;;  %v10313_v38 = vmul.f32 %v9028_v20, %v9763_v39  ;;  %v10317_v25 = vrot.slane %v9891_v55, %v9881_v37  ;;  %v1964_v55 = vrot.slane %v10039_v44, %v10026_v40 }
 0x7df   : > { %v3263_v39 = vrot.slane %v9999_v0, %v9982_v47 }
 0x7e0   : > { %12918 = vst [vmem:[#allocation26_spill] sm:$0xff] %v10299_v28  ;;  %12919 = vst [vmem:[#allocation27_spill] sm:$0xff] %v10313_v38  ;;  %v9030_v20 = vpop.eup %9029  ;;  %v10342_v44 = vmul.f32 %v10317_v25, %v9903_v60  ;;  %v1986_v31 = vcombine.high %v1964_v55, %v1964_v55  ;;  %v2124_v57 = vrot.slane %v1964_v55, %v9634_v35 }
 0x7e1   : > { %3293 = vbcast.lane.b32.xlu1 %v3291_v29, 256  ;;  %v2961_v36 = vmul.f32 0.0, %v9030_v20  ;;  %v2128_v20 = vrot.slane %v10053_v15, %v9634_v35  ;;  %v3333_v15 = vrot.slane %v9997_v63, %v10004_v3  ;;  %v10405_v29 = vmul.f32 %v10317_v25, %v9919_v2 }
 0x7e2   : > { %3328 = vbcast.lane.b32.xlu0 %v3326_v41, 256  ;;  %v3256_v41 = vrot.slane %v9999_v0, %v9885_v43  ;;  %12920 = vst [vmem:[#allocation28_spill] sm:$0xff] %v10342_v44  ;;  %v1929_v43 = vrot.slane %v1907_v12, %v10026_v40 }
 0x7e3   : > { %12923 = vst [vmem:[#allocation31_spill] sm:$0xff] %v10405_v29 }
 0x7e5   : > { %3244 = vbcast.lane.b32.xlu1 %v3242_v62, 256  ;;  %v10308_v62 = vrot.slane %v10291_v50, %v10026_v40 }
 0x7e6   : > { %3251 = vbcast.lane.b32.xlu0 %v3249_v32, 256 }
 0x7e9   : > { %3258 = vbcast.lane.b32.xlu1 %v3256_v41, 256  ;;  %v2772_v41 = vrot.slane %v10308_v62, %v9634_v35 }
 0x7ea   : > { %3237 = vbcast.lane.b32.xlu0 %v3235_v51, 256  ;;  %v10355_v51 = vmul.f32 %v10317_v25, %v9901_v59  ;;  %v2258_v59 = vmul.f32 %v2128_v20, %v10070_v48 }
 0x7eb   : > { %v10332_v14 = vpop.permute.xlu1 %2406 }
 0x7ec   : > { %v2351_v32 = vpop.permute.xlu0 %2350  ;;  %12921 = vst [vmem:[#allocation29_spill] sm:$0xff] %v10355_v51 }
 0x7ed   : > { %v2929_v37 = vmul.f32 %v2772_v41, %v2351_v32  ;;  %3272 = vbcast.lane.b32.xlu1 %v3270_v33, 256  ;;  %v3277_v32 = vrot.slane %v9999_v0, %v10004_v3  ;;  %v1892_v41 = vcombine.high %v10220_v24, %v10220_v24 }
 0x7ee   : > { %3265 = vbcast.lane.b32.xlu0 %v3263_v39, 256  ;;  %v2132_v39 = vrot.slane %v1986_v31, %v9634_v35  ;;  %v10393_v31 = vmul.f32 %v10317_v25, %v9922_v42 }
 0x7ef   : > { %v10358_v12 = vadd.f32 %v2961_v36, %v2929_v37  ;;  %v10360_v33 = vpop.permute.xlu1 %2413  ;;  %v1937_v36 = vcombine.high %v10236_v10, %v10236_v10  ;;  %v2096_v37 = vrot.slane %v1929_v43, %v9634_v35  ;;  %v2257_v10 = vmul.f32 %v2124_v57, %v10070_v48 }
 0x7f0   : > { %v10368_v9 = vpop.permute.xlu0 %2518  ;;  %12922 = vst [vmem:[#allocation30_spill] sm:$0xff] %v10393_v31  ;;  %v1906_v13 = vrot.slane %v1892_v41, %v10026_v40  ;;  %v2259_v20 = vmul.f32 %v2132_v39, %v10070_v48  ;;  %v2303_v39 = vmul.f32 1.442695, %v10082_v6  ;;  %v2339_v41 = vmul.f32 1.442695, %v10158_v4 }
 0x7f1   : > { %2963 = vst.msk [vmem:[#allocation2] sm:$0xff] %vm666_vm0, %v10358_v12  ;;  %3279 = vbcast.lane.b32.xlu1 %v3277_v32, 256  ;;  %v3284_v32 = vrot.slane %v9999_v0, %v10094_v18  ;;  %v2100_v3 = vrot.slane %v1937_v36, %v9634_v35  ;;  %v2250_v0 = vmul.f32 %v2096_v37, %v10070_v48  ;;  %v2297_v38 = vmul.f32 1.442695, %v2257_v10 }
 0x7f2   : > { %3335 = vbcast.lane.b32.xlu0 %v3333_v15, 256  ;;  %v1939_v15 = vcombine.high %v1929_v43, %v1929_v43  ;;  %v3340_v43 = vrot.slane %v9997_v63, %v10094_v18  ;;  %v1908_v24 = vcombine.high %v1906_v13, %v1906_v13  ;;  %v1922_v47 = vrot.slane %v1906_v13, %v10026_v40 }
 0x7f3   : > { %v10385_v53 = vpop.permute.xlu1 %2420  ;;  %v2251_v28 = vmul.f32 %v2100_v3, %v10070_v48  ;;  %v2283_v63 = vmul.f32 1.442695, %v2250_v0  ;;  %v2301_v18 = vmul.f32 1.442695, %v2259_v20  ;;  %9031 = vpow2.f32 %v2297_v38 }
 0x7f4   : > { %v10397_v55 = vpop.permute.xlu0 %2525  ;;  %v2104_v10 = vrot.slane %v1939_v15, %v9634_v35  ;;  %v2305_v3 = vmul.f32 1.442695, %v10078_v1  ;;  %v1936_v0 = vrot.slane %v1908_v24, %v10026_v40  ;;  %v2108_v37 = vrot.slane %v1922_v47, %v9634_v35  ;;  %v3828_v1 = vld [vmem:[%s12805_s12] sm:$0xff]  ;;  %v3829_v24 = vld [vmem:[%s12805_s12 + $0x8] sm:$0xff] }
 0x7f5   : > { %3286 = vbcast.lane.b32.xlu1 %v3284_v32, 256  ;;  %v2299_v32 = vmul.f32 1.442695, %v2258_v59  ;;  %v2285_v38 = vmul.f32 1.442695, %v2251_v28  ;;  %v10454_v15 = vrot.slane %v10136_v16, %v10026_v40 }
 0x7f6   : > { %v2252_v6 = vmul.f32 %v2104_v10, %v10070_v48  ;;  %v2307_v13 = vmul.f32 1.442695, %v10085_v54  ;;  %v2309_v28 = vmul.f32 1.442695, %v10088_v7  ;;  %v1938_v10 = vcombine.high %v1922_v47, %v1922_v47 }
 0x7f7   : > { %v10410_v57 = vpop.permute.xlu1 %2427  ;;  %9033 = vpow2.f32 %v2299_v32  ;;  %v2588_v32 = vcombine.high %v10291_v50, %v10291_v50  ;;  %v8750_v54 = vpack.c.bf16 %v3829_v24, %v3828_v1  ;;  %v2329_v50 = vmul.f32 1.442695, %v10141_v34 }
 0x7f8   : > { %v10416_v25 = vpop.permute.xlu0 %2532  ;;  %9035 = vpow2.f32 %v2283_v63  ;;  %v1940_v63 = vcombine.high %v1936_v0, %v1936_v0  ;;  %v2112_v36 = vrot.slane %v1936_v0, %v9634_v35  ;;  %v2287_v7 = vmul.f32 1.442695, %v2252_v6 }
 0x7f9   : > { %3342 = vbcast.lane.b32.xlu1 %v3340_v43, 256  ;;  %9037 = vpow2.f32 %v2301_v18  ;;  %8751 = vmatprep.subr.bf16.mxu0 %v8750_v54  ;;  %v10461_v47 = vrot.slane %v2588_v32, %v10026_v40  ;;  %v2337_v16 = vmul.f32 1.442695, %v10147_v49  ;;  %v2035_v6 = vcombine.high %v10454_v15, %v10454_v15 }
 0x7fa   : > { %9039 = vpow2.f32 %v2303_v39  ;;  %v2253_v39 = vmul.f32 %v2108_v37, %v10070_v48  ;;  %8753 = vmatpush3.bf16.msra.mxu0 %v8750_v54  ;;  %v2120_v49 = vrot.slane %v1940_v63, %v9634_v35  ;;  %v2254_v54 = vmul.f32 %v2112_v36, %v10070_v48 }
 0x7fb   : > { %v10427_v11 = vpop.permute.xlu1 %2434  ;;  %9041 = vpow2.f32 %v2305_v3  ;;  %v10494_v63 = vmul.f32 %v10098_v23, %v9922_v42  ;;  %v2333_v36 = vmul.f32 1.442695, %v10155_v61  ;;  %v2164_v34 = vrot.slane %v2035_v6, %v9634_v35  ;;  %v3830_v42 = vld [vmem:[%s12805_s12 + $0x10] sm:$0xff]  ;;  %v3831_v23 = vld [vmem:[%s12805_s12 + $0x18] sm:$0xff] }
 0x7fc   : > { %v10433_v20 = vpop.permute.xlu0 %2539  ;;  %9043 = vpow2.f32 %v2285_v38  ;;  %v2116_v38 = vrot.slane %v1938_v10, %v9634_v35  ;;  %v2618_v10 = vcombine.high %v10308_v62, %v10308_v62 }
 0x7fd   : > { %9045 = vpow2.f32 %v2307_v13  ;;  %v10472_v13 = vmul.f32 %v10031_v52, %v9903_v60  ;;  %v10479_v24 = vpop.eup %9031  ;;  %v2331_v60 = vmul.f32 1.442695, %v10152_v56  ;;  %v2776_v52 = vrot.slane %v10461_v47, %v9634_v35 }
 0x7fe   : > { %9047 = vpow2.f32 %v2309_v28  ;;  %v2289_v28 = vmul.f32 1.442695, %v2253_v39  ;;  %v2335_v39 = vmul.f32 1.442695, %v10168_v58  ;;  %v2291_v58 = vmul.f32 1.442695, %v2254_v54 }
 0x7ff   : > { %v10449_v18 = vpop.permute.xlu1 %2441  ;;  %9049 = vpow2.f32 %v2329_v50  ;;  %v2573_v50 = vcombine.high %v10275_v30, %v10275_v30  ;;  %v2620_v30 = vcombine.high %v10461_v47, %v10461_v47  ;;  %v2780_v47 = vrot.slane %v2618_v10, %v9634_v35 }
 0x800   : > { %v10456_v59 = vpop.permute.xlu0 %2546  ;;  %9051 = vpow2.f32 %v2287_v7  ;;  %v10522_v29 = vrot.slane %v10472_v13, %v10026_v40 }
 0x801   : > { %v10483_v0 = vpop.eup %9033  ;;  %9053 = vpow2.f32 %v2337_v16  ;;  %v2255_v16 = vmul.f32 %v2116_v38, %v10070_v48  ;;  %v2156_v38 = vrot.slane %v10454_v15, %v9634_v35  ;;  %v2256_v15 = vmul.f32 %v2120_v49, %v10070_v48 }
 0x802   : > { %v9036_v3 = vpop.eup %9035  ;;  %9055 = vpow2.f32 %v2289_v28  ;;  %v2341_v49 = vmul.f32 1.442695, %v10161_v17  ;;  %v10569_v31 = vrot.slane %v10522_v29, %v10026_v40 }
 0x803   : > { %v10466_v1 = vpop.permute.xlu1 %2448  ;;  %v10498_v7 = vpop.eup %9037  ;;  %v2964_v62 = vmul.f32 %v9036_v3, %v10358_v12  ;;  %v8754_v12 = vpack.c.bf16 %v3831_v23, %v3830_v42  ;;  %9057 = vpow2.f32 %v2331_v60  ;;  %v2295_v51 = vmul.f32 1.442695, %v2256_v15 }
 0x804   : > { %v10477_v32 = vpop.permute.xlu0 %2553  ;;  %v10512_v61 = vpop.eup %9039  ;;  %9059 = vpow2.f32 %v2333_v36  ;;  %v2784_v36 = vrot.slane %v2620_v30, %v9634_v35 }
 0x805   : > { %v10515_v3 = vpop.eup %9041  ;;  %8755 = vmatprep.subr.bf16.mxu0 %v8754_v12  ;;  %9061 = vpow2.f32 %v2335_v39  ;;  %v3832_v39 = vld [vmem:[%s12805_s12 + $0x20] sm:$0xff] }
 0x806   : > { %8757 = vmatpush3.bf16.msra.mxu0 %v8754_v12  ;;  %9063 = vpow2.f32 %v2291_v58 }
 0x807   : > { %v2358_v56 = vpop.permute.xlu1 %2357  ;;  %9065 = vpow2.f32 %v2339_v41 }
 0x808   : > { %v2930_v43 = vmul.f32 %v2776_v52, %v2358_v56  ;;  %v10502_v37 = vpop.permute.xlu0 %2560  ;;  %v2587_v52 = vrot.slane %v2573_v50, %v10026_v40  ;;  %v9044_v56 = vpop.eup %9043 }
 0x809   : > { %v10526_v54 = vpop.eup %9045 }
 0x80a   : > { %v2965_v6 = vadd.f32 %v2964_v62, %v2930_v43  ;;  %12924 = vst [vmem:[#allocation32_spill] sm:$0xff] %v10526_v54  ;;  %v2267_v43 = vmul.f32 %v2164_v34, %v10070_v48  ;;  %v10532_v4 = vpop.eup %9047  ;;  %v2293_v62 = vmul.f32 1.442695, %v2255_v16  ;;  %v3833_v34 = vld [vmem:[%s12805_s12 + $0x28] sm:$0xff]  ;;  %v10545_v12 = vrot.slane %v2587_v52, %v10026_v40 }
 0x80b   : > { %v2365_v28 = vpop.permute.xlu1 %2364  ;;  %12925 = vst [vmem:[#allocation33_spill] sm:$0xff] %v10532_v4  ;;  %v10542_v42 = vpop.eup %9049  ;;  %v8758_v30 = vpack.c.bf16 %v3833_v34, %v3832_v39  ;;  %v10550_v16 = vrot.slane %v10494_v63, %v10026_v40 }
 0x80c   : > { %2967 = vst.msk [vmem:[#allocation2 + $0x8] sm:$0xff] %vm666_vm0, %v2965_v6  ;;  %v2931_v60 = vmul.f32 %v2780_v47, %v2365_v28  ;;  %v2968_v10 = vmul.f32 %v9044_v56, %v2965_v6  ;;  %v10530_v50 = vpop.permute.xlu0 %2469  ;;  %12926 = vst [vmem:[#allocation34_spill] sm:$0xff] %v10542_v42  ;;  %v2589_v6 = vcombine.high %v2587_v52, %v2587_v52  ;;  %v9052_v58 = vpop.eup %9051  ;;  %v3834_v28 = vld [vmem:[%s12805_s12 + $0x30] sm:$0xff]  ;;  %v3835_v52 = vld [vmem:[%s12805_s12 + $0x38] sm:$0xff]  ;;  %9067 = vpow2.f32 %v2293_v62 }
 0x80d   : > { %v2265_v56 = vmul.f32 %v2156_v38, %v10070_v48  ;;  %8759 = vmatprep.subr.bf16.mxu0 %v8758_v30  ;;  %v8762_v39 = vpack.c.bf16 %v3835_v52, %v3834_v28  ;;  %v10563_v34 = vpop.eup %9053  ;;  %v2160_v38 = vrot.slane %v10175_v27, %v9634_v35  ;;  %9069 = vpow2.f32 %v2341_v49 }
 0x80e   : > { %v2969_v23 = vadd.f32 %v2968_v10, %v2931_v60  ;;  %v2321_v60 = vmul.f32 1.442695, %v10193_v5  ;;  %12927 = vst [vmem:[#allocation35_spill] sm:$0xff] %v10563_v34  ;;  %8761 = vmatpush3.bf16.msra.mxu0 %v8758_v30  ;;  %v2317_v5 = vmul.f32 1.442695, %v2267_v43  ;;  %v10578_v27 = vmul.f32 %v10113_v46, %v9919_v2 }
 0x80f   : > { %v2372_v47 = vpop.permute.xlu1 %2371  ;;  %8763 = vmatprep.subr.bf16.mxu0 %v8762_v39  ;;  %v2637_v62 = vcombine.high %v10522_v29, %v10522_v29  ;;  %v2313_v30 = vmul.f32 1.442695, %v2265_v56  ;;  %v2266_v46 = vmul.f32 %v2160_v38, %v10070_v48  ;;  %v2323_v29 = vmul.f32 1.442695, %v10200_v21 }
 0x810   : > { %2971 = vst.msk [vmem:[#allocation2 + $0x10] sm:$0xff] %vm666_vm0, %v2969_v23  ;;  %v2932_v17 = vmul.f32 %v2784_v36, %v2372_v47  ;;  %v2972_v41 = vmul.f32 %v9052_v58, %v2969_v23  ;;  %v10561_v10 = vpop.permute.xlu0 %2476  ;;  %v2788_v36 = vrot.slane %v10545_v12, %v9634_v35  ;;  %v10574_v23 = vrot.slane %v2589_v6, %v10026_v40  ;;  %v9056_v58 = vpop.eup %9055 }
 0x811   : > { %v10582_v43 = vpop.eup %9057  ;;  %9071 = vpow2.f32 %v2321_v60  ;;  %v10586_v47 = vrot.slane %v10550_v16, %v10026_v40  ;;  %v2319_v48 = vmul.f32 1.442695, %v10206_v45  ;;  %v2325_v21 = vmul.f32 1.442695, %v10203_v8 }
 0x812   : > { %v2973_v42 = vadd.f32 %v2972_v41, %v2932_v17  ;;  %12928 = vst [vmem:[#allocation36_spill] sm:$0xff] %v10582_v43  ;;  %v10591_v2 = vpop.eup %9059  ;;  %9073 = vpow2.f32 %v2295_v51  ;;  %8765 = vmatpush3.bf16.msra.mxu0 %v8762_v39  ;;  %v2619_v17 = vcombine.high %v10545_v12, %v10545_v12  ;;  %v2622_v38 = vcombine.high %v10472_v13, %v10472_v13 }
 0x813   : > { %v2379_v15 = vpop.permute.xlu1 %2378  ;;  %12929 = vst [vmem:[#allocation37_spill] sm:$0xff] %v10591_v2  ;;  %v10597_v52 = vpop.eup %9061  ;;  %9075 = vpow2.f32 %v2317_v5  ;;  %v10608_v39 = vrot.slane %v2637_v62, %v10026_v40  ;;  %v2667_v8 = vcombine.high %v10569_v31, %v10569_v31  ;;  %v2735_v13 = vcombine.high %v10550_v16, %v10550_v16 }
 0x814   : > { %2975 = vst.msk [vmem:[#allocation2 + $0x18] sm:$0xff] %vm666_vm0, %v2973_v42  ;;  %v2933_v6 = vmul.f32 %v2788_v36, %v2379_v15  ;;  %v2976_v49 = vmul.f32 %v9056_v58, %v2973_v42  ;;  %v10589_v28 = vpop.permute.xlu0 %2483  ;;  %12930 = vst [vmem:[#allocation38_spill] sm:$0xff] %v10597_v52  ;;  %v2792_v42 = vrot.slane %v10574_v23, %v9634_v35  ;;  %v9064_v41 = vpop.eup %9063  ;;  %9077 = vpow2.f32 %v2313_v30 }
 0x815   : > { %v10615_v45 = vpop.eup %9065  ;;  %v2720_v62 = vcombine.high %v10494_v63, %v10494_v63  ;;  %v2315_v15 = vmul.f32 1.442695, %v2266_v46  ;;  %v2678_v30 = vrot.slane %v10578_v27, %v10026_v40  ;;  %9079 = vpow2.f32 %v2319_v48 }
 0x816   : > { %v2977_v60 = vadd.f32 %v2976_v49, %v2933_v6  ;;  %12931 = vst [vmem:[#allocation39_spill] sm:$0xff] %v10615_v45  ;;  %v2796_v49 = vrot.slane %v2619_v17, %v9634_v35  ;;  %v2636_v16 = vrot.slane %v2622_v38, %v10026_v40  ;;  %v2671_v63 = vcombine.high %v10578_v27, %v10578_v27 }
 0x817   : > { %v2386_v51 = vpop.permute.xlu1 %2385  ;;  %9081 = vpow2.f32 %v2323_v29  ;;  %v2669_v38 = vcombine.high %v10608_v39, %v10608_v39  ;;  %v2734_v27 = vrot.slane %v2720_v62, %v10026_v40  ;;  %v2686_v5 = vcombine.high %v2678_v30, %v2678_v30 }
 0x818   : > { %2979 = vst.msk [vmem:[#allocation2 + $0x20] sm:$0xff] %vm666_vm0, %v2977_v60  ;;  %v2934_v36 = vmul.f32 %v2792_v42, %v2386_v51  ;;  %v2980_v12 = vmul.f32 %v9064_v41, %v2977_v60  ;;  %v10613_v58 = vpop.permute.xlu0 %2490  ;;  %v2621_v60 = vcombine.high %v10574_v23, %v10574_v23  ;;  %v9068_v42 = vpop.eup %9067  ;;  %v2765_v41 = vcombine.high %v10586_v47, %v10586_v47 }
 0x819   : > { %v10638_v48 = vpop.eup %9069  ;;  %9083 = vpow2.f32 %v2315_v15  ;;  %v2694_v51 = vrot.slane %v2678_v30, %v10026_v40  ;;  %v2638_v56 = vcombine.high %v2636_v16, %v2636_v16  ;;  %v2708_v34 = vrot.slane %v2686_v5, %v10026_v40 }
 0x81a   : > { %v2981_v6 = vadd.f32 %v2980_v12, %v2934_v36  ;;  %12932 = vst [vmem:[#allocation40_spill] sm:$0xff] %v10638_v48  ;;  %v10641_v12 = vrot.slane %v2735_v13, %v10026_v40  ;;  %v10654_v13 = vrot.slane %v2636_v16, %v10026_v40  ;;  %v2685_v48 = vrot.slane %v2671_v63, %v10026_v40 }
 0x81b   : > { %v2393_v46 = vpop.permute.xlu1 %2392  ;;  %v10646_v29 = vpop.eup %9071  ;;  %9085 = vpow2.f32 %v2325_v21  ;;  %v10660_v45 = vrot.slane %v2765_v41, %v9634_v35  ;;  %v10671_v63 = vrot.slane %v2734_v27, %v10026_v40  ;;  %v2736_v21 = vcombine.high %v2734_v27, %v2734_v27 }
 0x81c   : > { %2983 = vst.msk [vmem:[#allocation2 + $0x28] sm:$0xff] %vm666_vm0, %v2981_v6  ;;  %v2935_v17 = vmul.f32 %v2796_v49, %v2393_v46  ;;  %v2984_v36 = vmul.f32 %v9068_v42, %v2981_v6  ;;  %v10636_v23 = vpop.permute.xlu0 %2497  ;;  %v2800_v6 = vrot.slane %v2621_v60, %v9634_v35  ;;  %v9074_v42 = vpop.eup %9073  ;;  %v10651_v46 = vrot.slane %v2667_v8, %v9634_v35 }
 0x81d   : > { %v10657_v15 = vpop.eup %9075  ;;  %v2767_v16 = vcombine.high %v10641_v12, %v10641_v12  ;;  %v2687_v52 = vcombine.high %v2685_v48, %v2685_v48  ;;  %v12933_v27 = vrot.slane %v10569_v31, %v9634_v35  ;;  %v10696_v44 = vrot.slane %v2736_v21, %v10026_v40 }
 0x81e   : > { %v2985_v49 = vadd.f32 %v2984_v36, %v2935_v17  ;;  %v9078_v8 = vpop.eup %9077  ;;  %v10666_v36 = vrot.slane %v2669_v38, %v9634_v35  ;;  %v10680_v38 = vrot.slane %v2638_v56, %v10026_v40  ;;  %v2766_v4 = vcombine.high %v10671_v63, %v10671_v63 }
 0x81f   : > { %v2400_v62 = vpop.permute.xlu1 %2399  ;;  %v2937_v41 = vmul.f32 %v12933_v27, %v10332_v14  ;;  %v9080_v56 = vpop.eup %9079  ;;  %v10693_v43 = vrot.slane %v2767_v16, %v9634_v35  ;;  %v2716_v31 = vcombine.high %v2694_v51, %v2694_v51  ;;  %v2840_v27 = vrot.slane %v2708_v34, %v9634_v35 }
 0x820   : > { %2987 = vst.msk [vmem:[#allocation2 + $0x30] sm:$0xff] %vm666_vm0, %v2985_v49  ;;  %v2936_v30 = vmul.f32 %v2800_v6, %v2400_v62  ;;  %v2988_v60 = vmul.f32 %v9074_v42, %v2985_v49  ;;  %v10663_v17 = vpop.permute.xlu0 %2504  ;;  %v2836_v49 = vrot.slane %v2694_v51, %v9634_v35  ;;  %v2668_v62 = vcombine.high %v10654_v13, %v10654_v13 }
 0x821   : > { %v10700_v14 = vpop.eup %9081  ;;  %v2824_v16 = vrot.slane %v10680_v38, %v9634_v35  ;;  %v2884_v21 = vrot.slane %v10671_v63, %v9634_v35  ;;  %v10712_v51 = vrot.slane %v2687_v52, %v10026_v40  ;;  %v2888_v52 = vrot.slane %v10696_v44, %v9634_v35 }
 0x822   : > { %v2989_v6 = vadd.f32 %v2988_v60, %v2936_v30  ;;  %v3024_v60 = vmul.f32 0.0, %v9078_v8 }
 0x823   : > { %v2463_v2 = vpop.permute.xlu1 %2462 }
 0x824   : > { %2991 = vst.msk [vmem:[#allocation2 + $0x38] sm:$0xff] %vm666_vm0, %v2989_v6  ;;  %v2992_v5 = vmul.f32 %v10479_v24, %v2989_v6  ;;  %v2945_v30 = vmul.f32 %v2836_v49, %v2463_v2  ;;  %v10690_v42 = vpop.permute.xlu0 %2511  ;;  %v10704_v24 = vrot.slane %v2685_v48, %v10026_v40  ;;  %v9084_v6 = vpop.eup %9083  ;;  %v2828_v49 = vrot.slane %v2668_v62, %v9634_v35 }
 0x825   : > { %v12935_v48 = vrot.slane %v10608_v39, %v9634_v35  ;;  %v2844_v40 = vrot.slane %v2716_v31, %v9634_v35  ;;  %v10728_v39 = vpop.eup %9085  ;;  %v2939_v31 = vmul.f32 %v10651_v46, %v10385_v53  ;;  %v2856_v53 = vrot.slane %v10712_v51, %v9634_v35 }
 0x826   : > { %v2993_v2 = vadd.f32 %v2992_v5, %v2937_v41  ;;  %v3025_v8 = vadd.f32 %v3024_v60, %v2945_v30  ;;  %v2946_v5 = vmul.f32 %v2840_v27, %v10530_v50  ;;  %v2892_v60 = vrot.slane %v2766_v4, %v9634_v35 }
 0x827   : > { %v10714_v54 = vpop.permute.xlu1 %2455  ;;  %v2938_v41 = vmul.f32 %v12935_v48, %v10360_v33  ;;  %v2717_v50 = vcombine.high %v10704_v24, %v10704_v24  ;;  %v2670_v4 = vcombine.high %v10680_v38, %v10680_v38  ;;  %v2947_v48 = vmul.f32 %v2844_v40, %v10561_v10 }
 0x828   : > { %12934 = vst [vmem:[#allocation41_spill] sm:$0xff] %v10714_v54  ;;  %2995 = vst.msk [vmem:[#allocation2 + $0x40] sm:$0xff] %vm666_vm0, %v2993_v2  ;;  %v2996_v30 = vmul.f32 %v10483_v0, %v2993_v2  ;;  %v3028_v63 = vmul.f32 %v9084_v6, %v3025_v8  ;;  %v3189_v62 = vpop.permute.xlu0 %3188  ;;  %v2718_v54 = vcombine.high %v2708_v34, %v2708_v34  ;;  %v2327_v0 = vmul.f32 1.442695, %v10263_v19 }
 0x829   : > { %3027 = vst.msk [vmem:[#allocation2 + $0x80] sm:$0xff] %vm666_vm0, %v3025_v8  ;;  %v2719_v2 = vcombine.high %v10712_v51, %v10712_v51  ;;  %v2311_v8 = vmul.f32 1.442695, %v10266_v22  ;;  %v2768_v34 = vcombine.high %v10696_v44, %v10696_v44  ;;  %v2852_v44 = vrot.slane %v10704_v24, %v9634_v35 }
 0x82a   : > { %v2997_v33 = vadd.f32 %v2996_v30, %v2938_v41  ;;  %v3029_v27 = vadd.f32 %v3028_v63, %v2946_v5  ;;  %v2848_v38 = vrot.slane %v2718_v54, %v9634_v35  ;;  %v2343_v40 = vmul.f32 1.442695, %v10271_v26 }
 0x82b   : > { %v10738_v6 = vpop.permute.xlu1 %2567  ;;  %v2860_v46 = vrot.slane %v2717_v50, %v9634_v35  ;;  %9087 = vpow2.f32 %v2327_v0  ;;  %v2864_v5 = vrot.slane %v2719_v2, %v9634_v35  ;;  %v2896_v54 = vrot.slane %v2768_v34, %v9634_v35 }
 0x82c   : > { %2999 = vst.msk [vmem:[#allocation2 + $0x48] sm:$0xff] %vm666_vm0, %v2997_v33  ;;  %v3000_v19 = vmul.f32 %v10498_v7, %v2997_v33  ;;  %3031 = vst.msk [vmem:[#allocation2 + $0x88] sm:$0xff] %vm666_vm0, %v3029_v27  ;;  %v3032_v22 = vmul.f32 %v10657_v15, %v3029_v27  ;;  %v10749_v41 = vpop.permute.xlu0 %3202  ;;  %9089 = vpow2.f32 %v2311_v8  ;;  %v2832_v15 = vrot.slane %v2670_v4, %v9634_v35 }
 0x82d   : > { %v2940_v24 = vmul.f32 %v10666_v36, %v10410_v57  ;;  %v2948_v51 = vmul.f32 %v2848_v38, %v10589_v28  ;;  %v12936_v50 = vrot.slane %v10586_v47, %v9634_v35  ;;  %v12937_v57 = vrot.slane %v10641_v12, %v9634_v35 }
 0x82e   : > { %v3001_v10 = vadd.f32 %v3000_v19, %v2939_v31  ;;  %v3033_v7 = vadd.f32 %v3032_v22, %v2947_v48  ;;  %9091 = vpow2.f32 %v2343_v40  ;;  %v12938_v36 = vrot.slane %v10654_v13, %v9634_v35 }
 0x82f   : > { %v3196_v30 = vpop.permute.xlu1 %3195  ;;  %v10773_v27 = vmul.f32 %v12936_v50, %v10368_v9  ;;  %v10779_v28 = vmul.f32 %v12937_v57, %v10397_v55  ;;  %v10791_v9 = vmul.f32 %v10693_v43, %v10433_v20  ;;  %v2942_v12 = vmul.f32 %v2824_v16, %v10449_v18  ;;  %v3096_v8 = vld [vmem:[#allocation2 + $0x40] sm:$0xff]  ;;  %v12940_v19 = vld [vmem:[#allocation41_spill] sm:$0xff] }
 0x830   : > { %3003 = vst.msk [vmem:[#allocation2 + $0x50] sm:$0xff] %vm666_vm0, %v3001_v10  ;;  %v3004_v26 = vmul.f32 %v10512_v61, %v3001_v10  ;;  %3035 = vst.msk [vmem:[#allocation2 + $0x90] sm:$0xff] %vm666_vm0, %v3033_v7  ;;  %v3036_v63 = vmul.f32 %v9080_v56, %v3033_v7  ;;  %v10767_v33 = vpop.permute.xlu0 %3209  ;;  %v10783_v61 = vmul.f32 %v10660_v45, %v10416_v25 }
 0x831   : > { %v2941_v56 = vmul.f32 %v12938_v36, %v10427_v11  ;;  %v10795_v55 = vmul.f32 %v2884_v21, %v10456_v59  ;;  %v2943_v25 = vmul.f32 %v2828_v49, %v10466_v1  ;;  %v2949_v45 = vmul.f32 %v2852_v44, %v10613_v58 }
 0x832   : > { %v3037_v47 = vadd.f32 %v3036_v63, %v2948_v51  ;;  %v3005_v0 = vadd.f32 %v3004_v26, %v2940_v24  ;;  %v10804_v59 = vmul.f32 %v2888_v52, %v10477_v32  ;;  %v10807_v1 = vmul.f32 %v2892_v60, %v10502_v37  ;;  %v3091_v26 = vld [vmem:[#allocation2 + $0x18] sm:$0xff] }
 0x833   : > { %v3097_v2 = vld [vmem:[#allocation2 + $0x48] sm:$0xff]  ;;  %v3182_v4 = vpop.permute.xlu1 %3181  ;;  %v2950_v58 = vmul.f32 %v2856_v53, %v10636_v23  ;;  %v2951_v13 = vmul.f32 %v2860_v46, %v10663_v17  ;;  %v2944_v22 = vmul.f32 %v2832_v15, %v12940_v19 }
 0x834   : > { %3039 = vst.msk [vmem:[#allocation2 + $0x98] sm:$0xff] %vm666_vm0, %v3037_v47  ;;  %v3040_v11 = vmul.f32 %v10646_v29, %v3037_v47  ;;  %3007 = vst.msk [vmem:[#allocation2 + $0x58] sm:$0xff] %vm666_vm0, %v3005_v0  ;;  %v3008_v20 = vmul.f32 %v10515_v3, %v3005_v0  ;;  %v3353_v43 = vmul.f32 %v3189_v62, %v3097_v2  ;;  %v3133_v16 = vpop.permute.xlu0 %3132  ;;  %v3089_v3 = vld [vmem:[#allocation2 + $0x8] sm:$0xff] }
 0x835   : > { %v3352_v18 = vmul.f32 %v3182_v4, %v3096_v8  ;;  %v2952_v62 = vmul.f32 %v2864_v5, %v10690_v42  ;;  %v3345_v48 = vmul.f32 %v3133_v16, %v3089_v3  ;;  %v9088_v37 = vpop.eup %9087  ;;  %v12939_v17 = vld [vmem:[#allocation32_spill] sm:$0xff]  ;;  %v10820_v42 = vmul.f32 %v2896_v54, %v10738_v6  ;;  %v12941_v54 = vld [vmem:[#allocation33_spill] sm:$0xff] }
 0x836   : > { %v3041_v21 = vadd.f32 %v3040_v11, %v2949_v45  ;;  %v3009_v49 = vadd.f32 %v3008_v20, %v2941_v56  ;;  %v3439_v29 = vsel %vm666_vm0, %v3353_v43, 0.0  ;;  %v9090_v44 = vpop.eup %9089  ;;  %v12942_v19 = vld [vmem:[#allocation28_spill] sm:$0xff] }
 0x837   : > { %v3432_v34 = vsel %vm666_vm0, %v3352_v18, 0.0  ;;  %v3440_v31 = vrot.slane %v3439_v29, 4  ;;  %v3098_v32 = vld [vmem:[#allocation2 + $0x50] sm:$0xff]  ;;  %v3383_v10 = vsel %vm666_vm0, %v3345_v48, 0.0  ;;  %v3217_v51 = vpop.permute.xlu1 %3216 }
 0x838   : > { %v3433_v52 = vrot.slane %v3432_v34, 4  ;;  %3043 = vst.msk [vmem:[#allocation2 + $0xa0] sm:$0xff] %vm666_vm0, %v3041_v21  ;;  %v3044_v23 = vmul.f32 %v10700_v14, %v3041_v21  ;;  %3011 = vst.msk [vmem:[#allocation2 + $0x60] sm:$0xff] %vm666_vm0, %v3009_v49  ;;  %v3012_v60 = vmul.f32 %v12939_v17, %v3009_v49  ;;  %v3354_v38 = vmul.f32 %v3196_v30, %v3098_v32  ;;  %v3147_v46 = vpop.permute.xlu0 %3146  ;;  %v10824_v63 = vpop.eup %9091 }
 0x839   : > { %v3441_v53 = vadd.f32 %v3440_v31, %v3439_v29  ;;  %v3384_v24 = vrot.slane %v3383_v10, 4  ;;  %v3347_v36 = vmul.f32 %v3147_v46, %v3091_v26 }
 0x83a   : > { %v3434_v40 = vadd.f32 %v3433_v52, %v3432_v34  ;;  %v3045_v7 = vadd.f32 %v3044_v23, %v2950_v58  ;;  %v3013_v5 = vadd.f32 %v3012_v60, %v2942_v12  ;;  %v3446_v14 = vsel %vm666_vm0, %v3354_v38, 0.0 }
 0x83b   : > { %v3442_v15 = vrot.slane %v3441_v53, 2  ;;  %v3099_v30 = vld [vmem:[#allocation2 + $0x58] sm:$0xff]  ;;  %v3447_v50 = vrot.slane %v3446_v14, 4  ;;  %v3385_v0 = vadd.f32 %v3384_v24, %v3383_v10  ;;  %v10832_v8 = vsel %vm666_vm0, %v3347_v36, 0.0  ;;  %v12947_v36 = vld [vmem:[#allocation29_spill] sm:$0xff] }
 0x83c   : > { %v3435_v57 = vrot.slane %v3434_v40, 2  ;;  %3047 = vst.msk [vmem:[#allocation2 + $0xa8] sm:$0xff] %vm666_vm0, %v3045_v7  ;;  %v3048_v6 = vmul.f32 %v10728_v39, %v3045_v7  ;;  %3015 = vst.msk [vmem:[#allocation2 + $0x68] sm:$0xff] %vm666_vm0, %v3013_v5  ;;  %v3016_v56 = vmul.f32 %v12941_v54, %v3013_v5  ;;  %v3355_v47 = vmul.f32 %v10749_v41, %v3099_v30  ;;  %v3154_v60 = vpop.permute.xlu0 %3153  ;;  %v12944_v10 = vld [vmem:[#allocation34_spill] sm:$0xff]  ;;  %v12945_v5 = vld [vmem:[#allocation24_spill] sm:$0xff] }
 0x83d   : > { %v3443_v12 = vadd.f32 %v3442_v15, %v3441_v53  ;;  %v3448_v45 = vadd.f32 %v3447_v50, %v3446_v14  ;;  %v3386_v43 = vrot.slane %v3385_v0, 2  ;;  %v12946_v14 = vrot.slane %v12945_v5, 1 }
 0x83e   : > { %v3436_v2 = vadd.f32 %v3435_v57, %v3434_v40  ;;  %v3049_v4 = vadd.f32 %v3048_v6, %v2951_v13  ;;  %v3017_v11 = vadd.f32 %v3016_v56, %v2943_v25  ;;  %v3453_v20 = vsel %vm666_vm0, %v3355_v47, 0.0  ;;  %v3224_v13 = vpop.permute.xlu1 %3223 }
 0x83f   : > { %v3444_v39 = vrot.slane %v3443_v12, 1  ;;  %v3454_v18 = vrot.slane %v3453_v20, 4  ;;  %v3449_v58 = vrot.slane %v3448_v45, 2  ;;  %v3100_v16 = vld [vmem:[#allocation2 + $0x60] sm:$0xff]  ;;  %v3387_v34 = vadd.f32 %v3386_v43, %v3385_v0 }
 0x840   : > { %v3437_v21 = vrot.slane %v3436_v2, 1  ;;  %3051 = vst.msk [vmem:[#allocation2 + $0xb0] sm:$0xff] %vm666_vm0, %v3049_v4  ;;  %v3052_v41 = vmul.f32 %v9088_v37, %v3049_v4  ;;  %3019 = vst.msk [vmem:[#allocation2 + $0x70] sm:$0xff] %vm666_vm0, %v3017_v11  ;;  %v3020_v49 = vmul.f32 %v9090_v44, %v3017_v11  ;;  %v3356_v29 = vmul.f32 %v10767_v33, %v3100_v16  ;;  %v12950_v4 = vld [vmem:[#allocation36_spill] sm:$0xff]  ;;  %v3168_v16 = vpop.permute.xlu0 %3167 }
 0x841   : > { %v3445_v25 = vadd.f32 %v3444_v39, %v3443_v12  ;;  %v3455_v3 = vadd.f32 %v3454_v18, %v3453_v20  ;;  %v3450_v31 = vadd.f32 %v3449_v58, %v3448_v45  ;;  %v3388_v17 = vrot.slane %v3387_v34, 1  ;;  %v12951_v20 = vld [vmem:[#allocation25_spill] sm:$0xff] }
 0x842   : > { %v3438_v32 = vadd.f32 %v3437_v21, %v3436_v2  ;;  %v3053_v52 = vadd.f32 %v3052_v41, %v2952_v62  ;;  %v3021_v48 = vadd.f32 %v3020_v49, %v2944_v22  ;;  %v3460_v23 = vsel %vm666_vm0, %v3356_v29, 0.0  ;;  %v3231_v47 = vpop.permute.xlu1 %3230 }
 0x843   : > { %v12943_v37 = vrot.slane %v12942_v19, 1  ;;  %v3456_v53 = vrot.slane %v3455_v3, 2  ;;  %v3451_v44 = vrot.slane %v3450_v31, 1  ;;  %v3461_v40 = vrot.slane %v3460_v23, 4  ;;  %v3101_v33 = vld [vmem:[#allocation2 + $0x68] sm:$0xff] }
 0x844   : > { %3055 = vst.msk [vmem:[#allocation2 + $0xb8] sm:$0xff] %vm666_vm0, %v3053_v52  ;;  %v3056_v46 = vmul.f32 %v12944_v10, %v3053_v52  ;;  %3023 = vst.msk [vmem:[#allocation2 + $0x78] sm:$0xff] %vm666_vm0, %v3021_v48  ;;  %v3680_v62 = vadd.f32 %v12942_v19, %v3438_v32  ;;  %v3389_v22 = vadd.f32 %v3388_v17, %v3387_v34  ;;  %v12948_v6 = vrot.slane %v12947_v36, 1 }
 0x845   : > { %v3681_v38 = vadd.f32 %v12943_v37, %v3445_v25  ;;  %v3357_v7 = vmul.f32 %v3217_v51, %v3101_v33  ;;  %v3457_v26 = vadd.f32 %v3456_v53, %v3455_v3  ;;  %v3452_v15 = vadd.f32 %v3451_v44, %v3450_v31  ;;  %v12955_v53 = vld [vmem:[#allocation37_spill] sm:$0xff] }
 0x846   : > { %v3462_v30 = vadd.f32 %v3461_v40, %v3460_v23  ;;  %v3057_v50 = vadd.f32 %v3056_v46, %v10773_v27  ;;  %v3804_v57 = vmul.f32 %v12945_v5, %v3680_v62  ;;  %v3673_v54 = vadd.f32 %v12948_v6, %v3389_v22  ;;  %v3140_v46 = vpop.permute.xlu1 %3139 }
 0x847   : > { %v3805_v24 = vmul.f32 %v12946_v14, %v3681_v38  ;;  %v3467_v56 = vsel %vm666_vm0, %v3357_v7, 0.0  ;;  %v3458_v12 = vrot.slane %v3457_v26, 1  ;;  %v12949_v51 = vrot.slane %v12942_v19, 2  ;;  %v3102_v58 = vld [vmem:[#allocation2 + $0x70] sm:$0xff]  ;;  %v3092_v38 = vld [vmem:[#allocation2 + $0x20] sm:$0xff] }
 0x848   : > { %v3463_v2 = vrot.slane %v3462_v30, 2  ;;  %3059 = vst.msk [vmem:[#allocation2 + $0xc0] sm:$0xff] %vm666_vm0, %v3057_v50  ;;  %v3060_v11 = vmul.f32 %v12950_v4, %v3057_v50  ;;  %v12952_v27 = vrot.slane %v12951_v20, 1  ;;  %v3468_v39 = vrot.slane %v3467_v56, 4 }
 0x849   : > { %v3889_v0 = vrot.slane %v3805_v24, 7  ;;  %v3682_v45 = vadd.f32 %v12949_v51, %v3452_v15  ;;  %v3398_v18 = vrot.slane %v10832_v8, 4  ;;  %v3459_v21 = vadd.f32 %v3458_v12, %v3457_v26 }
 0x84a   : > { %v10858_v43 = vmul.f32 %v12952_v27, %v3673_v54  ;;  %v12953_v41 = vrot.slane %v12945_v5, 2  ;;  %v3464_v29 = vadd.f32 %v3463_v2, %v3462_v30  ;;  %v3061_v25 = vadd.f32 %v3060_v11, %v10779_v28  ;;  %v3175_v30 = vpop.permute.xlu0 %3174 }
 0x84b   : > { %v3890_v34 = vsel %vm3869_vm6, %v3889_v0, %v3804_v57  ;;  %v3469_v31 = vadd.f32 %v3468_v39, %v3467_v56  ;;  %v3399_v32 = vadd.f32 %v3398_v18, %v10832_v8  ;;  %v12954_v52 = vrot.slane %v12942_v19, 3  ;;  %v3103_v28 = vld [vmem:[#allocation2 + $0x78] sm:$0xff] }
 0x84c   : > { %v3806_v49 = vmul.f32 %v12953_v41, %v3682_v45  ;;  %v3868_v3 = vrot.slane %v10858_v43, 7  ;;  %v3465_v17 = vrot.slane %v3464_v29, 1  ;;  %v3358_v37 = vmul.f32 %v3224_v13, %v3102_v58  ;;  %3063 = vst.msk [vmem:[#allocation2 + $0xc8] sm:$0xff] %vm666_vm0, %v3061_v25  ;;  %v12958_v56 = vld [vmem:[#allocation38_spill] sm:$0xff]  ;;  %v3126_v41 = vpop.permute.xlu1 %3125 }
 0x84d   : > { %v3683_v48 = vadd.f32 %v12954_v52, %v3459_v21  ;;  %v3064_v44 = vmul.f32 %v12955_v53, %v3061_v25  ;;  %v3470_v40 = vrot.slane %v3469_v31, 2  ;;  %v3400_v33 = vrot.slane %v3399_v32, 2 }
 0x84e   : > { %v3891_v23 = vrot.slane %v3806_v49, 6  ;;  %v3348_v10 = vmul.f32 %v3154_v60, %v3092_v38  ;;  %v12956_v62 = vrot.slane %v12945_v5, 3  ;;  %v3466_v8 = vadd.f32 %v3465_v17, %v3464_v29  ;;  %v3090_v17 = vld [vmem:[#allocation2 + $0x10] sm:$0xff] }
 0x84f   : > { %v3474_v13 = vsel %vm666_vm0, %v3358_v37, 0.0  ;;  %v3065_v14 = vadd.f32 %v3064_v44, %v10783_v61  ;;  %v3471_v24 = vadd.f32 %v3470_v40, %v3469_v31  ;;  %v3401_v26 = vadd.f32 %v3400_v33, %v3399_v32  ;;  %v3094_v61 = vld [vmem:[#allocation2 + $0x30] sm:$0xff]  ;;  %v12960_v31 = vld [vmem:[#allocation35_spill] sm:$0xff]  ;;  %v3308_v37 = vpop.permute.xlu0 %3307 }
 0x850   : > { %v10873_v22 = vmul.f32 %v12956_v62, %v3683_v48  ;;  %v10876_v7 = vsel %vm3872_vm7, %v3891_v23, %v3890_v34  ;;  %v3475_v15 = vrot.slane %v3474_v13, 4  ;;  %v12957_v50 = vrot.slane %v12942_v19, 4 }
 0x851   : > { %v3404_v6 = vsel %vm666_vm0, %v3348_v10, 0.0  ;;  %v3359_v54 = vmul.f32 %v3231_v47, %v3103_v28  ;;  %3067 = vst.msk [vmem:[#allocation2 + $0xd0] sm:$0xff] %vm666_vm0, %v3065_v14  ;;  %v3068_v0 = vmul.f32 %v12958_v56, %v3065_v14  ;;  %v3472_v12 = vrot.slane %v3471_v24, 1 }
 0x852   : > { %v3893_v60 = vrot.slane %v10873_v22, 5  ;;  %v3684_v57 = vadd.f32 %v12957_v50, %v3466_v8  ;;  %v3402_v51 = vrot.slane %v3401_v26, 1  ;;  %v3476_v45 = vadd.f32 %v3475_v15, %v3474_v13  ;;  %v12965_v50 = vld [vmem:[#allocation39_spill] sm:$0xff] }
 0x853   : > { %v12959_v2 = vrot.slane %v12945_v5, 4  ;;  %v3405_v11 = vrot.slane %v3404_v6, 4  ;;  %v3481_v27 = vsel %vm666_vm0, %v3359_v54, 0.0  ;;  %v3350_v39 = vmul.f32 %v3168_v16, %v3094_v61  ;;  %v3161_v54 = vpop.permute.xlu1 %3160  ;;  %v3088_v61 = vld [vmem:[#allocation2] sm:$0xff] }
 0x854   : > { %v3069_v18 = vadd.f32 %v3068_v0, %v10791_v9  ;;  %v3473_v58 = vadd.f32 %v3472_v12, %v3471_v24  ;;  %v3403_v47 = vadd.f32 %v3402_v51, %v3401_v26  ;;  %v3477_v21 = vrot.slane %v3476_v45, 2 }
 0x855   : > { %v10888_v4 = vmul.f32 %v12959_v2, %v3684_v57  ;;  %v3406_v29 = vadd.f32 %v3405_v11, %v3404_v6  ;;  %v3482_v34 = vrot.slane %v3481_v27, 4  ;;  %v3418_v25 = vsel %vm666_vm0, %v3350_v39, 0.0 }
 0x856   : > { %3071 = vst.msk [vmem:[#allocation2 + $0xd8] sm:$0xff] %vm666_vm0, %v3069_v18  ;;  %v3072_v32 = vmul.f32 %v12960_v31, %v3069_v18  ;;  %v12961_v52 = vrot.slane %v12942_v19, 5  ;;  %v12962_v16 = vrot.slane %v12947_v36, 3  ;;  %v3478_v23 = vadd.f32 %v3477_v21, %v3476_v45  ;;  %v3095_v45 = vld [vmem:[#allocation2 + $0x38] sm:$0xff] }
 0x857   : > { %v3895_v49 = vrot.slane %v10888_v4, 4  ;;  %v3407_v38 = vrot.slane %v3406_v29, 2  ;;  %v3483_v53 = vadd.f32 %v3482_v34, %v3481_v27  ;;  %v3419_v44 = vrot.slane %v3418_v25, 4 }
 0x858   : > { %v3685_v48 = vadd.f32 %v12961_v52, %v3473_v58  ;;  %v3675_v9 = vadd.f32 %v12962_v16, %v3403_v47  ;;  %v3346_v40 = vmul.f32 %v3140_v46, %v3090_v17  ;;  %v3073_v33 = vadd.f32 %v3072_v32, %v10795_v55  ;;  %v3315_v58 = vpop.permute.xlu0 %3314  ;;  %v3114_v17 = vld [vmem:[#allocation2 + $0xd0] sm:$0xff] }
 0x859   : > { %v12963_v10 = vrot.slane %v12945_v5, 5  ;;  %v12964_v62 = vrot.slane %v12951_v20, 3  ;;  %v3479_v13 = vrot.slane %v3478_v23, 1  ;;  %v3408_v14 = vadd.f32 %v3407_v38, %v3406_v29 }
 0x85a   : > { %v3484_v24 = vrot.slane %v3483_v53, 2  ;;  %v3420_v26 = vadd.f32 %v3419_v44, %v3418_v25  ;;  %v3390_v15 = vsel %vm666_vm0, %v3346_v40, 0.0  ;;  %3075 = vst.msk [vmem:[#allocation2 + $0xe0] sm:$0xff] %vm666_vm0, %v3073_v33  ;;  %v3076_v46 = vmul.f32 %v12965_v50, %v3073_v33  ;;  %v12967_v25 = vld [vmem:[#allocation40_spill] sm:$0xff]  ;;  %v3301_v33 = vpop.permute.xlu1 %3300 }
 0x85b   : > { %v10903_v28 = vmul.f32 %v12963_v10, %v3685_v48  ;;  %v10907_v8 = vmul.f32 %v12964_v62, %v3675_v9  ;;  %v3480_v6 = vadd.f32 %v3479_v13, %v3478_v23  ;;  %v3409_v56 = vrot.slane %v3408_v14, 1 }
 0x85c   : > { %v3485_v0 = vadd.f32 %v3484_v24, %v3483_v53  ;;  %v3421_v12 = vrot.slane %v3420_v26, 2  ;;  %v3391_v51 = vrot.slane %v3390_v15, 4  ;;  %v3077_v2 = vadd.f32 %v3076_v46, %v10804_v59 }
 0x85d   : > { %v3897_v55 = vrot.slane %v10903_v28, 3  ;;  %v3874_v57 = vrot.slane %v10907_v8, 5  ;;  %v12966_v11 = vrot.slane %v12942_v19, 6  ;;  %v3351_v39 = vmul.f32 %v3175_v30, %v3095_v45 }
 0x85e   : > { %v3344_v18 = vmul.f32 %v3126_v41, %v3088_v61  ;;  %v3410_v47 = vadd.f32 %v3409_v56, %v3408_v14  ;;  %v3486_v21 = vrot.slane %v3485_v0, 1  ;;  %v3422_v29 = vadd.f32 %v3421_v12, %v3420_v26  ;;  %3079 = vst.msk [vmem:[#allocation2 + $0xe8] sm:$0xff] %vm666_vm0, %v3077_v2  ;;  %v3322_v56 = vpop.permute.xlu0 %3321 }
 0x85f   : > { %v3686_v27 = vadd.f32 %v12966_v11, %v3480_v6  ;;  %v3392_v34 = vadd.f32 %v3391_v51, %v3390_v15  ;;  %v3080_v31 = vmul.f32 %v12967_v25, %v3077_v2  ;;  %v12968_v32 = vrot.slane %v12945_v5, 6  ;;  %v3115_v6 = vld [vmem:[#allocation2 + $0xd8] sm:$0xff]  ;;  %v3113_v2 = vld [vmem:[#allocation2 + $0xc8] sm:$0xff] }
 0x860   : > { %v3425_v59 = vsel %vm666_vm0, %v3351_v39, 0.0  ;;  %v3376_v48 = vsel %vm666_vm0, %v3344_v18, 0.0  ;;  %v12969_v30 = vrot.slane %v12947_v36, 4  ;;  %v3487_v16 = vadd.f32 %v3486_v21, %v3485_v0  ;;  %v3093_v18 = vld [vmem:[#allocation2 + $0x28] sm:$0xff] }
 0x861   : > { %v10921_v52 = vmul.f32 %v12968_v32, %v3686_v27  ;;  %v3423_v9 = vrot.slane %v3422_v29, 1  ;;  %v3393_v23 = vrot.slane %v3392_v34, 2  ;;  %v3081_v38 = vadd.f32 %v3080_v31, %v10807_v1  ;;  %v3116_v11 = vld [vmem:[#allocation2 + $0xe0] sm:$0xff] }
 0x862   : > { %v3676_v41 = vadd.f32 %v12969_v30, %v3410_v47  ;;  %v3426_v44 = vrot.slane %v3425_v59, 4  ;;  %v3377_v40 = vrot.slane %v3376_v48, 4  ;;  %v12970_v10 = vrot.slane %v12951_v20, 4 }
 0x863   : > { %v3899_v53 = vrot.slane %v10921_v52, 2  ;;  %v12971_v13 = vrot.slane %v12942_v19, 7  ;;  %v3424_v24 = vadd.f32 %v3423_v9, %v3422_v29  ;;  %v3394_v26 = vadd.f32 %v3393_v23, %v3392_v34  ;;  %3083 = vst.msk [vmem:[#allocation2 + $0xf0] sm:$0xff] %vm666_vm0, %v3081_v38 }
 0x864   : > { %v10931_v62 = vmul.f32 %v12970_v10, %v3676_v41  ;;  %v3084_v15 = vmul.f32 %v10824_v63, %v3081_v38  ;;  %v3427_v50 = vadd.f32 %v3426_v44, %v3425_v59  ;;  %v3378_v1 = vadd.f32 %v3377_v40, %v3376_v48  ;;  %v3294_v59 = vpop.permute.xlu1 %3293 }
 0x865   : > { %v3687_v14 = vadd.f32 %v12971_v13, %v3487_v16  ;;  %v3370_v46 = vmul.f32 %v3308_v37, %v3114_v17  ;;  %v12972_v12 = vrot.slane %v12945_v5, 7  ;;  %v12973_v19 = vrot.slane %v12947_v36, 6 }
 0x866   : > { %v3877_v0 = vrot.slane %v10931_v62, 4  ;;  %v3395_v61 = vrot.slane %v3394_v26, 1  ;;  %v3085_v63 = vadd.f32 %v3084_v15, %v10820_v42  ;;  %v3428_v27 = vrot.slane %v3427_v50, 2  ;;  %v3117_v15 = vld [vmem:[#allocation2 + $0xe8] sm:$0xff] }
 0x867   : > { %v10940_v51 = vmul.f32 %v12972_v12, %v3687_v14  ;;  %v10944_v45 = vadd.f32 %v12973_v19, %v3424_v24  ;;  %v3379_v39 = vrot.slane %v3378_v1, 2  ;;  %v3558_v37 = vsel %vm666_vm0, %v3370_v46, 0.0 }
 0x868   : > { %v3396_v47 = vadd.f32 %v3395_v61, %v3394_v26  ;;  %v3559_v21 = vrot.slane %v3558_v37, 4  ;;  %v3349_v29 = vmul.f32 %v3161_v54, %v3093_v18  ;;  %v3371_v5 = vmul.f32 %v3315_v58, %v3115_v6  ;;  %3087 = vst.msk [vmem:[#allocation2 + $0xf8] sm:$0xff] %vm666_vm0, %v3085_v63  ;;  %v3329_v58 = vpop.permute.xlu0 %3328 }
 0x869   : > { %v3429_v34 = vadd.f32 %v3428_v27, %v3427_v50  ;;  %v3380_v25 = vadd.f32 %v3379_v39, %v3378_v1  ;;  %v3369_v31 = vmul.f32 %v3301_v33, %v3113_v2  ;;  %v3372_v32 = vmul.f32 %v3322_v56, %v3116_v11  ;;  %v3112_v56 = vld [vmem:[#allocation2 + $0xc0] sm:$0xff]  ;;  %v3245_v11 = vpop.permute.xlu1 %3244 }
 0x86a   : > { %v12974_v48 = vrot.slane %v12947_v36, 2  ;;  %v3560_v42 = vadd.f32 %v3559_v21, %v3558_v37  ;;  %v3411_v41 = vsel %vm666_vm0, %v3349_v29, 0.0  ;;  %v3565_v16 = vsel %vm666_vm0, %v3371_v5, 0.0 }
 0x86b   : > { %v3430_v9 = vrot.slane %v3429_v34, 1  ;;  %v3381_v23 = vrot.slane %v3380_v25, 1  ;;  %v3412_v17 = vrot.slane %v3411_v41, 4  ;;  %v3566_v54 = vrot.slane %v3565_v16, 4 }
 0x86c   : > { %v3674_v30 = vadd.f32 %v12974_v48, %v3396_v47  ;;  %v12975_v38 = vrot.slane %v12951_v20, 2  ;;  %v3561_v40 = vrot.slane %v3560_v42, 2  ;;  %v3551_v33 = vsel %vm666_vm0, %v3369_v31, 0.0  ;;  %v3252_v5 = vpop.permute.xlu0 %3251  ;;  %v3105_v48 = vld [vmem:[#allocation2 + $0x88] sm:$0xff] }
 0x86d   : > { %v3572_v10 = vsel %vm666_vm0, %v3372_v32, 0.0  ;;  %v10959_v13 = vadd.f32 %v3430_v9, %v3429_v34  ;;  %v3382_v14 = vadd.f32 %v3381_v23, %v3380_v25  ;;  %v3413_v24 = vadd.f32 %v3412_v17, %v3411_v41 }
 0x86e   : > { %v10955_v44 = vmul.f32 %v12975_v38, %v3674_v30  ;;  %v3567_v26 = vadd.f32 %v3566_v54, %v3565_v16  ;;  %v3562_v1 = vadd.f32 %v3561_v40, %v3560_v42  ;;  %v3552_v46 = vrot.slane %v3551_v33, 4  ;;  %v12976_v16 = vld [vmem:[#allocation30_spill] sm:$0xff] }
 0x86f   : > { %v3573_v6 = vrot.slane %v3572_v10, 4  ;;  %v3672_v12 = vadd.f32 %v12947_v36, %v3382_v14  ;;  %v3414_v19 = vrot.slane %v3413_v24, 2  ;;  %v3368_v2 = vmul.f32 %v3294_v59, %v3112_v56  ;;  %v3259_v14 = vpop.permute.xlu1 %3258 }
 0x870   : > { %v3871_v50 = vrot.slane %v10955_v44, 6  ;;  %v3568_v61 = vrot.slane %v3567_v26, 2  ;;  %v3563_v63 = vrot.slane %v3562_v1, 1  ;;  %v3553_v27 = vadd.f32 %v3552_v46, %v3551_v33  ;;  %v3118_v44 = vld [vmem:[#allocation2 + $0xf0] sm:$0xff] }
 0x871   : > { %v3574_v39 = vadd.f32 %v3573_v6, %v3572_v10  ;;  %v3373_v37 = vmul.f32 %v3329_v58, %v3117_v15  ;;  %v10964_v18 = vmul.f32 %v12951_v20, %v3672_v12  ;;  %v3415_v47 = vadd.f32 %v3414_v19, %v3413_v24  ;;  %v12978_v24 = vld [vmem:[#allocation26_spill] sm:$0xff] }
 0x872   : > { %v3569_v21 = vadd.f32 %v3568_v61, %v3567_v26  ;;  %v3544_v29 = vsel %vm666_vm0, %v3368_v2, 0.0  ;;  %v3564_v34 = vadd.f32 %v3563_v63, %v3562_v1  ;;  %v3554_v25 = vrot.slane %v3553_v27, 2  ;;  %v3238_v63 = vpop.permute.xlu0 %3237 }
 0x873   : > { %v3575_v31 = vrot.slane %v3574_v39, 2  ;;  %v3545_v32 = vrot.slane %v3544_v29, 4  ;;  %v3416_v30 = vrot.slane %v3415_v47, 1  ;;  %v3579_v42 = vsel %vm666_vm0, %v3373_v37, 0.0 }
 0x874   : > { %v3570_v59 = vrot.slane %v3569_v21, 1  ;;  %v3361_v41 = vmul.f32 %v3245_v11, %v3105_v48  ;;  %v12977_v9 = vrot.slane %v12976_v16, 2  ;;  %v3555_v17 = vadd.f32 %v3554_v25, %v3553_v27  ;;  %v3106_v48 = vld [vmem:[#allocation2 + $0x90] sm:$0xff] }
 0x875   : > { %v3576_v54 = vadd.f32 %v3575_v31, %v3574_v39  ;;  %v3546_v58 = vadd.f32 %v3545_v32, %v3544_v29  ;;  %v3417_v38 = vadd.f32 %v3416_v30, %v3415_v47  ;;  %v3580_v33 = vrot.slane %v3579_v42, 4 }
 0x876   : > { %v3698_v23 = vadd.f32 %v12977_v9, %v3564_v34  ;;  %v3571_v40 = vadd.f32 %v3570_v59, %v3569_v21  ;;  %v3495_v10 = vsel %vm666_vm0, %v3361_v41, 0.0  ;;  %v12979_v26 = vrot.slane %v12978_v24, 2 }
 0x877   : > { %v3556_v1 = vrot.slane %v3555_v17, 1  ;;  %v3577_v46 = vrot.slane %v3576_v54, 1  ;;  %v3547_v6 = vrot.slane %v3546_v58, 2  ;;  %v12980_v56 = vrot.slane %v12947_v36, 5 }
 0x878   : > { %v10973_v15 = vmul.f32 %v12979_v26, %v3698_v23  ;;  %v12981_v19 = vrot.slane %v12976_v16, 3  ;;  %v3581_v2 = vadd.f32 %v3580_v33, %v3579_v42  ;;  %v3496_v11 = vrot.slane %v3495_v10, 4  ;;  %v3273_v33 = vpop.permute.xlu1 %3272 }
 0x879   : > { %v3677_v12 = vadd.f32 %v12980_v56, %v3417_v38  ;;  %v3557_v39 = vadd.f32 %v3556_v1, %v3555_v17  ;;  %v3578_v37 = vadd.f32 %v3577_v46, %v3576_v54  ;;  %v3548_v47 = vadd.f32 %v3547_v6, %v3546_v58  ;;  %v3107_v17 = vld [vmem:[#allocation2 + $0x98] sm:$0xff] }
 0x87a   : > { %v3699_v61 = vadd.f32 %v12981_v19, %v3571_v40  ;;  %v3919_v27 = vrot.slane %v10973_v15, 6  ;;  %v12982_v21 = vrot.slane %v12951_v20, 5  ;;  %v12983_v34 = vrot.slane %v12978_v24, 3 }
 0x87b   : > { %v3582_v31 = vrot.slane %v3581_v2, 2  ;;  %v3497_v32 = vadd.f32 %v3496_v11, %v3495_v10  ;;  %v12984_v30 = vrot.slane %v12976_v16, 1  ;;  %v12985_v42 = vrot.slane %v12976_v16, 4 }
 0x87c   : > { %v10982_v29 = vmul.f32 %v12982_v21, %v3677_v12  ;;  %v10986_v25 = vmul.f32 %v12983_v34, %v3699_v61  ;;  %v3549_v9 = vrot.slane %v3548_v47, 1  ;;  %v3362_v23 = vmul.f32 %v3252_v5, %v3106_v48  ;;  %v3104_v21 = vld [vmem:[#allocation2 + $0x80] sm:$0xff] }
 0x87d   : > { %v3697_v59 = vadd.f32 %v12984_v30, %v3557_v39  ;;  %v3700_v41 = vadd.f32 %v12985_v42, %v3578_v37  ;;  %v3583_v58 = vadd.f32 %v3582_v31, %v3581_v2  ;;  %v3498_v38 = vrot.slane %v3497_v32, 2  ;;  %v3266_v2 = vpop.permute.xlu0 %3265  ;;  %v3109_v30 = vld [vmem:[#allocation2 + $0xa8] sm:$0xff] }
 0x87e   : > { %v3921_v54 = vrot.slane %v10986_v25, 5  ;;  %v3363_v40 = vmul.f32 %v3259_v14, %v3107_v17  ;;  %v12986_v26 = vrot.slane %v12978_v24, 1  ;;  %v12987_v10 = vrot.slane %v12978_v24, 4 }
 0x87f   : > { %v3550_v6 = vadd.f32 %v3549_v9, %v3548_v47  ;;  %v3502_v56 = vsel %vm666_vm0, %v3362_v23, 0.0  ;;  %v3584_v12 = vrot.slane %v3583_v58, 1  ;;  %v3499_v5 = vadd.f32 %v3498_v38, %v3497_v32 }
 0x880   : > { %v10995_v1 = vmul.f32 %v12986_v26, %v3697_v59  ;;  %v10999_v46 = vmul.f32 %v12987_v10, %v3700_v41  ;;  %v3503_v19 = vrot.slane %v3502_v56, 4  ;;  %v3509_v61 = vsel %vm666_vm0, %v3363_v40, 0.0  ;;  %v3108_v59 = vld [vmem:[#allocation2 + $0xa0] sm:$0xff]  ;;  %v3280_v10 = vpop.permute.xlu1 %3279 }
 0x881   : > { %v3696_v39 = vadd.f32 %v12976_v16, %v3550_v6  ;;  %v3510_v37 = vrot.slane %v3509_v61, 4  ;;  %v3585_v34 = vadd.f32 %v3584_v12, %v3583_v58  ;;  %v3500_v31 = vrot.slane %v3499_v5, 1 }
 0x882   : > { %v3917_v14 = vrot.slane %v10995_v1, 7  ;;  %v3504_v48 = vadd.f32 %v3503_v19, %v3502_v56  ;;  %v3360_v47 = vmul.f32 %v3238_v63, %v3104_v21  ;;  %v3365_v41 = vmul.f32 %v3273_v33, %v3109_v30  ;;  %v12990_v33 = vld [vmem:[#allocation31_spill] sm:$0xff] }
 0x883   : > { %v11007_v32 = vmul.f32 %v12978_v24, %v3696_v39  ;;  %v3511_v42 = vadd.f32 %v3510_v37, %v3509_v61  ;;  %v3364_v9 = vmul.f32 %v3266_v2, %v3108_v59  ;;  %v12988_v23 = vrot.slane %v12976_v16, 5  ;;  %v12992_v30 = vld [vmem:[#allocation27_spill] sm:$0xff] }
 0x884   : > { %v3501_v38 = vadd.f32 %v3500_v31, %v3499_v5  ;;  %v3505_v40 = vrot.slane %v3504_v48, 2  ;;  %v3488_v26 = vsel %vm666_vm0, %v3360_v47, 0.0  ;;  %v3523_v63 = vsel %vm666_vm0, %v3365_v41, 0.0  ;;  %v3110_v5 = vld [vmem:[#allocation2 + $0xb0] sm:$0xff] }
 0x885   : > { %v3701_v17 = vadd.f32 %v12988_v23, %v3585_v34  ;;  %v3512_v58 = vrot.slane %v3511_v42, 2  ;;  %v3489_v6 = vrot.slane %v3488_v26, 4  ;;  %v3516_v56 = vsel %vm666_vm0, %v3364_v9, 0.0 }
 0x886   : > { %v12989_v12 = vrot.slane %v12978_v24, 5  ;;  %v12991_v61 = vrot.slane %v12990_v33, 1  ;;  %v3506_v39 = vadd.f32 %v3505_v40, %v3504_v48  ;;  %v3524_v37 = vrot.slane %v3523_v63, 4 }
 0x887   : > { %v3513_v21 = vadd.f32 %v3512_v58, %v3511_v42  ;;  %v3490_v34 = vadd.f32 %v3489_v6, %v3488_v26  ;;  %v3517_v31 = vrot.slane %v3516_v56, 4  ;;  %v3366_v47 = vmul.f32 %v3280_v10, %v3110_v5 }
 0x888   : > { %v11016_v19 = vmul.f32 %v12989_v12, %v3701_v17  ;;  %v3689_v2 = vadd.f32 %v12991_v61, %v3501_v38  ;;  %v12993_v59 = vrot.slane %v12992_v30, 1  ;;  %v3507_v9 = vrot.slane %v3506_v39, 1 }
 0x889   : > { %v3525_v23 = vadd.f32 %v3524_v37, %v3523_v63  ;;  %v12994_v17 = vrot.slane %v12947_v36, 7  ;;  %v3514_v11 = vrot.slane %v3513_v21, 1  ;;  %v3491_v38 = vrot.slane %v3490_v34, 2 }
 0x88a   : > { %v3813_v41 = vmul.f32 %v12993_v59, %v3689_v2  ;;  %v3518_v48 = vadd.f32 %v3517_v31, %v3516_v56  ;;  %v3530_v40 = vsel %vm666_vm0, %v3366_v47, 0.0  ;;  %v3508_v42 = vadd.f32 %v3507_v9, %v3506_v39 }
 0x88b   : > { %v3679_v12 = vadd.f32 %v12994_v17, %v10959_v13  ;;  %v3526_v26 = vrot.slane %v3525_v23, 2  ;;  %v3531_v58 = vrot.slane %v3530_v40, 4  ;;  %v3515_v10 = vadd.f32 %v3514_v11, %v3513_v21 }
 0x88c   : > { %v3903_v61 = vrot.slane %v3813_v41, 7  ;;  %v3492_v6 = vadd.f32 %v3491_v38, %v3490_v34  ;;  %v3519_v5 = vrot.slane %v3518_v48, 2  ;;  %v12995_v63 = vrot.slane %v12951_v20, 6 }
 0x88d   : > { %v12996_v36 = vrot.slane %v12990_v33, 2  ;;  %v3527_v37 = vadd.f32 %v3526_v26, %v3525_v23  ;;  %v3532_v56 = vadd.f32 %v3531_v58, %v3530_v40  ;;  %v12997_v31 = vrot.slane %v12951_v20, 7 }
 0x88e   : > { %v3802_v2 = vmul.f32 %v12995_v63, %v10944_v45  ;;  %v12998_v39 = vrot.slane %v12990_v33, 3  ;;  %v3493_v11 = vrot.slane %v3492_v6, 1  ;;  %v3520_v21 = vadd.f32 %v3519_v5, %v3518_v48  ;;  %v3287_v48 = vpop.permute.xlu1 %3286 }
 0x88f   : > { %v3690_v13 = vadd.f32 %v12996_v36, %v3508_v42  ;;  %v3803_v47 = vmul.f32 %v12997_v31, %v3679_v12  ;;  %v3870_v45 = vsel %vm3869_vm6, %v3868_v3, %v10964_v18  ;;  %v12999_v34 = vrot.slane %v12992_v30, 2 }
 0x890   : > { %v3691_v59 = vadd.f32 %v12998_v39, %v3515_v10  ;;  %v3528_v9 = vrot.slane %v3527_v37, 1  ;;  %v3533_v23 = vrot.slane %v3532_v56, 2  ;;  %v3873_v20 = vsel %vm3872_vm7, %v3871_v50, %v3870_v45 }
 0x891   : > { %v3814_v41 = vmul.f32 %v12999_v34, %v3690_v13  ;;  %v13000_v17 = vrot.slane %v12992_v30, 3  ;;  %v3494_v38 = vadd.f32 %v3493_v11, %v3492_v6  ;;  %v3521_v40 = vrot.slane %v3520_v21, 1  ;;  %v3336_v13 = vpop.permute.xlu0 %3335 }
 0x892   : > { %v3876_v43 = vsel %vm3875_vm8, %v3874_v57, %v3873_v20  ;;  %v3529_v18 = vadd.f32 %v3528_v9, %v3527_v37  ;;  %v3534_v42 = vadd.f32 %v3533_v23, %v3532_v56  ;;  %v3880_v6 = vrot.slane %v10982_v29, 3  ;;  %v3343_v9 = vpop.permute.xlu1 %3342  ;;  %v3119_v23 = vld [vmem:[#allocation2 + $0xf8] sm:$0xff] }
 0x893   : > { %v3815_v12 = vmul.f32 %v13000_v17, %v3691_v59  ;;  %v3905_v3 = vrot.slane %v3814_v41, 6  ;;  %v3879_v26 = vsel %vm3878_vm9, %v3877_v0, %v3876_v43  ;;  %v3688_v50 = vadd.f32 %v12990_v33, %v3494_v38 }
 0x894   : > { %v3522_v10 = vadd.f32 %v3521_v40, %v3520_v21  ;;  %v13001_v5 = vrot.slane %v12990_v33, 5  ;;  %v3535_v63 = vrot.slane %v3534_v42, 1  ;;  %v3883_v57 = vrot.slane %v3802_v2, 2 }
 0x895   : > { %v3907_v58 = vrot.slane %v3815_v12, 5  ;;  %v3886_v36 = vrot.slane %v3803_v47, 1  ;;  %v3812_v37 = vmul.f32 %v12992_v30, %v3688_v50  ;;  %v13002_v62 = vrot.slane %v12990_v33, 4 }
 0x896   : > { %v3693_v8 = vadd.f32 %v13001_v5, %v3529_v18  ;;  %v3882_v0 = vsel %vm3881_vm10, %v3880_v6, %v3879_v26  ;;  %v3374_v31 = vmul.f32 %v3336_v13, %v3118_v44  ;;  %v13003_v39 = vrot.slane %v12992_v30, 5 }
 0x897   : > { %v3692_v56 = vadd.f32 %v13002_v62, %v3522_v10  ;;  %v3536_v11 = vadd.f32 %v3535_v63, %v3534_v42  ;;  %v3885_v29 = vsel %vm3884_vm11, %v3883_v57, %v3882_v0  ;;  %v3894_v2 = vsel %vm3875_vm8, %v3893_v60, %v10876_v7  ;;  %v3111_v60 = vld [vmem:[#allocation2 + $0xb8] sm:$0xff] }
 0x898   : > { %v3817_v59 = vmul.f32 %v13003_v39, %v3693_v8  ;;  %v3904_v47 = vsel %vm3869_vm6, %v3903_v61, %v3812_v37  ;;  %v13004_v21 = vrot.slane %v12992_v30, 4  ;;  %v3888_v34 = vsel %vm3887_vm12, %v3886_v36, %v3885_v29 }
 0x899   : > { %v3586_v41 = vsel %vm666_vm0, %v3374_v31, 0.0  ;;  %v13005_v17 = vrot.slane %v12990_v33, 6  ;;  %8382 = vmatprep.mubr.msk.f32.mxu0 %vm666_vm0, %v3888_v34  ;;  %v3896_v7 = vsel %vm3878_vm9, %v3895_v49, %v3894_v2  ;;  %v3901_v40 = vrot.slane %v10940_v51, 1 }
 0x89a   : > { %v3816_v45 = vmul.f32 %v13004_v21, %v3692_v56  ;;  %v3911_v20 = vrot.slane %v3817_v59, 3  ;;  %v3587_v22 = vrot.slane %v3586_v41, 4  ;;  %v3898_v38 = vsel %vm3881_vm10, %v3897_v55, %v3896_v7 }
 0x89b   : > { %v3694_v12 = vadd.f32 %v13005_v17, %v3536_v11  ;;  %v3367_v43 = vmul.f32 %v3287_v48, %v3111_v60  ;;  %v3900_v42 = vsel %vm3884_vm11, %v3899_v53, %v3898_v38  ;;  %v3375_v26 = vmul.f32 %v3343_v9, %v3119_v23 }
 0x89c   : > { %v3909_v61 = vrot.slane %v3816_v45, 4  ;;  %v3588_v18 = vadd.f32 %v3587_v22, %v3586_v41  ;;  %v13006_v44 = vrot.slane %v12992_v30, 6  ;;  %v3902_v49 = vsel %vm3887_vm12, %v3901_v40, %v3900_v42 }
 0x89d   : > { %v3537_v50 = vsel %vm666_vm0, %v3367_v43, 0.0  ;;  %v3906_v28 = vsel %vm3872_vm7, %v3905_v3, %v3904_v47  ;;  %v3918_v55 = vsel %vm3869_vm6, %v3917_v14, %v11007_v32  ;;  %8383 = vmatmul.mubr.msk.f32.vlgmr.msra.gmra.mrb[12].mxu0 %vm666_vm0, %v3902_v49  ;;  %v3593_v53 = vsel %vm666_vm0, %v3375_v26, 0.0  ;;  %v13010_v26 = vld [vmem:[#allocation15_spill] sm:$0xff] }
 0x89e   : > { %v3818_v4 = vmul.f32 %v13006_v44, %v3694_v12  ;;  %v3589_v51 = vrot.slane %v3588_v18, 2  ;;  %v3538_v52 = vrot.slane %v3537_v50, 4  ;;  %v3908_v48 = vsel %vm3875_vm8, %v3907_v58, %v3906_v28 }
 0x89f   : > { %v3594_v10 = vrot.slane %v3593_v53, 4  ;;  %v3910_v6 = vsel %vm3878_vm9, %v3909_v61, %v3908_v48  ;;  %v3920_v3 = vsel %vm3872_vm7, %v3919_v27, %v3918_v55  ;;  %v13007_v58 = vrot.slane %v10999_v46, 4 }
 0x8a0   : > { %v3913_v5 = vrot.slane %v3818_v4, 2  ;;  %v3590_v8 = vadd.f32 %v3589_v51, %v3588_v18  ;;  %v3539_v1 = vadd.f32 %v3538_v52, %v3537_v50  ;;  %v3912_v14 = vsel %vm3881_vm10, %v3911_v20, %v3910_v6  ;;  %v13011_v4 = vld [vmem:[#allocation16_spill] sm:$0xff] }
 0x8a1   : > { %v3922_v32 = vsel %vm3875_vm8, %v3921_v54, %v3920_v3  ;;  %v3595_v63 = vadd.f32 %v3594_v10, %v3593_v53  ;;  %v3925_v13 = vrot.slane %v11016_v19, 3  ;;  %v3638_v56 = vrot.slane %v12976_v16, 6 }
 0x8a2   : > { %v3914_v57 = vsel %vm3884_vm11, %v3913_v5, %v3912_v14  ;;  %v3924_v36 = vsel %vm3878_vm9, %v13007_v58, %v3922_v32  ;;  %v3591_v15 = vrot.slane %v3590_v8, 1  ;;  %v3540_v37 = vrot.slane %v3539_v1, 2 }
 0x8a3   : > { %v3596_v27 = vrot.slane %v3595_v63, 2  ;;  %v3926_v62 = vsel %vm3881_vm10, %v3925_v13, %v3924_v36  ;;  %v3762_v59 = vrot.slane %v12978_v24, 6  ;;  %v3632_v46 = vrot.slane %v12990_v33, 7 }
 0x8a4   : > { %v3592_v0 = vadd.f32 %v3591_v15, %v3590_v8  ;;  %v3541_v25 = vadd.f32 %v3540_v37, %v3539_v1  ;;  %v3639_v19 = vrot.slane %v12976_v16, 7  ;;  %v3756_v45 = vrot.slane %v12992_v30, 7  ;;  %v13008_v30 = vld [vmem:[#allocation14_spill] sm:$0xff] }
 0x8a5   : > { %v3597_v31 = vadd.f32 %v3596_v27, %v3595_v63  ;;  %v3763_v9 = vrot.slane %v12978_v24, 7  ;;  %v13009_v24 = vld [vmem:[#allocation13_spill] sm:$0xff]  ;;  %v11153_v27 = vld [vmem:[%s12808_s15] sm:$0xff] }
 0x8a6   : > { %v3702_v54 = vadd.f32 %v3638_v56, %v3592_v0  ;;  %v3542_v39 = vrot.slane %v3541_v25, 1  ;;  %8396 = vmatprep.mubr.msk.f32.mxu1 %vm906_vm1, %v11153_v27 }
 0x8a7   : > { %v3598_v11 = vrot.slane %v3597_v31, 1 }
 0x8a8   : > { %v3543_v29 = vadd.f32 %v3542_v39, %v3541_v25  ;;  %v3826_v2 = vmul.f32 %v3762_v59, %v3702_v54 }
 0x8a9   : > { %v3599_v47 = vadd.f32 %v3598_v11, %v3597_v31 }
 0x8aa   : > { %v3695_v21 = vadd.f32 %v3632_v46, %v3543_v29  ;;  %v3927_v34 = vrot.slane %v3826_v2, 2 }
 0x8ab   : > { %v3703_v41 = vadd.f32 %v3639_v19, %v3599_v47 }
 0x8ac   : > { %v3819_v23 = vmul.f32 %v3756_v45, %v3695_v21  ;;  %v3928_v20 = vsel %vm3884_vm11, %v3927_v34, %v3926_v62 }
 0x8ad   : > { %v3827_v17 = vmul.f32 %v3763_v9, %v3703_v41 }
 0x8ae   : > { %v3915_v12 = vrot.slane %v3819_v23, 1 }
 0x8af   : > { %v3929_v22 = vrot.slane %v3827_v17, 1 }
 0x8b0   : > { %v3916_v33 = vsel %vm3887_vm12, %v3915_v12, %v3914_v57  ;;  %v1001_v12 = vld [vmem:[%s12808_s15 + $0x8] sm:$0xff] }
 0x8b1   : > { %8385 = vmatprep.mubr.msk.f32.mxu0 %vm666_vm0, %v3916_v33  ;;  %v3930_v16 = vsel %vm3887_vm12, %v3929_v22, %v3928_v20  ;;  %v1002_v22 = vld [vmem:[%s12808_s15 + $0x10] sm:$0xff]  ;;  %v1003_v33 = vld [vmem:[%s12808_s15 + $0x18] sm:$0xff] }
 0x8b2   : > { %8386 = vmatmul.mubr.msk.f32.gmra.mrb[14].mxu0 %vm666_vm0, %v3930_v16  ;;  %v1004_v16 = vld [vmem:[%s12808_s15 + $0x20] sm:$0xff] }
 0x970   : > { %v8384_v7 = vpop.f32.mrb[12].mxu0 }
 0x971   : > { %v11123_v60 = vadd.f32 %v8384_v7, %v13008_v30  ;;  %v4005_v61 = vpop.f32.mrb[13].mxu0  ;;  %v1005_v7 = vld [vmem:[%s12808_s15 + $0x28] sm:$0xff]  ;;  %v1006_v30 = vld [vmem:[%s12808_s15 + $0x30] sm:$0xff] }
 0x972   : > { %v11126_v38 = vadd.f32 %v4005_v61, %v13009_v24  ;;  %v1007_v61 = vld [vmem:[%s12808_s15 + $0x38] sm:$0xff]  ;;  %v1008_v24 = vld [vmem:[%s12809_s16] sm:$0xff] }
 0x973   : > { %v4031_v40 = vsel %vm906_vm1, %v11123_v60, 0.0  ;;  %8424 = vmatprep.mubr.msk.f32.mxu0 %vm666_vm0, %v1008_v24 }
 0x974   : > { %4032 = vadd.xlane.f32.xlu1 %v4031_v40  ;;  %v4028_v43 = vsel %vm906_vm1, %v11126_v38, 0.0 }
 0x975   : > { %4029 = vadd.xlane.f32.xlu0 %v4028_v43 }
 0x985   : > { %v8387_v18 = vpop.f32.mrb[14].mxu0 }
 0x986   : > { %v4015_v42 = vpop.f32.mrb[15].mxu0  ;;  %v11136_v49 = vadd.f32 %v8387_v18, %v13011_v4  ;;  %v4214_v4 = vld [vmem:[%s12806_s13 + $0x28] sm:$0xff] }
 0x987   : > { %v11133_v44 = vadd.f32 %v4015_v42, %v13010_v26  ;;  %v4210_v26 = vld [vmem:[%s12806_s13 + $0x8] sm:$0xff] }
 0x988   : > { %v4037_v28 = vsel %vm906_vm1, %v11136_v49, 0.0 }
 0x989   : > { %v4034_v50 = vsel %vm906_vm1, %v11133_v44, 0.0 }
 0x98a   : > { %4035 = vadd.xlane.f32.xlu0 %v4034_v50  ;;  %v4209_v50 = vld [vmem:[%s12806_s13] sm:$0xff] }
 0x98e   : > { %4038 = vadd.xlane.f32.xlu0 %v4037_v28  ;;  %v4213_v28 = vld [vmem:[%s12806_s13 + $0x20] sm:$0xff] }
 0xa01   : > { %v4033_v55 = vpop.xlane.xlu1 %4032 }
 0xa02   : > { %v4041_v51 = vmul.f32 0.03125, %v4033_v55  ;;  %v4030_v52 = vpop.xlane.xlu0 %4029 }
 0xa03   : > { %v4040_v53 = vmul.f32 0.03125, %v4030_v52 }
 0xa04   : > { %v4045_v48 = vsub.f32 %v11123_v60, %v4041_v51 }
 0xa05   : > { %v4044_v10 = vsub.f32 %v11126_v38, %v4040_v53  ;;  %v4212_v53 = vld [vmem:[%s12806_s13 + $0x18] sm:$0xff] }
 0xa06   : > { %v4049_v6 = vmul.f32 %v4045_v48, %v4045_v48 }
 0xa07   : > { %v4048_v5 = vmul.f32 %v4044_v10, %v4044_v10 }
 0xa08   : > { %v4055_v3 = vsel %vm906_vm1, %v4049_v6, 0.0 }
 0xa09   : > { %4056 = vadd.xlane.f32.xlu1 %v4055_v3  ;;  %v4052_v8 = vsel %vm906_vm1, %v4048_v5, 0.0 }
 0xa0a   : > { %4053 = vadd.xlane.f32.xlu0 %v4052_v8 }
 0xa17   : > { %v4036_v1 = vpop.xlane.xlu0 %4035 }
 0xa18   : > { %v4042_v14 = vmul.f32 0.03125, %v4036_v1  ;;  %v4211_v1 = vld [vmem:[%s12806_s13 + $0x10] sm:$0xff] }
 0xa1a   : > { %v4046_v32 = vsub.f32 %v11133_v44, %v4042_v14  ;;  %v4215_v14 = vld [vmem:[%s12806_s13 + $0x30] sm:$0xff] }
 0xa1b   : > { %v4039_v63 = vpop.xlane.xlu0 %4038 }
 0xa1c   : > { %v4043_v57 = vmul.f32 0.03125, %v4039_v63  ;;  %v4050_v58 = vmul.f32 %v4046_v32, %v4046_v32 }
 0xa1e   : > { %v4047_v36 = vsub.f32 %v11136_v49, %v4043_v57  ;;  %v4058_v13 = vsel %vm906_vm1, %v4050_v58, 0.0 }
 0xa1f   : > { %4059 = vadd.xlane.f32.xlu0 %v4058_v13 }
 0xa20   : > { %v4051_v15 = vmul.f32 %v4047_v36, %v4047_v36 }
 0xa22   : > { %v4061_v37 = vsel %vm906_vm1, %v4051_v15, 0.0 }
 0xa23   : > { %4062 = vadd.xlane.f32.xlu1 %v4061_v37 }
 0xa96   : > { %v4057_v62 = vpop.xlane.xlu1 %4056 }
 0xa97   : > { %v4065_v56 = vmul.f32 0.03125, %v4057_v62  ;;  %v4054_v0 = vpop.xlane.xlu0 %4053 }
 0xa98   : > { %v4064_v25 = vmul.f32 0.03125, %v4054_v0 }
 0xa99   : > { %v4069_v31 = vadd.f32 1e-05, %v4065_v56 }
 0xa9a   : > { %v4068_v54 = vadd.f32 1e-05, %v4064_v25 }
 0xa9b   : > { %9093 = vrsqrt.f32 %v4069_v31 }
 0xa9c   : > { %9095 = vrsqrt.f32 %v4068_v54 }
 0xaa5   : > { %v9094_v39 = vpop.eup %9093 }
 0xaa6   : > { %v9096_v59 = vpop.eup %9095  ;;  %v4077_v11 = vmul.f32 %v9094_v39, %v4045_v48  ;;  %v4216_v48 = vld [vmem:[%s12806_s13 + $0x38] sm:$0xff] }
 0xaa7   : > { %v4076_v46 = vmul.f32 %v9096_v59, %v4044_v10 }
 0xaa9   : > { %v8766_v29 = vpack.c.bf16 %v4077_v11, %v4076_v46 }
 0xaab   : > { %8767 = vmatprep.subr.bf16.mxu1 %v8766_v29 }
 0xaac   : > { %v4060_v2 = vpop.xlane.xlu0 %4059  ;;  %8769 = vmatpush3.bf16.msra.mxu1 %v8766_v29 }
 0xaad   : > { %v4066_v19 = vmul.f32 0.03125, %v4060_v2 }
 0xaaf   : > { %v4070_v47 = vadd.f32 1e-05, %v4066_v19 }
 0xab0   : > { %v4063_v21 = vpop.xlane.xlu1 %4062 }
 0xab1   : > { %v4067_v45 = vmul.f32 0.03125, %v4063_v21  ;;  %9097 = vrsqrt.f32 %v4070_v47 }
 0xab3   : > { %v4071_v34 = vadd.f32 1e-05, %v4067_v45 }
 0xab5   : > { %9099 = vrsqrt.f32 %v4071_v34  ;;  %v1009_v34 = vld [vmem:[%s12809_s16 + $0x8] sm:$0xff] }
 0xabb   : > { %v9098_v41 = vpop.eup %9097 }
 0xabc   : > { %v4078_v23 = vmul.f32 %v9098_v41, %v4046_v32  ;;  %v1010_v41 = vld [vmem:[%s12809_s16 + $0x10] sm:$0xff] }
 0xabf   : > { %v9100_v9 = vpop.eup %9099 }
 0xac0   : > { %v4079_v20 = vmul.f32 %v9100_v9, %v4047_v36  ;;  %v1011_v9 = vld [vmem:[%s12809_s16 + $0x18] sm:$0xff] }
 0xac2   : > { %v8770_v17 = vpack.c.bf16 %v4079_v20, %v4078_v23 }
 0xac4   : > { %8771 = vmatprep.subr.bf16.mxu1 %v8770_v17 }
 0xac5   : > { %8773 = vmatpush3.bf16.msra.mxu1 %v8770_v17 }
 0xac8   : > { %8397 = vmatmul.mubr.msk.f32.vlgmr.msra.gmra.mrb[32].mxu1 %vm906_vm1, %v1001_v12 }
 0xac9   : > { %8399 = vmatprep.mubr.msk.f32.mxu1 %vm906_vm1, %v1002_v22 }
 0xacc   : > { %8400 = vmatmul.mubr.msk.f32.gmra.mrb[34].mxu1 %vm906_vm1, %v1003_v33 }
 0xacd   : > { %8402 = vmatprep.mubr.msk.f32.mxu1 %vm906_vm1, %v1004_v16 }
 0xad0   : > { %8403 = vmatmul.mubr.msk.f32.gmra.mrb[36].mxu1 %vm906_vm1, %v1005_v7 }
 0xad1   : > { %8405 = vmatprep.mubr.msk.f32.mxu1 %vm906_vm1, %v1006_v30 }
 0xad4   : > { %8406 = vmatmul.mubr.msk.f32.gmra.mrb[38].mxu1 %vm906_vm1, %v1007_v61 }
 0xb9b   : > { %v8398_v40 = vpop.f32.mrb[32].mxu1 }
 0xb9c   : > { %v4170_v43 = vpop.f32.mrb[33].mxu1  ;;  %v4218_v51 = vmul.f32 %v8398_v40, %v4210_v26  ;;  %v4230_v52 = vmul.f32 %v8398_v40, %v4214_v4 }
 0xb9d   : > { %v4217_v3 = vmul.f32 %v4209_v50, %v4170_v43  ;;  %v4229_v8 = vmul.f32 %v4213_v28, %v4170_v43 }
 0xb9f   : > { %v8401_v18 = vpop.f32.mrb[34].mxu1 }
 0xba0   : > { %v4180_v42 = vpop.f32.mrb[35].mxu1  ;;  %v4220_v36 = vmul.f32 %v8401_v18, %v4212_v53  ;;  %v4232_v13 = vmul.f32 %v8401_v18, %v4216_v48 }
 0xba1   : > { %v4219_v56 = vmul.f32 %v4211_v1, %v4180_v42  ;;  %v4231_v0 = vmul.f32 %v4215_v14, %v4180_v42 }
 0xba3   : > { %v8404_v55 = vpop.f32.mrb[36].mxu1 }
 0xba4   : > { %v4222_v10 = vmul.f32 %v8404_v55, %v4214_v4  ;;  %v4234_v6 = vmul.f32 %v8404_v55, %v4210_v26  ;;  %v4190_v5 = vpop.f32.mrb[37].mxu1 }
 0xba5   : > { %v4221_v32 = vmul.f32 %v4213_v28, %v4190_v5  ;;  %v4233_v63 = vmul.f32 %v4209_v50, %v4190_v5 }
 0xba6   : > { %v4226_v57 = vsub.f32 %v4218_v51, %v4222_v10  ;;  %v4238_v58 = vadd.f32 %v4234_v6, %v4230_v52 }
 0xba7   : > { %v4225_v15 = vsub.f32 %v4217_v3, %v4221_v32  ;;  %v4237_v37 = vadd.f32 %v4233_v63, %v4229_v8  ;;  %v8407_v62 = vpop.f32.mrb[38].mxu1  ;;  %v7893_v8 = vld [vmem:[%s12908_s29 + $0x20] sm:$0xff]  ;;  %v7896_v63 = vld [vmem:[%s12908_s29 + $0x38] sm:$0xff] }
 0xba8   : > { %v4224_v25 = vmul.f32 %v8407_v62, %v4216_v48  ;;  %v4236_v31 = vmul.f32 %v8407_v62, %v4212_v53  ;;  %v4200_v54 = vpop.f32.mrb[39].mxu1 }
 0xba9   : > { %v4223_v39 = vmul.f32 %v4215_v14, %v4200_v54  ;;  %v4235_v59 = vmul.f32 %v4211_v1, %v4200_v54  ;;  %v8774_v11 = vpack.c.bf16 %v4226_v57, %v4225_v15  ;;  %v8782_v46 = vpack.c.bf16 %v4238_v58, %v4237_v37  ;;  %v7894_v1 = vld [vmem:[%s12908_s29 + $0x28] sm:$0xff]  ;;  %v7895_v14 = vld [vmem:[%s12908_s29 + $0x30] sm:$0xff]  ;;  %v7901_v57 = vld [vmem:[%s12799_s6 + $0x20] sm:$0xff] }
 0xbaa   : > { %v4228_v29 = vsub.f32 %v4220_v36, %v4224_v25  ;;  %v4240_v2 = vadd.f32 %v4236_v31, %v4232_v13  ;;  %v8790_v32 = vpack.c.bf16 %v7894_v1, %v7893_v8  ;;  %v7902_v58 = vld [vmem:[%s12799_s6 + $0x28] sm:$0xff]  ;;  %v8794_v36 = vpack.c.bf16 %v7896_v63, %v7895_v14  ;;  %v7903_v15 = vld [vmem:[%s12799_s6 + $0x30] sm:$0xff]  ;;  %v7904_v37 = vld [vmem:[%s12799_s6 + $0x38] sm:$0xff] }
 0xbab   : > { %v4227_v19 = vsub.f32 %v4219_v56, %v4223_v39  ;;  %v4239_v47 = vadd.f32 %v4235_v59, %v4231_v0  ;;  %8775 = vmatprep.subr.bf16.mxu0 %v8774_v11  ;;  %v8798_v13 = vpack.c.bf16 %v7902_v58, %v7901_v57  ;;  %v8802_v62 = vpack.c.bf16 %v7904_v37, %v7903_v15  ;;  %v7931_v8 = vld [vmem:[%s12802_s9 + $0x40] sm:$0xff]  ;;  %v7932_v1 = vld [vmem:[%s12802_s9 + $0x48] sm:$0xff]  ;;  %v7933_v57 = vld [vmem:[%s12802_s9 + $0x50] sm:$0xff] }
 0xbac   : > { %8777 = vmatpush3.bf16.msra.mxu0 %v8774_v11  ;;  %8791 = vmatprep.subr.bf16.mxu1 %v8790_v32  ;;  %v7951_v14 = vld [vmem:[%s12803_s10 + $0xc0] sm:$0xff]  ;;  %v7952_v63 = vld [vmem:[%s12803_s10 + $0xc8] sm:$0xff]  ;;  %v7934_v58 = vld [vmem:[%s12802_s9 + $0x58] sm:$0xff] }
 0xbad   : > { %v8778_v21 = vpack.c.bf16 %v4228_v29, %v4227_v19  ;;  %v8786_v45 = vpack.c.bf16 %v4240_v2, %v4239_v47  ;;  %8793 = vmatpush3.bf16.msra.mxu1 %v8790_v32  ;;  %v8814_v32 = vpack.c.bf16 %v7932_v1, %v7931_v8  ;;  %v7953_v15 = vld [vmem:[%s12803_s10 + $0xd0] sm:$0xff]  ;;  %v7954_v37 = vld [vmem:[%s12803_s10 + $0xd8] sm:$0xff] }
 0xbae   : > { %8795 = vmatprep.subr.bf16.mxu1 %v8794_v36 }
 0xbaf   : > { %8779 = vmatprep.subr.bf16.mxu0 %v8778_v21 }
 0xbb0   : > { %8781 = vmatpush3.bf16.msra.mxu0 %v8778_v21 }
 0xbb1   : > { %8783 = vmatprep.subr.bf16.mxu0 %v8782_v46  ;;  %8797 = vmatpush3.bf16.msra.mxu1 %v8794_v36  ;;  %v8846_v36 = vpack.c.bf16 %v7952_v63, %v7951_v14 }
 0xbb4   : > { %8785 = vmatpush3.bf16.msra.mxu0 %v8782_v46 }
 0xbb5   : > { %8787 = vmatprep.subr.bf16.mxu0 %v8786_v45 }
 0xbb8   : > { %8789 = vmatpush3.bf16.msra.mxu0 %v8786_v45 }
 0xbb9   : > { %8799 = vmatprep.subr.bf16.mxu0 %v8798_v13 }
 0xbbb   : > { %8425 = vmatmul.mubr.msk.f32.vlgmr.msra.gmra.mrb[16].mxu0 %vm666_vm0, %v1009_v34 }
 0xbbc   : > { %8427 = vmatprep.mubr.msk.f32.mxu0 %vm666_vm0, %v1010_v41  ;;  %8801 = vmatpush3.bf16.msra.mxu0 %v8798_v13  ;;  %v8818_v13 = vpack.c.bf16 %v7934_v58, %v7933_v57 }
 0xbbd   : > { %8803 = vmatprep.subr.bf16.mxu0 %v8802_v62 }
 0xbbf   : > { %8428 = vmatmul.mubr.msk.f32.gmra.mrb[18].mxu0 %vm666_vm0, %v1011_v9 }
 0xbc0   : > { %8805 = vmatpush3.bf16.msra.mxu0 %v8802_v62  ;;  %v7935_v62 = vld [vmem:[%s12802_s9 + $0x60] sm:$0xff] }
 0xbc1   : > { %8815 = vmatprep.subr.bf16.mxu0 %v8814_v32 }
 0xc8e   : > { %v8426_v23 = vpop.f32.mrb[16].mxu0 }
 0xc8f   : > { %v11226_v20 = vadd.f32 %v8426_v23, %v11123_v60  ;;  %v4319_v17 = vpop.f32.mrb[17].mxu0 }
 0xc90   : > { %v11229_v12 = vadd.f32 %v4319_v17, %v11126_v38 }
 0xc91   : > { %13012 = vst [vmem:[#allocation32_spill] sm:$0xff] %v11226_v20  ;;  %v4345_v22 = vsel %vm906_vm1, %v11226_v20, 0.0 }
 0xc92   : > { %13013 = vst [vmem:[#allocation41_spill] sm:$0xff] %v11229_v12  ;;  %4346 = vadd.xlane.f32.xlu1 %v4345_v22  ;;  %v8429_v33 = vpop.f32.mrb[18].mxu0  ;;  %v4342_v16 = vsel %vm906_vm1, %v11229_v12, 0.0  ;;  %v9231_v22 = vld [vmem:[%s12807_s14] sm:$0xff] }
 0xc93   : > { %v11236_v7 = vadd.f32 %v8429_v33, %v11136_v49  ;;  %4343 = vadd.xlane.f32.xlu0 %v4342_v16  ;;  %v4329_v30 = vpop.f32.mrb[19].mxu0 }
 0xc94   : > { %v11239_v60 = vadd.f32 %v4329_v30, %v11133_v44 }
 0xc95   : > { %13014 = vst [vmem:[#allocation33_spill] sm:$0xff] %v11236_v7  ;;  %v4351_v38 = vsel %vm906_vm1, %v11236_v7, 0.0 }
 0xc96   : > { %13015 = vst [vmem:[#allocation28_spill] sm:$0xff] %v11239_v60  ;;  %4352 = vadd.xlane.f32.xlu1 %v4351_v38  ;;  %v4348_v61 = vsel %vm906_vm1, %v11239_v60, 0.0 }
 0xc97   : > { %4349 = vadd.xlane.f32.xlu0 %v4348_v61 }
 0xd1f   : > { %v4347_v24 = vpop.xlane.xlu1 %4346 }
 0xd20   : > { %v4355_v40 = vmul.f32 0.03125, %v4347_v24  ;;  %v4344_v43 = vpop.xlane.xlu0 %4343 }
 0xd21   : > { %v4354_v18 = vmul.f32 0.03125, %v4344_v43 }
 0xd22   : > { %v4359_v49 = vsub.f32 %v11226_v20, %v4355_v40 }
 0xd23   : > { %v4358_v42 = vsub.f32 %v11229_v12, %v4354_v18  ;;  %v4353_v26 = vpop.xlane.xlu1 %4352 }
 0xd24   : > { %v4357_v4 = vmul.f32 0.03125, %v4353_v26  ;;  %v4350_v44 = vpop.xlane.xlu0 %4349  ;;  %v4363_v50 = vmul.f32 %v4359_v49, %v4359_v49  ;;  %v9233_v26 = vld [vmem:[%s12807_s14 + $0x10] sm:$0xff] }
 0xd25   : > { %v4356_v28 = vmul.f32 0.03125, %v4350_v44  ;;  %v4362_v55 = vmul.f32 %v4358_v42, %v4358_v42  ;;  %v9235_v44 = vld [vmem:[%s12807_s14 + $0x20] sm:$0xff] }
 0xd26   : > { %v4361_v51 = vsub.f32 %v11236_v7, %v4357_v4  ;;  %v4369_v52 = vsel %vm906_vm1, %v4363_v50, 0.0  ;;  %v9234_v4 = vld [vmem:[%s12807_s14 + $0x18] sm:$0xff]  ;;  %v9236_v50 = vld [vmem:[%s12807_s14 + $0x28] sm:$0xff] }
 0xd27   : > { %v4360_v53 = vsub.f32 %v11239_v60, %v4356_v28  ;;  %4370 = vadd.xlane.f32.xlu1 %v4369_v52  ;;  %v4366_v48 = vsel %vm906_vm1, %v4362_v55, 0.0  ;;  %v9237_v28 = vld [vmem:[%s12807_s14 + $0x30] sm:$0xff]  ;;  %v9238_v55 = vld [vmem:[%s12807_s14 + $0x38] sm:$0xff]  ;;  %v9240_v52 = vld [vmem:[%s12807_s14 + $0x48] sm:$0xff] }
 0xd28   : > { %4367 = vadd.xlane.f32.xlu0 %v4366_v48  ;;  %v4365_v10 = vmul.f32 %v4361_v51, %v4361_v51  ;;  %v9242_v48 = vld [vmem:[%s12807_s14 + $0x58] sm:$0xff] }
 0xd29   : > { %v4364_v6 = vmul.f32 %v4360_v53, %v4360_v53 }
 0xd2a   : > { %v4375_v5 = vsel %vm906_vm1, %v4365_v10, 0.0  ;;  %v9243_v10 = vld [vmem:[%s12807_s14 + $0x60] sm:$0xff] }
 0xd2b   : > { %4376 = vadd.xlane.f32.xlu1 %v4375_v5  ;;  %v4372_v3 = vsel %vm906_vm1, %v4364_v6, 0.0  ;;  %v9244_v6 = vld [vmem:[%s12807_s14 + $0x68] sm:$0xff]  ;;  %v9245_v5 = vld [vmem:[%s12807_s14 + $0x70] sm:$0xff] }
 0xd2c   : > { %4373 = vadd.xlane.f32.xlu0 %v4372_v3  ;;  %v9246_v3 = vld [vmem:[%s12807_s14 + $0x78] sm:$0xff] }
 0xdb4   : > { %v4371_v56 = vpop.xlane.xlu1 %4370 }
 0xdb5   : > { %v4379_v0 = vmul.f32 0.03125, %v4371_v56  ;;  %v4368_v25 = vpop.xlane.xlu0 %4367  ;;  %v8850_v56 = vpack.c.bf16 %v7954_v37, %v7953_v15 }
 0xdb6   : > { %v4378_v31 = vmul.f32 0.03125, %v4368_v25  ;;  %v7955_v25 = vld [vmem:[%s12803_s10 + $0xe0] sm:$0xff] }
 0xdb7   : > { %v4383_v54 = vadd.f32 1e-05, %v4379_v0  ;;  %v7936_v0 = vld [vmem:[%s12802_s9 + $0x68] sm:$0xff] }
 0xdb8   : > { %v4382_v39 = vadd.f32 1e-05, %v4378_v31  ;;  %v4377_v59 = vpop.xlane.xlu1 %4376  ;;  %v7956_v31 = vld [vmem:[%s12803_s10 + $0xe8] sm:$0xff] }
 0xdb9   : > { %9101 = vrsqrt.f32 %v4383_v54  ;;  %v4381_v11 = vmul.f32 0.03125, %v4377_v59  ;;  %v4374_v46 = vpop.xlane.xlu0 %4373  ;;  %v8822_v54 = vpack.c.bf16 %v7936_v0, %v7935_v62  ;;  %v7937_v59 = vld [vmem:[%s12802_s9 + $0x70] sm:$0xff]  ;;  %v11424_v62 = vld [vmem:[%s12801_s8 + $0x4] sm:$0x7] }
 0xdba   : > { %9103 = vrsqrt.f32 %v4382_v39  ;;  %v4380_v29 = vmul.f32 0.03125, %v4374_v46  ;;  %v8854_v39 = vpack.c.bf16 %v7956_v31, %v7955_v25  ;;  %v7957_v46 = vld [vmem:[%s12803_s10 + $0xf0] sm:$0xff] }
 0xdbb   : > { %v4385_v2 = vadd.f32 1e-05, %v4381_v11  ;;  %v7938_v11 = vld [vmem:[%s12802_s9 + $0x78] sm:$0xff] }
 0xdbc   : > { %v4384_v19 = vadd.f32 1e-05, %v4380_v29  ;;  %v7958_v29 = vld [vmem:[%s12803_s10 + $0xf8] sm:$0xff] }
 0xdbd   : > { %9105 = vrsqrt.f32 %v4385_v2  ;;  %v8826_v2 = vpack.c.bf16 %v7938_v11, %v7937_v59 }
 0xdbe   : > { %9107 = vrsqrt.f32 %v4384_v19  ;;  %v8858_v19 = vpack.c.bf16 %v7958_v29, %v7957_v46 }
 0xdc3   : > { %v9102_v47 = vpop.eup %9101 }
 0xdc4   : > { %v9104_v21 = vpop.eup %9103  ;;  %v4391_v34 = vmul.f32 %v9102_v47, %v4359_v49  ;;  %v7943_v47 = vld [vmem:[%s12803_s10 + $0x80] sm:$0xff] }
 0xdc5   : > { %v4390_v45 = vmul.f32 %v9104_v21, %v4358_v42  ;;  %v9232_v42 = vld [vmem:[%s12807_s14 + $0x8] sm:$0xff] }
 0xdc6   : > { %v7944_v21 = vld [vmem:[%s12803_s10 + $0x88] sm:$0xff] }
 0xdc7   : > { %v9106_v41 = vpop.eup %9105  ;;  %8438 = vmatprep.mubr.msk.f32.mxu1 %vm906_vm1, %v4390_v45  ;;  %8452 = vmatprep.mubr.msk.f32.mxu0 %vm906_vm1, %v4390_v45  ;;  %v11411_v45 = vpack.c.bf16 %v7944_v21, %v7943_v47 }
 0xdc8   : > { %v9108_v9 = vpop.eup %9107  ;;  %8439 = vmatmul.mubr.msk.f32.vlgmr.msra.gmra.mrb[40].mxu1 %vm906_vm1, %v4391_v34  ;;  %8453 = vmatmul.mubr.msk.f32.vlgmr.msra.gmra.mrb[20].mxu0 %vm906_vm1, %v4391_v34  ;;  %v4393_v17 = vmul.f32 %v9106_v41, %v4361_v51  ;;  %v9239_v51 = vld [vmem:[%s12807_s14 + $0x40] sm:$0xff] }
 0xdc9   : > { %v4392_v23 = vmul.f32 %v9108_v9, %v4360_v53  ;;  %v9241_v53 = vld [vmem:[%s12807_s14 + $0x50] sm:$0xff]  ;;  %8817 = vmatpush3.bf16.msra.mxu0 %v8814_v32  ;;  %v7925_v9 = vld [vmem:[%s12800_s7 + $0x4] sm:$0xf] }
 0xdca   : > { %8819 = vmatprep.subr.bf16.mxu0 %v8818_v13 }
 0xdcb   : > { %8441 = vmatprep.mubr.msk.f32.mxu1 %vm906_vm1, %v4392_v23  ;;  %8455 = vmatprep.mubr.msk.f32.mxu0 %vm906_vm1, %v4392_v23 }
 0xdcc   : > { %8442 = vmatmul.mubr.msk.f32.gmra.mrb[42].mxu1 %vm906_vm1, %v4393_v17  ;;  %8456 = vmatmul.mubr.msk.f32.gmra.mrb[22].mxu0 %vm906_vm1, %v4393_v17  ;;  %v4738_v17 = vrot.slane %v7925_v9, %v9634_v35 }
 0xdcd   : > { %8466 = vmatprep.mubr.msk.f32.mxu1 %vm906_vm1, %v9231_v22  ;;  %8821 = vmatpush3.bf16.msra.mxu0 %v8818_v13  ;;  %v13018_v13 = vld [vmem:[#allocation18_spill] sm:$0xff] }
 0xdce   : > { %8823 = vmatprep.subr.bf16.mxu0 %v8822_v54  ;;  %v4770_v15 = vrot.slane %v7925_v9, %v13018_v13 }
 0xdd1   : > { %8825 = vmatpush3.bf16.msra.mxu0 %v8822_v54  ;;  %v4782_v54 = vrot.slane %v11424_v62, %v9634_v35 }
 0xdd2   : > { %8827 = vmatprep.subr.bf16.mxu0 %v8826_v2 }
 0xdd5   : > { %8829 = vmatpush3.bf16.msra.mxu0 %v8826_v2 }
 0xdd6   : > { %8831 = vmatprep.subr.bf16.mxu0 %v11411_v45 }
 0xe9b   : > { %v8440_v33 = vpop.f32.mrb[40].mxu1  ;;  %v11289_v16 = vpop.f32.mrb[20].mxu0 }
 0xe9c   : > { %v4477_v30 = vpop.f32.mrb[41].mxu1  ;;  %v11291_v38 = vpop.f32.mrb[21].mxu0 }
 0xe9d   : > { %v8806_v61 = vpack.c.bf16 %v8440_v33, %v4477_v30  ;;  %v13016_v33 = vld [vmem:[#allocation12_spill] sm:$0xff] }
 0xe9e   : > { %v4746_v30 = vrot.slane %v7925_v9, %v13016_v33 }
 0xe9f   : > { %v8443_v24 = vpop.f32.mrb[42].mxu1  ;;  %v11293_v40 = vpop.f32.mrb[22].mxu0  ;;  %8807 = vmatprep.subr.bf16.mxu1 %v8806_v61 }
 0xea0   : > { %v4487_v43 = vpop.f32.mrb[43].mxu1  ;;  %v11295_v18 = vpop.f32.mrb[23].mxu0  ;;  %8809 = vmatpush3.bf16.msra.mxu1 %v8806_v61 }
 0xea1   : > { %v8810_v49 = vpack.c.bf16 %v8443_v24, %v4487_v43 }
 0xea3   : > { %8811 = vmatprep.subr.bf16.mxu1 %v8810_v49 }
 0xea4   : > { %8813 = vmatpush3.bf16.msra.mxu1 %v8810_v49 }
 0xea5   : > { %8847 = vmatprep.subr.bf16.mxu1 %v8846_v36 }
 0xea7   : > { %8467 = vmatmul.mubr.msk.f32.vlgmr.msra.gmra.mrb[44].mxu1 %vm906_vm1, %v9232_v42 }
 0xea8   : > { %8469 = vmatprep.mubr.msk.f32.mxu1 %vm906_vm1, %v9233_v26  ;;  %8849 = vmatpush3.bf16.msra.mxu1 %v8846_v36 }
 0xea9   : > { %8851 = vmatprep.subr.bf16.mxu1 %v8850_v56 }
 0xeab   : > { %8470 = vmatmul.mubr.msk.f32.gmra.mrb[46].mxu1 %vm906_vm1, %v9234_v4 }
 0xeac   : > { %8472 = vmatprep.mubr.msk.f32.mxu1 %vm906_vm1, %v9235_v44  ;;  %8853 = vmatpush3.bf16.msra.mxu1 %v8850_v56 }
 0xead   : > { %8855 = vmatprep.subr.bf16.mxu1 %v8854_v39 }
 0xeaf   : > { %8473 = vmatmul.mubr.msk.f32.gmra.mrb[48].mxu1 %vm906_vm1, %v9236_v50 }
 0xeb0   : > { %8475 = vmatprep.mubr.msk.f32.mxu1 %vm906_vm1, %v9237_v28  ;;  %8857 = vmatpush3.bf16.msra.mxu1 %v8854_v39 }
 0xeb1   : > { %8859 = vmatprep.subr.bf16.mxu1 %v8858_v19 }
 0xeb3   : > { %8476 = vmatmul.mubr.msk.f32.gmra.mrb[50].mxu1 %vm906_vm1, %v9238_v55 }
 0xeb4   : > { %8478 = vmatprep.mubr.msk.f32.mxu1 %vm906_vm1, %v9239_v51  ;;  %8861 = vmatpush3.bf16.msra.mxu1 %v8858_v19 }
 0xeb7   : > { %8479 = vmatmul.mubr.msk.f32.gmra.mrb[52].mxu1 %vm906_vm1, %v9240_v52  ;;  %v13017_v52 = vld [vmem:[#allocation17_spill] sm:$0xff] }
 0xeb8   : > { %8481 = vmatprep.mubr.msk.f32.mxu1 %vm906_vm1, %v9241_v53  ;;  %v4758_v53 = vrot.slane %v7925_v9, %v13017_v52 }
 0xebb   : > { %8482 = vmatmul.mubr.msk.f32.gmra.mrb[54].mxu1 %vm906_vm1, %v9242_v48 }
 0xebc   : > { %8484 = vmatprep.mubr.msk.f32.mxu1 %vm906_vm1, %v9243_v10 }
 0xebf   : > { %8485 = vmatmul.mubr.msk.f32.gmra.mrb[56].mxu1 %vm906_vm1, %v9244_v6 }
 0xec0   : > { %8487 = vmatprep.mubr.msk.f32.mxu1 %vm906_vm1, %v9245_v5 }
 0xec3   : > { %8488 = vmatmul.mubr.msk.f32.gmra.mrb[58].mxu1 %vm906_vm1, %v9246_v3 }
 0xf7a   : > { %v8468_v34 = vpop.f32.mrb[44].mxu1 }
 0xf7b   : > { %v4652_v41 = vpop.f32.mrb[45].mxu1  ;;  %v4740_v24 = vmul.f32 %v8468_v34, %v4738_v17 }
 0xf7c   : > { %v4739_v42 = vmul.f32 %v4738_v17, %v4652_v41 }
 0xf7e   : > { %v8471_v23 = vpop.f32.mrb[46].mxu1 }
 0xf7f   : > { %v4662_v22 = vpop.f32.mrb[47].mxu1  ;;  %v4742_v28 = vmul.f32 %v8471_v23, %v4738_v17 }
 0xf80   : > { %v4741_v48 = vmul.f32 %v4738_v17, %v4662_v22 }
 0xf82   : > { %v8474_v61 = vpop.f32.mrb[48].mxu1 }
 0xf83   : > { %v4748_v43 = vmul.f32 %v8474_v61, %v4746_v30  ;;  %v4672_v49 = vpop.f32.mrb[49].mxu1 }
 0xf84   : > { %v4747_v26 = vmul.f32 %v4746_v30, %v4672_v49 }
 0xf85   : > { %v4752_v4 = vadd.f32 %v4748_v43, %v4740_v24 }
 0xf86   : > { %v4751_v44 = vadd.f32 %v4747_v26, %v4739_v42  ;;  %v8477_v50 = vpop.f32.mrb[50].mxu1 }
 0xf87   : > { %v4750_v55 = vmul.f32 %v8477_v50, %v4746_v30  ;;  %v4682_v51 = vpop.f32.mrb[51].mxu1 }
 0xf88   : > { %v4749_v10 = vmul.f32 %v4746_v30, %v4682_v51  ;;  %v7945_v51 = vld [vmem:[%s12803_s10 + $0x90] sm:$0xff] }
 0xf89   : > { %v4754_v6 = vadd.f32 %v4750_v55, %v4742_v28 }
 0xf8a   : > { %v4753_v5 = vadd.f32 %v4749_v10, %v4741_v48  ;;  %v8480_v3 = vpop.f32.mrb[52].mxu1 }
 0xf8b   : > { %v4760_v8 = vmul.f32 %v8480_v3, %v4758_v53  ;;  %v4692_v1 = vpop.f32.mrb[53].mxu1 }
 0xf8c   : > { %v4759_v14 = vmul.f32 %v4758_v53, %v4692_v1  ;;  %v7948_v1 = vld [vmem:[%s12803_s10 + $0xa8] sm:$0xff] }
 0xf8d   : > { %v4764_v32 = vadd.f32 %v4760_v8, %v4752_v4  ;;  %v7947_v8 = vld [vmem:[%s12803_s10 + $0xa0] sm:$0xff] }
 0xf8e   : > { %v4763_v63 = vadd.f32 %v4759_v14, %v4751_v44  ;;  %v8483_v57 = vpop.f32.mrb[54].mxu1 }
 0xf8f   : > { %v4762_v58 = vmul.f32 %v8483_v57, %v4758_v53  ;;  %v4702_v36 = vpop.f32.mrb[55].mxu1  ;;  %v8838_v57 = vpack.c.bf16 %v7948_v1, %v7947_v8 }
 0xf90   : > { %v4761_v37 = vmul.f32 %v4758_v53, %v4702_v36  ;;  %v7946_v53 = vld [vmem:[%s12803_s10 + $0x98] sm:$0xff] }
 0xf91   : > { %v4766_v56 = vadd.f32 %v4762_v58, %v4754_v6  ;;  %v7949_v58 = vld [vmem:[%s12803_s10 + $0xb0] sm:$0xff]  ;;  %v7950_v36 = vld [vmem:[%s12803_s10 + $0xb8] sm:$0xff] }
 0xf92   : > { %v4765_v0 = vadd.f32 %v4761_v37, %v4753_v5  ;;  %v8486_v25 = vpop.f32.mrb[56].mxu1  ;;  %v8834_v5 = vpack.c.bf16 %v7946_v53, %v7945_v51 }
 0xf93   : > { %v4772_v31 = vmul.f32 %v8486_v25, %v4770_v15  ;;  %v4712_v39 = vpop.f32.mrb[57].mxu1 }
 0xf94   : > { %v4771_v59 = vmul.f32 %v4770_v15, %v4712_v39 }
 0xf95   : > { %v4776_v11 = vadd.f32 %v4772_v31, %v4764_v32 }
 0xf96   : > { %v4775_v46 = vadd.f32 %v4771_v59, %v4763_v63  ;;  %v8489_v29 = vpop.f32.mrb[58].mxu1 }
 0xf97   : > { %v4784_v2 = vadd.f32 %v4782_v54, %v4776_v11  ;;  %v4774_v19 = vmul.f32 %v8489_v29, %v4770_v15  ;;  %v4722_v47 = vpop.f32.mrb[59].mxu1 }
 0xf98   : > { %v4783_v21 = vadd.f32 %v4782_v54, %v4775_v46  ;;  %v4773_v34 = vmul.f32 %v4770_v15, %v4722_v47  ;;  %v4827_v15 = vrot.slane %v11424_v62, %v13016_v33 }
 0xf99   : > { %v7928_v41 = vmul.f32 -1.442695, %v4784_v2  ;;  %v4778_v9 = vadd.f32 %v4774_v19, %v4766_v56 }
 0xf9a   : > { %v7927_v23 = vmul.f32 -1.442695, %v4783_v21  ;;  %v4777_v17 = vadd.f32 %v4773_v34, %v4765_v0 }
 0xf9b   : > { %9109 = vpow2.f32 %v7928_v41  ;;  %v4786_v22 = vadd.f32 %v4782_v54, %v4778_v9 }
 0xf9c   : > { %9111 = vpow2.f32 %v7927_v23  ;;  %v4785_v30 = vadd.f32 %v4782_v54, %v4777_v17 }
 0xf9d   : > { %v7930_v61 = vmul.f32 -1.442695, %v4786_v22 }
 0xf9e   : > { %v7929_v24 = vmul.f32 -1.442695, %v4785_v30 }
 0xf9f   : > { %9113 = vpow2.f32 %v7930_v61 }
 0xfa0   : > { %9115 = vpow2.f32 %v7929_v24 }
 0xfa5   : > { %v9110_v43 = vpop.eup %9109 }
 0xfa6   : > { %v9112_v49 = vpop.eup %9111  ;;  %v4800_v42 = vadd.f32 1.0, %v9110_v43 }
 0xfa7   : > { %v4799_v26 = vadd.f32 1.0, %v9112_v49 }
 0xfa8   : > { %9117 = vrcp.f32 %v4800_v42 }
 0xfa9   : > { %v9114_v4 = vpop.eup %9113  ;;  %9119 = vrcp.f32 %v4799_v26 }
 0xfaa   : > { %v9116_v44 = vpop.eup %9115  ;;  %v4802_v50 = vadd.f32 1.0, %v9114_v4 }
 0xfab   : > { %v4801_v28 = vadd.f32 1.0, %v9116_v44 }
 0xfac   : > { %9121 = vrcp.f32 %v4802_v50 }
 0xfad   : > { %9123 = vrcp.f32 %v4801_v28 }
 0xfb2   : > { %v9118_v55 = vpop.eup %9117 }
 0xfb3   : > { %v9120_v48 = vpop.eup %9119  ;;  %v11436_v6 = vmul.f32 %v9118_v55, %v4784_v2 }
 0xfb4   : > { %v11434_v10 = vmul.f32 %v9120_v48, %v4783_v21 }
 0xfb6   : > { %v9122_v3 = vpop.eup %9121  ;;  %8506 = vmatprep.mubr.msk.f32.mxu0 %vm666_vm0, %v11434_v10  ;;  %8550 = vmatprep.mubr.msk.f32.mxu1 %vm666_vm0, %v11434_v10 }
 0xfb7   : > { %v9124_v14 = vpop.eup %9123  ;;  %8507 = vmatmul.mubr.msk.f32.vlgmr.msra.gmra.mrb[24].mxu0 %vm666_vm0, %v11436_v6  ;;  %8551 = vmatmul.mubr.msk.f32.vlgmr.msra.gmra.mrb[60].mxu1 %vm666_vm0, %v11436_v6  ;;  %v11455_v63 = vmul.f32 %v9122_v3, %v4786_v22 }
 0xfb8   : > { %v11452_v32 = vmul.f32 %v9124_v14, %v4785_v30  ;;  %8833 = vmatpush3.bf16.msra.mxu0 %v11411_v45  ;;  %v8842_v45 = vpack.c.bf16 %v7950_v36, %v7949_v58  ;;  %v13019_v58 = vld [vmem:[#allocation19_spill] sm:$0xff] }
 0xfb9   : > { %8835 = vmatprep.subr.bf16.mxu0 %v8834_v5 }
 0xfba   : > { %8509 = vmatprep.mubr.msk.f32.mxu0 %vm666_vm0, %v11452_v32  ;;  %8553 = vmatprep.mubr.msk.f32.mxu1 %vm666_vm0, %v11452_v32 }
 0xfbb   : > { %8510 = vmatmul.mubr.msk.f32.gmra.mrb[26].mxu0 %vm666_vm0, %v11455_v63  ;;  %8554 = vmatmul.mubr.msk.f32.gmra.mrb[62].mxu1 %vm666_vm0, %v11455_v63 }
 0xfbc   : > { %8837 = vmatpush3.bf16.msra.mxu0 %v8834_v5  ;;  %8528 = vmatprep.mubr.msk.f32.mxu0 %vm666_vm0, %v11434_v10 }
 0xfbd   : > { %8839 = vmatprep.subr.bf16.mxu0 %v8838_v57  ;;  %8586 = vmatprep.mubr.msk.f32.mxu1 %vm906_vm1, %v11153_v27 }
 0xfc0   : > { %8841 = vmatpush3.bf16.msra.mxu0 %v8838_v57 }
 0xfc1   : > { %8843 = vmatprep.subr.bf16.mxu0 %v8842_v45 }
 0xfc4   : > { %8845 = vmatpush3.bf16.msra.mxu0 %v8842_v45 }
 0xfc7   : > { %8529 = vmatmul.mubr.msk.f32.vlgmr.msra.gmra.mrb[28].mxu0 %vm666_vm0, %v11436_v6 }
 0xfc8   : > { %8531 = vmatprep.mubr.msk.f32.mxu0 %vm666_vm0, %v11452_v32 }
 0xfcb   : > { %8532 = vmatmul.mubr.msk.f32.gmra.mrb[30].mxu0 %vm666_vm0, %v11455_v63 }
0x108a   : > { %v8508_v37 = vpop.f32.mrb[24].mxu0  ;;  %v11483_v56 = vpop.f32.mrb[60].mxu1 }
0x108b   : > { %v4912_v0 = vadd.f32 %v8508_v37, %v4827_v15  ;;  %v4906_v27 = vpop.f32.mrb[25].mxu0  ;;  %v11485_v25 = vpop.f32.mrb[61].mxu1 }
0x108c   : > { %v11487_v31 = vadd.f32 %v4906_v27, %v4827_v15 }
0x108d   : > { %v4930_v54 = vand.u32 2147483647, %v4912_v0  ;;  %v4926_v45 = vmax.f32 %v4912_v0, 0.0 }
0x108e   : > { %v8511_v39 = vpop.f32.mrb[26].mxu0  ;;  %v11489_v59 = vpop.f32.mrb[62].mxu1 }
0x108f   : > { %v4934_v11 = vsub.f32 0.0, %v4930_v54  ;;  %v11491_v46 = vadd.f32 %v8511_v39, %v4827_v15  ;;  %v4916_v29 = vpop.f32.mrb[27].mxu0  ;;  %v11493_v2 = vpop.f32.mrb[63].mxu1  ;;  %v13020_v39 = vld [vmem:[#allocation20_spill] sm:$0xff] }
0x1090   : > { %v11495_v19 = vadd.f32 %v4916_v29, %v4827_v15 }
0x1091   : > { %v4939_v47 = vmul.f32 1.442695, %v4934_v11  ;;  %v4932_v21 = vand.u32 2147483647, %v11491_v46 }
0x1092   : > { %v4931_v4 = vand.u32 2147483647, %v11495_v19 }
0x1093   : > { %9125 = vpow2.f32 %v4939_v47  ;;  %v4936_v34 = vsub.f32 0.0, %v4932_v21  ;;  %v13021_v47 = vld [vmem:[#allocation22_spill] sm:$0xff] }
0x1094   : > { %v4935_v51 = vsub.f32 0.0, %v4931_v4 }
0x1095   : > { %v4943_v41 = vmul.f32 1.442695, %v4936_v34 }
0x1096   : > { %v4941_v1 = vmul.f32 1.442695, %v4935_v51 }
0x1097   : > { %9127 = vpow2.f32 %v4943_v41 }
0x109a   : > { %v11498_v9 = vpop.f32.mrb[28].mxu0 }
0x109b   : > { %v11500_v23 = vpop.f32.mrb[29].mxu0  ;;  %v5693_v17 = vrot.slane %v11498_v9, %v9634_v35  ;;  %v5700_v49 = vrot.slane %v11498_v9, %v13016_v33  ;;  %v5707_v28 = vrot.slane %v11498_v9, %v13017_v52  ;;  %v5714_v48 = vrot.slane %v11498_v9, %v13018_v13 }
0x109c   : > { %v5637_v22 = vrot.slane %v11500_v23, %v9634_v35  ;;  %v5721_v36 = vrot.slane %v11498_v9, %v13019_v58  ;;  %v5728_v11 = vrot.slane %v11498_v9, %v13020_v39 }
0x109d   : > { %v9126_v30 = vpop.eup %9125  ;;  %5695 = vbcast.lane.b32.xlu1 %v5693_v17, 256 }
0x109e   : > { %v4954_v61 = vadd.f32 1.0, %v9126_v30  ;;  %5639 = vbcast.lane.b32.xlu0 %v5637_v22, 256  ;;  %v11506_v24 = vpop.f32.mrb[30].mxu0  ;;  %v4957_v44 = vmul.f32 -0.5, %v9126_v30  ;;  %v4960_v5 = vand.u32 2147483647, %v9126_v30 }
0x109f   : > { %v11508_v43 = vpop.f32.mrb[31].mxu0  ;;  %v5805_v42 = vrot.slane %v11506_v24, %v9634_v35  ;;  %v5812_v55 = vrot.slane %v11506_v24, %v13016_v33  ;;  %v5819_v3 = vrot.slane %v11506_v24, %v13017_v52  ;;  %v5826_v15 = vrot.slane %v11506_v24, %v13018_v13 }
0x10a0   : > { %9129 = vlog2.f32 %v4954_v61  ;;  %v4958_v53 = vadd.f32 1.0, %v4957_v44  ;;  %vm4961_vm13 = vcmp.lt.f32.partialorder %v4960_v5, 0.0004427343  ;;  %v5833_v21 = vrot.slane %v11506_v24, %v13019_v58  ;;  %v13022_v61 = vld [vmem:[#allocation21_spill] sm:$0xff] }
0x10a1   : > { %v9128_v26 = vpop.eup %9127  ;;  %5702 = vbcast.lane.b32.xlu1 %v5700_v49, 256  ;;  %v5735_v49 = vrot.slane %v11498_v9, %v13022_v61 }
0x10a2   : > { %5807 = vbcast.lane.b32.xlu0 %v5805_v42, 256  ;;  %v4972_v50 = vadd.f32 1.0, %v9128_v26  ;;  %v4959_v57 = vmul.f32 %v9126_v30, %v4958_v53  ;;  %v4975_v54 = vmul.f32 -0.5, %v9128_v26  ;;  %v4978_v30 = vand.u32 2147483647, %v9128_v26 }
0x10a3   : > { %v5840_v42 = vrot.slane %v11506_v24, %v13020_v39 }
0x10a4   : > { %9131 = vlog2.f32 %v4972_v50  ;;  %v4976_v22 = vadd.f32 1.0, %v4975_v54  ;;  %vm11557_vm14 = vcmp.lt.f32.partialorder %v4978_v30, 0.0004427343 }
0x10a5   : > { %5709 = vbcast.lane.b32.xlu1 %v5707_v28, 256  ;;  %9133 = vpow2.f32 %v4941_v1  ;;  %v5644_v1 = vrot.slane %v11500_v23, %v13016_v33 }
0x10a6   : > { %5814 = vbcast.lane.b32.xlu0 %v5812_v55, 256  ;;  %v4929_v55 = vand.u32 2147483647, %v11487_v31  ;;  %v4977_v5 = vmul.f32 %v9128_v26, %v4976_v22  ;;  %v5651_v22 = vrot.slane %v11500_v23, %v13017_v52 }
0x10a8   : > { %v4933_v30 = vsub.f32 0.0, %v4929_v55 }
0x10a9   : > { %5716 = vbcast.lane.b32.xlu1 %v5714_v48, 256 }
0x10aa   : > { %v9130_v8 = vpop.eup %9129  ;;  %5821 = vbcast.lane.b32.xlu0 %v5819_v3, 256 }
0x10ab   : > { %v4956_v14 = vmul.f32 0.6931472, %v9130_v8 }
0x10ad   : > { %v4962_v37 = vsel %vm4961_vm13, %v4959_v57, %v4956_v14  ;;  %5723 = vbcast.lane.b32.xlu1 %v5721_v36, 256  ;;  %v5847_v14 = vrot.slane %v11506_v24, %v13022_v61  ;;  %v11570_v36 = vld [vmem:[%s12804_s11 + $0x8] sm:$0xff] }
0x10ae   : > { %v11527_v27 = vadd.f32 %v4962_v37, %v4926_v45  ;;  %5828 = vbcast.lane.b32.xlu0 %v5826_v15, 256  ;;  %v9132_v34 = vpop.eup %9131 }
0x10af   : > { %v4974_v28 = vmul.f32 0.6931472, %v9132_v34  ;;  %v11565_v57 = vpop.eup %9133 }
0x10b0   : > { %v5229_v29 = vcombine.high %v11527_v27, %v11527_v27  ;;  %v11535_v0 = vrot.slane %v11527_v27, %v13021_v47 }
0x10b1   : > { %5730 = vbcast.lane.b32.xlu1 %v5728_v11, 256  ;;  %v4980_v37 = vsel %vm11557_vm14, %v4977_v5, %v4974_v28  ;;  %v4928_v11 = vmax.f32 %v11491_v46, 0.0  ;;  %v6388_v46 = vrot.slane %v11485_v25, %v13016_v33  ;;  %v6444_v28 = vrot.slane %v11483_v56, %v13016_v33 }
0x10b2   : > { %v5243_v41 = vrot.slane %v5229_v29, %v13021_v47  ;;  %v5244_v17 = vcombine.high %v11535_v0, %v11535_v0  ;;  %5835 = vbcast.lane.b32.xlu0 %v5833_v21, 256  ;;  %v5665_v5 = vrot.slane %v11500_v23, %v13019_v58 }
0x10b4   : > { %v5245_v4 = vcombine.high %v5243_v41, %v5243_v41  ;;  %v5259_v44 = vrot.slane %v5243_v41, %v13021_v47  ;;  %v11548_v50 = vrot.slane %v5244_v17, %v13021_v47  ;;  %v11591_v41 = vadd.f32 %v4980_v37, %v4928_v11 }
0x10b5   : > { %5737 = vbcast.lane.b32.xlu1 %v5735_v49, 256  ;;  %v4963_v17 = vadd.f32 1.0, %v11565_v57 }
0x10b6   : > { %v11552_v51 = vrot.slane %v5245_v4, %v13021_v47  ;;  %v5275_v53 = vcombine.high %v5259_v44, %v5259_v44  ;;  %v5276_v48 = vcombine.high %v11548_v50, %v11548_v50  ;;  %5842 = vbcast.lane.b32.xlu0 %v5840_v42, 256  ;;  %v5429_v3 = vrot.slane %v5259_v44, %v9634_v35 }
0x10b7   : > { %v5327_v49 = vcombine.high %v11591_v41, %v11591_v41  ;;  %v5334_v42 = vrot.slane %v11591_v41, %v13021_v47  ;;  %9135 = vlog2.f32 %v4963_v17  ;;  %v5658_v4 = vrot.slane %v11500_v23, %v13018_v13 }
0x10b8   : > { %v5425_v26 = vrot.slane %v5276_v48, %v9634_v35  ;;  %v5433_v45 = vrot.slane %v11552_v51, %v9634_v35  ;;  %v5437_v15 = vrot.slane %v5275_v53, %v9634_v35  ;;  %v11579_v54 = vmul.f32 %v11570_v36, %v5429_v3 }
0x10b9   : > { %5646 = vbcast.lane.b32.xlu1 %v5644_v1, 256  ;;  %v4937_v44 = vmul.f32 1.442695, %v4933_v30  ;;  %v5341_v55 = vrot.slane %v5327_v49, %v13021_v47  ;;  %v5342_v53 = vcombine.high %v5334_v42, %v5334_v42  ;;  %v5350_v48 = vrot.slane %v5334_v42, %v13021_v47 }
0x10ba   : > { %v11583_v29 = vmul.f32 %v11570_v36, %v5425_v26  ;;  %v11586_v21 = vmul.f32 %v11570_v36, %v5433_v45  ;;  %v11589_v34 = vmul.f32 %v11570_v36, %v5437_v15  ;;  %5849 = vbcast.lane.b32.xlu0 %v5847_v14, 256  ;;  %v6402_v45 = vrot.slane %v11485_v25, %v13018_v13 }
0x10bb   : > { %v5343_v3 = vcombine.high %v5341_v55, %v5341_v55  ;;  %v5357_v8 = vrot.slane %v5341_v55, %v13021_v47  ;;  %v5364_v1 = vrot.slane %v5342_v53, %v13021_v47  ;;  %v5372_v14 = vcombine.high %v5350_v48, %v5350_v48 }
0x10bc   : > { %9137 = vpow2.f32 %v4937_v44  ;;  %v5477_v26 = vrot.slane %v5350_v48, %v9634_v35  ;;  %v5672_v15 = vrot.slane %v11500_v23, %v13020_v39  ;;  %v4966_v42 = vmul.f32 -0.5, %v11565_v57 }
0x10bd   : > { %5653 = vbcast.lane.b32.xlu1 %v5651_v22, 256  ;;  %v5371_v37 = vrot.slane %v5343_v3, %v13021_v47  ;;  %v5373_v11 = vcombine.high %v5357_v8, %v5357_v8  ;;  %v5374_v17 = vcombine.high %v5364_v1, %v5364_v1  ;;  %v5481_v22 = vrot.slane %v5364_v1, %v9634_v35 }
0x10be   : > { %6390 = vbcast.lane.b32.xlu0 %v6388_v46, 256  ;;  %v5485_v30 = vrot.slane %v5372_v14, %v9634_v35  ;;  %v5493_v46 = vrot.slane %v5357_v8, %v9634_v35  ;;  %v11622_v49 = vmul.f32 %v11570_v36, %v5477_v26 }
0x10bf   : > { %v5489_v44 = vrot.slane %v5374_v17, %v9634_v35  ;;  %v5501_v55 = vrot.slane %v5373_v11, %v9634_v35  ;;  %v11629_v53 = vmul.f32 %v11570_v36, %v5481_v22  ;;  %v4969_v17 = vand.u32 2147483647, %v11565_v57 }
0x10c0   : > { %v11632_v48 = vmul.f32 %v11570_v36, %v5485_v30  ;;  %v5679_v22 = vrot.slane %v11500_v23, %v13022_v61 }
0x10c1   : > { %5660 = vbcast.lane.b32.xlu1 %v5658_v4, 256  ;;  %v5375_v4 = vcombine.high %v5371_v37, %v5371_v37  ;;  %v9136_v3 = vpop.eup %9135  ;;  %v11639_v1 = vmul.f32 %v11570_v36, %v5489_v44  ;;  %v11645_v26 = vmul.f32 %v11570_v36, %v5501_v55  ;;  %vm4970_vm15 = vcmp.lt.f32.partialorder %v4969_v17, 0.0004427343 }
0x10c2   : > { %6446 = vbcast.lane.b32.xlu0 %v6444_v28, 256  ;;  %v5497_v28 = vrot.slane %v5371_v37, %v9634_v35  ;;  %v6409_v37 = vrot.slane %v11485_v25, %v13019_v58  ;;  %v4965_v30 = vmul.f32 0.6931472, %v9136_v3  ;;  %v4927_v55 = vmax.f32 %v11495_v19, 0.0 }
0x10c3   : > { %v5505_v8 = vrot.slane %v5375_v4, %v9634_v35  ;;  %v5756_v3 = vrot.slane %v11508_v43, %v13016_v33 }
0x10c4   : > { %v11642_v14 = vmul.f32 %v11570_v36, %v5497_v28 }
0x10c5   : > { %5667 = vbcast.lane.b32.xlu1 %v5665_v5, 256  ;;  %v11635_v5 = vmul.f32 %v11570_v36, %v5493_v46  ;;  %v11650_v11 = vmul.f32 %v11570_v36, %v5505_v8 }
0x10c6   : > { %6404 = vbcast.lane.b32.xlu0 %v6402_v45, 256  ;;  %v4967_v45 = vadd.f32 1.0, %v4966_v42  ;;  %v11655_v46 = vpop.eup %9137  ;;  %v13025_v42 = vld [vmem:[#allocation23_spill] sm:$0xff] }
0x10c7   : > { %v5686_v44 = vrot.slane %v11500_v23, %v13025_v42  ;;  %v5763_v23 = vrot.slane %v11508_v43, %v13017_v52  ;;  %v5742_v17 = vrot.slane %v11498_v9, %v13025_v42  ;;  %v7971_v9 = vmul.f32 -1.442695, %v11293_v40 }
0x10c8   : > { %v4968_v4 = vmul.f32 %v11565_v57, %v4967_v45  ;;  %v5749_v57 = vrot.slane %v11508_v43, %v9634_v35  ;;  %v4945_v45 = vadd.f32 1.0, %v11655_v46 }
0x10c9   : > { %5674 = vbcast.lane.b32.xlu1 %v5672_v15, 256  ;;  %v6458_v15 = vrot.slane %v11483_v56, %v13018_v13 }
0x10ca   : > { %6411 = vbcast.lane.b32.xlu0 %v6409_v37, 256  ;;  %v4971_v28 = vsel %vm4970_vm15, %v4968_v4, %v4965_v30  ;;  %v7969_v37 = vmul.f32 -1.442695, %v11289_v16  ;;  %9139 = vlog2.f32 %v4945_v45  ;;  %v5770_v4 = vrot.slane %v11508_v43, %v13018_v13 }
0x10cb   : > { %v11665_v8 = vadd.f32 %v4971_v28, %v4927_v55  ;;  %v7970_v28 = vmul.f32 -1.442695, %v11295_v18 }
0x10cc   : > { %9141 = vpow2.f32 %v7969_v37 }
0x10cd   : > { %5681 = vbcast.lane.b32.xlu1 %v5679_v22, 256  ;;  %v11675_v19 = vrot.slane %v11665_v8, %v13021_v47  ;;  %v7968_v22 = vmul.f32 -1.442695, %v11291_v38  ;;  %v5278_v30 = vcombine.high %v11665_v8, %v11665_v8 }
0x10ce   : > { %6460 = vbcast.lane.b32.xlu0 %v6458_v15, 256 }
0x10cf   : > { %v5293_v15 = vcombine.high %v11675_v19, %v11675_v19  ;;  %9143 = vpow2.f32 %v7968_v22  ;;  %v5292_v55 = vrot.slane %v5278_v30, %v13021_v47  ;;  %v5784_v22 = vrot.slane %v11508_v43, %v13020_v39 }
0x10d0   : > { %9145 = vpow2.f32 %v7971_v9  ;;  %v4951_v9 = vand.u32 2147483647, %v11655_v46 }
0x10d1   : > { %5688 = vbcast.lane.b32.xlu1 %v5686_v44, 256  ;;  %v5854_v44 = vrot.slane %v11506_v24, %v13025_v42  ;;  %v11695_v45 = vrot.slane %v5293_v15, %v13021_v47  ;;  %v6395_v24 = vrot.slane %v11485_v25, %v13017_v52  ;;  %9147 = vpow2.f32 %v7970_v28 }
0x10d2   : > { %5758 = vbcast.lane.b32.xlu0 %v5756_v3, 256  ;;  %v5777_v3 = vrot.slane %v11508_v43, %v13019_v58  ;;  %v5294_v37 = vcombine.high %v5292_v55, %v5292_v55  ;;  %v6381_v15 = vrot.slane %v11485_v25, %v9634_v35  ;;  %vm11716_vm2 = vcmp.lt.f32.partialorder %v4951_v9, 0.0004427343 }
0x10d3   : > { %13026 = vst [vmem:[#allocation34_spill] sm:$0xff] %v11695_v45 }
0x10d5   : > { %5751 = vbcast.lane.b32.xlu1 %v5749_v57, 256  ;;  %v4948_v57 = vmul.f32 -0.5, %v11655_v46 }
0x10d6   : > { %5765 = vbcast.lane.b32.xlu0 %v5763_v23, 256  ;;  %v9140_v23 = vpop.eup %9139 }
0x10d7   : > { %v4949_v30 = vadd.f32 1.0, %v4948_v57  ;;  %v9142_v28 = vpop.eup %9141  ;;  %v5791_v57 = vrot.slane %v11508_v43, %v13022_v61 }
0x10d8   : > { %v6975_v20 = vadd.f32 1.0, %v9142_v28  ;;  %v5798_v28 = vrot.slane %v11508_v43, %v13025_v42  ;;  %v6465_v43 = vrot.slane %v11483_v56, %v13019_v58 }
0x10d9   : > { %5744 = vbcast.lane.b32.xlu1 %v5742_v17, 256  ;;  %v5308_v17 = vrot.slane %v5292_v55, %v13021_v47  ;;  %v9144_v55 = vpop.eup %9143  ;;  %v4950_v60 = vmul.f32 %v11655_v46, %v4949_v30 }
0x10da   : > { %5772 = vbcast.lane.b32.xlu0 %v5770_v4, 256  ;;  %v5325_v4 = vcombine.high %v11695_v45, %v11695_v45  ;;  %v9146_v30 = vpop.eup %9145  ;;  %9149 = vrcp.f32 %v6975_v20  ;;  %v6416_v20 = vrot.slane %v11485_v25, %v13020_v39 }
0x10db   : > { %v5324_v7 = vcombine.high %v5308_v17, %v5308_v17  ;;  %v5461_v46 = vrot.slane %v5308_v17, %v9634_v35  ;;  %v9148_v17 = vpop.eup %9147 }
0x10dc   : > { %v5457_v12 = vrot.slane %v5325_v4, %v9634_v35 }
0x10dd   : > { %5856 = vbcast.lane.b32.xlu1 %v5854_v44, 256  ;;  %v5277_v44 = vcombine.high %v11552_v51, %v11552_v51  ;;  %v6451_v51 = vrot.slane %v11483_v56, %v13017_v52  ;;  %v5469_v9 = vrot.slane %v5324_v7, %v9634_v35  ;;  %v11740_v7 = vmul.f32 %v11570_v36, %v5461_v46 }
0x10de   : > { %5779 = vbcast.lane.b32.xlu0 %v5777_v3, 256  ;;  %v4947_v3 = vmul.f32 0.6931472, %v9140_v23 }
0x10df   : > { %v5441_v23 = vrot.slane %v5277_v44, %v9634_v35 }
0x10e0   : > { %v4953_v45 = vsel %vm11716_vm2, %v4950_v60, %v4947_v3  ;;  %v11735_v60 = vmul.f32 %v11570_v36, %v5457_v12  ;;  %v11748_v12 = vmul.f32 %v11570_v36, %v5469_v9  ;;  %v6472_v9 = vrot.slane %v11483_v56, %v13020_v39 }
0x10e1   : > { %6397 = vbcast.lane.b32.xlu1 %v6395_v24, 256  ;;  %v5322_v24 = vrot.slane %v5294_v37, %v13021_v47  ;;  %v6974_v37 = vadd.f32 1.0, %v9144_v55  ;;  %v6977_v55 = vadd.f32 1.0, %v9146_v30 }
0x10e2   : > { %5786 = vbcast.lane.b32.xlu0 %v5784_v22, 256 }
0x10e3   : > { %v5465_v4 = vrot.slane %v5322_v24, %v9634_v35  ;;  %v5326_v44 = vcombine.high %v5322_v24, %v5322_v24  ;;  %9151 = vrcp.f32 %v6974_v37  ;;  %v6423_v37 = vrot.slane %v11485_v25, %v13022_v61 }
0x10e4   : > { %9153 = vrcp.f32 %v6977_v55  ;;  %v9150_v30 = vpop.eup %9149 }
0x10e5   : > { %6383 = vbcast.lane.b32.xlu1 %v6381_v15, 256  ;;  %v4925_v15 = vmax.f32 %v11487_v31, 0.0  ;;  %v6437_v31 = vrot.slane %v11483_v56, %v9634_v35  ;;  %v11745_v24 = vmul.f32 %v11570_v36, %v5465_v4  ;;  %v6507_v4 = vrot.slane %v11493_v2, %v13017_v52 }
0x10e6   : > { %5793 = vbcast.lane.b32.xlu0 %v5791_v57, 256  ;;  %v11730_v57 = vmul.f32 %v11570_v36, %v5441_v23 }
0x10e7   : > { %v11737_v3 = vadd.f32 %v4953_v45, %v4925_v15  ;;  %v5473_v45 = vrot.slane %v5326_v44, %v9634_v35  ;;  %v6500_v15 = vrot.slane %v11493_v2, %v13016_v33 }
0x10e9   : > { %6453 = vbcast.lane.b32.xlu1 %v6451_v51, 256  ;;  %v6976_v51 = vadd.f32 1.0, %v9148_v17  ;;  %v11755_v22 = vrot.slane %v11737_v3, %v13021_v47  ;;  %v11758_v23 = vmul.f32 %v11570_v36, %v5473_v45  ;;  %v6430_v17 = vrot.slane %v11485_v25, %v13025_v42 }
0x10ea   : > { %5800 = vbcast.lane.b32.xlu0 %v5798_v28, 256  ;;  %v6493_v25 = vrot.slane %v11493_v2, %v9634_v35 }
0x10eb   : > { %9155 = vrcp.f32 %v6976_v51  ;;  %v11766_v46 = vrot.slane %v11755_v22, %v13021_v47  ;;  %v6556_v51 = vrot.slane %v11489_v59, %v13016_v33  ;;  %v6479_v33 = vrot.slane %v11483_v56, %v13022_v61 }
0x10ed   : > { %6439 = vbcast.lane.b32.xlu1 %v6437_v31, 256  ;;  %v9152_v28 = vpop.eup %9151  ;;  %v5381_v44 = vrot.slane %v11766_v46, %v9634_v35  ;;  %v11775_v31 = vmul.f32 %v9150_v30, %v11289_v16 }
0x10ee   : > { %6467 = vbcast.lane.b32.xlu0 %v6465_v43, 256  ;;  %v9154_v55 = vpop.eup %9153  ;;  %v11780_v43 = vmul.f32 %v9152_v28, %v11291_v38 }
0x10ef   : > { %13029 = vst [vmem:[#allocation24_spill] sm:$0xff] %v11775_v31  ;;  %v11787_v16 = vmul.f32 %v9154_v55, %v11293_v40  ;;  %v6861_v40 = vrot.slane %v11424_v62, %v13017_v52  ;;  %v5195_v55 = vcombine.high %v11755_v22, %v11755_v22 }
0x10f1   : > { %6418 = vbcast.lane.b32.xlu1 %v6416_v20, 256  ;;  %v5538_v20 = vmul.f32 %v11570_v36, %v5381_v44  ;;  %13030 = vst [vmem:[#allocation29_spill] sm:$0xff] %v11787_v16  ;;  %v11827_v62 = vmul.f32 %v6861_v40, %v11434_v10  ;;  %v5217_v30 = vrot.slane %v5195_v55, %v13021_v47 }
0x10f2   : > { %6425 = vbcast.lane.b32.xlu0 %v6423_v37, 256  ;;  %v6521_v37 = vrot.slane %v11493_v2, %v13019_v58 }
0x10f3   : > { %v5570_v44 = vmul.f32 1.442695, %v5538_v20  ;;  %v11845_v20 = vmul.f32 %v11591_v41, %v11455_v63 }
0x10f5   : > { %6502 = vbcast.lane.b32.xlu1 %v6500_v15, 256  ;;  %v9156_v45 = vpop.eup %9155  ;;  %9157 = vpow2.f32 %v5570_v44  ;;  %v11876_v15 = vmul.f32 %v6861_v40, %v11452_v32 }
0x10f6   : > { %6509 = vbcast.lane.b32.xlu0 %v6507_v4, 256  ;;  %v11799_v28 = vmul.f32 %v9156_v45, %v11295_v18  ;;  %v6563_v18 = vrot.slane %v11489_v59, %v13017_v52 }
0x10f7   : > { %13033 = vst [vmem:[#allocation37_spill] sm:$0xff] %v11876_v15 }
0x10f8   : > { %13031 = vst [vmem:[#allocation36_spill] sm:$0xff] %v11799_v28 }
0x10f9   : > { %6474 = vbcast.lane.b32.xlu1 %v6472_v9, 256  ;;  %v11822_v9 = vmul.f32 %v6861_v40, %v11436_v6 }
0x10fa   : > { %6432 = vbcast.lane.b32.xlu0 %v6430_v17, 256 }
0x10fd   : > { %6558 = vbcast.lane.b32.xlu1 %v6556_v51, 256 }
0x10fe   : > { %6495 = vbcast.lane.b32.xlu0 %v6493_v25, 256  ;;  %v6514_v25 = vrot.slane %v11493_v2, %v13018_v13 }
0x10ff   : > { %v9158_v4 = vpop.eup %9157 }
0x1100   : > { %v6250_v45 = vmul.f32 0.0, %v9158_v4 }
0x1101   : > { %6481 = vbcast.lane.b32.xlu1 %v6479_v33, 256  ;;  %v11817_v33 = vmul.f32 %v11737_v3, %v11434_v10  ;;  %v6486_v10 = vrot.slane %v11483_v56, %v13025_v42  ;;  %v11853_v56 = vmul.f32 %v6861_v40, %v11455_v63  ;;  %v11865_v63 = vrot.slane %v11535_v0, %v13021_v47 }
0x1102   : > { %6565 = vbcast.lane.b32.xlu0 %v6563_v18, 256  ;;  %v6577_v40 = vrot.slane %v11489_v59, %v13019_v58  ;;  %v5180_v58 = vcombine.high %v11737_v3, %v11737_v3  ;;  %v6584_v3 = vrot.slane %v11489_v59, %v13020_v39 }
0x1103   : > { %13032 = vst [vmem:[#allocation25_spill] sm:$0xff] %v11853_v56  ;;  %v5274_v22 = vcombine.high %v11865_v63, %v11865_v63 }
0x1105   : > { %6516 = vbcast.lane.b32.xlu1 %v6514_v25, 256  ;;  %v11841_v25 = vrot.slane %v11817_v33, %v13021_v47  ;;  %v5421_v41 = vrot.slane %v5274_v22, %v9634_v35 }
0x1106   : > { %6523 = vbcast.lane.b32.xlu0 %v6521_v37, 256  ;;  %v6570_v37 = vrot.slane %v11489_v59, %v13018_v13  ;;  %v6016_v13 = vrot.slane %v11845_v20, %v13021_v47 }
0x1107   : > { %v11871_v51 = vrot.slane %v11841_v25, %v13021_v47  ;;  %v5548_v0 = vmul.f32 %v11570_v36, %v5421_v41 }
0x1108   : > { %v6032_v38 = vrot.slane %v6016_v13, %v13021_v47  ;;  %v6024_v18 = vcombine.high %v6016_v13, %v6016_v13  ;;  %v5417_v13 = vrot.slane %v11548_v50, %v9634_v35  ;;  %v5413_v50 = vrot.slane %v11865_v63, %v9634_v35 }
0x1109   : > { %6488 = vbcast.lane.b32.xlu1 %v6486_v10, 256  ;;  %v6549_v10 = vrot.slane %v11489_v59, %v9634_v35  ;;  %v6061_v17 = vrot.slane %v11871_v51, %v9634_v35  ;;  %v5590_v28 = vmul.f32 1.442695, %v5548_v0 }
0x110a   : > { %6572 = vbcast.lane.b32.xlu0 %v6570_v37, 256  ;;  %v6528_v37 = vrot.slane %v11493_v2, %v13020_v39  ;;  %v6046_v55 = vrot.slane %v6024_v18, %v13021_v47  ;;  %v5194_v39 = vrot.slane %v5180_v58, %v13021_v47  ;;  %v5547_v22 = vmul.f32 %v11570_v36, %v5417_v13 }
0x110b   : > { %v6591_v58 = vrot.slane %v11489_v59, %v13022_v61  ;;  %v5546_v13 = vmul.f32 %v11570_v36, %v5413_v50  ;;  %v11955_v50 = vmul.f32 %v11527_v27, %v11436_v6 }
0x110c   : > { %v5196_v63 = vcombine.high %v5194_v39, %v5194_v39 }
0x110d   : > { %6551 = vbcast.lane.b32.xlu1 %v6549_v10, 256 }
0x110e   : > { %6579 = vbcast.lane.b32.xlu0 %v6577_v40, 256  ;;  %v6535_v40 = vrot.slane %v11493_v2, %v13022_v61  ;;  %v11968_v6 = vrot.slane %v5196_v63, %v13021_v47 }
0x110f   : > { %v11894_v10 = vpop.permute.xlu1 %5695 }
0x1110   : > { %v5640_v52 = vpop.permute.xlu0 %5639 }
0x1111   : > { %v6218_v16 = vmul.f32 %v6061_v17, %v5640_v52  ;;  %6530 = vbcast.lane.b32.xlu1 %v6528_v37, 256  ;;  %v6157_v17 = vrot.slane %v6032_v38, %v9634_v35 }
0x1112   : > { %6586 = vbcast.lane.b32.xlu0 %v6584_v3, 256  ;;  %v6542_v3 = vrot.slane %v11493_v2, %v13025_v42 }
0x1113   : > { %v11914_v44 = vadd.f32 %v6250_v45, %v6218_v16  ;;  %v11916_v4 = vpop.permute.xlu1 %5702  ;;  %v5225_v16 = vcombine.high %v11766_v46, %v11766_v46  ;;  %v5385_v45 = vrot.slane %v5217_v30, %v9634_v35  ;;  %v5227_v46 = vcombine.high %v5217_v30, %v5217_v30 }
0x1114   : > { %v5808_v52 = vpop.permute.xlu0 %5807 }
0x1115   : > { %6252 = vst.msk [vmem:[#allocation2] sm:$0xff] %vm666_vm0, %v11914_v44  ;;  %v11930_v18 = vmul.f32 %v6157_v17, %v5808_v52  ;;  %6537 = vbcast.lane.b32.xlu1 %v6535_v40, 256  ;;  %v6161_v17 = vrot.slane %v6046_v55, %v9634_v35  ;;  %v6054_v52 = vcombine.high %v6032_v38, %v6032_v38 }
0x1116   : > { %v6009_v40 = vcombine.high %v11845_v20, %v11845_v20  ;;  %6593 = vbcast.lane.b32.xlu0 %v6591_v58, 256  ;;  %v5389_v41 = vrot.slane %v5225_v16, %v9634_v35  ;;  %v5539_v38 = vmul.f32 %v11570_v36, %v5385_v45  ;;  %v5210_v20 = vrot.slane %v5194_v39, %v13021_v47 }
0x1117   : > { %13034 = vst [vmem:[#allocation38_spill] sm:$0xff] %v11930_v18  ;;  %v11940_v37 = vpop.permute.xlu1 %5709  ;;  %v5588_v18 = vmul.f32 1.442695, %v5547_v22  ;;  %v6598_v58 = vrot.slane %v11489_v59, %v13025_v42  ;;  %v6165_v30 = vrot.slane %v6054_v52, %v9634_v35  ;;  %v6056_v16 = vcombine.high %v6046_v55, %v6046_v55 }
0x1118   : > { %v5815_v61 = vpop.permute.xlu0 %5814  ;;  %v5592_v45 = vmul.f32 1.442695, %v11583_v29  ;;  %v5594_v39 = vmul.f32 1.442695, %v11579_v54  ;;  %v5393_v59 = vrot.slane %v5227_v46, %v9634_v35  ;;  %v5572_v0 = vmul.f32 1.442695, %v5539_v38 }
0x1119   : > { %v11949_v31 = vmul.f32 %v6161_v17, %v5815_v61  ;;  %6544 = vbcast.lane.b32.xlu1 %v6542_v3, 256  ;;  %v6023_v3 = vrot.slane %v6009_v40, %v13021_v47  ;;  %v11963_v17 = vmul.f32 1.442695, %v5546_v13  ;;  %v5540_v55 = vmul.f32 %v11570_v36, %v5389_v41 }
0x111a   : > { %9159 = vpow2.f32 %v5588_v18  ;;  %v5596_v22 = vmul.f32 1.442695, %v11586_v21  ;;  %v11976_v52 = vmul.f32 1.442695, %v11589_v34  ;;  %v5226_v29 = vcombine.high %v5210_v20, %v5210_v20 }
0x111b   : > { %v11959_v2 = vpop.permute.xlu1 %5716  ;;  %9161 = vpow2.f32 %v5590_v28  ;;  %v6169_v63 = vrot.slane %v6056_v16, %v9634_v35  ;;  %v11982_v46 = vrot.slane %v6023_v3, %v13021_v47  ;;  %v6025_v40 = vcombine.high %v6023_v3, %v6023_v3 }
0x111c   : > { %v5822_v27 = vpop.permute.xlu0 %5821  ;;  %9163 = vpow2.f32 %v5592_v45  ;;  %v5397_v18 = vrot.slane %v5210_v20, %v9634_v35  ;;  %v11989_v21 = vrot.slane %v11955_v50, %v13021_v47  ;;  %v5574_v61 = vmul.f32 1.442695, %v5540_v55 }
0x111d   : > { %v11971_v42 = vmul.f32 %v6165_v30, %v5822_v27  ;;  %6600 = vbcast.lane.b32.xlu1 %v6598_v58, 256  ;;  %9165 = vpow2.f32 %v5572_v0  ;;  %v5541_v41 = vmul.f32 %v11570_v36, %v5393_v59  ;;  %v5401_v38 = vrot.slane %v11968_v6, %v9634_v35 }
0x111e   : > { %9167 = vpow2.f32 %v5594_v39  ;;  %v5405_v58 = vrot.slane %v5226_v29, %v9634_v35  ;;  %v5877_v20 = vcombine.high %v11841_v25, %v11841_v25  ;;  %v5620_v30 = vmul.f32 1.442695, %v11629_v53 }
0x111f   : > { %13035 = vst [vmem:[#allocation35_spill] sm:$0xff] %v11971_v42  ;;  %v11978_v54 = vpop.permute.xlu1 %5723  ;;  %9169 = vpow2.f32 %v5596_v22  ;;  %v6173_v3 = vrot.slane %v11982_v46, %v9634_v35  ;;  %v12005_v45 = vrot.slane %v6025_v40, %v13021_v47  ;;  %v5622_v39 = vmul.f32 1.442695, %v11632_v48  ;;  %v7973_v48 = vld [vmem:[%s12805_s12 + $0x48] sm:$0xff] }
0x1120   : > { %v5829_v34 = vpop.permute.xlu0 %5828  ;;  %v12010_v27 = vmul.f32 %v11665_v8, %v11452_v32  ;;  %v12014_v25 = vrot.slane %v11675_v19, %v13021_v47  ;;  %v12018_v53 = vrot.slane %v11989_v21, %v13021_v47  ;;  %9171 = vpow2.f32 %v5574_v61  ;;  %v7972_v32 = vld [vmem:[%s12805_s12 + $0x40] sm:$0xff] }
0x1121   : > { %v11991_v28 = vmul.f32 %v6169_v63, %v5829_v34  ;;  %v5576_v55 = vmul.f32 1.442695, %v5541_v41  ;;  %v5542_v22 = vmul.f32 %v11570_v36, %v5397_v18  ;;  %v12030_v8 = vmul.f32 1.442695, %v11622_v49 }
0x1122   : > { %v5626_v19 = vmul.f32 1.442695, %v11635_v5  ;;  %v5899_v29 = vrot.slane %v5877_v20, %v13021_v47  ;;  %v8862_v63 = vpack.c.bf16 %v7973_v48, %v7972_v32  ;;  %9173 = vpow2.f32 %v5620_v30 }
0x1123   : > { %13036 = vst [vmem:[#allocation39_spill] sm:$0xff] %v11991_v28  ;;  %v12000_v16 = vpop.permute.xlu1 %5730  ;;  %v5624_v40 = vmul.f32 1.442695, %v11639_v1  ;;  %v6177_v34 = vrot.slane %v12005_v45, %v9634_v35  ;;  %v6055_v61 = vcombine.high %v11982_v46, %v11982_v46  ;;  %9175 = vpow2.f32 %v5622_v39 }
0x1124   : > { %v5836_v59 = vpop.permute.xlu0 %5835  ;;  %v12041_v41 = vpop.eup %9159  ;;  %v5628_v49 = vmul.f32 1.442695, %v11642_v14  ;;  %v12045_v5 = vmul.f32 1.442695, %v11645_v26  ;;  %v5323_v20 = vcombine.high %v12014_v25, %v12014_v25  ;;  %8863 = vmatprep.subr.bf16.mxu0 %v8862_v63  ;;  %9177 = vpow2.f32 %v5576_v55  ;;  %v13039_v55 = vld [vmem:[#allocation34_spill] sm:$0xff] }
0x1125   : > { %v12020_v0 = vmul.f32 %v6173_v3, %v5836_v59  ;;  %v12049_v30 = vpop.eup %9161  ;;  %v5578_v59 = vmul.f32 1.442695, %v5542_v22  ;;  %v5543_v46 = vmul.f32 %v11570_v36, %v5401_v38  ;;  %8865 = vmatpush3.bf16.msra.mxu0 %v8862_v63  ;;  %v12057_v14 = vmul.f32 1.442695, %v11650_v11 }
0x1126   : > { %v12054_v39 = vpop.eup %9163  ;;  %v6065_v26 = vrot.slane %v5899_v29, %v9634_v35  ;;  %v5907_v32 = vcombine.high %v11871_v51, %v11871_v51  ;;  %v5862_v48 = vcombine.high %v11817_v33, %v11817_v33  ;;  %9179 = vpow2.f32 %v5624_v40 }
0x1127   : > { %13037 = vst [vmem:[#allocation40_spill] sm:$0xff] %v12020_v0  ;;  %v12035_v18 = vpop.permute.xlu1 %5737  ;;  %v5911_v38 = vcombine.high %v11955_v50, %v11955_v50  ;;  %v6181_v11 = vrot.slane %v6055_v61, %v9634_v35  ;;  %v5544_v33 = vmul.f32 %v11570_v36, %v5405_v58  ;;  %9181 = vpow2.f32 %v5578_v59 }
0x1128   : > { %v5843_v1 = vpop.permute.xlu0 %5842  ;;  %v5580_v22 = vmul.f32 1.442695, %v5543_v46  ;;  %v13041_v50 = vcombine.high %v11968_v6, %v11968_v6  ;;  %9183 = vpow2.f32 %v5626_v19  ;;  %v12084_v58 = vrot.slane %v5323_v20, %v9634_v35  ;;  %v7974_v20 = vld [vmem:[%s12805_s12 + $0x50] sm:$0xff] }
0x1129   : > { %v12051_v3 = vmul.f32 %v6177_v34, %v5843_v1  ;;  %v9166_v34 = vpop.eup %9165  ;;  %9185 = vpow2.f32 %v5628_v49  ;;  %v5926_v59 = vcombine.high %v11989_v21, %v11989_v21  ;;  %v12091_v6 = vrot.slane %v5911_v38, %v13021_v47  ;;  %v7975_v21 = vld [vmem:[%s12805_s12 + $0x58] sm:$0xff] }
0x112a   : > { %v12069_v1 = vpop.eup %9167  ;;  %v6253_v56 = vmul.f32 %v9166_v34, %v11914_v44  ;;  %v5409_v61 = vrot.slane %v13041_v50, %v9634_v35  ;;  %v5876_v44 = vrot.slane %v5862_v48, %v13021_v47  ;;  %v5445_v34 = vrot.slane %v12014_v25, %v9634_v35  ;;  %v7976_v25 = vld [vmem:[%s12805_s12 + $0x60] sm:$0xff] }
0x112b   : > { %13038 = vst [vmem:[#allocation30_spill] sm:$0xff] %v12051_v3  ;;  %v5647_v63 = vpop.permute.xlu1 %5646  ;;  %v5909_v3 = vcombine.high %v5899_v29, %v5899_v29  ;;  %v12073_v15 = vpop.eup %9169  ;;  %9187 = vpow2.f32 %v5580_v22  ;;  %v5582_v48 = vmul.f32 1.442695, %v5544_v33  ;;  %v8866_v38 = vpack.c.bf16 %v7975_v21, %v7974_v20  ;;  %v7978_v22 = vld [vmem:[%s12805_s12 + $0x70] sm:$0xff]  ;;  %v7979_v33 = vld [vmem:[%s12805_s12 + $0x78] sm:$0xff] }
0x112c   : > { %v6219_v13 = vmul.f32 %v6065_v26, %v5647_v63  ;;  %v5850_v51 = vpop.permute.xlu0 %5849  ;;  %v6069_v26 = vrot.slane %v5907_v32, %v9634_v35  ;;  %v9172_v29 = vpop.eup %9171  ;;  %v5878_v50 = vcombine.high %v5876_v44, %v5876_v44  ;;  %9189 = vpow2.f32 %v12045_v5 }
0x112d   : > { %v12075_v40 = vmul.f32 %v6181_v11, %v5850_v51  ;;  %v6073_v49 = vrot.slane %v5909_v3, %v9634_v35  ;;  %v12104_v32 = vpop.eup %9173  ;;  %v7977_v3 = vld [vmem:[%s12805_s12 + $0x68] sm:$0xff]  ;;  %v12113_v51 = vrot.slane %v5876_v44, %v13021_v47  ;;  %v5967_v44 = vrot.slane %v12010_v27, %v13021_v47  ;;  %8867 = vmatprep.subr.bf16.mxu0 %v8866_v38 }
0x112e   : > { %v6254_v0 = vadd.f32 %v6253_v56, %v6219_v13  ;;  %v12110_v63 = vpop.eup %9175  ;;  %v12130_v20 = vrot.slane %v5926_v59, %v13021_v47  ;;  %8869 = vmatpush3.bf16.msra.mxu0 %v8866_v38  ;;  %9191 = vpow2.f32 %v5582_v48  ;;  %v8874_v28 = vpack.c.bf16 %v7979_v33, %v7978_v22 }
0x112f   : > { %13040 = vst [vmem:[#allocation26_spill] sm:$0xff] %v12075_v40  ;;  %v5654_v46 = vpop.permute.xlu1 %5653  ;;  %13042 = vst [vmem:[#allocation31_spill] sm:$0xff] %v12110_v63  ;;  %v5927_v40 = vcombine.high %v12091_v6, %v12091_v6  ;;  %9193 = vpow2.f32 %v12057_v14  ;;  %v6077_v59 = vrot.slane %v12113_v51, %v9634_v35  ;;  %v5975_v22 = vcombine.high %v5967_v44, %v5967_v44 }
0x1130   : > { %6255 = vst.msk [vmem:[#allocation2 + $0x8] sm:$0xff] %vm666_vm0, %v6254_v0  ;;  %v6220_v56 = vmul.f32 %v6069_v26, %v5654_v46  ;;  %v6256_v13 = vmul.f32 %v9172_v29, %v6254_v0  ;;  %v6391_v19 = vpop.permute.xlu0 %6390  ;;  %v5545_v0 = vmul.f32 %v11570_v36, %v5409_v61  ;;  %v8870_v26 = vpack.c.bf16 %v7977_v3, %v7976_v25  ;;  %v9178_v61 = vpop.eup %9177 }
0x1131   : > { %v5956_v46 = vcombine.high %v12018_v53, %v12018_v53  ;;  %v12135_v29 = vpop.eup %9179  ;;  %v12162_v42 = vrot.slane %v5927_v40, %v13021_v47  ;;  %v5600_v63 = vmul.f32 1.442695, %v11730_v57 }
0x1132   : > { %v6257_v11 = vadd.f32 %v6256_v13, %v6220_v56  ;;  %v5554_v13 = vmul.f32 %v11570_v36, %v5445_v34  ;;  %13043 = vst [vmem:[#allocation27_spill] sm:$0xff] %v12135_v29  ;;  %v5584_v34 = vmul.f32 1.442695, %v5545_v0  ;;  %8871 = vmatprep.subr.bf16.mxu0 %v8870_v26 }
0x1133   : > { %v5661_v56 = vpop.permute.xlu1 %5660  ;;  %v12146_v38 = vrot.slane %v5956_v46, %v9634_v35  ;;  %8873 = vmatpush3.bf16.msra.mxu0 %v8870_v26 }
0x1134   : > { %6258 = vst.msk [vmem:[#allocation2 + $0x10] sm:$0xff] %vm666_vm0, %v6257_v11  ;;  %v6221_v21 = vmul.f32 %v6073_v49, %v5661_v56  ;;  %v6259_v25 = vmul.f32 %v9178_v61, %v6257_v11  ;;  %v12133_v3 = vpop.permute.xlu0 %6446  ;;  %v12143_v49 = vrot.slane %v5878_v50, %v13021_v47  ;;  %v9182_v11 = vpop.eup %9181  ;;  %v12150_v61 = vrot.slane %v12091_v6, %v13021_v47 }
0x1135   : > { %v5602_v33 = vmul.f32 1.442695, %v5554_v13  ;;  %v12152_v14 = vpop.eup %9183  ;;  %v5958_v6 = vcombine.high %v12130_v20, %v12130_v20  ;;  %9195 = vpow2.f32 %v5584_v34  ;;  %v13046_v13 = vrot.slane %v13039_v55, %v9634_v35  ;;  %8875 = vmatprep.subr.bf16.mxu0 %v8874_v28 }
0x1136   : > { %v6260_v5 = vadd.f32 %v6259_v25, %v6221_v21  ;;  %13044 = vst [vmem:[#allocation14_spill] sm:$0xff] %v12152_v14  ;;  %v12157_v29 = vpop.eup %9185  ;;  %v6081_v26 = vrot.slane %v12143_v49, %v9634_v35  ;;  %v5957_v40 = vcombine.high %v12150_v61, %v12150_v61  ;;  %v12176_v55 = vrot.slane %v5975_v22, %v13021_v47  ;;  %v9247_v22 = vld [vmem:[%s12804_s11 + $0x8] sm:$0xff] }
0x1137   : > { %v6347_v48 = vld [vmem:[#allocation2 + $0x8] sm:$0xff]  ;;  %v5668_v0 = vpop.permute.xlu1 %5667  ;;  %13045 = vst [vmem:[#allocation13_spill] sm:$0xff] %v12157_v29  ;;  %9197 = vpow2.f32 %v5602_v33  ;;  %8877 = vmatpush3.bf16.msra.mxu0 %v8874_v28  ;;  %v5556_v33 = vmul.f32 %v9247_v22, %v12084_v58  ;;  %v13047_v56 = vmov 0.0|0.0  }
0x1138   : > { %v6603_v21 = vmul.f32 %v6391_v19, %v6347_v48  ;;  %6261 = vst.msk [vmem:[#allocation2 + $0x18] sm:$0xff] %vm666_vm0, %v6260_v5  ;;  %v6222_v50 = vmul.f32 %v6077_v59, %v5668_v0  ;;  %v6262_v25 = vmul.f32 %v9182_v11, %v6260_v5  ;;  %v6405_v46 = vpop.permute.xlu0 %6404  ;;  %v5555_v19 = vmul.f32 %v11570_v36, %v13046_v13  ;;  %v9188_v48 = vpop.eup %9187 }
0x1139   : > { %v5908_v11 = vcombine.high %v12113_v51, %v12113_v51  ;;  %9199 = vpow2.f32 %v11963_v17  ;;  %8902 = vmatprep.subr.bf16.mxu0 %v13047_v56  ;;  %v12193_v17 = vrot.slane %v5958_v6, %v9634_v35  ;;  %v12201_v58 = vrot.slane %v5957_v40, %v9634_v35 }
0x113a   : > { %v6641_v59 = vsel %vm666_vm0, %v6603_v21, 0.0  ;;  %v6263_v5 = vadd.f32 %v6262_v25, %v6222_v50  ;;  %v12181_v50 = vrot.slane %v5967_v44, %v13021_v47  ;;  %v5910_v25 = vcombine.high %v12143_v49, %v12143_v49 }
0x113b   : > { %v6642_v34 = vrot.slane %v6641_v59, 4  ;;  %v5675_v0 = vpop.permute.xlu1 %5674  ;;  %v5604_v13 = vmul.f32 1.442695, %v5555_v19  ;;  %v6085_v49 = vrot.slane %v5908_v11, %v9634_v35  ;;  %v5606_v56 = vmul.f32 1.442695, %v5556_v33 }
0x113c   : > { %6264 = vst.msk [vmem:[#allocation2 + $0x20] sm:$0xff] %vm666_vm0, %v6263_v5  ;;  %v6223_v36 = vmul.f32 %v6081_v26, %v5675_v0  ;;  %v6265_v21 = vmul.f32 %v9188_v48, %v6263_v5  ;;  %v12190_v5 = vpop.eup %9189  ;;  %v6089_v40 = vrot.slane %v5910_v25, %v9634_v35 }
0x113d   : > { %v6643_v51 = vadd.f32 %v6642_v34, %v6641_v59  ;;  %13048 = vst [vmem:[#allocation15_spill] sm:$0xff] %v12190_v5  ;;  %v6412_v59 = vpop.permute.xlu0 %6411  ;;  %v9192_v19 = vpop.eup %9191  ;;  %9201 = vpow2.f32 %v5604_v13 }
0x113e   : > { %v6266_v44 = vadd.f32 %v6265_v21, %v6223_v36  ;;  %v12205_v22 = vpop.eup %9193  ;;  %v6005_v21 = vcombine.high %v12181_v50, %v12181_v50  ;;  %9203 = vpow2.f32 %v11976_v52 }
0x113f   : > { %v6644_v48 = vrot.slane %v6643_v51, 2  ;;  %v6349_v34 = vld [vmem:[#allocation2 + $0x18] sm:$0xff]  ;;  %v5682_v0 = vpop.permute.xlu1 %5681  ;;  %13049 = vst [vmem:[#allocation16_spill] sm:$0xff] %v12205_v22  ;;  %9205 = vpow2.f32 %v5606_v56  ;;  %v5610_v56 = vmul.f32 1.442695, %v11740_v7 }
0x1140   : > { %v6605_v28 = vmul.f32 %v6405_v46, %v6349_v34  ;;  %6267 = vst.msk [vmem:[#allocation2 + $0x28] sm:$0xff] %vm666_vm0, %v6266_v44  ;;  %v6224_v36 = vmul.f32 %v6085_v49, %v5682_v0  ;;  %v6268_v11 = vmul.f32 %v9192_v19, %v6266_v44  ;;  %v6125_v46 = vrot.slane %v12181_v50, %v9634_v35  ;;  %v9196_v49 = vpop.eup %9195 }
0x1141   : > { %v6645_v26 = vadd.f32 %v6644_v48, %v6643_v51  ;;  %v12212_v14 = vpop.permute.xlu0 %6460  ;;  %v5608_v34 = vmul.f32 1.442695, %v11735_v60  ;;  %v5959_v51 = vcombine.high %v12162_v42, %v12162_v42  ;;  %v9198_v50 = vpop.eup %9197 }
0x1142   : > { %v6655_v5 = vsel %vm666_vm0, %v6605_v28, 0.0  ;;  %v6269_v29 = vadd.f32 %v6268_v11, %v6224_v36  ;;  %13050 = vst [vmem:[#allocation12_spill] sm:$0xff] %v12212_v14  ;;  %v12222_v28 = vrot.slane %v6005_v21, %v9634_v35  ;;  %v5960_v36 = vcombine.high %v12010_v27, %v12010_v27 }
0x1143   : > { %v6646_v44 = vrot.slane %v6645_v26, 1  ;;  %v6656_v19 = vrot.slane %v6655_v5, 4  ;;  %v6350_v0 = vld [vmem:[#allocation2 + $0x20] sm:$0xff]  ;;  %v5689_v6 = vpop.permute.xlu1 %5688  ;;  %v9200_v11 = vpop.eup %9199  ;;  %9207 = vpow2.f32 %v5608_v34  ;;  %v13052_v27 = vrot.slane %v12018_v53, %v9634_v35 }
0x1144   : > { %v6606_v25 = vmul.f32 %v6412_v59, %v6350_v0  ;;  %6270 = vst.msk [vmem:[#allocation2 + $0x30] sm:$0xff] %vm666_vm0, %v6269_v29  ;;  %v6225_v13 = vmul.f32 %v6089_v40, %v5689_v6  ;;  %v6271_v33 = vmul.f32 %v9196_v49, %v6269_v29  ;;  %v6007_v59 = vcombine.high %v12176_v55, %v12176_v55 }
0x1145   : > { %v6647_v60 = vadd.f32 %v6646_v44, %v6645_v26  ;;  %v6657_v48 = vadd.f32 %v6656_v19, %v6655_v5  ;;  %v5759_v14 = vpop.permute.xlu0 %5758  ;;  %v13051_v29 = vrot.slane %v11827_v62, 1  ;;  %v6226_v5 = vmul.f32 %v13052_v27, %v11894_v10 }
0x1146   : > { %v6662_v52 = vsel %vm666_vm0, %v6606_v25, 0.0  ;;  %v6272_v22 = vadd.f32 %v6271_v33, %v6225_v13  ;;  %v6298_v44 = vmul.f32 0.0, %v9198_v50  ;;  %v13053_v19 = vrot.slane %v11780_v43, 1 }
0x1147   : > { %v6931_v6 = vadd.f32 %v13051_v29, %v6647_v60  ;;  %v6658_v21 = vrot.slane %v6657_v48, 2  ;;  %v6663_v40 = vrot.slane %v6662_v52, 4  ;;  %v5752_v26 = vpop.permute.xlu1 %5751  ;;  %v5974_v33 = vrot.slane %v5960_v36, %v13021_v47  ;;  %v9202_v53 = vpop.eup %9201 }
0x1148   : > { %6273 = vst.msk [vmem:[#allocation2 + $0x38] sm:$0xff] %vm666_vm0, %v6272_v22  ;;  %v6274_v49 = vmul.f32 %v9200_v11, %v6272_v22  ;;  %v6234_v34 = vmul.f32 %v6125_v46, %v5752_v26  ;;  %v12244_v10 = vrot.slane %v5959_v51, %v9634_v35  ;;  %v6057_v11 = vcombine.high %v12005_v45, %v12005_v45 }
0x1149   : > { %v12239_v0 = vmul.f32 %v13053_v19, %v6931_v6  ;;  %v6659_v25 = vadd.f32 %v6658_v21, %v6657_v48  ;;  %v6664_v13 = vadd.f32 %v6663_v40, %v6662_v52  ;;  %v5766_v29 = vpop.permute.xlu0 %5765  ;;  %v5612_v48 = vmul.f32 1.442695, %v11745_v24  ;;  %v12261_v40 = vpop.eup %9203 }
0x114a   : > { %v6275_v60 = vadd.f32 %v6274_v49, %v6226_v5  ;;  %v6299_v7 = vadd.f32 %v6298_v44, %v6234_v34  ;;  %v13054_v36 = vrot.slane %v12130_v20, %v9634_v35  ;;  %v13055_v51 = vrot.slane %v12176_v55, %v9634_v35 }
0x114b   : > { %v6660_v22 = vrot.slane %v6659_v25, 1  ;;  %v6665_v46 = vrot.slane %v6664_v13, 2  ;;  %v12246_v50 = vpop.permute.xlu1 %5744  ;;  %9209 = vpow2.f32 %v5610_v56  ;;  %v5976_v26 = vcombine.high %v5974_v33, %v5974_v33 }
0x114c   : > { %v6227_v52 = vmul.f32 %v13054_v36, %v11916_v4  ;;  %6276 = vst.msk [vmem:[#allocation2 + $0x40] sm:$0xff] %vm666_vm0, %v6275_v60  ;;  %v6277_v57 = vmul.f32 %v12041_v41, %v6275_v60  ;;  %v6235_v6 = vmul.f32 %v13055_v51, %v5759_v14  ;;  %6300 = vst.msk [vmem:[#allocation2 + $0x80] sm:$0xff] %vm666_vm0, %v6299_v7  ;;  %9211 = vpow2.f32 %v5600_v63  ;;  %v9206_v41 = vpop.eup %9205 }
0x114d   : > { %v6301_v21 = vmul.f32 %v9202_v53, %v6299_v7  ;;  %v6661_v45 = vadd.f32 %v6660_v22, %v6659_v25  ;;  %v6666_v24 = vadd.f32 %v6665_v46, %v6664_v13  ;;  %v5773_v4 = vpop.permute.xlu0 %5772  ;;  %v6137_v5 = vrot.slane %v6007_v59, %v9634_v35  ;;  %v9208_v25 = vpop.eup %9207 }
0x114e   : > { %v6278_v27 = vadd.f32 %v6277_v57, %v6227_v52  ;;  %v13056_v49 = vrot.slane %v11827_v62, 3  ;;  %v5990_v44 = vrot.slane %v5974_v33, %v13021_v47  ;;  %v5614_v19 = vmul.f32 1.442695, %v11748_v12 }
0x114f   : > { %v6302_v20 = vadd.f32 %v6301_v21, %v6235_v6  ;;  %v6667_v14 = vrot.slane %v6666_v24, 1  ;;  %v12266_v34 = vpop.permute.xlu1 %5856  ;;  %v6228_v56 = vmul.f32 %v12146_v38, %v11940_v37  ;;  %v6236_v59 = vmul.f32 %v12222_v28, %v5766_v29 }
0x1150   : > { %v6933_v55 = vadd.f32 %v13056_v49, %v6661_v45  ;;  %6279 = vst.msk [vmem:[#allocation2 + $0x48] sm:$0xff] %vm666_vm0, %v6278_v27  ;;  %v6280_v63 = vmul.f32 %v12049_v30, %v6278_v27  ;;  %v13057_v60 = vrot.slane %v11780_v43, 3  ;;  %9213 = vpow2.f32 %v5612_v48  ;;  %v6348_v48 = vld [vmem:[#allocation2 + $0x10] sm:$0xff] }
0x1151   : > { %6303 = vst.msk [vmem:[#allocation2 + $0x88] sm:$0xff] %vm666_vm0, %v6302_v20  ;;  %v6304_v13 = vmul.f32 %v9206_v41, %v6302_v20  ;;  %v6668_v33 = vadd.f32 %v6667_v14, %v6666_v24  ;;  %v12281_v12 = vrot.slane %v5976_v26, %v13021_v47  ;;  %v12284_v38 = vrot.slane %v6057_v11, %v9634_v35  ;;  %v5780_v30 = vpop.permute.xlu0 %5779 }
0x1152   : > { %v12278_v7 = vmul.f32 %v13057_v60, %v6933_v55  ;;  %v6281_v53 = vadd.f32 %v6280_v63, %v6228_v56  ;;  %9215 = vpow2.f32 %v12030_v8  ;;  %v6229_v28 = vmul.f32 %v12193_v17, %v11959_v2 }
0x1153   : > { %v6305_v37 = vadd.f32 %v6304_v13, %v6236_v59  ;;  %v13058_v29 = vrot.slane %v11827_v62, 4  ;;  %v6141_v46 = vrot.slane %v5990_v44, %v9634_v35  ;;  %v6398_v36 = vpop.permute.xlu1 %6397  ;;  %v6006_v47 = vcombine.high %v5990_v44, %v5990_v44 }
0x1154   : > { %6282 = vst.msk [vmem:[#allocation2 + $0x50] sm:$0xff] %vm666_vm0, %v6281_v53  ;;  %v6283_v52 = vmul.f32 %v12054_v39, %v6281_v53  ;;  %v6237_v11 = vmul.f32 %v6137_v5, %v5773_v4  ;;  %v6604_v8 = vmul.f32 %v6398_v36, %v6348_v48  ;;  %v13059_v51 = vrot.slane %v11780_v43, 4 }
0x1155   : > { %v6934_v22 = vadd.f32 %v13058_v29, %v6668_v33  ;;  %6306 = vst.msk [vmem:[#allocation2 + $0x90] sm:$0xff] %vm666_vm0, %v6305_v37  ;;  %v6307_v57 = vmul.f32 %v9208_v25, %v6305_v37  ;;  %9217 = vpow2.f32 %v5614_v19  ;;  %v5616_v17 = vmul.f32 1.442695, %v11758_v23  ;;  %v5787_v39 = vpop.permute.xlu0 %5786  ;;  %v9210_v27 = vpop.eup %9209  ;;  %v6346_v23 = vld [vmem:[#allocation2] sm:$0xff] }
0x1156   : > { %v6008_v6 = vcombine.high %v12281_v12, %v12281_v12  ;;  %v6284_v21 = vadd.f32 %v6283_v52, %v6229_v28  ;;  %v6648_v24 = vsel %vm666_vm0, %v6604_v8, 0.0  ;;  %v6145_v26 = vrot.slane %v12281_v12, %v9634_v35  ;;  %v12310_v44 = vpop.eup %9211 }
0x1157   : > { %v12297_v2 = vmul.f32 %v13059_v51, %v6934_v22  ;;  %v6308_v45 = vadd.f32 %v6307_v57, %v6237_v11  ;;  %v13060_v20 = vrot.slane %v12150_v61, %v9634_v35  ;;  %v6238_v5 = vmul.f32 %v6141_v46, %v5780_v30  ;;  %v6384_v49 = vpop.permute.xlu1 %6383  ;;  %v6355_v14 = vld [vmem:[#allocation2 + $0x48] sm:$0xff] }
0x1158   : > { %v6649_v41 = vrot.slane %v6648_v24, 4  ;;  %v6149_v55 = vrot.slane %v6006_v47, %v9634_v35  ;;  %6285 = vst.msk [vmem:[#allocation2 + $0x58] sm:$0xff] %vm666_vm0, %v6284_v21  ;;  %v6286_v19 = vmul.f32 %v12069_v1, %v6284_v21  ;;  %v6602_v56 = vmul.f32 %v6384_v49, %v6346_v23 }
0x1159   : > { %v6230_v4 = vmul.f32 %v13060_v20, %v11978_v54  ;;  %6309 = vst.msk [vmem:[#allocation2 + $0x98] sm:$0xff] %vm666_vm0, %v6308_v45  ;;  %v6310_v25 = vmul.f32 %v9210_v27, %v6308_v45  ;;  %v6611_v61 = vmul.f32 %v12133_v3, %v6355_v14  ;;  %v13061_v54 = vrot.slane %v12162_v42, %v9634_v35  ;;  %v5794_v1 = vpop.permute.xlu0 %5793 }
0x115a   : > { %v6650_v59 = vadd.f32 %v6649_v41, %v6648_v24  ;;  %9219 = vpow2.f32 %v5616_v17  ;;  %v6153_v13 = vrot.slane %v6008_v6, %v9634_v35  ;;  %v6634_v12 = vsel %vm666_vm0, %v6602_v56, 0.0  ;;  %v9214_v37 = vpop.eup %9213 }
0x115b   : > { %v6231_v63 = vmul.f32 %v13061_v54, %v12000_v16  ;;  %v6287_v60 = vadd.f32 %v6286_v19, %v6230_v4  ;;  %v6311_v33 = vadd.f32 %v6310_v25, %v6238_v5  ;;  %v6697_v53 = vsel %vm666_vm0, %v6611_v61, 0.0  ;;  %v6356_v29 = vld [vmem:[#allocation2 + $0x50] sm:$0xff]  ;;  %v6454_v42 = vpop.permute.xlu1 %6453 }
0x115c   : > { %v6232_v3 = vmul.f32 %v12201_v58, %v12035_v18  ;;  %v6651_v30 = vrot.slane %v6650_v59, 2  ;;  %v6635_v28 = vrot.slane %v6634_v12, 4  ;;  %v6698_v16 = vrot.slane %v6697_v53, 4  ;;  %v12325_v22 = vpop.eup %9215 }
0x115d   : > { %6288 = vst.msk [vmem:[#allocation2 + $0x60] sm:$0xff] %vm666_vm0, %v6287_v60  ;;  %v6289_v35 = vmul.f32 %v12073_v15, %v6287_v60  ;;  %6312 = vst.msk [vmem:[#allocation2 + $0xa0] sm:$0xff] %vm666_vm0, %v6311_v33  ;;  %v6239_v46 = vmul.f32 %v6145_v26, %v5787_v39  ;;  %v6313_v48 = vmul.f32 %v9214_v37, %v6311_v33  ;;  %v7127_v47 = vrot.slane %v12239_v0, 7  ;;  %v5801_v17 = vpop.permute.xlu0 %5800  ;;  %v6354_v39 = vld [vmem:[#allocation2 + $0x40] sm:$0xff] }
0x115e   : > { %v6612_v36 = vmul.f32 %v6454_v42, %v6356_v29  ;;  %v6652_v52 = vadd.f32 %v6651_v30, %v6650_v59  ;;  %v6636_v18 = vadd.f32 %v6635_v28, %v6634_v12  ;;  %v6699_v58 = vadd.f32 %v6698_v16, %v6697_v53 }
0x115f   : > { %v6290_v11 = vadd.f32 %v6289_v35, %v6231_v63  ;;  %v6233_v57 = vmul.f32 %v12244_v10, %v12246_v50  ;;  %v6314_v8 = vadd.f32 %v6313_v48, %v6239_v46  ;;  %v9218_v6 = vpop.eup %9217  ;;  %v6240_v45 = vmul.f32 %v6149_v55, %v5794_v1  ;;  %v6440_v26 = vpop.permute.xlu1 %6439 }
0x1160   : > { %v6704_v51 = vsel %vm666_vm0, %v6612_v36, 0.0  ;;  %v6653_v15 = vrot.slane %v6652_v52, 1  ;;  %v6637_v21 = vrot.slane %v6636_v18, 2  ;;  %v6700_v4 = vrot.slane %v6699_v58, 2 }
0x1161   : > { %v6705_v24 = vrot.slane %v6704_v51, 4  ;;  %6291 = vst.msk [vmem:[#allocation2 + $0x68] sm:$0xff] %vm666_vm0, %v6290_v11  ;;  %v6292_v27 = vmul.f32 %v12261_v40, %v6290_v11  ;;  %6315 = vst.msk [vmem:[#allocation2 + $0xa8] sm:$0xff] %vm666_vm0, %v6314_v8  ;;  %v6316_v20 = vmul.f32 %v9218_v6, %v6314_v8  ;;  %v6610_v10 = vmul.f32 %v6440_v26, %v6354_v39  ;;  %v6468_v25 = vpop.permute.xlu0 %6467  ;;  %v13066_v26 = vld [vmem:[#allocation24_spill] sm:$0xff] }
0x1162   : > { %v6654_v50 = vadd.f32 %v6653_v15, %v6652_v52  ;;  %v6638_v5 = vadd.f32 %v6637_v21, %v6636_v18  ;;  %v6241_v23 = vmul.f32 %v6153_v13, %v5801_v17  ;;  %v6701_v19 = vadd.f32 %v6700_v4, %v6699_v58  ;;  %v6351_v58 = vld [vmem:[#allocation2 + $0x28] sm:$0xff]  ;;  %v6352_v15 = vld [vmem:[#allocation2 + $0x30] sm:$0xff] }
0x1163   : > { %v6706_v41 = vadd.f32 %v6705_v24, %v6704_v51  ;;  %v6293_v49 = vadd.f32 %v6292_v27, %v6232_v3  ;;  %v6317_v14 = vadd.f32 %v6316_v20, %v6240_v45  ;;  %v6690_v55 = vsel %vm666_vm0, %v6610_v10, 0.0  ;;  %v6419_v33 = vpop.permute.xlu1 %6418  ;;  %v13065_v24 = vld [vmem:[#allocation38_spill] sm:$0xff] }
0x1164   : > { %v9220_v56 = vpop.eup %9219  ;;  %v13062_v61 = vrot.slane %v11827_v62, 2  ;;  %v6639_v40 = vrot.slane %v6638_v5, 1  ;;  %v6691_v59 = vrot.slane %v6690_v55, 4  ;;  %v6358_v60 = vld [vmem:[#allocation2 + $0x60] sm:$0xff]  ;;  %v6702_v1 = vrot.slane %v6701_v19, 1 }
0x1165   : > { %v6707_v63 = vrot.slane %v6706_v41, 2  ;;  %6294 = vst.msk [vmem:[#allocation2 + $0x70] sm:$0xff] %vm666_vm0, %v6293_v49  ;;  %v6295_v12 = vmul.f32 %v12310_v44, %v6293_v49  ;;  %6318 = vst.msk [vmem:[#allocation2 + $0xb0] sm:$0xff] %vm666_vm0, %v6317_v14  ;;  %v6319_v13 = vmul.f32 %v9220_v56, %v6317_v14  ;;  %v6614_v53 = vmul.f32 %v6468_v25, %v6358_v60  ;;  %v6426_v48 = vpop.permute.xlu0 %6425 }
0x1166   : > { %v6932_v54 = vadd.f32 %v13062_v61, %v6654_v50  ;;  %v13063_v37 = vrot.slane %v11780_v43, 2  ;;  %v6640_v30 = vadd.f32 %v6639_v40, %v6638_v5  ;;  %v6692_v29 = vadd.f32 %v6691_v59, %v6690_v55  ;;  %v6364_v59 = vld [vmem:[#allocation2 + $0x90] sm:$0xff] }
0x1167   : > { %v6708_v28 = vadd.f32 %v6707_v63, %v6706_v41  ;;  %v6296_v42 = vadd.f32 %v6295_v12, %v6233_v57  ;;  %v6320_v16 = vadd.f32 %v6319_v13, %v6241_v23  ;;  %v6703_v35 = vadd.f32 %v6702_v1, %v6701_v19  ;;  %v6503_v11 = vpop.permute.xlu1 %6502  ;;  %v6363_v63 = vld [vmem:[#allocation2 + $0x88] sm:$0xff] }
0x1168   : > { %v12345_v3 = vmul.f32 %v13063_v37, %v6932_v54  ;;  %v6718_v46 = vsel %vm666_vm0, %v6614_v53, 0.0  ;;  %v12350_v44 = vmul.f32 %v12284_v38, %v12266_v34  ;;  %v6930_v36 = vadd.f32 %v11827_v62, %v6640_v30 }
0x1169   : > { %v6709_v52 = vrot.slane %v6708_v28, 1  ;;  %v6693_v18 = vrot.slane %v6692_v29, 2  ;;  %6297 = vst.msk [vmem:[#allocation2 + $0x78] sm:$0xff] %vm666_vm0, %v6296_v42  ;;  %6321 = vst.msk [vmem:[#allocation2 + $0xb8] sm:$0xff] %vm666_vm0, %v6320_v16  ;;  %v6322_v57 = vmul.f32 %v12325_v22, %v6320_v16  ;;  %v13064_v8 = vrot.slane %v11822_v9, 1  ;;  %v6510_v22 = vpop.permute.xlu0 %6509 }
0x116a   : > { %v6719_v17 = vrot.slane %v6718_v46, 4  ;;  %v6607_v6 = vmul.f32 %v6419_v33, %v6351_v58  ;;  %v7054_v34 = vmul.f32 %v11780_v43, %v6930_v36  ;;  %v6608_v45 = vmul.f32 %v6426_v48, %v6352_v15  ;;  %v13071_v58 = vld [vmem:[#allocation35_spill] sm:$0xff] }
0x116b   : > { %v6939_v51 = vadd.f32 %v13064_v8, %v6703_v35  ;;  %v6710_v38 = vadd.f32 %v6709_v52, %v6708_v28  ;;  %v6694_v21 = vadd.f32 %v6693_v18, %v6692_v29  ;;  %v6323_v39 = vadd.f32 %v6322_v57, %v13065_v24  ;;  %v6475_v14 = vpop.permute.xlu1 %6474  ;;  %v13070_v28 = vld [vmem:[#allocation31_spill] sm:$0xff]  ;;  %v6359_v18 = vld [vmem:[#allocation2 + $0x68] sm:$0xff] }
0x116c   : > { %v13067_v27 = vrot.slane %v13066_v26, 1  ;;  %v6720_v4 = vadd.f32 %v6719_v17, %v6718_v46  ;;  %v6669_v10 = vsel %vm666_vm0, %v6607_v6, 0.0  ;;  %v12366_v50 = vsel %vm3869_vm6, %v7127_v47, %v7054_v34 }
0x116d   : > { %v13068_v5 = vrot.slane %v11822_v9, 2  ;;  %v6695_v23 = vrot.slane %v6694_v21, 1  ;;  %v6670_v49 = vrot.slane %v6669_v10, 4  ;;  %6324 = vst.msk [vmem:[#allocation2 + $0xc0] sm:$0xff] %vm666_vm0, %v6323_v39  ;;  %v6325_v19 = vmul.f32 %v12104_v32, %v6323_v39  ;;  %v6433_v46 = vpop.permute.xlu0 %6432 }
0x116e   : > { %v7063_v20 = vmul.f32 %v13067_v27, %v6939_v51  ;;  %v6721_v25 = vrot.slane %v6720_v4, 2  ;;  %v6676_v56 = vsel %vm666_vm0, %v6608_v45, 0.0  ;;  %v13069_v61 = vrot.slane %v13066_v26, 2 }
0x116f   : > { %v6940_v41 = vadd.f32 %v13068_v5, %v6710_v38  ;;  %v6696_v54 = vadd.f32 %v6695_v23, %v6694_v21  ;;  %v6671_v47 = vadd.f32 %v6670_v49, %v6669_v10  ;;  %v6677_v40 = vrot.slane %v6676_v56, 4  ;;  %v6559_v30 = vpop.permute.xlu1 %6558  ;;  %v13072_v38 = vld [vmem:[#allocation27_spill] sm:$0xff] }
0x1170   : > { %v7141_v55 = vrot.slane %v7063_v20, 7  ;;  %v6326_v60 = vadd.f32 %v6325_v19, %v11949_v31  ;;  %v6722_v33 = vadd.f32 %v6721_v25, %v6720_v4  ;;  %v6619_v12 = vmul.f32 %v6503_v11, %v6363_v63  ;;  %v6353_v25 = vld [vmem:[#allocation2 + $0x38] sm:$0xff] }
0x1171   : > { %v7064_v0 = vmul.f32 %v13069_v61, %v6940_v41  ;;  %v6620_v13 = vmul.f32 %v6510_v22, %v6364_v59  ;;  %v6938_v32 = vadd.f32 %v11822_v9, %v6696_v54  ;;  %v6672_v53 = vrot.slane %v6671_v47, 2  ;;  %v13074_v41 = vld [vmem:[#allocation39_spill] sm:$0xff] }
0x1172   : > { %v6678_v37 = vadd.f32 %v6677_v40, %v6676_v56  ;;  %6327 = vst.msk [vmem:[#allocation2 + $0xc8] sm:$0xff] %vm666_vm0, %v6326_v60  ;;  %v6328_v29 = vmul.f32 %v13070_v28, %v6326_v60  ;;  %v6723_v42 = vrot.slane %v6722_v33, 1  ;;  %v6753_v16 = vsel %vm666_vm0, %v6619_v12, 0.0  ;;  %v6496_v56 = vpop.permute.xlu0 %6495  ;;  %v6357_v61 = vld [vmem:[#allocation2 + $0x58] sm:$0xff] }
0x1173   : > { %v7143_v1 = vrot.slane %v7064_v0, 6  ;;  %v6760_v35 = vsel %vm666_vm0, %v6620_v13, 0.0  ;;  %v7062_v31 = vmul.f32 %v13066_v26, %v6938_v32  ;;  %v6673_v48 = vadd.f32 %v6672_v53, %v6671_v47  ;;  %v6482_v5 = vpop.permute.xlu1 %6481  ;;  %v13077_v60 = vld [vmem:[#allocation14_spill] sm:$0xff] }
0x1174   : > { %v6679_v36 = vrot.slane %v6678_v37, 2  ;;  %v6754_v52 = vrot.slane %v6753_v16, 4  ;;  %v6329_v11 = vadd.f32 %v6328_v29, %v13071_v58  ;;  %v6724_v57 = vadd.f32 %v6723_v42, %v6722_v33  ;;  %v13079_v29 = vld [vmem:[#allocation12_spill] sm:$0xff] }
0x1175   : > { %v6761_v8 = vrot.slane %v6760_v35, 4  ;;  %v6615_v51 = vmul.f32 %v6475_v14, %v6359_v18  ;;  %v7142_v17 = vsel %vm3869_vm6, %v7141_v55, %v7062_v31  ;;  %v6674_v6 = vrot.slane %v6673_v48, 1 }
0x1176   : > { %v6680_v15 = vadd.f32 %v6679_v36, %v6678_v37  ;;  %v6755_v34 = vadd.f32 %v6754_v52, %v6753_v16  ;;  %6330 = vst.msk [vmem:[#allocation2 + $0xd0] sm:$0xff] %vm666_vm0, %v6329_v11  ;;  %v6331_v21 = vmul.f32 %v13072_v38, %v6329_v11  ;;  %v12387_v45 = vsel %vm3872_vm7, %v7143_v1, %v7142_v17  ;;  %v13080_v16 = vld [vmem:[#allocation40_spill] sm:$0xff]  ;;  %v6360_v38 = vld [vmem:[#allocation2 + $0x70] sm:$0xff] }
0x1177   : > { %v13073_v24 = vrot.slane %v11822_v9, 4  ;;  %v6762_v27 = vadd.f32 %v6761_v8, %v6760_v35  ;;  %v7131_v20 = vrot.slane %v12278_v7, 5  ;;  %v6675_v4 = vadd.f32 %v6674_v6, %v6673_v48  ;;  %v6362_v36 = vld [vmem:[#allocation2 + $0x80] sm:$0xff]  ;;  %v13081_v8 = vld [vmem:[#allocation13_spill] sm:$0xff] }
0x1178   : > { %v6756_v10 = vrot.slane %v6755_v34, 2  ;;  %v6725_v22 = vsel %vm666_vm0, %v6615_v51, 0.0  ;;  %v6332_v23 = vadd.f32 %v6331_v21, %v13074_v41  ;;  %v13075_v49 = vrot.slane %v13066_v26, 4  ;;  %v6566_v21 = vpop.permute.xlu0 %6565 }
0x1179   : > { %v6942_v39 = vadd.f32 %v13073_v24, %v6724_v57  ;;  %v6763_v19 = vrot.slane %v6762_v27, 2  ;;  %v6726_v55 = vrot.slane %v6725_v22, 4  ;;  %v13076_v0 = vrot.slane %v11827_v62, 5  ;;  %v6371_v1 = vld [vmem:[#allocation2 + $0xc8] sm:$0xff]  ;;  %v6517_v57 = vpop.permute.xlu1 %6516 }
0x117a   : > { %v6681_v47 = vrot.slane %v6680_v15, 1  ;;  %v6757_v40 = vadd.f32 %v6756_v10, %v6755_v34  ;;  %v6609_v63 = vmul.f32 %v6433_v46, %v6353_v25  ;;  %v7133_v59 = vrot.slane %v12297_v2, 4  ;;  %6333 = vst.msk [vmem:[#allocation2 + $0xd8] sm:$0xff] %vm666_vm0, %v6332_v23  ;;  %v13082_v24 = vld [vmem:[#allocation37_spill] sm:$0xff] }
0x117b   : > { %v12396_v14 = vmul.f32 %v13075_v49, %v6942_v39  ;;  %v6935_v54 = vadd.f32 %v13076_v0, %v6675_v4  ;;  %v6334_v33 = vmul.f32 %v13077_v60, %v6332_v23  ;;  %v6764_v12 = vadd.f32 %v6763_v19, %v6762_v27 }
0x117c   : > { %v6727_v13 = vadd.f32 %v6726_v55, %v6725_v22  ;;  %v13078_v32 = vrot.slane %v11780_v43, 5  ;;  %v6758_v37 = vrot.slane %v6757_v40, 1  ;;  %v6683_v28 = vsel %vm666_vm0, %v6609_v63, 0.0  ;;  %v13086_v55 = vld [vmem:[#allocation36_spill] sm:$0xff] }
0x117d   : > { %v12409_v42 = vmul.f32 %v13079_v29, %v6357_v61  ;;  %v6335_v35 = vadd.f32 %v6334_v33, %v13080_v16  ;;  %v6765_v46 = vrot.slane %v6764_v12, 1  ;;  %v6684_v48 = vrot.slane %v6683_v28, 4  ;;  %v13090_v29 = vld [vmem:[#allocation26_spill] sm:$0xff] }
0x117e   : > { %v12405_v53 = vmul.f32 %v13078_v32, %v6935_v54  ;;  %v6728_v31 = vrot.slane %v6727_v13, 2  ;;  %v6682_v52 = vadd.f32 %v6681_v47, %v6680_v15  ;;  %v6759_v18 = vadd.f32 %v6758_v37, %v6757_v40  ;;  %v13088_v47 = vld [vmem:[#allocation15_spill] sm:$0xff] }
0x117f   : > { %v6627_v58 = vmul.f32 %v6559_v30, %v6371_v1  ;;  %v6618_v11 = vmul.f32 %v6496_v56, %v6362_v36  ;;  %6336 = vst.msk [vmem:[#allocation2 + $0xe0] sm:$0xff] %vm666_vm0, %v6335_v35  ;;  %v6337_v51 = vmul.f32 %v13081_v8, %v6335_v35  ;;  %v6766_v17 = vadd.f32 %v6765_v46, %v6764_v12  ;;  %v13084_v30 = vld [vmem:[#allocation30_spill] sm:$0xff] }
0x1180   : > { %v6729_v6 = vadd.f32 %v6728_v31, %v6727_v13  ;;  %v6685_v34 = vadd.f32 %v6684_v48, %v6683_v28  ;;  %v13083_v39 = vrot.slane %v13082_v24, 1  ;;  %v6616_v10 = vmul.f32 %v6482_v5, %v6360_v38  ;;  %v6372_v12 = vld [vmem:[#allocation2 + $0xd0] sm:$0xff]  ;;  %v6489_v28 = vpop.permute.xlu1 %6488 }
0x1181   : > { %v6809_v4 = vsel %vm666_vm0, %v6627_v58, 0.0  ;;  %v6746_v15 = vsel %vm666_vm0, %v6618_v11, 0.0  ;;  %v6338_v22 = vadd.f32 %v6337_v51, %v13084_v30  ;;  %v13085_v41 = vrot.slane %v13082_v24, 2 }
0x1182   : > { %v6947_v27 = vadd.f32 %v13083_v39, %v6759_v18  ;;  %v6730_v49 = vrot.slane %v6729_v6, 1  ;;  %v6686_v19 = vrot.slane %v6685_v34, 2  ;;  %v13087_v25 = vrot.slane %v13086_v55, 1  ;;  %v6524_v18 = vpop.permute.xlu0 %6523 }
0x1183   : > { %v6948_v23 = vadd.f32 %v13085_v41, %v6766_v17  ;;  %v6810_v61 = vrot.slane %v6809_v4, 4  ;;  %v6747_v0 = vrot.slane %v6746_v15, 4  ;;  %v6732_v54 = vsel %vm666_vm0, %v6616_v10, 0.0  ;;  %6339 = vst.msk [vmem:[#allocation2 + $0xe8] sm:$0xff] %vm666_vm0, %v6338_v22  ;;  %v6365_v17 = vld [vmem:[#allocation2 + $0x98] sm:$0xff] }
0x1184   : > { %v12423_v56 = vmul.f32 %v13087_v25, %v6947_v27  ;;  %v6340_v40 = vmul.f32 %v13088_v47, %v6338_v22  ;;  %v13089_v5 = vrot.slane %v13086_v55, 2  ;;  %v6731_v60 = vadd.f32 %v6730_v49, %v6729_v6  ;;  %v13093_v6 = vld [vmem:[#allocation16_spill] sm:$0xff]  ;;  %v6373_v49 = vld [vmem:[#allocation2 + $0xd8] sm:$0xff] }
0x1185   : > { %v6687_v33 = vadd.f32 %v6686_v19, %v6685_v34  ;;  %v7129_v13 = vrot.slane %v12345_v3, 6  ;;  %v6811_v1 = vadd.f32 %v6810_v61, %v6809_v4  ;;  %v6748_v32 = vadd.f32 %v6747_v0, %v6746_v15  ;;  %v6361_v47 = vld [vmem:[#allocation2 + $0x78] sm:$0xff] }
0x1186   : > { %v12430_v63 = vmul.f32 %v13089_v5, %v6948_v23  ;;  %v6733_v37 = vrot.slane %v6732_v54, 4  ;;  %v6341_v16 = vadd.f32 %v6340_v40, %v13090_v29  ;;  %v13091_v35 = vrot.slane %v11827_v62, 6 }
0x1187   : > { %v13092_v31 = vrot.slane %v11822_v9, 5  ;;  %v6688_v36 = vrot.slane %v6687_v33, 1  ;;  %v6812_v58 = vrot.slane %v6811_v1, 2  ;;  %v6749_v11 = vrot.slane %v6748_v32, 2 }
0x1188   : > { %v12436_v46 = vadd.f32 %v13091_v35, %v6682_v52  ;;  %v6734_v8 = vadd.f32 %v6733_v37, %v6732_v54  ;;  %v6628_v51 = vmul.f32 %v6566_v21, %v6372_v12  ;;  %v6343_v34 = vmul.f32 %v13093_v6, %v6341_v16  ;;  %6342 = vst.msk [vmem:[#allocation2 + $0xf0] sm:$0xff] %vm666_vm0, %v6341_v16  ;;  %v6366_v54 = vld [vmem:[#allocation2 + $0xa0] sm:$0xff]  ;;  %v13097_v6 = vld [vmem:[#allocation29_spill] sm:$0xff] }
0x1189   : > { %v6943_v48 = vadd.f32 %v13092_v31, %v6731_v60  ;;  %v7135_v38 = vrot.slane %v12405_v53, 3  ;;  %v13094_v39 = vrot.slane %v13066_v26, 5  ;;  %v6621_v27 = vmul.f32 %v6517_v57, %v6365_v17  ;;  %v6552_v57 = vpop.permute.xlu1 %6551  ;;  %v13095_v31 = vld [vmem:[#allocation25_spill] sm:$0xff] }
0x118a   : > { %v6813_v4 = vadd.f32 %v6812_v58, %v6811_v1  ;;  %v6750_v15 = vadd.f32 %v6749_v11, %v6748_v32  ;;  %v6735_v10 = vrot.slane %v6734_v8, 2  ;;  %v6816_v30 = vsel %vm666_vm0, %v6628_v51, 0.0 }
0x118b   : > { %v12445_v52 = vmul.f32 %v13094_v39, %v6943_v48  ;;  %v6344_v22 = vadd.f32 %v6343_v34, %v12350_v44  ;;  %v7155_v21 = vrot.slane %v12423_v56, 7  ;;  %v6689_v41 = vadd.f32 %v6688_v36, %v6687_v33  ;;  %v6573_v44 = vpop.permute.xlu0 %6572 }
0x118c   : > { %v6817_v23 = vrot.slane %v6816_v30, 4  ;;  %v6814_v19 = vrot.slane %v6813_v4, 1  ;;  %v6751_v25 = vrot.slane %v6750_v15, 1  ;;  %v6736_v61 = vadd.f32 %v6735_v10, %v6734_v8 }
0x118d   : > { %v6767_v0 = vsel %vm666_vm0, %v6621_v27, 0.0  ;;  %6345 = vst.msk [vmem:[#allocation2 + $0xf8] sm:$0xff] %vm666_vm0, %v6344_v22  ;;  %v6622_v60 = vmul.f32 %v6524_v18, %v6366_v54  ;;  %v6617_v12 = vmul.f32 %v6489_v28, %v6361_v47  ;;  %v6629_v32 = vmul.f32 %v6573_v44, %v6373_v49 }
0x118e   : > { %v6818_v40 = vadd.f32 %v6817_v23, %v6816_v30  ;;  %v6768_v5 = vrot.slane %v6767_v0, 4  ;;  %v6815_v1 = vadd.f32 %v6814_v19, %v6813_v4  ;;  %v6752_v56 = vadd.f32 %v6751_v25, %v6750_v15  ;;  %v12465_v30 = vpop.permute.xlu1 %6530  ;;  %v6374_v25 = vld [vmem:[#allocation2 + $0xe0] sm:$0xff] }
0x118f   : > { %v6737_v33 = vrot.slane %v6736_v61, 1  ;;  %v6774_v16 = vsel %vm666_vm0, %v6622_v60, 0.0  ;;  %v6739_v35 = vsel %vm666_vm0, %v6617_v12, 0.0  ;;  %v13096_v48 = vrot.slane %v13095_v31, 1 }
0x1190   : > { %v6819_v37 = vrot.slane %v6818_v40, 2  ;;  %v6769_v29 = vadd.f32 %v6768_v5, %v6767_v0  ;;  %v6946_v58 = vadd.f32 %v13082_v24, %v6752_v56  ;;  %v6775_v8 = vrot.slane %v6774_v16, 4  ;;  %v6580_v56 = vpop.permute.xlu0 %6579 }
0x1191   : > { %v6955_v36 = vadd.f32 %v13096_v48, %v6815_v1  ;;  %v6738_v11 = vadd.f32 %v6737_v33, %v6736_v61  ;;  %v6740_v51 = vrot.slane %v6739_v35, 4  ;;  %v6823_v17 = vsel %vm666_vm0, %v6629_v32, 0.0  ;;  %v6370_v1 = vld [vmem:[#allocation2 + $0xc0] sm:$0xff] }
0x1192   : > { %v6820_v18 = vadd.f32 %v6819_v37, %v6818_v40  ;;  %v6770_v28 = vrot.slane %v6769_v29, 2  ;;  %v13098_v34 = vrot.slane %v13097_v6, 1  ;;  %v7070_v27 = vmul.f32 %v13086_v55, %v6946_v58 }
0x1193   : > { %v13099_v4 = vrot.slane %v11822_v9, 6  ;;  %v6776_v10 = vadd.f32 %v6775_v8, %v6774_v16  ;;  %v6741_v49 = vadd.f32 %v6740_v51, %v6739_v35  ;;  %v6824_v19 = vrot.slane %v6823_v17, 4 }
0x1194   : > { %v12460_v39 = vmul.f32 %v13098_v34, %v6955_v36  ;;  %v6821_v22 = vrot.slane %v6820_v18, 1  ;;  %v6771_v23 = vadd.f32 %v6770_v28, %v6769_v29  ;;  %v7157_v61 = vrot.slane %v12430_v63, 6 }
0x1195   : > { %v6944_v15 = vadd.f32 %v13099_v4, %v6738_v11  ;;  %v12469_v0 = vsel %vm3869_vm6, %v7155_v21, %v7070_v27  ;;  %v13100_v54 = vrot.slane %v13066_v26, 6  ;;  %v6777_v40 = vrot.slane %v6776_v10, 2 }
0x1196   : > { %v6822_v5 = vadd.f32 %v6821_v22, %v6820_v18  ;;  %v6772_v60 = vrot.slane %v6771_v23, 1  ;;  %v6742_v12 = vrot.slane %v6741_v49, 2  ;;  %v6825_v44 = vadd.f32 %v6824_v19, %v6823_v17 }
0x1197   : > { %v12473_v47 = vmul.f32 %v13100_v54, %v6944_v15  ;;  %v13101_v33 = vrot.slane %v11827_v62, 7  ;;  %v6778_v37 = vadd.f32 %v6777_v40, %v6776_v10  ;;  %v6626_v29 = vmul.f32 %v6552_v57, %v6370_v1  ;;  %v6538_v62 = vpop.permute.xlu1 %6537 }
0x1198   : > { %v6630_v16 = vmul.f32 %v6580_v56, %v6374_v25  ;;  %v13102_v21 = vrot.slane %v13095_v31, 2  ;;  %v6773_v48 = vadd.f32 %v6772_v60, %v6771_v23  ;;  %v6743_v36 = vadd.f32 %v6742_v12, %v6741_v49 }
0x1199   : > { %v6937_v32 = vadd.f32 %v13101_v33, %v6689_v41  ;;  %v6826_v58 = vrot.slane %v6825_v44, 2  ;;  %v6779_v11 = vrot.slane %v6778_v37, 1  ;;  %v6802_v8 = vsel %vm666_vm0, %v6626_v29, 0.0 }
0x119a   : > { %v6956_v35 = vadd.f32 %v13102_v21, %v6822_v5  ;;  %v6830_v18 = vsel %vm666_vm0, %v6630_v16, 0.0  ;;  %v13103_v28 = vrot.slane %v11780_v43, 6  ;;  %v13104_v41 = vrot.slane %v13097_v6, 2 }
0x119b   : > { %v13105_v17 = vrot.slane %v13082_v24, 3  ;;  %v6744_v27 = vrot.slane %v6743_v36, 1  ;;  %v6827_v4 = vadd.f32 %v6826_v58, %v6825_v44  ;;  %v6780_v15 = vadd.f32 %v6779_v11, %v6778_v37 }
0x119c   : > { %v7060_v51 = vmul.f32 %v13103_v28, %v12436_v46  ;;  %v12486_v57 = vmul.f32 %v13104_v41, %v6956_v35  ;;  %v6803_v10 = vrot.slane %v6802_v8, 4  ;;  %v6831_v22 = vrot.slane %v6830_v18, 4 }
0x119d   : > { %v6949_v34 = vadd.f32 %v13105_v17, %v6773_v48  ;;  %v13106_v23 = vrot.slane %v11780_v43, 7  ;;  %v7169_v19 = vrot.slane %v12460_v39, 7  ;;  %v13107_v46 = vrot.slane %v13086_v55, 3  ;;  %v6587_v43 = vpop.permute.xlu0 %6586  ;;  %v6376_v17 = vld [vmem:[#allocation2 + $0xf0] sm:$0xff] }
0x119e   : > { %v6745_v54 = vadd.f32 %v6744_v27, %v6743_v36  ;;  %v6828_v40 = vrot.slane %v6827_v4, 1  ;;  %v13108_v5 = vrot.slane %v13082_v24, 4  ;;  %v6804_v12 = vadd.f32 %v6803_v10, %v6802_v8  ;;  %v6375_v8 = vld [vmem:[#allocation2 + $0xe8] sm:$0xff] }
0x119f   : > { %v7061_v49 = vmul.f32 %v13106_v23, %v6937_v32  ;;  %v12495_v25 = vmul.f32 %v13107_v46, %v6949_v34  ;;  %v6832_v1 = vadd.f32 %v6831_v22, %v6830_v18  ;;  %v7130_v44 = vsel %vm3872_vm7, %v7129_v13, %v12366_v50  ;;  %v6545_v50 = vpop.permute.xlu1 %6544  ;;  %v6368_v23 = vld [vmem:[#allocation2 + $0xb0] sm:$0xff] }
0x11a0   : > { %v6950_v60 = vadd.f32 %v13108_v5, %v6780_v15  ;;  %v7171_v56 = vrot.slane %v12486_v57, 6  ;;  %v13109_v33 = vrot.slane %v11822_v9, 7  ;;  %v6829_v37 = vadd.f32 %v6828_v40, %v6827_v4 }
0x11a1   : > { %v7132_v29 = vsel %vm3875_vm8, %v7131_v20, %v7130_v44  ;;  %v13110_v16 = vrot.slane %v13086_v55, 4  ;;  %v6805_v35 = vrot.slane %v6804_v12, 2  ;;  %v6833_v48 = vrot.slane %v6832_v1, 2  ;;  %v6594_v46 = vpop.permute.xlu0 %6593  ;;  %v6369_v44 = vld [vmem:[#allocation2 + $0xb8] sm:$0xff] }
0x11a2   : > { %v6945_v32 = vadd.f32 %v13109_v33, %v6745_v54  ;;  %v7134_v3 = vsel %vm3878_vm9, %v7133_v59, %v7132_v29  ;;  %v13111_v13 = vrot.slane %v13066_v26, 7  ;;  %v13112_v58 = vrot.slane %v13095_v31, 3  ;;  %v6367_v59 = vld [vmem:[#allocation2 + $0xa8] sm:$0xff] }
0x11a3   : > { %v12511_v21 = vmul.f32 %v13110_v16, %v6950_v60  ;;  %v7136_v20 = vsel %vm3881_vm10, %v7135_v38, %v7134_v3  ;;  %v7137_v11 = vrot.slane %v7060_v51, 2  ;;  %v7159_v18 = vrot.slane %v12495_v25, 5  ;;  %v6601_v33 = vpop.permute.xlu1 %6600 }
0x11a4   : > { %v12518_v36 = vmul.f32 %v13111_v13, %v6945_v32  ;;  %v6957_v7 = vadd.f32 %v13112_v58, %v6829_v37  ;;  %v6806_v28 = vadd.f32 %v6805_v35, %v6804_v12  ;;  %v6834_v2 = vadd.f32 %v6833_v48, %v6832_v1  ;;  %v6377_v32 = vld [vmem:[#allocation2 + $0xf8] sm:$0xff] }
0x11a5   : > { %v7139_v41 = vrot.slane %v7061_v49, 1  ;;  %v7161_v34 = vrot.slane %v12511_v21, 4  ;;  %v13113_v27 = vrot.slane %v13097_v6, 3  ;;  %v7138_v15 = vsel %vm3884_vm11, %v7137_v11, %v7136_v20 }
0x11a6   : > { %v6623_v53 = vmul.f32 %v12465_v30, %v6367_v59  ;;  %v6807_v38 = vrot.slane %v6806_v28, 1  ;;  %v6835_v51 = vrot.slane %v6834_v2, 1  ;;  %v6631_v22 = vmul.f32 %v6587_v43, %v6375_v8 }
0x11a7   : > { %v12529_v4 = vmul.f32 %v13113_v27, %v6957_v7  ;;  %v7140_v10 = vsel %vm3887_vm12, %v7139_v41, %v7138_v15  ;;  %v6624_v40 = vmul.f32 %v6538_v62, %v6368_v23  ;;  %v6632_v5 = vmul.f32 %v6594_v46, %v6376_v17 }
0x11a8   : > { %8572 = vmatprep.mubr.msk.f32.mxu0 %vm666_vm0, %v7140_v10  ;;  %v6781_v54 = vsel %vm666_vm0, %v6623_v53, 0.0  ;;  %v6808_v60 = vadd.f32 %v6807_v38, %v6806_v28  ;;  %v6836_v12 = vadd.f32 %v6835_v51, %v6834_v2  ;;  %v6837_v30 = vsel %vm666_vm0, %v6631_v22, 0.0 }
0x11a9   : > { %v7173_v49 = vrot.slane %v12529_v4, 5  ;;  %v6782_v1 = vrot.slane %v6781_v54, 4  ;;  %v6838_v37 = vrot.slane %v6837_v30, 4  ;;  %v6788_v43 = vsel %vm666_vm0, %v6624_v40, 0.0 }
0x11aa   : > { %v6844_v29 = vsel %vm666_vm0, %v6632_v5, 0.0  ;;  %v6625_v16 = vmul.f32 %v6545_v50, %v6369_v44  ;;  %v6954_v35 = vadd.f32 %v13095_v31, %v6808_v60  ;;  %v13114_v48 = vrot.slane %v13095_v31, 4 }
0x11ab   : > { %v6783_v3 = vadd.f32 %v6782_v1, %v6781_v54  ;;  %v6789_v13 = vrot.slane %v6788_v43, 4  ;;  %v6839_v58 = vadd.f32 %v6838_v37, %v6837_v30  ;;  %v6845_v7 = vrot.slane %v6844_v29, 4 }
0x11ac   : > { %v6958_v62 = vadd.f32 %v13114_v48, %v6836_v12  ;;  %v6795_v20 = vsel %vm666_vm0, %v6625_v16, 0.0  ;;  %v6633_v11 = vmul.f32 %v6601_v33, %v6377_v32  ;;  %v7078_v8 = vmul.f32 %v13097_v6, %v6954_v35 }
0x11ad   : > { %v13115_v28 = vrot.slane %v13097_v6, 4  ;;  %v6784_v41 = vrot.slane %v6783_v3, 2  ;;  %v6790_v59 = vadd.f32 %v6789_v13, %v6788_v43  ;;  %v6840_v50 = vrot.slane %v6839_v58, 2 }
0x11ae   : > { %v6846_v17 = vadd.f32 %v6845_v7, %v6844_v29  ;;  %v6796_v27 = vrot.slane %v6795_v20, 4  ;;  %v6851_v15 = vsel %vm666_vm0, %v6633_v11, 0.0  ;;  %v7170_v53 = vsel %vm3869_vm6, %v7169_v19, %v7078_v8 }
0x11af   : > { %v7082_v2 = vmul.f32 %v13115_v28, %v6958_v62  ;;  %v6785_v51 = vadd.f32 %v6784_v41, %v6783_v3  ;;  %v6791_v10 = vrot.slane %v6790_v59, 2  ;;  %v6841_v22 = vadd.f32 %v6840_v50, %v6839_v58 }
0x11b0   : > { %v6847_v23 = vrot.slane %v6846_v17, 2  ;;  %v6797_v46 = vadd.f32 %v6796_v27, %v6795_v20  ;;  %v6852_v54 = vrot.slane %v6851_v15, 4  ;;  %v6711_v60 = vsel %vm666_vm0, %v12409_v42, 0.0 }
0x11b1   : > { %v7175_v38 = vrot.slane %v7082_v2, 4  ;;  %v6786_v40 = vrot.slane %v6785_v51, 1  ;;  %v6792_v5 = vadd.f32 %v6791_v10, %v6790_v59  ;;  %v7158_v12 = vsel %vm3872_vm7, %v7157_v61, %v12469_v0 }
0x11b2   : > { %v6842_v39 = vrot.slane %v6841_v22, 1  ;;  %v6848_v1 = vadd.f32 %v6847_v23, %v6846_v17  ;;  %v6798_v19 = vrot.slane %v6797_v46, 2  ;;  %v6853_v30 = vadd.f32 %v6852_v54, %v6851_v15 }
0x11b3   : > { %v6787_v44 = vadd.f32 %v6786_v40, %v6785_v51  ;;  %v6793_v33 = vrot.slane %v6792_v5, 1  ;;  %v6712_v32 = vrot.slane %v6711_v60, 4  ;;  %v7160_v37 = vsel %vm3875_vm8, %v7159_v18, %v7158_v12 }
0x11b4   : > { %v6843_v43 = vadd.f32 %v6842_v39, %v6841_v22  ;;  %v6849_v29 = vrot.slane %v6848_v1, 1  ;;  %v6799_v16 = vadd.f32 %v6798_v19, %v6797_v46  ;;  %v6854_v42 = vrot.slane %v6853_v30, 2 }
0x11b5   : > { %v13116_v35 = vrot.slane %v13082_v24, 5  ;;  %v6794_v48 = vadd.f32 %v6793_v33, %v6792_v5  ;;  %v6713_v61 = vadd.f32 %v6712_v32, %v6711_v60  ;;  %v7162_v0 = vsel %vm3878_vm9, %v7161_v34, %v7160_v37 }
0x11b6   : > { %v13117_v62 = vrot.slane %v13095_v31, 5  ;;  %v6850_v13 = vadd.f32 %v6849_v29, %v6848_v1  ;;  %v6800_v25 = vrot.slane %v6799_v16, 1  ;;  %v6855_v58 = vadd.f32 %v6854_v42, %v6853_v30 }
0x11b7   : > { %v6951_v63 = vadd.f32 %v13116_v35, %v6787_v44  ;;  %v13118_v18 = vrot.slane %v13086_v55, 5  ;;  %v13119_v20 = vrot.slane %v13082_v24, 6  ;;  %v6714_v8 = vrot.slane %v6713_v61, 2 }
0x11b8   : > { %v6959_v3 = vadd.f32 %v13117_v62, %v6843_v43  ;;  %v7172_v28 = vsel %vm3872_vm7, %v7171_v56, %v7170_v53  ;;  %v13120_v21 = vrot.slane %v13097_v6, 5  ;;  %v13121_v2 = vrot.slane %v13095_v31, 6 }
0x11b9   : > { %v7075_v7 = vmul.f32 %v13118_v18, %v6951_v63  ;;  %v6952_v11 = vadd.f32 %v13119_v20, %v6794_v48  ;;  %v6801_v59 = vadd.f32 %v6800_v25, %v6799_v16  ;;  %v6856_v50 = vrot.slane %v6855_v58, 1  ;;  %v13130_v20 = vld [vmem:[#allocation28_spill] sm:$0xff] }
0x11ba   : > { %v7083_v34 = vmul.f32 %v13120_v21, %v6959_v3  ;;  %v6960_v41 = vadd.f32 %v13121_v2, %v6850_v13  ;;  %v6715_v27 = vadd.f32 %v6714_v8, %v6713_v61  ;;  %v13122_v15 = vrot.slane %v13086_v55, 6  ;;  %v13131_v8 = vld [vmem:[#allocation33_spill] sm:$0xff] }
0x11bb   : > { %v7163_v17 = vrot.slane %v7075_v7, 3  ;;  %v7174_v10 = vsel %vm3875_vm8, %v7173_v49, %v7172_v28  ;;  %v13123_v56 = vrot.slane %v13082_v24, 7  ;;  %v6857_v22 = vadd.f32 %v6856_v50, %v6855_v58 }
0x11bc   : > { %v7076_v51 = vmul.f32 %v13122_v15, %v6952_v11  ;;  %v7177_v57 = vrot.slane %v7083_v34, 3  ;;  %v13124_v23 = vrot.slane %v13097_v6, 6  ;;  %v6716_v54 = vrot.slane %v6715_v27, 1 }
0x11bd   : > { %v6953_v53 = vadd.f32 %v13123_v56, %v6801_v59  ;;  %v7164_v40 = vsel %vm3881_vm10, %v7163_v17, %v7162_v0  ;;  %v7176_v60 = vsel %vm3878_vm9, %v7175_v38, %v7174_v10  ;;  %v13125_v12 = vrot.slane %v13095_v31, 7 }
0x11be   : > { %v7084_v46 = vmul.f32 %v13124_v23, %v6960_v41  ;;  %v7165_v5 = vrot.slane %v7076_v51, 2  ;;  %v13126_v4 = vrot.slane %v13086_v55, 7  ;;  %v7178_v1 = vsel %vm3881_vm10, %v7177_v57, %v7176_v60 }
0x11bf   : > { %v6961_v39 = vadd.f32 %v13125_v12, %v6857_v22  ;;  %v6717_v19 = vadd.f32 %v6716_v54, %v6715_v27  ;;  %v6879_v30 = vrot.slane %v11822_v9, 3  ;;  %v13127_v32 = vrot.slane %v13097_v6, 7 }
0x11c0   : > { %v7077_v49 = vmul.f32 %v13126_v4, %v6953_v53  ;;  %v7179_v24 = vrot.slane %v7084_v46, 2  ;;  %v7166_v44 = vsel %vm3884_vm11, %v7165_v5, %v7164_v40  ;;  %v7003_v31 = vrot.slane %v13066_v26, 3 }
0x11c1   : > { %v7085_v37 = vmul.f32 %v13127_v32, %v6961_v39  ;;  %v6941_v43 = vadd.f32 %v6879_v30, %v6717_v19  ;;  %v7147_v42 = vrot.slane %v12396_v14, 4  ;;  %v7149_v9 = vrot.slane %v12445_v52, 3 }
0x11c2   : > { %v7167_v33 = vrot.slane %v7077_v49, 1  ;;  %v7180_v38 = vsel %vm3884_vm11, %v7179_v24, %v7178_v1  ;;  %v7151_v48 = vrot.slane %v12473_v47, 2  ;;  %v7153_v6 = vrot.slane %v12518_v36, 1  ;;  %v13128_v47 = vld [vmem:[#allocation32_spill] sm:$0xff] }
0x11c3   : > { %v7181_v29 = vrot.slane %v7085_v37, 1  ;;  %v7065_v16 = vmul.f32 %v7003_v31, %v6941_v43 }
0x11c4   : > { %v7168_v55 = vsel %vm3887_vm12, %v7167_v33, %v7166_v44 }
0x11c5   : > { %v7182_v35 = vsel %vm3887_vm12, %v7181_v29, %v7180_v38  ;;  %v7145_v63 = vrot.slane %v7065_v16, 5 }
0x11c7   : > { %v7146_v61 = vsel %vm3875_vm8, %v7145_v63, %v12387_v45  ;;  %v13129_v45 = vld [vmem:[#allocation41_spill] sm:$0xff] }
0x11c8   : > { %v7148_v26 = vsel %vm3878_vm9, %v7147_v42, %v7146_v61  ;;  %v9249_v61 = vld [vmem:[%s12808_s15 + $0x10] sm:$0xff] }
0x11c9   : > { %v7150_v0 = vsel %vm3881_vm10, %v7149_v9, %v7148_v26  ;;  %v9250_v26 = vld [vmem:[%s12808_s15 + $0x18] sm:$0xff] }
0x11ca   : > { %v7152_v62 = vsel %vm3884_vm11, %v7151_v48, %v7150_v0  ;;  %v9251_v0 = vld [vmem:[%s12808_s15 + $0x20] sm:$0xff] }
0x11cb   : > { %v7154_v14 = vsel %vm3887_vm12, %v7153_v6, %v7152_v62  ;;  %v9248_v6 = vld [vmem:[%s12808_s15 + $0x8] sm:$0xff] }
0x11cc   : > { %8573 = vmatmul.mubr.msk.f32.vlgmr.msra.gmra.mrb[32].mxu0 %vm666_vm0, %v7154_v14  ;;  %v9252_v62 = vld [vmem:[%s12808_s15 + $0x28] sm:$0xff]  ;;  %v9253_v14 = vld [vmem:[%s12808_s15 + $0x30] sm:$0xff] }
0x11cd   : > { %8575 = vmatprep.mubr.msk.f32.mxu0 %vm666_vm0, %v7168_v55 }
0x11d0   : > { %8576 = vmatmul.mubr.msk.f32.gmra.mrb[34].mxu0 %vm666_vm0, %v7182_v35 }
0x129f   : > { %v8574_v52 = vpop.f32.mrb[32].mxu0 }
0x12a0   : > { %v12616_v36 = vadd.f32 %v8574_v52, %v13128_v47  ;;  %v7257_v3 = vpop.f32.mrb[33].mxu0  ;;  %v9254_v52 = vld [vmem:[%s12808_s15 + $0x38] sm:$0xff]  ;;  %v9255_v47 = vld [vmem:[%s12809_s16] sm:$0xff] }
0x12a1   : > { %v12619_v13 = vadd.f32 %v7257_v3, %v13129_v45 }
0x12a2   : > { %v7283_v25 = vsel %vm906_vm1, %v12616_v36, 0.0 }
0x12a3   : > { %7284 = vadd.xlane.f32.xlu1 %v7283_v25  ;;  %v7280_v58 = vsel %vm906_vm1, %v12619_v13, 0.0  ;;  %v8577_v18 = vpop.f32.mrb[34].mxu0 }
0x12a4   : > { %7281 = vadd.xlane.f32.xlu0 %v7280_v58  ;;  %v7267_v7 = vpop.f32.mrb[35].mxu0  ;;  %v12629_v28 = vadd.f32 %v8577_v18, %v13131_v8  ;;  %v7993_v18 = vld [vmem:[%s12806_s13 + $0x48] sm:$0xff]  ;;  %v7996_v8 = vld [vmem:[%s12806_s13 + $0x60] sm:$0xff] }
0x12a5   : > { %v12626_v11 = vadd.f32 %v7267_v7, %v13130_v20  ;;  %v7997_v7 = vld [vmem:[%s12806_s13 + $0x68] sm:$0xff]  ;;  %v7992_v20 = vld [vmem:[%s12806_s13 + $0x40] sm:$0xff] }
0x12a6   : > { %v7289_v34 = vsel %vm906_vm1, %v12629_v28, 0.0 }
0x12a7   : > { %v7286_v21 = vsel %vm906_vm1, %v12626_v11, 0.0 }
0x12a8   : > { %7287 = vadd.xlane.f32.xlu0 %v7286_v21 }
0x12ac   : > { %7290 = vadd.xlane.f32.xlu0 %v7289_v34 }
0x1330   : > { %v7285_v2 = vpop.xlane.xlu1 %7284 }
0x1331   : > { %v7293_v41 = vmul.f32 0.03125, %v7285_v2  ;;  %v7282_v59 = vpop.xlane.xlu0 %7281 }
0x1332   : > { %v7292_v50 = vmul.f32 0.03125, %v7282_v59  ;;  %v7999_v59 = vld [vmem:[%s12806_s13 + $0x78] sm:$0xff] }
0x1333   : > { %v7297_v17 = vsub.f32 %v12616_v36, %v7293_v41  ;;  %v7995_v41 = vld [vmem:[%s12806_s13 + $0x58] sm:$0xff] }
0x1334   : > { %v7296_v27 = vsub.f32 %v12619_v13, %v7292_v50 }
0x1335   : > { %v7301_v15 = vmul.f32 %v7297_v17, %v7297_v17  ;;  %v7288_v51 = vpop.xlane.xlu0 %7287 }
0x1336   : > { %v7300_v10 = vmul.f32 %v7296_v27, %v7296_v27  ;;  %v7294_v57 = vmul.f32 0.03125, %v7288_v51 }
0x1337   : > { %v7307_v56 = vsel %vm906_vm1, %v7301_v15, 0.0 }
0x1338   : > { %7308 = vadd.xlane.f32.xlu1 %v7307_v56  ;;  %v7304_v53 = vsel %vm906_vm1, %v7300_v10, 0.0  ;;  %v7298_v22 = vsub.f32 %v12626_v11, %v7294_v57  ;;  %v7994_v10 = vld [vmem:[%s12806_s13 + $0x50] sm:$0xff] }
0x1339   : > { %7305 = vadd.xlane.f32.xlu0 %v7304_v53  ;;  %v7291_v23 = vpop.xlane.xlu0 %7290  ;;  %v7998_v57 = vld [vmem:[%s12806_s13 + $0x70] sm:$0xff] }
0x133a   : > { %v7295_v46 = vmul.f32 0.03125, %v7291_v23  ;;  %v7302_v54 = vmul.f32 %v7298_v22, %v7298_v22 }
0x133c   : > { %v7299_v40 = vsub.f32 %v12629_v28, %v7295_v46  ;;  %v7310_v5 = vsel %vm906_vm1, %v7302_v54, 0.0 }
0x133d   : > { %7311 = vadd.xlane.f32.xlu0 %v7310_v5 }
0x133e   : > { %v7303_v60 = vmul.f32 %v7299_v40, %v7299_v40 }
0x1340   : > { %v7313_v12 = vsel %vm906_vm1, %v7303_v60, 0.0 }
0x1341   : > { %7314 = vadd.xlane.f32.xlu1 %v7313_v12 }
0x13c5   : > { %v7309_v39 = vpop.xlane.xlu1 %7308 }
0x13c6   : > { %v7317_v4 = vmul.f32 0.03125, %v7309_v39  ;;  %v7306_v49 = vpop.xlane.xlu0 %7305 }
0x13c7   : > { %v7316_v1 = vmul.f32 0.03125, %v7306_v49 }
0x13c8   : > { %v7321_v24 = vadd.f32 1e-05, %v7317_v4 }
0x13c9   : > { %v7320_v19 = vadd.f32 1e-05, %v7316_v1 }
0x13ca   : > { %9221 = vrsqrt.f32 %v7321_v24  ;;  %v7312_v30 = vpop.xlane.xlu0 %7311 }
0x13cb   : > { %9223 = vrsqrt.f32 %v7320_v19  ;;  %v7318_v44 = vmul.f32 0.03125, %v7312_v30 }
0x13cd   : > { %v7322_v33 = vadd.f32 1e-05, %v7318_v44 }
0x13ce   : > { %v7315_v32 = vpop.xlane.xlu1 %7314 }
0x13cf   : > { %v7319_v37 = vmul.f32 0.03125, %v7315_v32  ;;  %9225 = vrsqrt.f32 %v7322_v33 }
0x13d1   : > { %v7323_v38 = vadd.f32 1e-05, %v7319_v37 }
0x13d3   : > { %9227 = vrsqrt.f32 %v7323_v38 }
0x13d4   : > { %v9222_v43 = vpop.eup %9221 }
0x13d5   : > { %v9224_v31 = vpop.eup %9223  ;;  %v7329_v55 = vmul.f32 %v9222_v43, %v7297_v17 }
0x13d6   : > { %v7328_v29 = vmul.f32 %v9224_v31, %v7296_v27 }
0x13d8   : > { %v8878_v16 = vpack.c.bf16 %v7329_v55, %v7328_v29  ;;  %v9256_v55 = vld [vmem:[%s12809_s16 + $0x8] sm:$0xff]  ;;  %v9257_v29 = vld [vmem:[%s12809_s16 + $0x10] sm:$0xff] }
0x13d9   : > { %v9226_v42 = vpop.eup %9225 }
0x13da   : > { %8879 = vmatprep.subr.bf16.mxu1 %v8878_v16  ;;  %v7330_v9 = vmul.f32 %v9226_v42, %v7298_v22  ;;  %v9326_v42 = vmov 0.0  }
0x13db   : > { %8881 = vmatpush3.bf16.msra.mxu1 %v8878_v16  ;;  %v9258_v16 = vld [vmem:[%s12809_s16 + $0x18] sm:$0xff]  ;;  %8628 = vmatprep.mubr.msk.f32.mxu0 %vm9325_vm3, %v9326_v42 }
0x13dd   : > { %v9228_v35 = vpop.eup %9227 }
0x13de   : > { %v7331_v63 = vmul.f32 %v9228_v35, %v7299_v40 }
0x13e0   : > { %v8882_v48 = vpack.c.bf16 %v7331_v63, %v7330_v9 }
0x13e2   : > { %8883 = vmatprep.subr.bf16.mxu1 %v8882_v48 }
0x13e3   : > { %8885 = vmatpush3.bf16.msra.mxu1 %v8882_v48 }
0x13e6   : > { %8587 = vmatmul.mubr.msk.f32.vlgmr.msra.gmra.mrb[64].mxu1 %vm906_vm1, %v9248_v6 }
0x13e7   : > { %8589 = vmatprep.mubr.msk.f32.mxu1 %vm906_vm1, %v9249_v61 }
0x13ea   : > { %8590 = vmatmul.mubr.msk.f32.gmra.mrb[66].mxu1 %vm906_vm1, %v9250_v26 }
0x13eb   : > { %8592 = vmatprep.mubr.msk.f32.mxu1 %vm906_vm1, %v9251_v0 }
0x13ee   : > { %8593 = vmatmul.mubr.msk.f32.gmra.mrb[68].mxu1 %vm906_vm1, %v9252_v62 }
0x13ef   : > { %8595 = vmatprep.mubr.msk.f32.mxu1 %vm906_vm1, %v9253_v14  ;;  %v13132_v14 = vmov 0.0|0.0  }
0x13f2   : > { %8596 = vmatmul.mubr.msk.f32.gmra.mrb[70].mxu1 %vm906_vm1, %v9254_v52 }
0x13f3   : > { %8614 = vmatprep.mubr.msk.f32.mxu1 %vm666_vm0, %v9255_v47  ;;  %v7559_v47 = vld [vmem:[%s12810_s17] sm:$0x3] }
0x14b9   : > { %v8588_v3 = vpop.f32.mrb[64].mxu1 }
0x14ba   : > { %v7398_v45 = vpop.f32.mrb[65].mxu1  ;;  %v7447_v34 = vmul.f32 %v8588_v3, %v7993_v18  ;;  %v7459_v2 = vmul.f32 %v8588_v3, %v7997_v7 }
0x14bb   : > { %v7446_v15 = vmul.f32 %v7992_v20, %v7398_v45  ;;  %v7458_v51 = vmul.f32 %v7996_v8, %v7398_v45 }
0x14bd   : > { %v8591_v25 = vpop.f32.mrb[66].mxu1 }
0x14be   : > { %v7408_v58 = vpop.f32.mrb[67].mxu1  ;;  %v7449_v46 = vmul.f32 %v8591_v25, %v7995_v41  ;;  %v7461_v54 = vmul.f32 %v8591_v25, %v7999_v59 }
0x14bf   : > { %v7448_v12 = vmul.f32 %v7994_v10, %v7408_v58  ;;  %v7460_v39 = vmul.f32 %v7998_v57, %v7408_v58 }
0x14c1   : > { %v8594_v21 = vpop.f32.mrb[68].mxu1 }
0x14c2   : > { %v7451_v50 = vmul.f32 %v8594_v21, %v7997_v7  ;;  %v7463_v17 = vmul.f32 %v8594_v21, %v7993_v18  ;;  %v7418_v27 = vpop.f32.mrb[69].mxu1  ;;  %v7659_v18 = vld [vmem:[%s12812_s19] sm:$0xff]  ;;  %v7660_v7 = vld [vmem:[%s12812_s19 + $0x8] sm:$0xff]  ;;  %v7662_v21 = vld [vmem:[%s12812_s19 + $0x18] sm:$0xff] }
0x14c3   : > { %v7450_v56 = vmul.f32 %v7996_v8, %v7418_v27  ;;  %v7462_v53 = vmul.f32 %v7992_v20, %v7418_v27  ;;  %v7661_v20 = vld [vmem:[%s12812_s19 + $0x10] sm:$0xff]  ;;  %v8909_v8 = vpack.c.bf16 %v7660_v7, %v7659_v18 }
0x14c4   : > { %v7455_v22 = vsub.f32 %v7447_v34, %v7451_v50  ;;  %v7467_v23 = vadd.f32 %v7463_v17, %v7459_v2  ;;  %v8912_v34 = vpack.c.bf16 %v7662_v21, %v7661_v20  ;;  %v8005_v17 = vld [vmem:[%s12811_s18] ss:$0 sm:$0xff] }
0x14c5   : > { %v7454_v40 = vsub.f32 %v7446_v15, %v7450_v56  ;;  %v7466_v5 = vadd.f32 %v7462_v53, %v7458_v51  ;;  %v8597_v60 = vpop.f32.mrb[70].mxu1  ;;  %v8006_v15 = vld [vmem:[%s12811_s18 + $0x1] ss:$0 sm:$0xff] }
0x14c6   : > { %v7453_v4 = vmul.f32 %v8597_v60, %v7999_v59  ;;  %v7465_v49 = vmul.f32 %v8597_v60, %v7995_v41  ;;  %v7428_v1 = vpop.f32.mrb[71].mxu1 }
0x14c7   : > { %v7452_v24 = vmul.f32 %v7998_v57, %v7428_v1  ;;  %v7464_v19 = vmul.f32 %v7994_v10, %v7428_v1  ;;  %v8886_v30 = vpack.c.bf16 %v7455_v22, %v7454_v40  ;;  %v8894_v44 = vpack.c.bf16 %v7467_v23, %v7466_v5  ;;  %v8007_v57 = vld [vmem:[%s12813_s20] ss:$0 sm:$0xff] }
0x14c8   : > { %v7457_v33 = vsub.f32 %v7449_v46, %v7453_v4  ;;  %v7469_v32 = vadd.f32 %v7465_v49, %v7461_v54 }
0x14c9   : > { %v7456_v37 = vsub.f32 %v7448_v12, %v7452_v24  ;;  %v7468_v38 = vadd.f32 %v7464_v19, %v7460_v39  ;;  %8887 = vmatprep.subr.bf16.mxu1 %v8886_v30 }
0x14ca   : > { %8889 = vmatpush3.bf16.msra.mxu1 %v8886_v30 }
0x14cb   : > { %v8890_v43 = vpack.c.bf16 %v7457_v33, %v7456_v37  ;;  %v8898_v31 = vpack.c.bf16 %v7469_v32, %v7468_v38 }
0x14cd   : > { %8891 = vmatprep.subr.bf16.mxu1 %v8890_v43 }
0x14ce   : > { %8893 = vmatpush3.bf16.msra.mxu1 %v8890_v43 }
0x14cf   : > { %8895 = vmatprep.subr.bf16.mxu1 %v8894_v44 }
0x14d2   : > { %8897 = vmatpush3.bf16.msra.mxu1 %v8894_v44 }
0x14d3   : > { %8899 = vmatprep.subr.bf16.mxu1 %v8898_v31 }
0x14d6   : > { %8901 = vmatpush3.bf16.msra.mxu1 %v8898_v31 }
0x14d9   : > { %8615 = vmatmul.mubr.msk.f32.vlgmr.msra.gmra.mrb[72].mxu1 %vm666_vm0, %v9256_v55 }
0x14da   : > { %8617 = vmatprep.mubr.msk.f32.mxu1 %vm666_vm0, %v9257_v29 }
0x14dd   : > { %8618 = vmatmul.mubr.msk.f32.gmra.mrb[74].mxu1 %vm666_vm0, %v9258_v16  ;;  %vm7635_vm0 = vcmask 254976  }
0x15ac   : > { %v8616_v35 = vpop.f32.mrb[72].mxu1 }
0x15ad   : > { %v7556_v9 = vadd.f32 %v8616_v35, %v12616_v36  ;;  %v7536_v63 = vpop.f32.mrb[73].mxu1 }
0x15ae   : > { %v7555_v48 = vadd.f32 %v7536_v63, %v12619_v13 }
0x15b0   : > { %v8903_v6 = vpack.c.bf16 %v7556_v9, %v7555_v48  ;;  %v8619_v61 = vpop.f32.mrb[74].mxu1 }
0x15b1   : > { %v7558_v26 = vadd.f32 %v8619_v61, %v12629_v28  ;;  %v7546_v0 = vpop.f32.mrb[75].mxu1 }
0x15b2   : > { %v7557_v62 = vadd.f32 %v7546_v0, %v12626_v11  ;;  %8904 = vmatpush3.bf16.msra.mxu0 %v8903_v6 }
0x15b3   : > { %8905 = vmatprep.subr.bf16.mxu0 %v13132_v14 }
0x15b4   : > { %v8906_v52 = vpack.c.bf16 %v7558_v26, %v7557_v62 }
0x15b6   : > { %8907 = vmatpush3.bf16.msra.mxu0 %v8906_v52 }
0x15b7   : > { %8908 = vmatprep.subr.bf16.mxu0 %v13132_v14 }
0x15b9   : > { %8629 = vmatmul.mubr.msk.f32.vlgmr.msra.gmra.mrb[36].mxu0 %vm906_vm1, %v7559_v47 }
0x15ba   : > { %8639 = vmatprep.mubr.msk.f32.mxu0 %vm9325_vm3, %v9326_v42  ;;  %8910 = vmatpush3.bf16.msra.mxu0 %v8909_v8 }
0x15bb   : > { %8911 = vmatprep.subr.bf16.mxu0 %v13132_v14 }
0x15be   : > { %8913 = vmatpush3.bf16.msra.mxu0 %v8912_v34 }
0x168c   : > { %v7629_v36 = vpop.f32.mrb[36].mxu0 }
0x168d   : > { %v8630_v13 = vpop.f32.mrb[37].mxu0  ;;  %v7636_v28 = vsel %vm7635_vm0, %v7629_v36, 0.0 }
0x168e   : > { %7637 = vadd.xlane.f32.xlu0 %v7636_v28 }
0x171b   : > { %v7638_v11 = vpop.xlane.xlu0 %7637 }
0x171c   : > { %v7639_v3 = vmul.f32 0.03125, %v7638_v11 }
0x171e   : > { %v7640_v45 = vsub.f32 %v7629_v36, %v7639_v3 }
0x1720   : > { %v7641_v25 = vmul.f32 %v7640_v45, %v7640_v45 }
0x1722   : > { %v7642_v58 = vsel %vm7635_vm0, %v7641_v25, 0.0 }
0x1723   : > { %7643 = vadd.xlane.f32.xlu1 %v7642_v58 }
0x17b0   : > { %v7644_v2 = vpop.xlane.xlu1 %7643 }
0x17b1   : > { %v7645_v41 = vmul.f32 0.03125, %v7644_v2 }
0x17b3   : > { %v7646_v59 = vadd.f32 1e-05, %v7645_v41 }
0x17b5   : > { %9229 = vrsqrt.f32 %v7646_v59 }
0x17bf   : > { %v9230_v50 = vpop.eup %9229 }
0x17c0   : > { %v7648_v27 = vmul.f32 %v9230_v50, %v7640_v45 }
0x17c2   : > { %v7653_v51 = vmul.f32 %v8005_v17, %v7648_v27 }
0x17c4   : > { %v7658_v10 = vadd.f32 %v8006_v15, %v7653_v51 }
0x17c6   : > { %8640 = vmatmul.mubr.msk.f32.vlgmr.msra.gmra.mrb[38].mxu0 %vm906_vm1, %v7658_v10 }
0x1899   : > { %v7739_v56 = vpop.f32.mrb[38].mxu0 }
0x189a   : > { %v7740_v53 = vadd.f32 %v8007_v57, %v7739_v56  ;;  %v8641_v22 = vpop.f32.mrb[39].mxu0 }
0x189c   : > { %7744 = vst.msk [vmem:[%s649_s22] sm:$0x3] %vm7743_vm4, %v7740_v53 }
0x189d   : > { %9272 = shalt.err (!%p9269_p3)
}
0x189e   : > { %s9273_s24 = scalar_lea.hbm %s12751_s27, 32  ;;  %s9277_s28 = scalar_lea.hbm %s12814_s21, 64 }
0x189f   : > { %p9274_p4 = scmp.ne.s32.totalorder %s12751_s27, %s9273_s24  ;;  %p9278_p9 = scmp.lt.u32.totalorder %s12751_s27, %s12814_s21 }
0x18a0   : > { %p9279_p10 = scmp.lt.u32.totalorder %s9277_s28, %s9273_s24  ;;  %p9281_p12 = scmp.lt.u32.totalorder %s9273_s24, %s12751_s27 }
0x18a1   : > { %p9275_p7 = pnand %p9274_p4, %p9476_p5 }
0x18a2   : > { %p9280_p11 = por %p9279_p10, %p9278_p9 }
0x18a3   : > { %p9276_p8 = pneg %p9275_p7 }
0x18a4   : > { %p9282_p13 = por %p9281_p12, %p9280_p11 }
0x18a6   : > { %p9283_p0 = pnand %p9282_p13, %p9276_p8 }
0x18a8   : > { %9286 = shalt.err (!%p9283_p0)
}
0x18a9   : > { %8914 = dma.vmem_to_hbm [thread:$0]  (%p9476_p5), %s12753_s1, 32, %s12751_s27, %s7746_s30  }
0x18aa PF: > { %s13133_s4 = sld [smem:[#allocation8_spill]]  ;;  %s13134_s23 = sld [smem:[#allocation6_spill]] }
0x18b0   : > { %p8920_p1 = scmp.ge.s32.totalorder %s13133_s4, 2  ;;  %s7771_s26 = sand.u32 1, %s13134_s23  }
0x18b1   : > { %s7772_s22 = scalar_lea.sflag [#allocation4], %s7771_s26 }
0x18b2   : > { %p8917_p2 = pnand %p8920_p1, %p9480_p6 }
0x18b4   : > { %9304 = dma.done.wait (!%p8917_p2), %s7772_s22, 32  }
0x18b5   : > { %9306 = vsyncadd (!%p8917_p2), %s7772_s22, 4294967264  ;;  %s13136_s27 = sld [smem:[#allocation9_spill]]  ;;  %s13137_s24 = sld [smem:[#allocation7_spill]] }
0x18b6   : > { %s13138_s26 = sld [smem:[#allocation10_spill]]  ;;  %s13139_s2 = smov %s9313_s25 }
0x18bb   : > { %p31_p3 = scmp.ge.s32.totalorder %s13136_s27, 4   ;;  %s13140_s25 = smov %s13137_s24 }
0x18bd   :  { %33 = sbr.rel (!%p31_p3) target bundleno = 10 (0xa), region = 180 }
0x18c4   :  { %7777 = vsyncpa [#allocation4], 1 }
0x18c5   :  { %7779 = vsyncpa [#allocation4 + $0x1], 1 }

</bundles_post_ra>
